<compile_context>
chip_gen: v5e
topology: v5e:2x2
jax: 0.10.0
libtpu: 0.0.40
codegen_flags: <defaults>
</compile_context>

<pallas_src>
import functools
import numpy as np
import jax
import jax.numpy as jnp
from jax import lax
from jax.experimental import pallas as pl
from jax.experimental.pallas import tpu as pltpu

THRESH = 1.0
BN_EPS = 1e-5


# ------------------------------------------------------------------
# tiling helpers (full dims are exempt from the (8,128) constraint ->
# we never materialize padded host copies)
# ------------------------------------------------------------------

def _row_tile(m):
    for t in (256, 128, 64, 32, 16, 8):
        if m % t == 0:
            return t
    return m


def _choose_tile(dim, candidates):
    for t in candidates:
        if dim % t == 0:
            return t
    return dim


# ------------------------------------------------------------------
# Pallas kernel: bf16 matmul with f32 accumulation + fused BN statistics
# ------------------------------------------------------------------

def _matmul_stats_kernel(a_ref, b_ref, o_ref, sum_ref, sq_ref, acc_ref):
    k = pl.program_id(2)

    @pl.when(k == 0)
    def _():
        acc_ref[...] = jnp.zeros_like(acc_ref)

    acc_ref[...] += jnp.dot(a_ref[...], b_ref[...],
                            preferred_element_type=jnp.float32)

    @pl.when(k == pl.num_programs(2) - 1)
    def _():
        acc = acc_ref[...]
        o_ref[...] = acc.astype(o_ref.dtype)
        sum_ref[...] = jnp.sum(acc, axis=0, keepdims=True)[None]
        sq_ref[...] = jnp.sum(acc * acc, axis=0, keepdims=True)[None]


def pallas_matmul_stats(a, b, out_dtype=jnp.float32):
    """a [M,K] @ b [K,N] (bf16 operands on the MXU, f32 accumulation).

    Also returns per-M-tile column sums and sums-of-squares (for the fused
    training-mode BatchNorm statistics) so no extra HBM reduction pass is
    needed afterwards.
    """
    M, K = a.shape
    _, N = b.shape
    tm = _row_tile(M)
    tn = _choose_tile(N, (256, 128))
    tk = _choose_tile(K, (512, 256, 128))
    nm, nn, nk = M // tm, N // tn, K // tk
    out, colsum, colsq = pl.pallas_call(
        _matmul_stats_kernel,
        out_shape=(jax.ShapeDtypeStruct((M, N), out_dtype),
                   jax.ShapeDtypeStruct((nm, 1, N), jnp.float32),
                   jax.ShapeDtypeStruct((nm, 1, N), jnp.float32)),
        grid=(nm, nn, nk),
        in_specs=[pl.BlockSpec((tm, tk), lambda i, j, k: (i, k)),
                  pl.BlockSpec((tk, tn), lambda i, j, k: (k, j))],
        out_specs=(pl.BlockSpec((tm, tn), lambda i, j, k: (i, j)),
                   pl.BlockSpec((1, 1, tn), lambda i, j, k: (i, 0, j)),
                   pl.BlockSpec((1, 1, tn), lambda i, j, k: (i, 0, j))),
        scratch_shapes=[pltpu.VMEM((tm, tn), jnp.float32)],
        compiler_params=pltpu.CompilerParams(
            dimension_semantics=("parallel", "parallel", "arbitrary")),
    )(a.astype(jnp.bfloat16), b.astype(jnp.bfloat16))
    return out, colsum, colsq


# ------------------------------------------------------------------
# Pallas kernel: MSF spiking neuron with fused (lazy) BN affine on its inputs
# ------------------------------------------------------------------

def _msf_kernel(*refs, n_in, decay, init_thre, D, T):
    o_ref = refs[-1]
    xs = [refs[3 * i] for i in range(n_in)]
    ss = [refs[3 * i + 1] for i in range(n_in)]
    ts = [refs[3 * i + 2] for i in range(n_in)]

    def pre(i):
        v = xs[0][i].astype(jnp.float32) * ss[0][...] + ts[0][...]
        for j in range(1, n_in):
            v = v + xs[j][i].astype(jnp.float32) * ss[j][...] + ts[j][...]
        return v

    def spikes(mem):
        # closed form of sum_d (mem >= init_thre + d), d = 0..D-1
        return jnp.clip(jnp.floor(mem - init_thre + 1.0), 0.0, float(D))

    mem = pre(0)
    spike = spikes(mem)
    o_ref[0] = spike.astype(o_ref.dtype)

    if T > 1:
        def body(i, carry):
            mem_c, spike_c = carry
            mask = (spike_c > 0).astype(jnp.float32)
            mem_n = mem_c * decay * (1.0 - mask) + pre(i)
            spike_n = spikes(mem_n)
            o_ref[i] = spike_n.astype(o_ref.dtype)
            return (mem_n, spike_n)
        lax.fori_loop(1, T, body, (mem, spike))


def msf_spike_lazy(inputs, decay=0.25, init_thre=1.0, D=8):
    """mem_update_MSF forward with the pending BN affine(s) fused in.

    inputs: list of (x [T,B,H,W,C], scale [C] or None, shift [C] or None);
    when len(inputs) == 2 the pre-activation is the sum of the two affined
    tensors (the `sp + spx[i]` path).  Returns bf16 spike counts, same shape.
    """
    x0 = inputs[0][0]
    T = x0.shape[0]
    C = x0.shape[-1]
    M = int(np.prod(x0.shape[1:-1]))
    tm = _row_tile(M)
    n_in = len(inputs)

    args, in_specs = [], []
    for (x, s, t) in inputs:
        args.append(x.reshape(T, M, C))
        in_specs.append(pl.BlockSpec((T, tm, C), lambda i: (0, i, 0)))
        s = jnp.ones((C,), jnp.float32) if s is None else s
        t = jnp.zeros((C,), jnp.float32) if t is None else t
        args.append(s.reshape(1, C).astype(jnp.float32))
        in_specs.append(pl.BlockSpec((1, C), lambda i: (0, 0)))
        args.append(t.reshape(1, C).astype(jnp.float32))
        in_specs.append(pl.BlockSpec((1, C), lambda i: (0, 0)))

    out = pl.pallas_call(
        functools.partial(_msf_kernel, n_in=n_in, decay=decay,
                          init_thre=init_thre, D=D, T=T),
        out_shape=jax.ShapeDtypeStruct((T, M, C), jnp.bfloat16),
        grid=(M // tm,),
        in_specs=in_specs,
        out_specs=pl.BlockSpec((T, tm, C), lambda i: (0, i, 0)),
        compiler_params=pltpu.CompilerParams(dimension_semantics=("parallel",)),
    )(*args)
    return out.reshape(x0.shape)


# ------------------------------------------------------------------
# Pallas kernel: fused BN-affine + residual add (block epilogue)
# ------------------------------------------------------------------

def _residual_kernel(a_ref, sa_ref, ta_ref, b_ref, sb_ref, tb_ref, o_ref):
    o_ref[...] = (a_ref[...].astype(jnp.float32) * sa_ref[...] + ta_ref[...]
                  + b_ref[...].astype(jnp.float32) * sb_ref[...] + tb_ref[...])


def residual_bn_add(c3, s3, t3, ident, sd=None, td=None):
    """out = BN3(conv3_raw) + (BN_d(down_raw) or identity)."""
    shp = c3.shape
    C = shp[-1]
    a = c3.reshape(-1, C)
    b = ident.reshape(-1, C)
    M = a.shape[0]
    tm = _row_tile(M)
    if sd is None:
        sd = jnp.ones((C,), jnp.float32)
        td = jnp.zeros((C,), jnp.float32)
    out = pl.pallas_call(
        _residual_kernel,
        out_shape=jax.ShapeDtypeStruct((M, C), jnp.float32),
        grid=(M // tm,),
        in_specs=[pl.BlockSpec((tm, C), lambda i: (i, 0)),
                  pl.BlockSpec((1, C), lambda i: (0, 0)),
                  pl.BlockSpec((1, C), lambda i: (0, 0)),
                  pl.BlockSpec((tm, C), lambda i: (i, 0)),
                  pl.BlockSpec((1, C), lambda i: (0, 0)),
                  pl.BlockSpec((1, C), lambda i: (0, 0))],
        out_specs=pl.BlockSpec((tm, C), lambda i: (i, 0)),
        compiler_params=pltpu.CompilerParams(dimension_semantics=("parallel",)),
    )(a, s3.reshape(1, C).astype(jnp.float32), t3.reshape(1, C).astype(jnp.float32),
      b, sd.reshape(1, C).astype(jnp.float32), td.reshape(1, C).astype(jnp.float32))
    return out.reshape(shp)


# ------------------------------------------------------------------
# Pallas kernel: standalone per-channel affine (only stem + stage pre-pool)
# ------------------------------------------------------------------

def _affine_kernel(x_ref, s_ref, t_ref, o_ref):
    o_ref[...] = (x_ref[...].astype(jnp.float32) * s_ref[...]
                  + t_ref[...]).astype(o_ref.dtype)


def pallas_affine(x, scale, shift, out_dtype=jnp.float32):
    shp = x.shape
    C = shp[-1]
    flat = x.reshape(-1, C)
    M = flat.shape[0]
    tm = _row_tile(M)
    out = pl.pallas_call(
        _affine_kernel,
        out_shape=jax.ShapeDtypeStruct((M, C), out_dtype),
        grid=(M // tm,),
        in_specs=[pl.BlockSpec((tm, C), lambda i: (i, 0)),
                  pl.BlockSpec((1, C), lambda i: (0, 0)),
                  pl.BlockSpec((1, C), lambda i: (0, 0))],
        out_specs=pl.BlockSpec((tm, C), lambda i: (i, 0)),
        compiler_params=pltpu.CompilerParams(dimension_semantics=("parallel",)),
    )(flat, scale.reshape(1, C).astype(jnp.float32),
      shift.reshape(1, C).astype(jnp.float32))
    return out.reshape(shp)


# ------------------------------------------------------------------
# conv (SeqToANN) + training-mode BN statistics (affine applied lazily)
# ------------------------------------------------------------------

def conv_bn(x, w, bn_weight, stride=1, padding=0, eps=BN_EPS):
    """Returns (raw conv output f32 [T,B,Ho,Wo,Cout], BN scale [Cout], BN shift [Cout]).

    The BN affine is NOT applied here; the per-channel scale/shift are carried
    to the consumer kernel (MSF / residual) and fused there.
    """
    T, B, H, W, Cin = x.shape
    KH, KW, _, Cout = w.shape
    xb = x.astype(jnp.bfloat16)

    if KH == 1 and KW == 1 and padding == 0:
        xs = xb[:, :, ::stride, ::stride, :] if stride > 1 else xb
        Ho, Wo = xs.shape[2], xs.shape[3]
        A = xs.reshape(T * B * Ho * Wo, Cin)
        Bmat = w.reshape(Cin, Cout)
    else:
        # TODO(synk): im2col is built host-side (bf16 jnp glue); an in-kernel
        # DMA-gather conv would cut the KH*KW x HBM blowup further.
        xm = xb.reshape(T * B, H, W, Cin)
        xp = jnp.pad(xm, ((0, 0), (padding, padding), (padding, padding), (0, 0)))
        Ho = (H + 2 * padding - KH) // stride + 1
        Wo = (W + 2 * padding - KW) // stride + 1
        cols = [xp[:, ih:ih + stride * Ho:stride, iw:iw + stride * Wo:stride, :]
                for ih in range(KH) for iw in range(KW)]
        Kc = KH * KW * Cin
        kpad = (-Kc) % 128  # free K-alignment inside the concatenate
        if kpad:
            cols.append(jnp.zeros((T * B, Ho, Wo, kpad), jnp.bfloat16))
        A = jnp.concatenate(cols, axis=-1).reshape(T * B * Ho * Wo, Kc + kpad)
        Bmat = w.reshape(Kc, Cout)
        if kpad:
            Bmat = jnp.concatenate(
                [Bmat, jnp.zeros((kpad, Cout), Bmat.dtype)], axis=0)

    raw, colsum, colsq = pallas_matmul_stats(A, Bmat, out_dtype=jnp.float32)
    M = A.shape[0]
    mean = colsum.sum(axis=(0, 1)) / M
    var = jnp.maximum(colsq.sum(axis=(0, 1)) / M - mean * mean, 0.0)
    scale = bn_weight / jnp.sqrt(var + eps)
    shift = -mean * scale
    return raw.reshape(T, B, Ho, Wo, Cout), scale, shift


# ------------------------------------------------------------------
# spatial pools (lax glue, as in the torch Max/AvgPool3d with (1,3,3) kernels)
# ------------------------------------------------------------------

def maxpool2d_3x3_s2(x):
    return lax.reduce_window(x, -jnp.inf, lax.max,
                             (1, 1, 3, 3, 1), (1, 1, 2, 2, 1),
                             ((0, 0), (0, 0), (1, 1), (1, 1), (0, 0)))


def avgpool2d_3x3(x, stride):
    s = lax.reduce_window(x, 0.0, lax.add,
                          (1, 1, 3, 3, 1), (1, 1, stride, stride, 1),
                          ((0, 0), (0, 0), (1, 1), (1, 1), (0, 0)))
    return s / 9.0


# ------------------------------------------------------------------
# Bottle2neck block
# ------------------------------------------------------------------

def bottle2neck_forward(p, x, stride, stype, scale, width):
    nums = 1 if scale == 1 else scale - 1

    # snn_conv1: MSF -> 1x1 conv -> BN(thresh)   (BN applied lazily downstream)
    spk = msf_spike_lazy([(x, None, None)])
    c1_raw, c1_s, c1_t = conv_bn(spk, p['conv1_w'], p['bn1_w'])

    def spx(i):
        sl = slice(i * width, (i + 1) * width)
        return c1_raw[..., sl], c1_s[sl], c1_t[sl]

    # For 'stage' blocks all branch inputs are independent channel slices of
    # c1 -> one fused MSF call over the whole range (fewer tiny kernel calls).
    if stype == 'stage' or nums == 1:
        fused = msf_spike_lazy([(c1_raw[..., :nums * width],
                                 c1_s[:nums * width], c1_t[:nums * width])])
        branch_spk = [fused[..., i * width:(i + 1) * width] for i in range(nums)]
    else:
        branch_spk = None

    chunks = []
    sp_lazy = None
    for i in range(nums):
        if branch_spk is not None:
            sp_spk = branch_spk[i]
        elif i == 0:
            sp_spk = msf_spike_lazy([spx(i)])
        else:
            sp_spk = msf_spike_lazy([sp_lazy, spx(i)])   # sp + spx[i], both lazy-BN
        r, s, t = conv_bn(sp_spk, p['convs_w'][i], p['convs_bn_w'][i],
                          stride=stride, padding=1)
        sp_lazy = (r, s, t)
        chunks.append(sp_lazy)

    if scale != 1 and stype == 'normal':
        chunks.append(spx(nums))
    elif scale != 1 and stype == 'stage':
        # AvgPool must see the BN'd values (count_include_pad borders), so
        # apply this one slice's affine eagerly, then pool.
        r, s, t = spx(nums)
        chunk = pallas_affine(r, s, t)
        chunk = avgpool2d_3x3(chunk, stride)
        chunks.append((chunk,
                       jnp.ones((width,), jnp.float32),
                       jnp.zeros((width,), jnp.float32)))

    cat_raw = jnp.concatenate([c[0] for c in chunks], axis=-1)
    cat_s = jnp.concatenate([c[1] for c in chunks])
    cat_t = jnp.concatenate([c[2] for c in chunks])

    # snn_conv3: MSF(fused affines) -> 1x1 conv -> BN(0.2)
    spk3 = msf_spike_lazy([(cat_raw, cat_s, cat_t)])
    c3_raw, c3_s, c3_t = conv_bn(spk3, p['conv3_w'], p['bn3_w'])
    # TODO(synk): CSA(1, planes*expansion, c_ratio=8) is undefined in the source; identity here.

    if p['down_w'] is not None:
        dn_raw, dn_s, dn_t = conv_bn(x, p['down_w'], p['down_bn_w'], stride=stride)
        return residual_bn_add(c3_raw, c3_s, c3_t, dn_raw, dn_s, dn_t)
    return residual_bn_add(c3_raw, c3_s, c3_t, x, None, None)


# ------------------------------------------------------------------
# Parameter initialization (deterministic, in-script; bf16 conv weights)
# ------------------------------------------------------------------

class KeyGen:
    def __init__(self, key):
        self.key = key
        self.i = 0

    def __call__(self):
        self.i += 1
        return jax.random.fold_in(self.key, self.i)


def conv_w(key, kh, kw, cin, cout):
    fan_in = kh * kw * cin
    w = jax.random.normal(key, (kh, kw, cin, cout), jnp.float32) / np.sqrt(float(fan_in))
    return w.astype(jnp.bfloat16)


def init_block(kg, inplanes, planes, base_width, scale, has_downsample):
    expansion = 2
    width = int(planes * (base_width / 64.0)) * 1  # groups = 1
    nums = 1 if scale == 1 else scale - 1
    p = {
        'conv1_w': conv_w(kg(), 1, 1, inplanes, width * scale),
        'bn1_w': jnp.full((width * scale,), THRESH, jnp.float32),
        'convs_w': [conv_w(kg(), 3, 3, width, width) for _ in range(nums)],
        'convs_bn_w': [jnp.full((width,), 0.2 * THRESH, jnp.float32) for _ in range(nums)],
        'conv3_w': conv_w(kg(), 1, 1, width * scale, planes * expansion),
        'bn3_w': jnp.full((planes * expansion,), 0.2 * THRESH, jnp.float32),
        'down_w': None,
        'down_bn_w': None,
    }
    if has_downsample:
        p['down_w'] = conv_w(kg(), 1, 1, inplanes, planes * expansion)
        p['down_bn_w'] = jnp.full((planes * expansion,), THRESH, jnp.float32)
    return p, width


def init_params(key, layers=(1, 1, 1, 1), base_width=16, scale=4):
    kg = KeyGen(key)
    expansion = 2
    params = {
        'conv1_w': conv_w(kg(), 7, 7, 3, 64),
        'conv1_bn_w': jnp.full((64,), THRESH, jnp.float32),
        'layers': [],
    }
    config = []
    inplanes = 64
    layer_specs = [(64, layers[0], 1), (128, layers[1], 2),
                   (256, layers[2], 2), (512, layers[3], 2)]
    for planes, blocks, stride in layer_specs:
        blk_params, blk_cfg = [], []
        has_down = (stride != 1) or (inplanes != planes * expansion)
        p, width = init_block(kg, inplanes, planes, base_width, scale, has_down)
        blk_params.append(p)
        blk_cfg.append({'stride': stride, 'stype': 'stage', 'width': width, 'scale': scale})
        inplanes = planes * expansion
        for _ in range(1, blocks):
            p, width = init_block(kg, inplanes, planes, base_width, scale, False)
            blk_params.append(p)
            blk_cfg.append({'stride': 1, 'stype': 'normal', 'width': width, 'scale': scale})
        params['layers'].append(blk_params)
        config.append(blk_cfg)
    return params, config


# ------------------------------------------------------------------
# Full forward
# ------------------------------------------------------------------

def mhsanet_forward(params, config, x_nchw, T=1):
    # torch NCHW input -> channels-last, repeated over T.
    x = jnp.transpose(x_nchw, (0, 2, 3, 1))              # [B, H, W, 3]
    x = jnp.broadcast_to(x[None], (T,) + x.shape)        # [T, B, H, W, 3]

    # stem: conv7x7/s2 (+BN stats) -> maxpool(raw) -> fused BN affine.
    # max-pool (-inf pad) commutes with the positive-scale BN affine, so this
    # is exactly conv -> BN -> maxpool.
    raw, s, t = conv_bn(x, params['conv1_w'], params['conv1_bn_w'], stride=2, padding=3)
    pooled = maxpool2d_3x3_s2(raw)
    out = pallas_affine(pooled, s, t)

    outputs = []
    for li, (blk_params, blk_cfg) in enumerate(zip(params['layers'], config)):
        for p, cfg in zip(blk_params, blk_cfg):
            out = bottle2neck_forward(p, out, cfg['stride'], cfg['stype'],
                                      cfg['scale'], cfg['width'])
        if li >= 1:   # outputs appended after layer2, layer3, layer4
            outputs.append(out)
    return outputs


# ------------------------------------------------------------------

if __name__ == "__main__":
    key = jax.random.PRNGKey(0)
    B, H, W = 1, 32, 32
    x = jax.random.normal(jax.random.fold_in(key, 12345), (B, 3, H, W), jnp.float32)

    # layers=(1,2,1,1) exercises both the 'stage' (downsample + avg-pool branch)
    # and the 'normal' (two-input MSF, identity residual) code paths.
    params, config = init_params(key, layers=(1, 2, 1, 1), base_width=16, scale=4)

    fwd = jax.jit(lambda xx: mhsanet_forward(params, config, xx, T=1))
    outs = fwd(x)
    outs = jax.block_until_ready(outs)

    # sanity: three feature maps, channels-last [T, B, H, W, C]
    assert len(outs) == 3
    assert outs[0].shape == (1, B, 4, 4, 256)
    assert outs[1].shape == (1, B, 2, 2, 512)
    assert outs[2].shape == (1, B, 1, 1, 1024)
    assert all(bool(jnp.all(jnp.isfinite(o))) for o in outs)
    print("KERNEL_OK")
</pallas_src>

<mosaic_0001>
module attributes {stable_mosaic.version = 11 : i64} {
  func.func @_matmul_stats_kernel(%arg0: i32, %arg1: i32, %arg2: i32, %arg3: memref<256x256xbf16, #tpu.memory_space<vmem>>, %arg4: memref<256x64xbf16, #tpu.memory_space<vmem>>, %arg5: memref<256x64xf32, #tpu.memory_space<vmem>>, %arg6: memref<1x1x64xf32, #tpu.memory_space<vmem>>, %arg7: memref<1x1x64xf32, #tpu.memory_space<vmem>>, %arg8: memref<256x64xf32, #tpu.memory_space<vmem>>) attributes {dimension_semantics = [#tpu.dimension_semantics<parallel>, #tpu.dimension_semantics<parallel>, #tpu.dimension_semantics<arbitrary>], iteration_bounds = array<i64: 1, 1, 1>, scalar_prefetch = 0 : i64, scratch_operands = 1 : i64, tpu.core_type = #tpu.core_type<tc>, window_params = [{transform_indices = @transform_0, window_bounds = array<i64: 256, 256>}, {transform_indices = @transform_1, window_bounds = array<i64: 256, 64>}, {transform_indices = @transform_2, window_bounds = array<i64: 256, 64>}, {transform_indices = @transform_3, window_bounds = array<i64: 1, 1, 64>}, {transform_indices = @transform_4, window_bounds = array<i64: 1, 1, 64>}]} {
    %c0_i32 = arith.constant 0 : i32
    %0 = arith.cmpi eq, %arg2, %c0_i32 : i32
    %1 = arith.extui %0 : i1 to i32
    %c0_i32_0 = arith.constant 0 : i32
    %2 = arith.cmpi ne, %1, %c0_i32_0 : i32
    scf.if %2 {
      %cst_10 = arith.constant 0.000000e+00 : f32
      %12 = vector.broadcast %cst_10 : f32 to vector<256x64xf32>
      %c0_11 = arith.constant 0 : index
      %c0_12 = arith.constant 0 : index
      %13 = vector.load %arg8[%c0_11, %c0_12] : memref<256x64xf32, #tpu.memory_space<vmem>>, vector<256x64xf32>
      tpu.vector_store %arg8[%c0_11, %c0_12], %12 {strides = array<i32>} : memref<256x64xf32, #tpu.memory_space<vmem>>, vector<256x64xf32>,
    } else {
    }
    %c0 = arith.constant 0 : index
    %c0_1 = arith.constant 0 : index
    %3 = vector.load %arg8[%c0, %c0_1] : memref<256x64xf32, #tpu.memory_space<vmem>>, vector<256x64xf32>
    %c0_2 = arith.constant 0 : index
    %c0_3 = arith.constant 0 : index
    %4 = vector.load %arg3[%c0_2, %c0_3] : memref<256x256xbf16, #tpu.memory_space<vmem>>, vector<256x256xbf16>
    %c0_4 = arith.constant 0 : index
    %c0_5 = arith.constant 0 : index
    %5 = vector.load %arg4[%c0_4, %c0_5] : memref<256x64xbf16, #tpu.memory_space<vmem>>, vector<256x64xbf16>
    %cst = arith.constant dense<0.000000e+00> : vector<256x64xf32>
    %6 = tpu.matmul %4, %5, %cst {dimension_numbers = #tpu.dot_dimension_numbers<[1], [0], [0], [1], [0, 0, 1, 1], [], []>} : vector<256x256xbf16>, vector<256x64xbf16>, vector<256x64xf32> -> vector<256x64xf32>
    %7 = arith.addf %3, %6 : vector<256x64xf32>
    %c0_6 = arith.constant 0 : index
    %c0_7 = arith.constant 0 : index
    %8 = vector.load %arg8[%c0_6, %c0_7] : memref<256x64xf32, #tpu.memory_space<vmem>>, vector<256x64xf32>
    tpu.vector_store %arg8[%c0_6, %c0_7], %7 {strides = array<i32>} : memref<256x64xf32, #tpu.memory_space<vmem>>, vector<256x64xf32>,
    %c0_i32_8 = arith.constant 0 : i32
    %9 = arith.cmpi eq, %arg2, %c0_i32_8 : i32
    %10 = arith.extui %9 : i1 to i32
    %c0_i32_9 = arith.constant 0 : i32
    %11 = arith.cmpi ne, %10, %c0_i32_9 : i32
    scf.if %11 {
      %c0_10 = arith.constant 0 : index
      %c0_11 = arith.constant 0 : index
      %12 = vector.load %arg8[%c0_10, %c0_11] : memref<256x64xf32, #tpu.memory_space<vmem>>, vector<256x64xf32>
      %c0_12 = arith.constant 0 : index
      %c0_13 = arith.constant 0 : index
      %13 = vector.load %arg5[%c0_12, %c0_13] : memref<256x64xf32, #tpu.memory_space<vmem>>, vector<256x64xf32>
      tpu.vector_store %arg5[%c0_12, %c0_13], %12 {strides = array<i32>} : memref<256x64xf32, #tpu.memory_space<vmem>>, vector<256x64xf32>,
      %cst_14 = arith.constant dense<0.000000e+00> : vector<64xf32>
      %14 = vector.multi_reduction <add>, %12, %cst_14 [0] : vector<256x64xf32> to vector<64xf32>
      %15 = vector.shape_cast %14 : vector<64xf32> to vector<1x64xf32>
      %16 = vector.shape_cast %15 : vector<1x64xf32> to vector<1x1x64xf32>
      %c0_15 = arith.constant 0 : index
      %c0_16 = arith.constant 0 : index
      %c0_17 = arith.constant 0 : index
      %17 = vector.load %arg6[%c0_15, %c0_16, %c0_17] : memref<1x1x64xf32, #tpu.memory_space<vmem>>, vector<1x1x64xf32>
      tpu.vector_store %arg6[%c0_15, %c0_16, %c0_17], %16 {strides = array<i32>} : memref<1x1x64xf32, #tpu.memory_space<vmem>>, vector<1x1x64xf32>,
      %18 = arith.mulf %12, %12 : vector<256x64xf32>
      %cst_18 = arith.constant dense<0.000000e+00> : vector<64xf32>
      %19 = vector.multi_reduction <add>, %18, %cst_18 [0] : vector<256x64xf32> to vector<64xf32>
      %20 = vector.shape_cast %19 : vector<64xf32> to vector<1x64xf32>
      %21 = vector.shape_cast %20 : vector<1x64xf32> to vector<1x1x64xf32>
      %c0_19 = arith.constant 0 : index
      %c0_20 = arith.constant 0 : index
      %c0_21 = arith.constant 0 : index
      %22 = vector.load %arg7[%c0_19, %c0_20, %c0_21] : memref<1x1x64xf32, #tpu.memory_space<vmem>>, vector<1x1x64xf32>
      tpu.vector_store %arg7[%c0_19, %c0_20, %c0_21], %21 {strides = array<i32>} : memref<1x1x64xf32, #tpu.memory_space<vmem>>, vector<1x1x64xf32>,
    } else {
    }
    return
  }
  func.func @transform_0(%arg0: i32, %arg1: i32, %arg2: i32) -> (i32, i32) {
    %c0_i32 = arith.constant 0 : i32
    return %arg0, %arg2 : i32, i32
  }
  func.func @transform_1(%arg0: i32, %arg1: i32, %arg2: i32) -> (i32, i32) {
    %c0_i32 = arith.constant 0 : i32
    return %arg2, %arg1 : i32, i32
  }
  func.func @transform_2(%arg0: i32, %arg1: i32, %arg2: i32) -> (i32, i32) {
    %c0_i32 = arith.constant 0 : i32
    return %arg0, %arg1 : i32, i32
  }
  func.func @transform_3(%arg0: i32, %arg1: i32, %arg2: i32) -> (i32, i32, i32) {
    %c0_i32 = arith.constant 0 : i32
    %c0_i32_0 = arith.constant 0 : i32
    return %arg0, %c0_i32, %arg1 : i32, i32, i32
  }
  func.func @transform_4(%arg0: i32, %arg1: i32, %arg2: i32) -> (i32, i32, i32) {
    %c0_i32 = arith.constant 0 : i32
    %c0_i32_0 = arith.constant 0 : i32
    return %arg0, %c0_i32, %arg1 : i32, i32, i32
  }
}

module attributes {stable_mosaic.version = 11 : i64} {
  func.func @_affine_kernel(%arg0: i32, %arg1: memref<64x64xf32, #tpu.memory_space<vmem>>, %arg2: memref<1x64xf32, #tpu.memory_space<vmem>>, %arg3: memref<1x64xf32, #tpu.memory_space<vmem>>, %arg4: memref<64x64xf32, #tpu.memory_space<vmem>>) attributes {dimension_semantics = [#tpu.dimension_semantics<parallel>], iteration_bounds = array<i64: 1>, scalar_prefetch = 0 : i64, scratch_operands = 0 : i64, tpu.core_type = #tpu.core_type<tc>, window_params = [{transform_indices = @transform_0, window_bounds = array<i64: 64, 64>}, {pipeline_mode = #tpu.pipeline_mode<synchronous>, transform_indices = @transform_1, window_bounds = array<i64: 1, 64>}, {pipeline_mode = #tpu.pipeline_mode<synchronous>, transform_indices = @transform_2, window_bounds = array<i64: 1, 64>}, {transform_indices = @transform_3, window_bounds = array<i64: 64, 64>}]} {
    %c0 = arith.constant 0 : index
    %c0_0 = arith.constant 0 : index
    %0 = vector.load %arg1[%c0, %c0_0] : memref<64x64xf32, #tpu.memory_space<vmem>>, vector<64x64xf32>
    %c0_1 = arith.constant 0 : index
    %c0_2 = arith.constant 0 : index
    %1 = vector.load %arg2[%c0_1, %c0_2] : memref<1x64xf32, #tpu.memory_space<vmem>>, vector<1x64xf32>
    %2 = vector.broadcast %1 : vector<1x64xf32> to vector<64x64xf32>
    %3 = arith.mulf %0, %2 : vector<64x64xf32>
    %c0_3 = arith.constant 0 : index
    %c0_4 = arith.constant 0 : index
    %4 = vector.load %arg3[%c0_3, %c0_4] : memref<1x64xf32, #tpu.memory_space<vmem>>, vector<1x64xf32>
    %5 = vector.broadcast %4 : vector<1x64xf32> to vector<64x64xf32>
    %6 = arith.addf %3, %5 : vector<64x64xf32>
    %c0_5 = arith.constant 0 : index
    %c0_6 = arith.constant 0 : index
    %7 = vector.load %arg4[%c0_5, %c0_6] : memref<64x64xf32, #tpu.memory_space<vmem>>, vector<64x64xf32>
    tpu.vector_store %arg4[%c0_5, %c0_6], %6 {strides = array<i32>} : memref<64x64xf32, #tpu.memory_space<vmem>>, vector<64x64xf32>,
    return
  }
  func.func @transform_0(%arg0: i32) -> (i32, i32) {
    %c0_i32 = arith.constant 0 : i32
    %c0_i32_0 = arith.constant 0 : i32
    return %arg0, %c0_i32 : i32, i32
  }
  func.func @transform_1(%arg0: i32) -> (i32, i32) {
    %c0_i32 = arith.constant 0 : i32
    %c0_i32_0 = arith.constant 0 : i32
    %c0_i32_1 = arith.constant 0 : i32
    return %c0_i32, %c0_i32_0 : i32, i32
  }
  func.func @transform_2(%arg0: i32) -> (i32, i32) {
    %c0_i32 = arith.constant 0 : i32
    %c0_i32_0 = arith.constant 0 : i32
    %c0_i32_1 = arith.constant 0 : i32
    return %c0_i32, %c0_i32_0 : i32, i32
  }
  func.func @transform_3(%arg0: i32) -> (i32, i32) {
    %c0_i32 = arith.constant 0 : i32
    %c0_i32_0 = arith.constant 0 : i32
    return %arg0, %c0_i32 : i32, i32
  }
}

module attributes {stable_mosaic.version = 11 : i64} {
  func.func @_matmul_stats_kernel(%arg0: i32, %arg1: i32, %arg2: i32, %arg3: memref<64x64xbf16, #tpu.memory_space<vmem>>, %arg4: memref<64x128xbf16, #tpu.memory_space<vmem>>, %arg5: memref<64x128xf32, #tpu.memory_space<vmem>>, %arg6: memref<1x1x128xf32, #tpu.memory_space<vmem>>, %arg7: memref<1x1x128xf32, #tpu.memory_space<vmem>>, %arg8: memref<64x128xf32, #tpu.memory_space<vmem>>) attributes {dimension_semantics = [#tpu.dimension_semantics<parallel>, #tpu.dimension_semantics<parallel>, #tpu.dimension_semantics<arbitrary>], iteration_bounds = array<i64: 1, 1, 1>, scalar_prefetch = 0 : i64, scratch_operands = 1 : i64, tpu.core_type = #tpu.core_type<tc>, window_params = [{transform_indices = @transform_0, window_bounds = array<i64: 64, 64>}, {transform_indices = @transform_1, window_bounds = array<i64: 64, 128>}, {transform_indices = @transform_2, window_bounds = array<i64: 64, 128>}, {transform_indices = @transform_3, window_bounds = array<i64: 1, 1, 128>}, {transform_indices = @transform_4, window_bounds = array<i64: 1, 1, 128>}]} {
    %c0_i32 = arith.constant 0 : i32
    %0 = arith.cmpi eq, %arg2, %c0_i32 : i32
    %1 = arith.extui %0 : i1 to i32
    %c0_i32_0 = arith.constant 0 : i32
    %2 = arith.cmpi ne, %1, %c0_i32_0 : i32
    scf.if %2 {
      %cst_10 = arith.constant 0.000000e+00 : f32
      %12 = vector.broadcast %cst_10 : f32 to vector<64x128xf32>
      %c0_11 = arith.constant 0 : index
      %c0_12 = arith.constant 0 : index
      %13 = vector.load %arg8[%c0_11, %c0_12] : memref<64x128xf32, #tpu.memory_space<vmem>>, vector<64x128xf32>
      tpu.vector_store %arg8[%c0_11, %c0_12], %12 {strides = array<i32>} : memref<64x128xf32, #tpu.memory_space<vmem>>, vector<64x128xf32>,
    } else {
    }
    %c0 = arith.constant 0 : index
    %c0_1 = arith.constant 0 : index
    %3 = vector.load %arg8[%c0, %c0_1] : memref<64x128xf32, #tpu.memory_space<vmem>>, vector<64x128xf32>
    %c0_2 = arith.constant 0 : index
    %c0_3 = arith.constant 0 : index
    %4 = vector.load %arg3[%c0_2, %c0_3] : memref<64x64xbf16, #tpu.memory_space<vmem>>, vector<64x64xbf16>
    %c0_4 = arith.constant 0 : index
    %c0_5 = arith.constant 0 : index
    %5 = vector.load %arg4[%c0_4, %c0_5] : memref<64x128xbf16, #tpu.memory_space<vmem>>, vector<64x128xbf16>
    %cst = arith.constant dense<0.000000e+00> : vector<64x128xf32>
    %6 = tpu.matmul %4, %5, %cst {dimension_numbers = #tpu.dot_dimension_numbers<[1], [0], [0], [1], [0, 0, 1, 1], [], []>} : vector<64x64xbf16>, vector<64x128xbf16>, vector<64x128xf32> -> vector<64x128xf32>
    %7 = arith.addf %3, %6 : vector<64x128xf32>
    %c0_6 = arith.constant 0 : index
    %c0_7 = arith.constant 0 : index
    %8 = vector.load %arg8[%c0_6, %c0_7] : memref<64x128xf32, #tpu.memory_space<vmem>>, vector<64x128xf32>
    tpu.vector_store %arg8[%c0_6, %c0_7], %7 {strides = array<i32>} : memref<64x128xf32, #tpu.memory_space<vmem>>, vector<64x128xf32>,
    %c0_i32_8 = arith.constant 0 : i32
    %9 = arith.cmpi eq, %arg2, %c0_i32_8 : i32
    %10 = arith.extui %9 : i1 to i32
    %c0_i32_9 = arith.constant 0 : i32
    %11 = arith.cmpi ne, %10, %c0_i32_9 : i32
    scf.if %11 {
      %c0_10 = arith.constant 0 : index
      %c0_11 = arith.constant 0 : index
      %12 = vector.load %arg8[%c0_10, %c0_11] : memref<64x128xf32, #tpu.memory_space<vmem>>, vector<64x128xf32>
      %c0_12 = arith.constant 0 : index
      %c0_13 = arith.constant 0 : index
      %13 = vector.load %arg5[%c0_12, %c0_13] : memref<64x128xf32, #tpu.memory_space<vmem>>, vector<64x128xf32>
      tpu.vector_store %arg5[%c0_12, %c0_13], %12 {strides = array<i32>} : memref<64x128xf32, #tpu.memory_space<vmem>>, vector<64x128xf32>,
      %cst_14 = arith.constant dense<0.000000e+00> : vector<128xf32>
      %14 = vector.multi_reduction <add>, %12, %cst_14 [0] : vector<64x128xf32> to vector<128xf32>
      %15 = vector.shape_cast %14 : vector<128xf32> to vector<1x128xf32>
      %16 = vector.shape_cast %15 : vector<1x128xf32> to vector<1x1x128xf32>
      %c0_15 = arith.constant 0 : index
      %c0_16 = arith.constant 0 : index
      %c0_17 = arith.constant 0 : index
      %17 = vector.load %arg6[%c0_15, %c0_16, %c0_17] : memref<1x1x128xf32, #tpu.memory_space<vmem>>, vector<1x1x128xf32>
      tpu.vector_store %arg6[%c0_15, %c0_16, %c0_17], %16 {strides = array<i32>} : memref<1x1x128xf32, #tpu.memory_space<vmem>>, vector<1x1x128xf32>,
      %18 = arith.mulf %12, %12 : vector<64x128xf32>
      %cst_18 = arith.constant dense<0.000000e+00> : vector<128xf32>
      %19 = vector.multi_reduction <add>, %18, %cst_18 [0] : vector<64x128xf32> to vector<128xf32>
      %20 = vector.shape_cast %19 : vector<128xf32> to vector<1x128xf32>
      %21 = vector.shape_cast %20 : vector<1x128xf32> to vector<1x1x128xf32>
      %c0_19 = arith.constant 0 : index
      %c0_20 = arith.constant 0 : index
      %c0_21 = arith.constant 0 : index
      %22 = vector.load %arg7[%c0_19, %c0_20, %c0_21] : memref<1x1x128xf32, #tpu.memory_space<vmem>>, vector<1x1x128xf32>
      tpu.vector_store %arg7[%c0_19, %c0_20, %c0_21], %21 {strides = array<i32>} : memref<1x1x128xf32, #tpu.memory_space<vmem>>, vector<1x1x128xf32>,
    } else {
    }
    return
  }
  func.func @transform_0(%arg0: i32, %arg1: i32, %arg2: i32) -> (i32, i32) {
    %c0_i32 = arith.constant 0 : i32
    return %arg0, %arg2 : i32, i32
  }
  func.func @transform_1(%arg0: i32, %arg1: i32, %arg2: i32) -> (i32, i32) {
    %c0_i32 = arith.constant 0 : i32
    return %arg2, %arg1 : i32, i32
  }
  func.func @transform_2(%arg0: i32, %arg1: i32, %arg2: i32) -> (i32, i32) {
    %c0_i32 = arith.constant 0 : i32
    return %arg0, %arg1 : i32, i32
  }
  func.func @transform_3(%arg0: i32, %arg1: i32, %arg2: i32) -> (i32, i32, i32) {
    %c0_i32 = arith.constant 0 : i32
    %c0_i32_0 = arith.constant 0 : i32
    return %arg0, %c0_i32, %arg1 : i32, i32, i32
  }
  func.func @transform_4(%arg0: i32, %arg1: i32, %arg2: i32) -> (i32, i32, i32) {
    %c0_i32 = arith.constant 0 : i32
    %c0_i32_0 = arith.constant 0 : i32
    return %arg0, %c0_i32, %arg1 : i32, i32, i32
  }
}

module attributes {stable_mosaic.version = 11 : i64} {
  func.func @_msf_kernel(%arg0: i32, %arg1: memref<1x64x64xf32, #tpu.memory_space<vmem>>, %arg2: memref<1x64xf32, #tpu.memory_space<vmem>>, %arg3: memref<1x64xf32, #tpu.memory_space<vmem>>, %arg4: memref<1x64x64xbf16, #tpu.memory_space<vmem>>) attributes {dimension_semantics = [#tpu.dimension_semantics<parallel>], iteration_bounds = array<i64: 1>, scalar_prefetch = 0 : i64, scratch_operands = 0 : i64, tpu.core_type = #tpu.core_type<tc>, window_params = [{transform_indices = @transform_0, window_bounds = array<i64: 1, 64, 64>}, {pipeline_mode = #tpu.pipeline_mode<synchronous>, transform_indices = @transform_1, window_bounds = array<i64: 1, 64>}, {pipeline_mode = #tpu.pipeline_mode<synchronous>, transform_indices = @transform_2, window_bounds = array<i64: 1, 64>}, {transform_indices = @transform_3, window_bounds = array<i64: 1, 64, 64>}]} {
    %c0 = arith.constant 0 : index
    %c0_0 = arith.constant 0 : index
    %c0_1 = arith.constant 0 : index
    %0 = vector.load %arg1[%c0, %c0_0, %c0_1] : memref<1x64x64xf32, #tpu.memory_space<vmem>>, vector<1x64x64xf32>
    %1 = vector.shape_cast %0 : vector<1x64x64xf32> to vector<64x64xf32>
    %c0_2 = arith.constant 0 : index
    %c0_3 = arith.constant 0 : index
    %2 = vector.load %arg2[%c0_2, %c0_3] : memref<1x64xf32, #tpu.memory_space<vmem>>, vector<1x64xf32>
    %3 = vector.broadcast %2 : vector<1x64xf32> to vector<64x64xf32>
    %4 = arith.mulf %1, %3 : vector<64x64xf32>
    %c0_4 = arith.constant 0 : index
    %c0_5 = arith.constant 0 : index
    %5 = vector.load %arg3[%c0_4, %c0_5] : memref<1x64xf32, #tpu.memory_space<vmem>>, vector<1x64xf32>
    %6 = vector.broadcast %5 : vector<1x64xf32> to vector<64x64xf32>
    %7 = arith.addf %4, %6 : vector<64x64xf32>
    %cst = arith.constant 1.000000e+00 : f32
    %8 = vector.broadcast %cst : f32 to vector<64x64xf32>
    %9 = arith.subf %7, %8 : vector<64x64xf32>
    %cst_6 = arith.constant 1.000000e+00 : f32
    %10 = vector.broadcast %cst_6 : f32 to vector<64x64xf32>
    %11 = arith.addf %9, %10 : vector<64x64xf32>
    %12 = math.floor %11 : vector<64x64xf32>
    %cst_7 = arith.constant 0.000000e+00 : f32
    %cst_8 = arith.constant 8.000000e+00 : f32
    %13 = vector.broadcast %cst_7 : f32 to vector<64x64xf32>
    %14 = arith.maximumf %13, %12 : vector<64x64xf32>
    %15 = vector.broadcast %cst_8 : f32 to vector<64x64xf32>
    %16 = arith.minimumf %15, %14 : vector<64x64xf32>
    %17 = arith.truncf %16 : vector<64x64xf32> to vector<64x64xbf16>
    %c0_9 = arith.constant 0 : index
    %c0_10 = arith.constant 0 : index
    %c0_11 = arith.constant 0 : index
    %18 = vector.load %arg4[%c0_9, %c0_10, %c0_11] : memref<1x64x64xbf16, #tpu.memory_space<vmem>>, vector<1x64x64xbf16>
    %19 = vector.shape_cast %18 : vector<1x64x64xbf16> to vector<64x64xbf16>
    %20 = vector.shape_cast %17 : vector<64x64xbf16> to vector<1x64x64xbf16>
    tpu.vector_store %arg4[%c0_9, %c0_10, %c0_11], %20 {strides = array<i32>} : memref<1x64x64xbf16, #tpu.memory_space<vmem>>, vector<1x64x64xbf16>,
    return
  }
  func.func @transform_0(%arg0: i32) -> (i32, i32, i32) {
    %c0_i32 = arith.constant 0 : i32
    %c0_i32_0 = arith.constant 0 : i32
    %c0_i32_1 = arith.constant 0 : i32
    return %c0_i32, %arg0, %c0_i32_0 : i32, i32, i32
  }
  func.func @transform_1(%arg0: i32) -> (i32, i32) {
    %c0_i32 = arith.constant 0 : i32
    %c0_i32_0 = arith.constant 0 : i32
    %c0_i32_1 = arith.constant 0 : i32
    return %c0_i32, %c0_i32_0 : i32, i32
  }
  func.func @transform_2(%arg0: i32) -> (i32, i32) {
    %c0_i32 = arith.constant 0 : i32
    %c0_i32_0 = arith.constant 0 : i32
    %c0_i32_1 = arith.constant 0 : i32
    return %c0_i32, %c0_i32_0 : i32, i32
  }
  func.func @transform_3(%arg0: i32) -> (i32, i32, i32) {
    %c0_i32 = arith.constant 0 : i32
    %c0_i32_0 = arith.constant 0 : i32
    %c0_i32_1 = arith.constant 0 : i32
    return %c0_i32, %arg0, %c0_i32_0 : i32, i32, i32
  }
}

module attributes {stable_mosaic.version = 11 : i64} {
  func.func @_matmul_stats_kernel(%arg0: i32, %arg1: i32, %arg2: i32, %arg3: memref<64x64xbf16, #tpu.memory_space<vmem>>, %arg4: memref<64x64xbf16, #tpu.memory_space<vmem>>, %arg5: memref<64x64xf32, #tpu.memory_space<vmem>>, %arg6: memref<1x1x64xf32, #tpu.memory_space<vmem>>, %arg7: memref<1x1x64xf32, #tpu.memory_space<vmem>>, %arg8: memref<64x64xf32, #tpu.memory_space<vmem>>) attributes {dimension_semantics = [#tpu.dimension_semantics<parallel>, #tpu.dimension_semantics<parallel>, #tpu.dimension_semantics<arbitrary>], iteration_bounds = array<i64: 1, 1, 1>, scalar_prefetch = 0 : i64, scratch_operands = 1 : i64, tpu.core_type = #tpu.core_type<tc>, window_params = [{transform_indices = @transform_0, window_bounds = array<i64: 64, 64>}, {transform_indices = @transform_1, window_bounds = array<i64: 64, 64>}, {transform_indices = @transform_2, window_bounds = array<i64: 64, 64>}, {transform_indices = @transform_3, window_bounds = array<i64: 1, 1, 64>}, {transform_indices = @transform_4, window_bounds = array<i64: 1, 1, 64>}]} {
    %c0_i32 = arith.constant 0 : i32
    %0 = arith.cmpi eq, %arg2, %c0_i32 : i32
    %1 = arith.extui %0 : i1 to i32
    %c0_i32_0 = arith.constant 0 : i32
    %2 = arith.cmpi ne, %1, %c0_i32_0 : i32
    scf.if %2 {
      %cst_10 = arith.constant 0.000000e+00 : f32
      %12 = vector.broadcast %cst_10 : f32 to vector<64x64xf32>
      %c0_11 = arith.constant 0 : index
      %c0_12 = arith.constant 0 : index
      %13 = vector.load %arg8[%c0_11, %c0_12] : memref<64x64xf32, #tpu.memory_space<vmem>>, vector<64x64xf32>
      tpu.vector_store %arg8[%c0_11, %c0_12], %12 {strides = array<i32>} : memref<64x64xf32, #tpu.memory_space<vmem>>, vector<64x64xf32>,
    } else {
    }
    %c0 = arith.constant 0 : index
    %c0_1 = arith.constant 0 : index
    %3 = vector.load %arg8[%c0, %c0_1] : memref<64x64xf32, #tpu.memory_space<vmem>>, vector<64x64xf32>
    %c0_2 = arith.constant 0 : index
    %c0_3 = arith.constant 0 : index
    %4 = vector.load %arg3[%c0_2, %c0_3] : memref<64x64xbf16, #tpu.memory_space<vmem>>, vector<64x64xbf16>
    %c0_4 = arith.constant 0 : index
    %c0_5 = arith.constant 0 : index
    %5 = vector.load %arg4[%c0_4, %c0_5] : memref<64x64xbf16, #tpu.memory_space<vmem>>, vector<64x64xbf16>
    %cst = arith.constant dense<0.000000e+00> : vector<64x64xf32>
    %6 = tpu.matmul %4, %5, %cst {dimension_numbers = #tpu.dot_dimension_numbers<[1], [0], [0], [1], [0, 0, 1, 1], [], []>} : vector<64x64xbf16>, vector<64x64xbf16>, vector<64x64xf32> -> vector<64x64xf32>
    %7 = arith.addf %3, %6 : vector<64x64xf32>
    %c0_6 = arith.constant 0 : index
    %c0_7 = arith.constant 0 : index
    %8 = vector.load %arg8[%c0_6, %c0_7] : memref<64x64xf32, #tpu.memory_space<vmem>>, vector<64x64xf32>
    tpu.vector_store %arg8[%c0_6, %c0_7], %7 {strides = array<i32>} : memref<64x64xf32, #tpu.memory_space<vmem>>, vector<64x64xf32>,
    %c0_i32_8 = arith.constant 0 : i32
    %9 = arith.cmpi eq, %arg2, %c0_i32_8 : i32
    %10 = arith.extui %9 : i1 to i32
    %c0_i32_9 = arith.constant 0 : i32
    %11 = arith.cmpi ne, %10, %c0_i32_9 : i32
    scf.if %11 {
      %c0_10 = arith.constant 0 : index
      %c0_11 = arith.constant 0 : index
      %12 = vector.load %arg8[%c0_10, %c0_11] : memref<64x64xf32, #tpu.memory_space<vmem>>, vector<64x64xf32>
      %c0_12 = arith.constant 0 : index
      %c0_13 = arith.constant 0 : index
      %13 = vector.load %arg5[%c0_12, %c0_13] : memref<64x64xf32, #tpu.memory_space<vmem>>, vector<64x64xf32>
      tpu.vector_store %arg5[%c0_12, %c0_13], %12 {strides = array<i32>} : memref<64x64xf32, #tpu.memory_space<vmem>>, vector<64x64xf32>,
      %cst_14 = arith.constant dense<0.000000e+00> : vector<64xf32>
      %14 = vector.multi_reduction <add>, %12, %cst_14 [0] : vector<64x64xf32> to vector<64xf32>
      %15 = vector.shape_cast %14 : vector<64xf32> to vector<1x64xf32>
      %16 = vector.shape_cast %15 : vector<1x64xf32> to vector<1x1x64xf32>
      %c0_15 = arith.constant 0 : index
      %c0_16 = arith.constant 0 : index
      %c0_17 = arith.constant 0 : index
      %17 = vector.load %arg6[%c0_15, %c0_16, %c0_17] : memref<1x1x64xf32, #tpu.memory_space<vmem>>, vector<1x1x64xf32>
      tpu.vector_store %arg6[%c0_15, %c0_16, %c0_17], %16 {strides = array<i32>} : memref<1x1x64xf32, #tpu.memory_space<vmem>>, vector<1x1x64xf32>,
      %18 = arith.mulf %12, %12 : vector<64x64xf32>
      %cst_18 = arith.constant dense<0.000000e+00> : vector<64xf32>
      %19 = vector.multi_reduction <add>, %18, %cst_18 [0] : vector<64x64xf32> to vector<64xf32>
      %20 = vector.shape_cast %19 : vector<64xf32> to vector<1x64xf32>
      %21 = vector.shape_cast %20 : vector<1x64xf32> to vector<1x1x64xf32>
      %c0_19 = arith.constant 0 : index
      %c0_20 = arith.constant 0 : index
      %c0_21 = arith.constant 0 : index
      %22 = vector.load %arg7[%c0_19, %c0_20, %c0_21] : memref<1x1x64xf32, #tpu.memory_space<vmem>>, vector<1x1x64xf32>
      tpu.vector_store %arg7[%c0_19, %c0_20, %c0_21], %21 {strides = array<i32>} : memref<1x1x64xf32, #tpu.memory_space<vmem>>, vector<1x1x64xf32>,
    } else {
    }
    return
  }
  func.func @transform_0(%arg0: i32, %arg1: i32, %arg2: i32) -> (i32, i32) {
    %c0_i32 = arith.constant 0 : i32
    return %arg0, %arg2 : i32, i32
  }
  func.func @transform_1(%arg0: i32, %arg1: i32, %arg2: i32) -> (i32, i32) {
    %c0_i32 = arith.constant 0 : i32
    return %arg2, %arg1 : i32, i32
  }
  func.func @transform_2(%arg0: i32, %arg1: i32, %arg2: i32) -> (i32, i32) {
    %c0_i32 = arith.constant 0 : i32
    return %arg0, %arg1 : i32, i32
  }
  func.func @transform_3(%arg0: i32, %arg1: i32, %arg2: i32) -> (i32, i32, i32) {
    %c0_i32 = arith.constant 0 : i32
    %c0_i32_0 = arith.constant 0 : i32
    return %arg0, %c0_i32, %arg1 : i32, i32, i32
  }
  func.func @transform_4(%arg0: i32, %arg1: i32, %arg2: i32) -> (i32, i32, i32) {
    %c0_i32 = arith.constant 0 : i32
    %c0_i32_0 = arith.constant 0 : i32
    return %arg0, %c0_i32, %arg1 : i32, i32, i32
  }
}

module attributes {stable_mosaic.version = 11 : i64} {
  func.func @_msf_kernel(%arg0: i32, %arg1: memref<1x64x48xf32, #tpu.memory_space<vmem>>, %arg2: memref<1x48xf32, #tpu.memory_space<vmem>>, %arg3: memref<1x48xf32, #tpu.memory_space<vmem>>, %arg4: memref<1x64x48xbf16, #tpu.memory_space<vmem>>) attributes {dimension_semantics = [#tpu.dimension_semantics<parallel>], iteration_bounds = array<i64: 1>, scalar_prefetch = 0 : i64, scratch_operands = 0 : i64, tpu.core_type = #tpu.core_type<tc>, window_params = [{transform_indices = @transform_0, window_bounds = array<i64: 1, 64, 48>}, {pipeline_mode = #tpu.pipeline_mode<synchronous>, transform_indices = @transform_1, window_bounds = array<i64: 1, 48>}, {pipeline_mode = #tpu.pipeline_mode<synchronous>, transform_indices = @transform_2, window_bounds = array<i64: 1, 48>}, {transform_indices = @transform_3, window_bounds = array<i64: 1, 64, 48>}]} {
    %c0 = arith.constant 0 : index
    %c0_0 = arith.constant 0 : index
    %c0_1 = arith.constant 0 : index
    %0 = vector.load %arg1[%c0, %c0_0, %c0_1] : memref<1x64x48xf32, #tpu.memory_space<vmem>>, vector<1x64x48xf32>
    %1 = vector.shape_cast %0 : vector<1x64x48xf32> to vector<64x48xf32>
    %c0_2 = arith.constant 0 : index
    %c0_3 = arith.constant 0 : index
    %2 = vector.load %arg2[%c0_2, %c0_3] : memref<1x48xf32, #tpu.memory_space<vmem>>, vector<1x48xf32>
    %3 = vector.broadcast %2 : vector<1x48xf32> to vector<64x48xf32>
    %4 = arith.mulf %1, %3 : vector<64x48xf32>
    %c0_4 = arith.constant 0 : index
    %c0_5 = arith.constant 0 : index
    %5 = vector.load %arg3[%c0_4, %c0_5] : memref<1x48xf32, #tpu.memory_space<vmem>>, vector<1x48xf32>
    %6 = vector.broadcast %5 : vector<1x48xf32> to vector<64x48xf32>
    %7 = arith.addf %4, %6 : vector<64x48xf32>
    %cst = arith.constant 1.000000e+00 : f32
    %8 = vector.broadcast %cst : f32 to vector<64x48xf32>
    %9 = arith.subf %7, %8 : vector<64x48xf32>
    %cst_6 = arith.constant 1.000000e+00 : f32
    %10 = vector.broadcast %cst_6 : f32 to vector<64x48xf32>
    %11 = arith.addf %9, %10 : vector<64x48xf32>
    %12 = math.floor %11 : vector<64x48xf32>
    %cst_7 = arith.constant 0.000000e+00 : f32
    %cst_8 = arith.constant 8.000000e+00 : f32
    %13 = vector.broadcast %cst_7 : f32 to vector<64x48xf32>
    %14 = arith.maximumf %13, %12 : vector<64x48xf32>
    %15 = vector.broadcast %cst_8 : f32 to vector<64x48xf32>
    %16 = arith.minimumf %15, %14 : vector<64x48xf32>
    %17 = arith.truncf %16 : vector<64x48xf32> to vector<64x48xbf16>
    %c0_9 = arith.constant 0 : index
    %c0_10 = arith.constant 0 : index
    %c0_11 = arith.constant 0 : index
    %18 = vector.load %arg4[%c0_9, %c0_10, %c0_11] : memref<1x64x48xbf16, #tpu.memory_space<vmem>>, vector<1x64x48xbf16>
    %19 = vector.shape_cast %18 : vector<1x64x48xbf16> to vector<64x48xbf16>
    %20 = vector.shape_cast %17 : vector<64x48xbf16> to vector<1x64x48xbf16>
    tpu.vector_store %arg4[%c0_9, %c0_10, %c0_11], %20 {strides = array<i32>} : memref<1x64x48xbf16, #tpu.memory_space<vmem>>, vector<1x64x48xbf16>,
    return
  }
  func.func @transform_0(%arg0: i32) -> (i32, i32, i32) {
    %c0_i32 = arith.constant 0 : i32
    %c0_i32_0 = arith.constant 0 : i32
    %c0_i32_1 = arith.constant 0 : i32
    return %c0_i32, %arg0, %c0_i32_0 : i32, i32, i32
  }
  func.func @transform_1(%arg0: i32) -> (i32, i32) {
    %c0_i32 = arith.constant 0 : i32
    %c0_i32_0 = arith.constant 0 : i32
    %c0_i32_1 = arith.constant 0 : i32
    return %c0_i32, %c0_i32_0 : i32, i32
  }
  func.func @transform_2(%arg0: i32) -> (i32, i32) {
    %c0_i32 = arith.constant 0 : i32
    %c0_i32_0 = arith.constant 0 : i32
    %c0_i32_1 = arith.constant 0 : i32
    return %c0_i32, %c0_i32_0 : i32, i32
  }
  func.func @transform_3(%arg0: i32) -> (i32, i32, i32) {
    %c0_i32 = arith.constant 0 : i32
    %c0_i32_0 = arith.constant 0 : i32
    %c0_i32_1 = arith.constant 0 : i32
    return %c0_i32, %arg0, %c0_i32_0 : i32, i32, i32
  }
}

module attributes {stable_mosaic.version = 11 : i64} {
  func.func @_matmul_stats_kernel(%arg0: i32, %arg1: i32, %arg2: i32, %arg3: memref<64x256xbf16, #tpu.memory_space<vmem>>, %arg4: memref<256x16xbf16, #tpu.memory_space<vmem>>, %arg5: memref<64x16xf32, #tpu.memory_space<vmem>>, %arg6: memref<1x1x16xf32, #tpu.memory_space<vmem>>, %arg7: memref<1x1x16xf32, #tpu.memory_space<vmem>>, %arg8: memref<64x16xf32, #tpu.memory_space<vmem>>) attributes {dimension_semantics = [#tpu.dimension_semantics<parallel>, #tpu.dimension_semantics<parallel>, #tpu.dimension_semantics<arbitrary>], iteration_bounds = array<i64: 1, 1, 1>, scalar_prefetch = 0 : i64, scratch_operands = 1 : i64, tpu.core_type = #tpu.core_type<tc>, window_params = [{transform_indices = @transform_0, window_bounds = array<i64: 64, 256>}, {transform_indices = @transform_1, window_bounds = array<i64: 256, 16>}, {transform_indices = @transform_2, window_bounds = array<i64: 64, 16>}, {transform_indices = @transform_3, window_bounds = array<i64: 1, 1, 16>}, {transform_indices = @transform_4, window_bounds = array<i64: 1, 1, 16>}]} {
    %c0_i32 = arith.constant 0 : i32
    %0 = arith.cmpi eq, %arg2, %c0_i32 : i32
    %1 = arith.extui %0 : i1 to i32
    %c0_i32_0 = arith.constant 0 : i32
    %2 = arith.cmpi ne, %1, %c0_i32_0 : i32
    scf.if %2 {
      %cst_10 = arith.constant 0.000000e+00 : f32
      %12 = vector.broadcast %cst_10 : f32 to vector<64x16xf32>
      %c0_11 = arith.constant 0 : index
      %c0_12 = arith.constant 0 : index
      %13 = vector.load %arg8[%c0_11, %c0_12] : memref<64x16xf32, #tpu.memory_space<vmem>>, vector<64x16xf32>
      tpu.vector_store %arg8[%c0_11, %c0_12], %12 {strides = array<i32>} : memref<64x16xf32, #tpu.memory_space<vmem>>, vector<64x16xf32>,
    } else {
    }
    %c0 = arith.constant 0 : index
    %c0_1 = arith.constant 0 : index
    %3 = vector.load %arg8[%c0, %c0_1] : memref<64x16xf32, #tpu.memory_space<vmem>>, vector<64x16xf32>
    %c0_2 = arith.constant 0 : index
    %c0_3 = arith.constant 0 : index
    %4 = vector.load %arg3[%c0_2, %c0_3] : memref<64x256xbf16, #tpu.memory_space<vmem>>, vector<64x256xbf16>
    %c0_4 = arith.constant 0 : index
    %c0_5 = arith.constant 0 : index
    %5 = vector.load %arg4[%c0_4, %c0_5] : memref<256x16xbf16, #tpu.memory_space<vmem>>, vector<256x16xbf16>
    %cst = arith.constant dense<0.000000e+00> : vector<64x16xf32>
    %6 = tpu.matmul %4, %5, %cst {dimension_numbers = #tpu.dot_dimension_numbers<[1], [0], [0], [1], [0, 0, 1, 1], [], []>} : vector<64x256xbf16>, vector<256x16xbf16>, vector<64x16xf32> -> vector<64x16xf32>
    %7 = arith.addf %3, %6 : vector<64x16xf32>
    %c0_6 = arith.constant 0 : index
    %c0_7 = arith.constant 0 : index
    %8 = vector.load %arg8[%c0_6, %c0_7] : memref<64x16xf32, #tpu.memory_space<vmem>>, vector<64x16xf32>
    tpu.vector_store %arg8[%c0_6, %c0_7], %7 {strides = array<i32>} : memref<64x16xf32, #tpu.memory_space<vmem>>, vector<64x16xf32>,
    %c0_i32_8 = arith.constant 0 : i32
    %9 = arith.cmpi eq, %arg2, %c0_i32_8 : i32
    %10 = arith.extui %9 : i1 to i32
    %c0_i32_9 = arith.constant 0 : i32
    %11 = arith.cmpi ne, %10, %c0_i32_9 : i32
    scf.if %11 {
      %c0_10 = arith.constant 0 : index
      %c0_11 = arith.constant 0 : index
      %12 = vector.load %arg8[%c0_10, %c0_11] : memref<64x16xf32, #tpu.memory_space<vmem>>, vector<64x16xf32>
      %c0_12 = arith.constant 0 : index
      %c0_13 = arith.constant 0 : index
      %13 = vector.load %arg5[%c0_12, %c0_13] : memref<64x16xf32, #tpu.memory_space<vmem>>, vector<64x16xf32>
      tpu.vector_store %arg5[%c0_12, %c0_13], %12 {strides = array<i32>} : memref<64x16xf32, #tpu.memory_space<vmem>>, vector<64x16xf32>,
      %cst_14 = arith.constant dense<0.000000e+00> : vector<16xf32>
      %14 = vector.multi_reduction <add>, %12, %cst_14 [0] : vector<64x16xf32> to vector<16xf32>
      %15 = vector.shape_cast %14 : vector<16xf32> to vector<1x16xf32>
      %16 = vector.shape_cast %15 : vector<1x16xf32> to vector<1x1x16xf32>
      %c0_15 = arith.constant 0 : index
      %c0_16 = arith.constant 0 : index
      %c0_17 = arith.constant 0 : index
      %17 = vector.load %arg6[%c0_15, %c0_16, %c0_17] : memref<1x1x16xf32, #tpu.memory_space<vmem>>, vector<1x1x16xf32>
      tpu.vector_store %arg6[%c0_15, %c0_16, %c0_17], %16 {strides = array<i32>} : memref<1x1x16xf32, #tpu.memory_space<vmem>>, vector<1x1x16xf32>,
      %18 = arith.mulf %12, %12 : vector<64x16xf32>
      %cst_18 = arith.constant dense<0.000000e+00> : vector<16xf32>
      %19 = vector.multi_reduction <add>, %18, %cst_18 [0] : vector<64x16xf32> to vector<16xf32>
      %20 = vector.shape_cast %19 : vector<16xf32> to vector<1x16xf32>
      %21 = vector.shape_cast %20 : vector<1x16xf32> to vector<1x1x16xf32>
      %c0_19 = arith.constant 0 : index
      %c0_20 = arith.constant 0 : index
      %c0_21 = arith.constant 0 : index
      %22 = vector.load %arg7[%c0_19, %c0_20, %c0_21] : memref<1x1x16xf32, #tpu.memory_space<vmem>>, vector<1x1x16xf32>
      tpu.vector_store %arg7[%c0_19, %c0_20, %c0_21], %21 {strides = array<i32>} : memref<1x1x16xf32, #tpu.memory_space<vmem>>, vector<1x1x16xf32>,
    } else {
    }
    return
  }
  func.func @transform_0(%arg0: i32, %arg1: i32, %arg2: i32) -> (i32, i32) {
    %c0_i32 = arith.constant 0 : i32
    return %arg0, %arg2 : i32, i32
  }
  func.func @transform_1(%arg0: i32, %arg1: i32, %arg2: i32) -> (i32, i32) {
    %c0_i32 = arith.constant 0 : i32
    return %arg2, %arg1 : i32, i32
  }
  func.func @transform_2(%arg0: i32, %arg1: i32, %arg2: i32) -> (i32, i32) {
    %c0_i32 = arith.constant 0 : i32
    return %arg0, %arg1 : i32, i32
  }
  func.func @transform_3(%arg0: i32, %arg1: i32, %arg2: i32) -> (i32, i32, i32) {
    %c0_i32 = arith.constant 0 : i32
    %c0_i32_0 = arith.constant 0 : i32
    return %arg0, %c0_i32, %arg1 : i32, i32, i32
  }
  func.func @transform_4(%arg0: i32, %arg1: i32, %arg2: i32) -> (i32, i32, i32) {
    %c0_i32 = arith.constant 0 : i32
    %c0_i32_0 = arith.constant 0 : i32
    return %arg0, %c0_i32, %arg1 : i32, i32, i32
  }
}

module attributes {stable_mosaic.version = 11 : i64} {
  func.func @_affine_kernel(%arg0: i32, %arg1: memref<64x16xf32, #tpu.memory_space<vmem>>, %arg2: memref<1x16xf32, #tpu.memory_space<vmem>>, %arg3: memref<1x16xf32, #tpu.memory_space<vmem>>, %arg4: memref<64x16xf32, #tpu.memory_space<vmem>>) attributes {dimension_semantics = [#tpu.dimension_semantics<parallel>], iteration_bounds = array<i64: 1>, scalar_prefetch = 0 : i64, scratch_operands = 0 : i64, tpu.core_type = #tpu.core_type<tc>, window_params = [{transform_indices = @transform_0, window_bounds = array<i64: 64, 16>}, {pipeline_mode = #tpu.pipeline_mode<synchronous>, transform_indices = @transform_1, window_bounds = array<i64: 1, 16>}, {pipeline_mode = #tpu.pipeline_mode<synchronous>, transform_indices = @transform_2, window_bounds = array<i64: 1, 16>}, {transform_indices = @transform_3, window_bounds = array<i64: 64, 16>}]} {
    %c0 = arith.constant 0 : index
    %c0_0 = arith.constant 0 : index
    %0 = vector.load %arg1[%c0, %c0_0] : memref<64x16xf32, #tpu.memory_space<vmem>>, vector<64x16xf32>
    %c0_1 = arith.constant 0 : index
    %c0_2 = arith.constant 0 : index
    %1 = vector.load %arg2[%c0_1, %c0_2] : memref<1x16xf32, #tpu.memory_space<vmem>>, vector<1x16xf32>
    %2 = vector.broadcast %1 : vector<1x16xf32> to vector<64x16xf32>
    %3 = arith.mulf %0, %2 : vector<64x16xf32>
    %c0_3 = arith.constant 0 : index
    %c0_4 = arith.constant 0 : index
    %4 = vector.load %arg3[%c0_3, %c0_4] : memref<1x16xf32, #tpu.memory_space<vmem>>, vector<1x16xf32>
    %5 = vector.broadcast %4 : vector<1x16xf32> to vector<64x16xf32>
    %6 = arith.addf %3, %5 : vector<64x16xf32>
    %c0_5 = arith.constant 0 : index
    %c0_6 = arith.constant 0 : index
    %7 = vector.load %arg4[%c0_5, %c0_6] : memref<64x16xf32, #tpu.memory_space<vmem>>, vector<64x16xf32>
    tpu.vector_store %arg4[%c0_5, %c0_6], %6 {strides = array<i32>} : memref<64x16xf32, #tpu.memory_space<vmem>>, vector<64x16xf32>,
    return
  }
  func.func @transform_0(%arg0: i32) -> (i32, i32) {
    %c0_i32 = arith.constant 0 : i32
    %c0_i32_0 = arith.constant 0 : i32
    return %arg0, %c0_i32 : i32, i32
  }
  func.func @transform_1(%arg0: i32) -> (i32, i32) {
    %c0_i32 = arith.constant 0 : i32
    %c0_i32_0 = arith.constant 0 : i32
    %c0_i32_1 = arith.constant 0 : i32
    return %c0_i32, %c0_i32_0 : i32, i32
  }
  func.func @transform_2(%arg0: i32) -> (i32, i32) {
    %c0_i32 = arith.constant 0 : i32
    %c0_i32_0 = arith.constant 0 : i32
    %c0_i32_1 = arith.constant 0 : i32
    return %c0_i32, %c0_i32_0 : i32, i32
  }
  func.func @transform_3(%arg0: i32) -> (i32, i32) {
    %c0_i32 = arith.constant 0 : i32
    %c0_i32_0 = arith.constant 0 : i32
    return %arg0, %c0_i32 : i32, i32
  }
}

module attributes {stable_mosaic.version = 11 : i64} {
  func.func @_matmul_stats_kernel(%arg0: i32, %arg1: i32, %arg2: i32, %arg3: memref<16x128xbf16, #tpu.memory_space<vmem>>, %arg4: memref<128x256xbf16, #tpu.memory_space<vmem>>, %arg5: memref<16x256xf32, #tpu.memory_space<vmem>>, %arg6: memref<1x1x256xf32, #tpu.memory_space<vmem>>, %arg7: memref<1x1x256xf32, #tpu.memory_space<vmem>>, %arg8: memref<16x256xf32, #tpu.memory_space<vmem>>) attributes {dimension_semantics = [#tpu.dimension_semantics<parallel>, #tpu.dimension_semantics<parallel>, #tpu.dimension_semantics<arbitrary>], iteration_bounds = array<i64: 1, 1, 1>, scalar_prefetch = 0 : i64, scratch_operands = 1 : i64, tpu.core_type = #tpu.core_type<tc>, window_params = [{transform_indices = @transform_0, window_bounds = array<i64: 16, 128>}, {transform_indices = @transform_1, window_bounds = array<i64: 128, 256>}, {transform_indices = @transform_2, window_bounds = array<i64: 16, 256>}, {transform_indices = @transform_3, window_bounds = array<i64: 1, 1, 256>}, {transform_indices = @transform_4, window_bounds = array<i64: 1, 1, 256>}]} {
    %c0_i32 = arith.constant 0 : i32
    %0 = arith.cmpi eq, %arg2, %c0_i32 : i32
    %1 = arith.extui %0 : i1 to i32
    %c0_i32_0 = arith.constant 0 : i32
    %2 = arith.cmpi ne, %1, %c0_i32_0 : i32
    scf.if %2 {
      %cst_10 = arith.constant 0.000000e+00 : f32
      %12 = vector.broadcast %cst_10 : f32 to vector<16x256xf32>
      %c0_11 = arith.constant 0 : index
      %c0_12 = arith.constant 0 : index
      %13 = vector.load %arg8[%c0_11, %c0_12] : memref<16x256xf32, #tpu.memory_space<vmem>>, vector<16x256xf32>
      tpu.vector_store %arg8[%c0_11, %c0_12], %12 {strides = array<i32>} : memref<16x256xf32, #tpu.memory_space<vmem>>, vector<16x256xf32>,
    } else {
    }
    %c0 = arith.constant 0 : index
    %c0_1 = arith.constant 0 : index
    %3 = vector.load %arg8[%c0, %c0_1] : memref<16x256xf32, #tpu.memory_space<vmem>>, vector<16x256xf32>
    %c0_2 = arith.constant 0 : index
    %c0_3 = arith.constant 0 : index
    %4 = vector.load %arg3[%c0_2, %c0_3] : memref<16x128xbf16, #tpu.memory_space<vmem>>, vector<16x128xbf16>
    %c0_4 = arith.constant 0 : index
    %c0_5 = arith.constant 0 : index
    %5 = vector.load %arg4[%c0_4, %c0_5] : memref<128x256xbf16, #tpu.memory_space<vmem>>, vector<128x256xbf16>
    %cst = arith.constant dense<0.000000e+00> : vector<16x256xf32>
    %6 = tpu.matmul %4, %5, %cst {dimension_numbers = #tpu.dot_dimension_numbers<[1], [0], [0], [1], [0, 0, 1, 1], [], []>} : vector<16x128xbf16>, vector<128x256xbf16>, vector<16x256xf32> -> vector<16x256xf32>
    %7 = arith.addf %3, %6 : vector<16x256xf32>
    %c0_6 = arith.constant 0 : index
    %c0_7 = arith.constant 0 : index
    %8 = vector.load %arg8[%c0_6, %c0_7] : memref<16x256xf32, #tpu.memory_space<vmem>>, vector<16x256xf32>
    tpu.vector_store %arg8[%c0_6, %c0_7], %7 {strides = array<i32>} : memref<16x256xf32, #tpu.memory_space<vmem>>, vector<16x256xf32>,
    %c0_i32_8 = arith.constant 0 : i32
    %9 = arith.cmpi eq, %arg2, %c0_i32_8 : i32
    %10 = arith.extui %9 : i1 to i32
    %c0_i32_9 = arith.constant 0 : i32
    %11 = arith.cmpi ne, %10, %c0_i32_9 : i32
    scf.if %11 {
      %c0_10 = arith.constant 0 : index
      %c0_11 = arith.constant 0 : index
      %12 = vector.load %arg8[%c0_10, %c0_11] : memref<16x256xf32, #tpu.memory_space<vmem>>, vector<16x256xf32>
      %c0_12 = arith.constant 0 : index
      %c0_13 = arith.constant 0 : index
      %13 = vector.load %arg5[%c0_12, %c0_13] : memref<16x256xf32, #tpu.memory_space<vmem>>, vector<16x256xf32>
      tpu.vector_store %arg5[%c0_12, %c0_13], %12 {strides = array<i32>} : memref<16x256xf32, #tpu.memory_space<vmem>>, vector<16x256xf32>,
      %cst_14 = arith.constant dense<0.000000e+00> : vector<256xf32>
      %14 = vector.multi_reduction <add>, %12, %cst_14 [0] : vector<16x256xf32> to vector<256xf32>
      %15 = vector.shape_cast %14 : vector<256xf32> to vector<1x256xf32>
      %16 = vector.shape_cast %15 : vector<1x256xf32> to vector<1x1x256xf32>
      %c0_15 = arith.constant 0 : index
      %c0_16 = arith.constant 0 : index
      %c0_17 = arith.constant 0 : index
      %17 = vector.load %arg6[%c0_15, %c0_16, %c0_17] : memref<1x1x256xf32, #tpu.memory_space<vmem>>, vector<1x1x256xf32>
      tpu.vector_store %arg6[%c0_15, %c0_16, %c0_17], %16 {strides = array<i32>} : memref<1x1x256xf32, #tpu.memory_space<vmem>>, vector<1x1x256xf32>,
      %18 = arith.mulf %12, %12 : vector<16x256xf32>
      %cst_18 = arith.constant dense<0.000000e+00> : vector<256xf32>
      %19 = vector.multi_reduction <add>, %18, %cst_18 [0] : vector<16x256xf32> to vector<256xf32>
      %20 = vector.shape_cast %19 : vector<256xf32> to vector<1x256xf32>
      %21 = vector.shape_cast %20 : vector<1x256xf32> to vector<1x1x256xf32>
      %c0_19 = arith.constant 0 : index
      %c0_20 = arith.constant 0 : index
      %c0_21 = arith.constant 0 : index
      %22 = vector.load %arg7[%c0_19, %c0_20, %c0_21] : memref<1x1x256xf32, #tpu.memory_space<vmem>>, vector<1x1x256xf32>
      tpu.vector_store %arg7[%c0_19, %c0_20, %c0_21], %21 {strides = array<i32>} : memref<1x1x256xf32, #tpu.memory_space<vmem>>, vector<1x1x256xf32>,
    } else {
    }
    return
  }
  func.func @transform_0(%arg0: i32, %arg1: i32, %arg2: i32) -> (i32, i32) {
    %c0_i32 = arith.constant 0 : i32
    return %arg0, %arg2 : i32, i32
  }
  func.func @transform_1(%arg0: i32, %arg1: i32, %arg2: i32) -> (i32, i32) {
    %c0_i32 = arith.constant 0 : i32
    return %arg2, %arg1 : i32, i32
  }
  func.func @transform_2(%arg0: i32, %arg1: i32, %arg2: i32) -> (i32, i32) {
    %c0_i32 = arith.constant 0 : i32
    return %arg0, %arg1 : i32, i32
  }
  func.func @transform_3(%arg0: i32, %arg1: i32, %arg2: i32) -> (i32, i32, i32) {
    %c0_i32 = arith.constant 0 : i32
    %c0_i32_0 = arith.constant 0 : i32
    return %arg0, %c0_i32, %arg1 : i32, i32, i32
  }
  func.func @transform_4(%arg0: i32, %arg1: i32, %arg2: i32) -> (i32, i32, i32) {
    %c0_i32 = arith.constant 0 : i32
    %c0_i32_0 = arith.constant 0 : i32
    return %arg0, %c0_i32, %arg1 : i32, i32, i32
  }
}

module attributes {stable_mosaic.version = 11 : i64} {
  func.func @_residual_kernel(%arg0: i32, %arg1: memref<64x128xf32, #tpu.memory_space<vmem>>, %arg2: memref<1x128xf32, #tpu.memory_space<vmem>>, %arg3: memref<1x128xf32, #tpu.memory_space<vmem>>, %arg4: memref<64x128xf32, #tpu.memory_space<vmem>>, %arg5: memref<1x128xf32, #tpu.memory_space<vmem>>, %arg6: memref<1x128xf32, #tpu.memory_space<vmem>>, %arg7: memref<64x128xf32, #tpu.memory_space<vmem>>) attributes {dimension_semantics = [#tpu.dimension_semantics<parallel>], iteration_bounds = array<i64: 1>, scalar_prefetch = 0 : i64, scratch_operands = 0 : i64, tpu.core_type = #tpu.core_type<tc>, window_params = [{transform_indices = @transform_0, window_bounds = array<i64: 64, 128>}, {pipeline_mode = #tpu.pipeline_mode<synchronous>, transform_indices = @transform_1, window_bounds = array<i64: 1, 128>}, {pipeline_mode = #tpu.pipeline_mode<synchronous>, transform_indices = @transform_2, window_bounds = array<i64: 1, 128>}, {transform_indices = @transform_3, window_bounds = array<i64: 64, 128>}, {pipeline_mode = #tpu.pipeline_mode<synchronous>, transform_indices = @transform_4, window_bounds = array<i64: 1, 128>}, {pipeline_mode = #tpu.pipeline_mode<synchronous>, transform_indices = @transform_5, window_bounds = array<i64: 1, 128>}, {transform_indices = @transform_6, window_bounds = array<i64: 64, 128>}]} {
    %c0 = arith.constant 0 : index
    %c0_0 = arith.constant 0 : index
    %0 = vector.load %arg1[%c0, %c0_0] : memref<64x128xf32, #tpu.memory_space<vmem>>, vector<64x128xf32>
    %c0_1 = arith.constant 0 : index
    %c0_2 = arith.constant 0 : index
    %1 = vector.load %arg2[%c0_1, %c0_2] : memref<1x128xf32, #tpu.memory_space<vmem>>, vector<1x128xf32>
    %2 = vector.broadcast %1 : vector<1x128xf32> to vector<64x128xf32>
    %3 = arith.mulf %0, %2 : vector<64x128xf32>
    %c0_3 = arith.constant 0 : index
    %c0_4 = arith.constant 0 : index
    %4 = vector.load %arg3[%c0_3, %c0_4] : memref<1x128xf32, #tpu.memory_space<vmem>>, vector<1x128xf32>
    %5 = vector.broadcast %4 : vector<1x128xf32> to vector<64x128xf32>
    %6 = arith.addf %3, %5 : vector<64x128xf32>
    %c0_5 = arith.constant 0 : index
    %c0_6 = arith.constant 0 : index
    %7 = vector.load %arg4[%c0_5, %c0_6] : memref<64x128xf32, #tpu.memory_space<vmem>>, vector<64x128xf32>
    %c0_7 = arith.constant 0 : index
    %c0_8 = arith.constant 0 : index
    %8 = vector.load %arg5[%c0_7, %c0_8] : memref<1x128xf32, #tpu.memory_space<vmem>>, vector<1x128xf32>
    %9 = vector.broadcast %8 : vector<1x128xf32> to vector<64x128xf32>
    %10 = arith.mulf %7, %9 : vector<64x128xf32>
    %11 = arith.addf %6, %10 : vector<64x128xf32>
    %c0_9 = arith.constant 0 : index
    %c0_10 = arith.constant 0 : index
    %12 = vector.load %arg6[%c0_9, %c0_10] : memref<1x128xf32, #tpu.memory_space<vmem>>, vector<1x128xf32>
    %13 = vector.broadcast %12 : vector<1x128xf32> to vector<64x128xf32>
    %14 = arith.addf %11, %13 : vector<64x128xf32>
    %c0_11 = arith.constant 0 : index
    %c0_12 = arith.constant 0 : index
    %15 = vector.load %arg7[%c0_11, %c0_12] : memref<64x128xf32, #tpu.memory_space<vmem>>, vector<64x128xf32>
    tpu.vector_store %arg7[%c0_11, %c0_12], %14 {strides = array<i32>} : memref<64x128xf32, #tpu.memory_space<vmem>>, vector<64x128xf32>,
    return
  }
  func.func @transform_0(%arg0: i32) -> (i32, i32) {
    %c0_i32 = arith.constant 0 : i32
    %c0_i32_0 = arith.constant 0 : i32
    return %arg0, %c0_i32 : i32, i32
  }
  func.func @transform_1(%arg0: i32) -> (i32, i32) {
    %c0_i32 = arith.constant 0 : i32
    %c0_i32_0 = arith.constant 0 : i32
    %c0_i32_1 = arith.constant 0 : i32
    return %c0_i32, %c0_i32_0 : i32, i32
  }
  func.func @transform_2(%arg0: i32) -> (i32, i32) {
    %c0_i32 = arith.constant 0 : i32
    %c0_i32_0 = arith.constant 0 : i32
    %c0_i32_1 = arith.constant 0 : i32
    return %c0_i32, %c0_i32_0 : i32, i32
  }
  func.func @transform_3(%arg0: i32) -> (i32, i32) {
    %c0_i32 = arith.constant 0 : i32
    %c0_i32_0 = arith.constant 0 : i32
    return %arg0, %c0_i32 : i32, i32
  }
  func.func @transform_4(%arg0: i32) -> (i32, i32) {
    %c0_i32 = arith.constant 0 : i32
    %c0_i32_0 = arith.constant 0 : i32
    %c0_i32_1 = arith.constant 0 : i32
    return %c0_i32, %c0_i32_0 : i32, i32
  }
  func.func @transform_5(%arg0: i32) -> (i32, i32) {
    %c0_i32 = arith.constant 0 : i32
    %c0_i32_0 = arith.constant 0 : i32
    %c0_i32_1 = arith.constant 0 : i32
    return %c0_i32, %c0_i32_0 : i32, i32
  }
  func.func @transform_6(%arg0: i32) -> (i32, i32) {
    %c0_i32 = arith.constant 0 : i32
    %c0_i32_0 = arith.constant 0 : i32
    return %arg0, %c0_i32 : i32, i32
  }
}

module attributes {stable_mosaic.version = 11 : i64} {
  func.func @_msf_kernel(%arg0: i32, %arg1: memref<1x64x128xf32, #tpu.memory_space<vmem>>, %arg2: memref<1x128xf32, #tpu.memory_space<vmem>>, %arg3: memref<1x128xf32, #tpu.memory_space<vmem>>, %arg4: memref<1x64x128xbf16, #tpu.memory_space<vmem>>) attributes {dimension_semantics = [#tpu.dimension_semantics<parallel>], iteration_bounds = array<i64: 1>, scalar_prefetch = 0 : i64, scratch_operands = 0 : i64, tpu.core_type = #tpu.core_type<tc>, window_params = [{transform_indices = @transform_0, window_bounds = array<i64: 1, 64, 128>}, {pipeline_mode = #tpu.pipeline_mode<synchronous>, transform_indices = @transform_1, window_bounds = array<i64: 1, 128>}, {pipeline_mode = #tpu.pipeline_mode<synchronous>, transform_indices = @transform_2, window_bounds = array<i64: 1, 128>}, {transform_indices = @transform_3, window_bounds = array<i64: 1, 64, 128>}]} {
    %c0 = arith.constant 0 : index
    %c0_0 = arith.constant 0 : index
    %c0_1 = arith.constant 0 : index
    %0 = vector.load %arg1[%c0, %c0_0, %c0_1] : memref<1x64x128xf32, #tpu.memory_space<vmem>>, vector<1x64x128xf32>
    %1 = vector.shape_cast %0 : vector<1x64x128xf32> to vector<64x128xf32>
    %c0_2 = arith.constant 0 : index
    %c0_3 = arith.constant 0 : index
    %2 = vector.load %arg2[%c0_2, %c0_3] : memref<1x128xf32, #tpu.memory_space<vmem>>, vector<1x128xf32>
    %3 = vector.broadcast %2 : vector<1x128xf32> to vector<64x128xf32>
    %4 = arith.mulf %1, %3 : vector<64x128xf32>
    %c0_4 = arith.constant 0 : index
    %c0_5 = arith.constant 0 : index
    %5 = vector.load %arg3[%c0_4, %c0_5] : memref<1x128xf32, #tpu.memory_space<vmem>>, vector<1x128xf32>
    %6 = vector.broadcast %5 : vector<1x128xf32> to vector<64x128xf32>
    %7 = arith.addf %4, %6 : vector<64x128xf32>
    %cst = arith.constant 1.000000e+00 : f32
    %8 = vector.broadcast %cst : f32 to vector<64x128xf32>
    %9 = arith.subf %7, %8 : vector<64x128xf32>
    %cst_6 = arith.constant 1.000000e+00 : f32
    %10 = vector.broadcast %cst_6 : f32 to vector<64x128xf32>
    %11 = arith.addf %9, %10 : vector<64x128xf32>
    %12 = math.floor %11 : vector<64x128xf32>
    %cst_7 = arith.constant 0.000000e+00 : f32
    %cst_8 = arith.constant 8.000000e+00 : f32
    %13 = vector.broadcast %cst_7 : f32 to vector<64x128xf32>
    %14 = arith.maximumf %13, %12 : vector<64x128xf32>
    %15 = vector.broadcast %cst_8 : f32 to vector<64x128xf32>
    %16 = arith.minimumf %15, %14 : vector<64x128xf32>
    %17 = arith.truncf %16 : vector<64x128xf32> to vector<64x128xbf16>
    %c0_9 = arith.constant 0 : index
    %c0_10 = arith.constant 0 : index
    %c0_11 = arith.constant 0 : index
    %18 = vector.load %arg4[%c0_9, %c0_10, %c0_11] : memref<1x64x128xbf16, #tpu.memory_space<vmem>>, vector<1x64x128xbf16>
    %19 = vector.shape_cast %18 : vector<1x64x128xbf16> to vector<64x128xbf16>
    %20 = vector.shape_cast %17 : vector<64x128xbf16> to vector<1x64x128xbf16>
    tpu.vector_store %arg4[%c0_9, %c0_10, %c0_11], %20 {strides = array<i32>} : memref<1x64x128xbf16, #tpu.memory_space<vmem>>, vector<1x64x128xbf16>,
    return
  }
  func.func @transform_0(%arg0: i32) -> (i32, i32, i32) {
    %c0_i32 = arith.constant 0 : i32
    %c0_i32_0 = arith.constant 0 : i32
    %c0_i32_1 = arith.constant 0 : i32
    return %c0_i32, %arg0, %c0_i32_0 : i32, i32, i32
  }
  func.func @transform_1(%arg0: i32) -> (i32, i32) {
    %c0_i32 = arith.constant 0 : i32
    %c0_i32_0 = arith.constant 0 : i32
    %c0_i32_1 = arith.constant 0 : i32
    return %c0_i32, %c0_i32_0 : i32, i32
  }
  func.func @transform_2(%arg0: i32) -> (i32, i32) {
    %c0_i32 = arith.constant 0 : i32
    %c0_i32_0 = arith.constant 0 : i32
    %c0_i32_1 = arith.constant 0 : i32
    return %c0_i32, %c0_i32_0 : i32, i32
  }
  func.func @transform_3(%arg0: i32) -> (i32, i32, i32) {
    %c0_i32 = arith.constant 0 : i32
    %c0_i32_0 = arith.constant 0 : i32
    %c0_i32_1 = arith.constant 0 : i32
    return %c0_i32, %arg0, %c0_i32_0 : i32, i32, i32
  }
}

module attributes {stable_mosaic.version = 11 : i64} {
  func.func @_matmul_stats_kernel(%arg0: i32, %arg1: i32, %arg2: i32, %arg3: memref<64x128xbf16, #tpu.memory_space<vmem>>, %arg4: memref<128x128xbf16, #tpu.memory_space<vmem>>, %arg5: memref<64x128xf32, #tpu.memory_space<vmem>>, %arg6: memref<1x1x128xf32, #tpu.memory_space<vmem>>, %arg7: memref<1x1x128xf32, #tpu.memory_space<vmem>>, %arg8: memref<64x128xf32, #tpu.memory_space<vmem>>) attributes {dimension_semantics = [#tpu.dimension_semantics<parallel>, #tpu.dimension_semantics<parallel>, #tpu.dimension_semantics<arbitrary>], iteration_bounds = array<i64: 1, 1, 1>, scalar_prefetch = 0 : i64, scratch_operands = 1 : i64, tpu.core_type = #tpu.core_type<tc>, window_params = [{transform_indices = @transform_0, window_bounds = array<i64: 64, 128>}, {transform_indices = @transform_1, window_bounds = array<i64: 128, 128>}, {transform_indices = @transform_2, window_bounds = array<i64: 64, 128>}, {transform_indices = @transform_3, window_bounds = array<i64: 1, 1, 128>}, {transform_indices = @transform_4, window_bounds = array<i64: 1, 1, 128>}]} {
    %c0_i32 = arith.constant 0 : i32
    %0 = arith.cmpi eq, %arg2, %c0_i32 : i32
    %1 = arith.extui %0 : i1 to i32
    %c0_i32_0 = arith.constant 0 : i32
    %2 = arith.cmpi ne, %1, %c0_i32_0 : i32
    scf.if %2 {
      %cst_10 = arith.constant 0.000000e+00 : f32
      %12 = vector.broadcast %cst_10 : f32 to vector<64x128xf32>
      %c0_11 = arith.constant 0 : index
      %c0_12 = arith.constant 0 : index
      %13 = vector.load %arg8[%c0_11, %c0_12] : memref<64x128xf32, #tpu.memory_space<vmem>>, vector<64x128xf32>
      tpu.vector_store %arg8[%c0_11, %c0_12], %12 {strides = array<i32>} : memref<64x128xf32, #tpu.memory_space<vmem>>, vector<64x128xf32>,
    } else {
    }
    %c0 = arith.constant 0 : index
    %c0_1 = arith.constant 0 : index
    %3 = vector.load %arg8[%c0, %c0_1] : memref<64x128xf32, #tpu.memory_space<vmem>>, vector<64x128xf32>
    %c0_2 = arith.constant 0 : index
    %c0_3 = arith.constant 0 : index
    %4 = vector.load %arg3[%c0_2, %c0_3] : memref<64x128xbf16, #tpu.memory_space<vmem>>, vector<64x128xbf16>
    %c0_4 = arith.constant 0 : index
    %c0_5 = arith.constant 0 : index
    %5 = vector.load %arg4[%c0_4, %c0_5] : memref<128x128xbf16, #tpu.memory_space<vmem>>, vector<128x128xbf16>
    %cst = arith.constant dense<0.000000e+00> : vector<64x128xf32>
    %6 = tpu.matmul %4, %5, %cst {dimension_numbers = #tpu.dot_dimension_numbers<[1], [0], [0], [1], [0, 0, 1, 1], [], []>} : vector<64x128xbf16>, vector<128x128xbf16>, vector<64x128xf32> -> vector<64x128xf32>
    %7 = arith.addf %3, %6 : vector<64x128xf32>
    %c0_6 = arith.constant 0 : index
    %c0_7 = arith.constant 0 : index
    %8 = vector.load %arg8[%c0_6, %c0_7] : memref<64x128xf32, #tpu.memory_space<vmem>>, vector<64x128xf32>
    tpu.vector_store %arg8[%c0_6, %c0_7], %7 {strides = array<i32>} : memref<64x128xf32, #tpu.memory_space<vmem>>, vector<64x128xf32>,
    %c0_i32_8 = arith.constant 0 : i32
    %9 = arith.cmpi eq, %arg2, %c0_i32_8 : i32
    %10 = arith.extui %9 : i1 to i32
    %c0_i32_9 = arith.constant 0 : i32
    %11 = arith.cmpi ne, %10, %c0_i32_9 : i32
    scf.if %11 {
      %c0_10 = arith.constant 0 : index
      %c0_11 = arith.constant 0 : index
      %12 = vector.load %arg8[%c0_10, %c0_11] : memref<64x128xf32, #tpu.memory_space<vmem>>, vector<64x128xf32>
      %c0_12 = arith.constant 0 : index
      %c0_13 = arith.constant 0 : index
      %13 = vector.load %arg5[%c0_12, %c0_13] : memref<64x128xf32, #tpu.memory_space<vmem>>, vector<64x128xf32>
      tpu.vector_store %arg5[%c0_12, %c0_13], %12 {strides = array<i32>} : memref<64x128xf32, #tpu.memory_space<vmem>>, vector<64x128xf32>,
      %cst_14 = arith.constant dense<0.000000e+00> : vector<128xf32>
      %14 = vector.multi_reduction <add>, %12, %cst_14 [0] : vector<64x128xf32> to vector<128xf32>
      %15 = vector.shape_cast %14 : vector<128xf32> to vector<1x128xf32>
      %16 = vector.shape_cast %15 : vector<1x128xf32> to vector<1x1x128xf32>
      %c0_15 = arith.constant 0 : index
      %c0_16 = arith.constant 0 : index
      %c0_17 = arith.constant 0 : index
      %17 = vector.load %arg6[%c0_15, %c0_16, %c0_17] : memref<1x1x128xf32, #tpu.memory_space<vmem>>, vector<1x1x128xf32>
      tpu.vector_store %arg6[%c0_15, %c0_16, %c0_17], %16 {strides = array<i32>} : memref<1x1x128xf32, #tpu.memory_space<vmem>>, vector<1x1x128xf32>,
      %18 = arith.mulf %12, %12 : vector<64x128xf32>
      %cst_18 = arith.constant dense<0.000000e+00> : vector<128xf32>
      %19 = vector.multi_reduction <add>, %18, %cst_18 [0] : vector<64x128xf32> to vector<128xf32>
      %20 = vector.shape_cast %19 : vector<128xf32> to vector<1x128xf32>
      %21 = vector.shape_cast %20 : vector<1x128xf32> to vector<1x1x128xf32>
      %c0_19 = arith.constant 0 : index
      %c0_20 = arith.constant 0 : index
      %c0_21 = arith.constant 0 : index
      %22 = vector.load %arg7[%c0_19, %c0_20, %c0_21] : memref<1x1x128xf32, #tpu.memory_space<vmem>>, vector<1x1x128xf32>
      tpu.vector_store %arg7[%c0_19, %c0_20, %c0_21], %21 {strides = array<i32>} : memref<1x1x128xf32, #tpu.memory_space<vmem>>, vector<1x1x128xf32>,
    } else {
    }
    return
  }
  func.func @transform_0(%arg0: i32, %arg1: i32, %arg2: i32) -> (i32, i32) {
    %c0_i32 = arith.constant 0 : i32
    return %arg0, %arg2 : i32, i32
  }
  func.func @transform_1(%arg0: i32, %arg1: i32, %arg2: i32) -> (i32, i32) {
    %c0_i32 = arith.constant 0 : i32
    return %arg2, %arg1 : i32, i32
  }
  func.func @transform_2(%arg0: i32, %arg1: i32, %arg2: i32) -> (i32, i32) {
    %c0_i32 = arith.constant 0 : i32
    return %arg0, %arg1 : i32, i32
  }
  func.func @transform_3(%arg0: i32, %arg1: i32, %arg2: i32) -> (i32, i32, i32) {
    %c0_i32 = arith.constant 0 : i32
    %c0_i32_0 = arith.constant 0 : i32
    return %arg0, %c0_i32, %arg1 : i32, i32, i32
  }
  func.func @transform_4(%arg0: i32, %arg1: i32, %arg2: i32) -> (i32, i32, i32) {
    %c0_i32 = arith.constant 0 : i32
    %c0_i32_0 = arith.constant 0 : i32
    return %arg0, %c0_i32, %arg1 : i32, i32, i32
  }
}

module attributes {stable_mosaic.version = 11 : i64} {
  func.func @_msf_kernel(%arg0: i32, %arg1: memref<1x64x96xf32, #tpu.memory_space<vmem>>, %arg2: memref<1x96xf32, #tpu.memory_space<vmem>>, %arg3: memref<1x96xf32, #tpu.memory_space<vmem>>, %arg4: memref<1x64x96xbf16, #tpu.memory_space<vmem>>) attributes {dimension_semantics = [#tpu.dimension_semantics<parallel>], iteration_bounds = array<i64: 1>, scalar_prefetch = 0 : i64, scratch_operands = 0 : i64, tpu.core_type = #tpu.core_type<tc>, window_params = [{transform_indices = @transform_0, window_bounds = array<i64: 1, 64, 96>}, {pipeline_mode = #tpu.pipeline_mode<synchronous>, transform_indices = @transform_1, window_bounds = array<i64: 1, 96>}, {pipeline_mode = #tpu.pipeline_mode<synchronous>, transform_indices = @transform_2, window_bounds = array<i64: 1, 96>}, {transform_indices = @transform_3, window_bounds = array<i64: 1, 64, 96>}]} {
    %c0 = arith.constant 0 : index
    %c0_0 = arith.constant 0 : index
    %c0_1 = arith.constant 0 : index
    %0 = vector.load %arg1[%c0, %c0_0, %c0_1] : memref<1x64x96xf32, #tpu.memory_space<vmem>>, vector<1x64x96xf32>
    %1 = vector.shape_cast %0 : vector<1x64x96xf32> to vector<64x96xf32>
    %c0_2 = arith.constant 0 : index
    %c0_3 = arith.constant 0 : index
    %2 = vector.load %arg2[%c0_2, %c0_3] : memref<1x96xf32, #tpu.memory_space<vmem>>, vector<1x96xf32>
    %3 = vector.broadcast %2 : vector<1x96xf32> to vector<64x96xf32>
    %4 = arith.mulf %1, %3 : vector<64x96xf32>
    %c0_4 = arith.constant 0 : index
    %c0_5 = arith.constant 0 : index
    %5 = vector.load %arg3[%c0_4, %c0_5] : memref<1x96xf32, #tpu.memory_space<vmem>>, vector<1x96xf32>
    %6 = vector.broadcast %5 : vector<1x96xf32> to vector<64x96xf32>
    %7 = arith.addf %4, %6 : vector<64x96xf32>
    %cst = arith.constant 1.000000e+00 : f32
    %8 = vector.broadcast %cst : f32 to vector<64x96xf32>
    %9 = arith.subf %7, %8 : vector<64x96xf32>
    %cst_6 = arith.constant 1.000000e+00 : f32
    %10 = vector.broadcast %cst_6 : f32 to vector<64x96xf32>
    %11 = arith.addf %9, %10 : vector<64x96xf32>
    %12 = math.floor %11 : vector<64x96xf32>
    %cst_7 = arith.constant 0.000000e+00 : f32
    %cst_8 = arith.constant 8.000000e+00 : f32
    %13 = vector.broadcast %cst_7 : f32 to vector<64x96xf32>
    %14 = arith.maximumf %13, %12 : vector<64x96xf32>
    %15 = vector.broadcast %cst_8 : f32 to vector<64x96xf32>
    %16 = arith.minimumf %15, %14 : vector<64x96xf32>
    %17 = arith.truncf %16 : vector<64x96xf32> to vector<64x96xbf16>
    %c0_9 = arith.constant 0 : index
    %c0_10 = arith.constant 0 : index
    %c0_11 = arith.constant 0 : index
    %18 = vector.load %arg4[%c0_9, %c0_10, %c0_11] : memref<1x64x96xbf16, #tpu.memory_space<vmem>>, vector<1x64x96xbf16>
    %19 = vector.shape_cast %18 : vector<1x64x96xbf16> to vector<64x96xbf16>
    %20 = vector.shape_cast %17 : vector<64x96xbf16> to vector<1x64x96xbf16>
    tpu.vector_store %arg4[%c0_9, %c0_10, %c0_11], %20 {strides = array<i32>} : memref<1x64x96xbf16, #tpu.memory_space<vmem>>, vector<1x64x96xbf16>,
    return
  }
  func.func @transform_0(%arg0: i32) -> (i32, i32, i32) {
    %c0_i32 = arith.constant 0 : i32
    %c0_i32_0 = arith.constant 0 : i32
    %c0_i32_1 = arith.constant 0 : i32
    return %c0_i32, %arg0, %c0_i32_0 : i32, i32, i32
  }
  func.func @transform_1(%arg0: i32) -> (i32, i32) {
    %c0_i32 = arith.constant 0 : i32
    %c0_i32_0 = arith.constant 0 : i32
    %c0_i32_1 = arith.constant 0 : i32
    return %c0_i32, %c0_i32_0 : i32, i32
  }
  func.func @transform_2(%arg0: i32) -> (i32, i32) {
    %c0_i32 = arith.constant 0 : i32
    %c0_i32_0 = arith.constant 0 : i32
    %c0_i32_1 = arith.constant 0 : i32
    return %c0_i32, %c0_i32_0 : i32, i32
  }
  func.func @transform_3(%arg0: i32) -> (i32, i32, i32) {
    %c0_i32 = arith.constant 0 : i32
    %c0_i32_0 = arith.constant 0 : i32
    %c0_i32_1 = arith.constant 0 : i32
    return %c0_i32, %arg0, %c0_i32_0 : i32, i32, i32
  }
}

module attributes {stable_mosaic.version = 11 : i64} {
  func.func @_affine_kernel(%arg0: i32, %arg1: memref<64x32xf32, #tpu.memory_space<vmem>>, %arg2: memref<1x32xf32, #tpu.memory_space<vmem>>, %arg3: memref<1x32xf32, #tpu.memory_space<vmem>>, %arg4: memref<64x32xf32, #tpu.memory_space<vmem>>) attributes {dimension_semantics = [#tpu.dimension_semantics<parallel>], iteration_bounds = array<i64: 1>, scalar_prefetch = 0 : i64, scratch_operands = 0 : i64, tpu.core_type = #tpu.core_type<tc>, window_params = [{transform_indices = @transform_0, window_bounds = array<i64: 64, 32>}, {pipeline_mode = #tpu.pipeline_mode<synchronous>, transform_indices = @transform_1, window_bounds = array<i64: 1, 32>}, {pipeline_mode = #tpu.pipeline_mode<synchronous>, transform_indices = @transform_2, window_bounds = array<i64: 1, 32>}, {transform_indices = @transform_3, window_bounds = array<i64: 64, 32>}]} {
    %c0 = arith.constant 0 : index
    %c0_0 = arith.constant 0 : index
    %0 = vector.load %arg1[%c0, %c0_0] : memref<64x32xf32, #tpu.memory_space<vmem>>, vector<64x32xf32>
    %c0_1 = arith.constant 0 : index
    %c0_2 = arith.constant 0 : index
    %1 = vector.load %arg2[%c0_1, %c0_2] : memref<1x32xf32, #tpu.memory_space<vmem>>, vector<1x32xf32>
    %2 = vector.broadcast %1 : vector<1x32xf32> to vector<64x32xf32>
    %3 = arith.mulf %0, %2 : vector<64x32xf32>
    %c0_3 = arith.constant 0 : index
    %c0_4 = arith.constant 0 : index
    %4 = vector.load %arg3[%c0_3, %c0_4] : memref<1x32xf32, #tpu.memory_space<vmem>>, vector<1x32xf32>
    %5 = vector.broadcast %4 : vector<1x32xf32> to vector<64x32xf32>
    %6 = arith.addf %3, %5 : vector<64x32xf32>
    %c0_5 = arith.constant 0 : index
    %c0_6 = arith.constant 0 : index
    %7 = vector.load %arg4[%c0_5, %c0_6] : memref<64x32xf32, #tpu.memory_space<vmem>>, vector<64x32xf32>
    tpu.vector_store %arg4[%c0_5, %c0_6], %6 {strides = array<i32>} : memref<64x32xf32, #tpu.memory_space<vmem>>, vector<64x32xf32>,
    return
  }
  func.func @transform_0(%arg0: i32) -> (i32, i32) {
    %c0_i32 = arith.constant 0 : i32
    %c0_i32_0 = arith.constant 0 : i32
    return %arg0, %c0_i32 : i32, i32
  }
  func.func @transform_1(%arg0: i32) -> (i32, i32) {
    %c0_i32 = arith.constant 0 : i32
    %c0_i32_0 = arith.constant 0 : i32
    %c0_i32_1 = arith.constant 0 : i32
    return %c0_i32, %c0_i32_0 : i32, i32
  }
  func.func @transform_2(%arg0: i32) -> (i32, i32) {
    %c0_i32 = arith.constant 0 : i32
    %c0_i32_0 = arith.constant 0 : i32
    %c0_i32_1 = arith.constant 0 : i32
    return %c0_i32, %c0_i32_0 : i32, i32
  }
  func.func @transform_3(%arg0: i32) -> (i32, i32) {
    %c0_i32 = arith.constant 0 : i32
    %c0_i32_0 = arith.constant 0 : i32
    return %arg0, %c0_i32 : i32, i32
  }
}

module attributes {stable_mosaic.version = 11 : i64} {
  func.func @_matmul_stats_kernel(%arg0: i32, %arg1: i32, %arg2: i32, %arg3: memref<16x128xbf16, #tpu.memory_space<vmem>>, %arg4: memref<128x32xbf16, #tpu.memory_space<vmem>>, %arg5: memref<16x32xf32, #tpu.memory_space<vmem>>, %arg6: memref<1x1x32xf32, #tpu.memory_space<vmem>>, %arg7: memref<1x1x32xf32, #tpu.memory_space<vmem>>, %arg8: memref<16x32xf32, #tpu.memory_space<vmem>>) attributes {dimension_semantics = [#tpu.dimension_semantics<parallel>, #tpu.dimension_semantics<parallel>, #tpu.dimension_semantics<arbitrary>], iteration_bounds = array<i64: 1, 1, 3>, scalar_prefetch = 0 : i64, scratch_operands = 1 : i64, tpu.core_type = #tpu.core_type<tc>, window_params = [{transform_indices = @transform_0, window_bounds = array<i64: 16, 128>}, {transform_indices = @transform_1, window_bounds = array<i64: 128, 32>}, {transform_indices = @transform_2, window_bounds = array<i64: 16, 32>}, {transform_indices = @transform_3, window_bounds = array<i64: 1, 1, 32>}, {transform_indices = @transform_4, window_bounds = array<i64: 1, 1, 32>}]} {
    %c0_i32 = arith.constant 0 : i32
    %0 = arith.cmpi eq, %arg2, %c0_i32 : i32
    %1 = arith.extui %0 : i1 to i32
    %c0_i32_0 = arith.constant 0 : i32
    %2 = arith.cmpi ne, %1, %c0_i32_0 : i32
    scf.if %2 {
      %cst_9 = arith.constant 0.000000e+00 : f32
      %12 = vector.broadcast %cst_9 : f32 to vector<16x32xf32>
      %c0_10 = arith.constant 0 : index
      %c0_11 = arith.constant 0 : index
      %13 = vector.load %arg8[%c0_10, %c0_11] : memref<16x32xf32, #tpu.memory_space<vmem>>, vector<16x32xf32>
      tpu.vector_store %arg8[%c0_10, %c0_11], %12 {strides = array<i32>} : memref<16x32xf32, #tpu.memory_space<vmem>>, vector<16x32xf32>,
    } else {
    }
    %c0 = arith.constant 0 : index
    %c0_1 = arith.constant 0 : index
    %3 = vector.load %arg8[%c0, %c0_1] : memref<16x32xf32, #tpu.memory_space<vmem>>, vector<16x32xf32>
    %c0_2 = arith.constant 0 : index
    %c0_3 = arith.constant 0 : index
    %4 = vector.load %arg3[%c0_2, %c0_3] : memref<16x128xbf16, #tpu.memory_space<vmem>>, vector<16x128xbf16>
    %c0_4 = arith.constant 0 : index
    %c0_5 = arith.constant 0 : index
    %5 = vector.load %arg4[%c0_4, %c0_5] : memref<128x32xbf16, #tpu.memory_space<vmem>>, vector<128x32xbf16>
    %cst = arith.constant dense<0.000000e+00> : vector<16x32xf32>
    %6 = tpu.matmul %4, %5, %cst {dimension_numbers = #tpu.dot_dimension_numbers<[1], [0], [0], [1], [0, 0, 1, 1], [], []>} : vector<16x128xbf16>, vector<128x32xbf16>, vector<16x32xf32> -> vector<16x32xf32>
    %7 = arith.addf %3, %6 : vector<16x32xf32>
    %c0_6 = arith.constant 0 : index
    %c0_7 = arith.constant 0 : index
    %8 = vector.load %arg8[%c0_6, %c0_7] : memref<16x32xf32, #tpu.memory_space<vmem>>, vector<16x32xf32>
    tpu.vector_store %arg8[%c0_6, %c0_7], %7 {strides = array<i32>} : memref<16x32xf32, #tpu.memory_space<vmem>>, vector<16x32xf32>,
    %c2_i32 = arith.constant 2 : i32
    %9 = arith.cmpi eq, %arg2, %c2_i32 : i32
    %10 = arith.extui %9 : i1 to i32
    %c0_i32_8 = arith.constant 0 : i32
    %11 = arith.cmpi ne, %10, %c0_i32_8 : i32
    scf.if %11 {
      %c0_9 = arith.constant 0 : index
      %c0_10 = arith.constant 0 : index
      %12 = vector.load %arg8[%c0_9, %c0_10] : memref<16x32xf32, #tpu.memory_space<vmem>>, vector<16x32xf32>
      %c0_11 = arith.constant 0 : index
      %c0_12 = arith.constant 0 : index
      %13 = vector.load %arg5[%c0_11, %c0_12] : memref<16x32xf32, #tpu.memory_space<vmem>>, vector<16x32xf32>
      tpu.vector_store %arg5[%c0_11, %c0_12], %12 {strides = array<i32>} : memref<16x32xf32, #tpu.memory_space<vmem>>, vector<16x32xf32>,
      %cst_13 = arith.constant dense<0.000000e+00> : vector<32xf32>
      %14 = vector.multi_reduction <add>, %12, %cst_13 [0] : vector<16x32xf32> to vector<32xf32>
      %15 = vector.shape_cast %14 : vector<32xf32> to vector<1x32xf32>
      %16 = vector.shape_cast %15 : vector<1x32xf32> to vector<1x1x32xf32>
      %c0_14 = arith.constant 0 : index
      %c0_15 = arith.constant 0 : index
      %c0_16 = arith.constant 0 : index
      %17 = vector.load %arg6[%c0_14, %c0_15, %c0_16] : memref<1x1x32xf32, #tpu.memory_space<vmem>>, vector<1x1x32xf32>
      tpu.vector_store %arg6[%c0_14, %c0_15, %c0_16], %16 {strides = array<i32>} : memref<1x1x32xf32, #tpu.memory_space<vmem>>, vector<1x1x32xf32>,
      %18 = arith.mulf %12, %12 : vector<16x32xf32>
      %cst_17 = arith.constant dense<0.000000e+00> : vector<32xf32>
      %19 = vector.multi_reduction <add>, %18, %cst_17 [0] : vector<16x32xf32> to vector<32xf32>
      %20 = vector.shape_cast %19 : vector<32xf32> to vector<1x32xf32>
      %21 = vector.shape_cast %20 : vector<1x32xf32> to vector<1x1x32xf32>
      %c0_18 = arith.constant 0 : index
      %c0_19 = arith.constant 0 : index
      %c0_20 = arith.constant 0 : index
      %22 = vector.load %arg7[%c0_18, %c0_19, %c0_20] : memref<1x1x32xf32, #tpu.memory_space<vmem>>, vector<1x1x32xf32>
      tpu.vector_store %arg7[%c0_18, %c0_19, %c0_20], %21 {strides = array<i32>} : memref<1x1x32xf32, #tpu.memory_space<vmem>>, vector<1x1x32xf32>,
    } else {
    }
    return
  }
  func.func @transform_0(%arg0: i32, %arg1: i32, %arg2: i32) -> (i32, i32) {
    %c0_i32 = arith.constant 0 : i32
    return %arg0, %arg2 : i32, i32
  }
  func.func @transform_1(%arg0: i32, %arg1: i32, %arg2: i32) -> (i32, i32) {
    %c0_i32 = arith.constant 0 : i32
    return %arg2, %arg1 : i32, i32
  }
  func.func @transform_2(%arg0: i32, %arg1: i32, %arg2: i32) -> (i32, i32) {
    %c0_i32 = arith.constant 0 : i32
    return %arg0, %arg1 : i32, i32
  }
  func.func @transform_3(%arg0: i32, %arg1: i32, %arg2: i32) -> (i32, i32, i32) {
    %c0_i32 = arith.constant 0 : i32
    %c0_i32_0 = arith.constant 0 : i32
    return %arg0, %c0_i32, %arg1 : i32, i32, i32
  }
  func.func @transform_4(%arg0: i32, %arg1: i32, %arg2: i32) -> (i32, i32, i32) {
    %c0_i32 = arith.constant 0 : i32
    %c0_i32_0 = arith.constant 0 : i32
    return %arg0, %c0_i32, %arg1 : i32, i32, i32
  }
}

module attributes {stable_mosaic.version = 11 : i64} {
  func.func @_msf_kernel(%arg0: i32, %arg1: memref<1x16x128xf32, #tpu.memory_space<vmem>>, %arg2: memref<1x128xf32, #tpu.memory_space<vmem>>, %arg3: memref<1x128xf32, #tpu.memory_space<vmem>>, %arg4: memref<1x16x128xbf16, #tpu.memory_space<vmem>>) attributes {dimension_semantics = [#tpu.dimension_semantics<parallel>], iteration_bounds = array<i64: 1>, scalar_prefetch = 0 : i64, scratch_operands = 0 : i64, tpu.core_type = #tpu.core_type<tc>, window_params = [{transform_indices = @transform_0, window_bounds = array<i64: 1, 16, 128>}, {pipeline_mode = #tpu.pipeline_mode<synchronous>, transform_indices = @transform_1, window_bounds = array<i64: 1, 128>}, {pipeline_mode = #tpu.pipeline_mode<synchronous>, transform_indices = @transform_2, window_bounds = array<i64: 1, 128>}, {transform_indices = @transform_3, window_bounds = array<i64: 1, 16, 128>}]} {
    %c0 = arith.constant 0 : index
    %c0_0 = arith.constant 0 : index
    %c0_1 = arith.constant 0 : index
    %0 = vector.load %arg1[%c0, %c0_0, %c0_1] : memref<1x16x128xf32, #tpu.memory_space<vmem>>, vector<1x16x128xf32>
    %1 = vector.shape_cast %0 : vector<1x16x128xf32> to vector<16x128xf32>
    %c0_2 = arith.constant 0 : index
    %c0_3 = arith.constant 0 : index
    %2 = vector.load %arg2[%c0_2, %c0_3] : memref<1x128xf32, #tpu.memory_space<vmem>>, vector<1x128xf32>
    %3 = vector.broadcast %2 : vector<1x128xf32> to vector<16x128xf32>
    %4 = arith.mulf %1, %3 : vector<16x128xf32>
    %c0_4 = arith.constant 0 : index
    %c0_5 = arith.constant 0 : index
    %5 = vector.load %arg3[%c0_4, %c0_5] : memref<1x128xf32, #tpu.memory_space<vmem>>, vector<1x128xf32>
    %6 = vector.broadcast %5 : vector<1x128xf32> to vector<16x128xf32>
    %7 = arith.addf %4, %6 : vector<16x128xf32>
    %cst = arith.constant 1.000000e+00 : f32
    %8 = vector.broadcast %cst : f32 to vector<16x128xf32>
    %9 = arith.subf %7, %8 : vector<16x128xf32>
    %cst_6 = arith.constant 1.000000e+00 : f32
    %10 = vector.broadcast %cst_6 : f32 to vector<16x128xf32>
    %11 = arith.addf %9, %10 : vector<16x128xf32>
    %12 = math.floor %11 : vector<16x128xf32>
    %cst_7 = arith.constant 0.000000e+00 : f32
    %cst_8 = arith.constant 8.000000e+00 : f32
    %13 = vector.broadcast %cst_7 : f32 to vector<16x128xf32>
    %14 = arith.maximumf %13, %12 : vector<16x128xf32>
    %15 = vector.broadcast %cst_8 : f32 to vector<16x128xf32>
    %16 = arith.minimumf %15, %14 : vector<16x128xf32>
    %17 = arith.truncf %16 : vector<16x128xf32> to vector<16x128xbf16>
    %c0_9 = arith.constant 0 : index
    %c0_10 = arith.constant 0 : index
    %c0_11 = arith.constant 0 : index
    %18 = vector.load %arg4[%c0_9, %c0_10, %c0_11] : memref<1x16x128xbf16, #tpu.memory_space<vmem>>, vector<1x16x128xbf16>
    %19 = vector.shape_cast %18 : vector<1x16x128xbf16> to vector<16x128xbf16>
    %20 = vector.shape_cast %17 : vector<16x128xbf16> to vector<1x16x128xbf16>
    tpu.vector_store %arg4[%c0_9, %c0_10, %c0_11], %20 {strides = array<i32>} : memref<1x16x128xbf16, #tpu.memory_space<vmem>>, vector<1x16x128xbf16>,
    return
  }
  func.func @transform_0(%arg0: i32) -> (i32, i32, i32) {
    %c0_i32 = arith.constant 0 : i32
    %c0_i32_0 = arith.constant 0 : i32
    %c0_i32_1 = arith.constant 0 : i32
    return %c0_i32, %arg0, %c0_i32_0 : i32, i32, i32
  }
  func.func @transform_1(%arg0: i32) -> (i32, i32) {
    %c0_i32 = arith.constant 0 : i32
    %c0_i32_0 = arith.constant 0 : i32
    %c0_i32_1 = arith.constant 0 : i32
    return %c0_i32, %c0_i32_0 : i32, i32
  }
  func.func @transform_2(%arg0: i32) -> (i32, i32) {
    %c0_i32 = arith.constant 0 : i32
    %c0_i32_0 = arith.constant 0 : i32
    %c0_i32_1 = arith.constant 0 : i32
    return %c0_i32, %c0_i32_0 : i32, i32
  }
  func.func @transform_3(%arg0: i32) -> (i32, i32, i32) {
    %c0_i32 = arith.constant 0 : i32
    %c0_i32_0 = arith.constant 0 : i32
    %c0_i32_1 = arith.constant 0 : i32
    return %c0_i32, %arg0, %c0_i32_0 : i32, i32, i32
  }
}

module attributes {stable_mosaic.version = 11 : i64} {
  func.func @_residual_kernel(%arg0: i32, %arg1: memref<16x256xf32, #tpu.memory_space<vmem>>, %arg2: memref<1x256xf32, #tpu.memory_space<vmem>>, %arg3: memref<1x256xf32, #tpu.memory_space<vmem>>, %arg4: memref<16x256xf32, #tpu.memory_space<vmem>>, %arg5: memref<1x256xf32, #tpu.memory_space<vmem>>, %arg6: memref<1x256xf32, #tpu.memory_space<vmem>>, %arg7: memref<16x256xf32, #tpu.memory_space<vmem>>) attributes {dimension_semantics = [#tpu.dimension_semantics<parallel>], iteration_bounds = array<i64: 1>, scalar_prefetch = 0 : i64, scratch_operands = 0 : i64, tpu.core_type = #tpu.core_type<tc>, window_params = [{transform_indices = @transform_0, window_bounds = array<i64: 16, 256>}, {pipeline_mode = #tpu.pipeline_mode<synchronous>, transform_indices = @transform_1, window_bounds = array<i64: 1, 256>}, {pipeline_mode = #tpu.pipeline_mode<synchronous>, transform_indices = @transform_2, window_bounds = array<i64: 1, 256>}, {transform_indices = @transform_3, window_bounds = array<i64: 16, 256>}, {pipeline_mode = #tpu.pipeline_mode<synchronous>, transform_indices = @transform_4, window_bounds = array<i64: 1, 256>}, {pipeline_mode = #tpu.pipeline_mode<synchronous>, transform_indices = @transform_5, window_bounds = array<i64: 1, 256>}, {transform_indices = @transform_6, window_bounds = array<i64: 16, 256>}]} {
    %c0 = arith.constant 0 : index
    %c0_0 = arith.constant 0 : index
    %0 = vector.load %arg1[%c0, %c0_0] : memref<16x256xf32, #tpu.memory_space<vmem>>, vector<16x256xf32>
    %c0_1 = arith.constant 0 : index
    %c0_2 = arith.constant 0 : index
    %1 = vector.load %arg2[%c0_1, %c0_2] : memref<1x256xf32, #tpu.memory_space<vmem>>, vector<1x256xf32>
    %2 = vector.broadcast %1 : vector<1x256xf32> to vector<16x256xf32>
    %3 = arith.mulf %0, %2 : vector<16x256xf32>
    %c0_3 = arith.constant 0 : index
    %c0_4 = arith.constant 0 : index
    %4 = vector.load %arg3[%c0_3, %c0_4] : memref<1x256xf32, #tpu.memory_space<vmem>>, vector<1x256xf32>
    %5 = vector.broadcast %4 : vector<1x256xf32> to vector<16x256xf32>
    %6 = arith.addf %3, %5 : vector<16x256xf32>
    %c0_5 = arith.constant 0 : index
    %c0_6 = arith.constant 0 : index
    %7 = vector.load %arg4[%c0_5, %c0_6] : memref<16x256xf32, #tpu.memory_space<vmem>>, vector<16x256xf32>
    %c0_7 = arith.constant 0 : index
    %c0_8 = arith.constant 0 : index
    %8 = vector.load %arg5[%c0_7, %c0_8] : memref<1x256xf32, #tpu.memory_space<vmem>>, vector<1x256xf32>
    %9 = vector.broadcast %8 : vector<1x256xf32> to vector<16x256xf32>
    %10 = arith.mulf %7, %9 : vector<16x256xf32>
    %11 = arith.addf %6, %10 : vector<16x256xf32>
    %c0_9 = arith.constant 0 : index
    %c0_10 = arith.constant 0 : index
    %12 = vector.load %arg6[%c0_9, %c0_10] : memref<1x256xf32, #tpu.memory_space<vmem>>, vector<1x256xf32>
    %13 = vector.broadcast %12 : vector<1x256xf32> to vector<16x256xf32>
    %14 = arith.addf %11, %13 : vector<16x256xf32>
    %c0_11 = arith.constant 0 : index
    %c0_12 = arith.constant 0 : index
    %15 = vector.load %arg7[%c0_11, %c0_12] : memref<16x256xf32, #tpu.memory_space<vmem>>, vector<16x256xf32>
    tpu.vector_store %arg7[%c0_11, %c0_12], %14 {strides = array<i32>} : memref<16x256xf32, #tpu.memory_space<vmem>>, vector<16x256xf32>,
    return
  }
  func.func @transform_0(%arg0: i32) -> (i32, i32) {
    %c0_i32 = arith.constant 0 : i32
    %c0_i32_0 = arith.constant 0 : i32
    return %arg0, %c0_i32 : i32, i32
  }
  func.func @transform_1(%arg0: i32) -> (i32, i32) {
    %c0_i32 = arith.constant 0 : i32
    %c0_i32_0 = arith.constant 0 : i32
    %c0_i32_1 = arith.constant 0 : i32
    return %c0_i32, %c0_i32_0 : i32, i32
  }
  func.func @transform_2(%arg0: i32) -> (i32, i32) {
    %c0_i32 = arith.constant 0 : i32
    %c0_i32_0 = arith.constant 0 : i32
    %c0_i32_1 = arith.constant 0 : i32
    return %c0_i32, %c0_i32_0 : i32, i32
  }
  func.func @transform_3(%arg0: i32) -> (i32, i32) {
    %c0_i32 = arith.constant 0 : i32
    %c0_i32_0 = arith.constant 0 : i32
    return %arg0, %c0_i32 : i32, i32
  }
  func.func @transform_4(%arg0: i32) -> (i32, i32) {
    %c0_i32 = arith.constant 0 : i32
    %c0_i32_0 = arith.constant 0 : i32
    %c0_i32_1 = arith.constant 0 : i32
    return %c0_i32, %c0_i32_0 : i32, i32
  }
  func.func @transform_5(%arg0: i32) -> (i32, i32) {
    %c0_i32 = arith.constant 0 : i32
    %c0_i32_0 = arith.constant 0 : i32
    %c0_i32_1 = arith.constant 0 : i32
    return %c0_i32, %c0_i32_0 : i32, i32
  }
  func.func @transform_6(%arg0: i32) -> (i32, i32) {
    %c0_i32 = arith.constant 0 : i32
    %c0_i32_0 = arith.constant 0 : i32
    return %arg0, %c0_i32 : i32, i32
  }
}

module attributes {stable_mosaic.version = 11 : i64} {
  func.func @_msf_kernel(%arg0: i32, %arg1: memref<1x16x256xf32, #tpu.memory_space<vmem>>, %arg2: memref<1x256xf32, #tpu.memory_space<vmem>>, %arg3: memref<1x256xf32, #tpu.memory_space<vmem>>, %arg4: memref<1x16x256xbf16, #tpu.memory_space<vmem>>) attributes {dimension_semantics = [#tpu.dimension_semantics<parallel>], iteration_bounds = array<i64: 1>, scalar_prefetch = 0 : i64, scratch_operands = 0 : i64, tpu.core_type = #tpu.core_type<tc>, window_params = [{transform_indices = @transform_0, window_bounds = array<i64: 1, 16, 256>}, {pipeline_mode = #tpu.pipeline_mode<synchronous>, transform_indices = @transform_1, window_bounds = array<i64: 1, 256>}, {pipeline_mode = #tpu.pipeline_mode<synchronous>, transform_indices = @transform_2, window_bounds = array<i64: 1, 256>}, {transform_indices = @transform_3, window_bounds = array<i64: 1, 16, 256>}]} {
    %c0 = arith.constant 0 : index
    %c0_0 = arith.constant 0 : index
    %c0_1 = arith.constant 0 : index
    %0 = vector.load %arg1[%c0, %c0_0, %c0_1] : memref<1x16x256xf32, #tpu.memory_space<vmem>>, vector<1x16x256xf32>
    %1 = vector.shape_cast %0 : vector<1x16x256xf32> to vector<16x256xf32>
    %c0_2 = arith.constant 0 : index
    %c0_3 = arith.constant 0 : index
    %2 = vector.load %arg2[%c0_2, %c0_3] : memref<1x256xf32, #tpu.memory_space<vmem>>, vector<1x256xf32>
    %3 = vector.broadcast %2 : vector<1x256xf32> to vector<16x256xf32>
    %4 = arith.mulf %1, %3 : vector<16x256xf32>
    %c0_4 = arith.constant 0 : index
    %c0_5 = arith.constant 0 : index
    %5 = vector.load %arg3[%c0_4, %c0_5] : memref<1x256xf32, #tpu.memory_space<vmem>>, vector<1x256xf32>
    %6 = vector.broadcast %5 : vector<1x256xf32> to vector<16x256xf32>
    %7 = arith.addf %4, %6 : vector<16x256xf32>
    %cst = arith.constant 1.000000e+00 : f32
    %8 = vector.broadcast %cst : f32 to vector<16x256xf32>
    %9 = arith.subf %7, %8 : vector<16x256xf32>
    %cst_6 = arith.constant 1.000000e+00 : f32
    %10 = vector.broadcast %cst_6 : f32 to vector<16x256xf32>
    %11 = arith.addf %9, %10 : vector<16x256xf32>
    %12 = math.floor %11 : vector<16x256xf32>
    %cst_7 = arith.constant 0.000000e+00 : f32
    %cst_8 = arith.constant 8.000000e+00 : f32
    %13 = vector.broadcast %cst_7 : f32 to vector<16x256xf32>
    %14 = arith.maximumf %13, %12 : vector<16x256xf32>
    %15 = vector.broadcast %cst_8 : f32 to vector<16x256xf32>
    %16 = arith.minimumf %15, %14 : vector<16x256xf32>
    %17 = arith.truncf %16 : vector<16x256xf32> to vector<16x256xbf16>
    %c0_9 = arith.constant 0 : index
    %c0_10 = arith.constant 0 : index
    %c0_11 = arith.constant 0 : index
    %18 = vector.load %arg4[%c0_9, %c0_10, %c0_11] : memref<1x16x256xbf16, #tpu.memory_space<vmem>>, vector<1x16x256xbf16>
    %19 = vector.shape_cast %18 : vector<1x16x256xbf16> to vector<16x256xbf16>
    %20 = vector.shape_cast %17 : vector<16x256xbf16> to vector<1x16x256xbf16>
    tpu.vector_store %arg4[%c0_9, %c0_10, %c0_11], %20 {strides = array<i32>} : memref<1x16x256xbf16, #tpu.memory_space<vmem>>, vector<1x16x256xbf16>,
    return
  }
  func.func @transform_0(%arg0: i32) -> (i32, i32, i32) {
    %c0_i32 = arith.constant 0 : i32
    %c0_i32_0 = arith.constant 0 : i32
    %c0_i32_1 = arith.constant 0 : i32
    return %c0_i32, %arg0, %c0_i32_0 : i32, i32, i32
  }
  func.func @transform_1(%arg0: i32) -> (i32, i32) {
    %c0_i32 = arith.constant 0 : i32
    %c0_i32_0 = arith.constant 0 : i32
    %c0_i32_1 = arith.constant 0 : i32
    return %c0_i32, %c0_i32_0 : i32, i32
  }
  func.func @transform_2(%arg0: i32) -> (i32, i32) {
    %c0_i32 = arith.constant 0 : i32
    %c0_i32_0 = arith.constant 0 : i32
    %c0_i32_1 = arith.constant 0 : i32
    return %c0_i32, %c0_i32_0 : i32, i32
  }
  func.func @transform_3(%arg0: i32) -> (i32, i32, i32) {
    %c0_i32 = arith.constant 0 : i32
    %c0_i32_0 = arith.constant 0 : i32
    %c0_i32_1 = arith.constant 0 : i32
    return %c0_i32, %arg0, %c0_i32_0 : i32, i32, i32
  }
}

module attributes {stable_mosaic.version = 11 : i64} {
  func.func @_matmul_stats_kernel(%arg0: i32, %arg1: i32, %arg2: i32, %arg3: memref<16x256xbf16, #tpu.memory_space<vmem>>, %arg4: memref<256x128xbf16, #tpu.memory_space<vmem>>, %arg5: memref<16x128xf32, #tpu.memory_space<vmem>>, %arg6: memref<1x1x128xf32, #tpu.memory_space<vmem>>, %arg7: memref<1x1x128xf32, #tpu.memory_space<vmem>>, %arg8: memref<16x128xf32, #tpu.memory_space<vmem>>) attributes {dimension_semantics = [#tpu.dimension_semantics<parallel>, #tpu.dimension_semantics<parallel>, #tpu.dimension_semantics<arbitrary>], iteration_bounds = array<i64: 1, 1, 1>, scalar_prefetch = 0 : i64, scratch_operands = 1 : i64, tpu.core_type = #tpu.core_type<tc>, window_params = [{transform_indices = @transform_0, window_bounds = array<i64: 16, 256>}, {transform_indices = @transform_1, window_bounds = array<i64: 256, 128>}, {transform_indices = @transform_2, window_bounds = array<i64: 16, 128>}, {transform_indices = @transform_3, window_bounds = array<i64: 1, 1, 128>}, {transform_indices = @transform_4, window_bounds = array<i64: 1, 1, 128>}]} {
    %c0_i32 = arith.constant 0 : i32
    %0 = arith.cmpi eq, %arg2, %c0_i32 : i32
    %1 = arith.extui %0 : i1 to i32
    %c0_i32_0 = arith.constant 0 : i32
    %2 = arith.cmpi ne, %1, %c0_i32_0 : i32
    scf.if %2 {
      %cst_10 = arith.constant 0.000000e+00 : f32
      %12 = vector.broadcast %cst_10 : f32 to vector<16x128xf32>
      %c0_11 = arith.constant 0 : index
      %c0_12 = arith.constant 0 : index
      %13 = vector.load %arg8[%c0_11, %c0_12] : memref<16x128xf32, #tpu.memory_space<vmem>>, vector<16x128xf32>
      tpu.vector_store %arg8[%c0_11, %c0_12], %12 {strides = array<i32>} : memref<16x128xf32, #tpu.memory_space<vmem>>, vector<16x128xf32>,
    } else {
    }
    %c0 = arith.constant 0 : index
    %c0_1 = arith.constant 0 : index
    %3 = vector.load %arg8[%c0, %c0_1] : memref<16x128xf32, #tpu.memory_space<vmem>>, vector<16x128xf32>
    %c0_2 = arith.constant 0 : index
    %c0_3 = arith.constant 0 : index
    %4 = vector.load %arg3[%c0_2, %c0_3] : memref<16x256xbf16, #tpu.memory_space<vmem>>, vector<16x256xbf16>
    %c0_4 = arith.constant 0 : index
    %c0_5 = arith.constant 0 : index
    %5 = vector.load %arg4[%c0_4, %c0_5] : memref<256x128xbf16, #tpu.memory_space<vmem>>, vector<256x128xbf16>
    %cst = arith.constant dense<0.000000e+00> : vector<16x128xf32>
    %6 = tpu.matmul %4, %5, %cst {dimension_numbers = #tpu.dot_dimension_numbers<[1], [0], [0], [1], [0, 0, 1, 1], [], []>} : vector<16x256xbf16>, vector<256x128xbf16>, vector<16x128xf32> -> vector<16x128xf32>
    %7 = arith.addf %3, %6 : vector<16x128xf32>
    %c0_6 = arith.constant 0 : index
    %c0_7 = arith.constant 0 : index
    %8 = vector.load %arg8[%c0_6, %c0_7] : memref<16x128xf32, #tpu.memory_space<vmem>>, vector<16x128xf32>
    tpu.vector_store %arg8[%c0_6, %c0_7], %7 {strides = array<i32>} : memref<16x128xf32, #tpu.memory_space<vmem>>, vector<16x128xf32>,
    %c0_i32_8 = arith.constant 0 : i32
    %9 = arith.cmpi eq, %arg2, %c0_i32_8 : i32
    %10 = arith.extui %9 : i1 to i32
    %c0_i32_9 = arith.constant 0 : i32
    %11 = arith.cmpi ne, %10, %c0_i32_9 : i32
    scf.if %11 {
      %c0_10 = arith.constant 0 : index
      %c0_11 = arith.constant 0 : index
      %12 = vector.load %arg8[%c0_10, %c0_11] : memref<16x128xf32, #tpu.memory_space<vmem>>, vector<16x128xf32>
      %c0_12 = arith.constant 0 : index
      %c0_13 = arith.constant 0 : index
      %13 = vector.load %arg5[%c0_12, %c0_13] : memref<16x128xf32, #tpu.memory_space<vmem>>, vector<16x128xf32>
      tpu.vector_store %arg5[%c0_12, %c0_13], %12 {strides = array<i32>} : memref<16x128xf32, #tpu.memory_space<vmem>>, vector<16x128xf32>,
      %cst_14 = arith.constant dense<0.000000e+00> : vector<128xf32>
      %14 = vector.multi_reduction <add>, %12, %cst_14 [0] : vector<16x128xf32> to vector<128xf32>
      %15 = vector.shape_cast %14 : vector<128xf32> to vector<1x128xf32>
      %16 = vector.shape_cast %15 : vector<1x128xf32> to vector<1x1x128xf32>
      %c0_15 = arith.constant 0 : index
      %c0_16 = arith.constant 0 : index
      %c0_17 = arith.constant 0 : index
      %17 = vector.load %arg6[%c0_15, %c0_16, %c0_17] : memref<1x1x128xf32, #tpu.memory_space<vmem>>, vector<1x1x128xf32>
      tpu.vector_store %arg6[%c0_15, %c0_16, %c0_17], %16 {strides = array<i32>} : memref<1x1x128xf32, #tpu.memory_space<vmem>>, vector<1x1x128xf32>,
      %18 = arith.mulf %12, %12 : vector<16x128xf32>
      %cst_18 = arith.constant dense<0.000000e+00> : vector<128xf32>
      %19 = vector.multi_reduction <add>, %18, %cst_18 [0] : vector<16x128xf32> to vector<128xf32>
      %20 = vector.shape_cast %19 : vector<128xf32> to vector<1x128xf32>
      %21 = vector.shape_cast %20 : vector<1x128xf32> to vector<1x1x128xf32>
      %c0_19 = arith.constant 0 : index
      %c0_20 = arith.constant 0 : index
      %c0_21 = arith.constant 0 : index
      %22 = vector.load %arg7[%c0_19, %c0_20, %c0_21] : memref<1x1x128xf32, #tpu.memory_space<vmem>>, vector<1x1x128xf32>
      tpu.vector_store %arg7[%c0_19, %c0_20, %c0_21], %21 {strides = array<i32>} : memref<1x1x128xf32, #tpu.memory_space<vmem>>, vector<1x1x128xf32>,
    } else {
    }
    return
  }
  func.func @transform_0(%arg0: i32, %arg1: i32, %arg2: i32) -> (i32, i32) {
    %c0_i32 = arith.constant 0 : i32
    return %arg0, %arg2 : i32, i32
  }
  func.func @transform_1(%arg0: i32, %arg1: i32, %arg2: i32) -> (i32, i32) {
    %c0_i32 = arith.constant 0 : i32
    return %arg2, %arg1 : i32, i32
  }
  func.func @transform_2(%arg0: i32, %arg1: i32, %arg2: i32) -> (i32, i32) {
    %c0_i32 = arith.constant 0 : i32
    return %arg0, %arg1 : i32, i32
  }
  func.func @transform_3(%arg0: i32, %arg1: i32, %arg2: i32) -> (i32, i32, i32) {
    %c0_i32 = arith.constant 0 : i32
    %c0_i32_0 = arith.constant 0 : i32
    return %arg0, %c0_i32, %arg1 : i32, i32, i32
  }
  func.func @transform_4(%arg0: i32, %arg1: i32, %arg2: i32) -> (i32, i32, i32) {
    %c0_i32 = arith.constant 0 : i32
    %c0_i32_0 = arith.constant 0 : i32
    return %arg0, %c0_i32, %arg1 : i32, i32, i32
  }
}

module attributes {stable_mosaic.version = 11 : i64} {
  func.func @_msf_kernel(%arg0: i32, %arg1: memref<1x16x32xf32, #tpu.memory_space<vmem>>, %arg2: memref<1x32xf32, #tpu.memory_space<vmem>>, %arg3: memref<1x32xf32, #tpu.memory_space<vmem>>, %arg4: memref<1x16x32xbf16, #tpu.memory_space<vmem>>) attributes {dimension_semantics = [#tpu.dimension_semantics<parallel>], iteration_bounds = array<i64: 1>, scalar_prefetch = 0 : i64, scratch_operands = 0 : i64, tpu.core_type = #tpu.core_type<tc>, window_params = [{transform_indices = @transform_0, window_bounds = array<i64: 1, 16, 32>}, {pipeline_mode = #tpu.pipeline_mode<synchronous>, transform_indices = @transform_1, window_bounds = array<i64: 1, 32>}, {pipeline_mode = #tpu.pipeline_mode<synchronous>, transform_indices = @transform_2, window_bounds = array<i64: 1, 32>}, {transform_indices = @transform_3, window_bounds = array<i64: 1, 16, 32>}]} {
    %c0 = arith.constant 0 : index
    %c0_0 = arith.constant 0 : index
    %c0_1 = arith.constant 0 : index
    %0 = vector.load %arg1[%c0, %c0_0, %c0_1] : memref<1x16x32xf32, #tpu.memory_space<vmem>>, vector<1x16x32xf32>
    %1 = vector.shape_cast %0 : vector<1x16x32xf32> to vector<16x32xf32>
    %c0_2 = arith.constant 0 : index
    %c0_3 = arith.constant 0 : index
    %2 = vector.load %arg2[%c0_2, %c0_3] : memref<1x32xf32, #tpu.memory_space<vmem>>, vector<1x32xf32>
    %3 = vector.broadcast %2 : vector<1x32xf32> to vector<16x32xf32>
    %4 = arith.mulf %1, %3 : vector<16x32xf32>
    %c0_4 = arith.constant 0 : index
    %c0_5 = arith.constant 0 : index
    %5 = vector.load %arg3[%c0_4, %c0_5] : memref<1x32xf32, #tpu.memory_space<vmem>>, vector<1x32xf32>
    %6 = vector.broadcast %5 : vector<1x32xf32> to vector<16x32xf32>
    %7 = arith.addf %4, %6 : vector<16x32xf32>
    %cst = arith.constant 1.000000e+00 : f32
    %8 = vector.broadcast %cst : f32 to vector<16x32xf32>
    %9 = arith.subf %7, %8 : vector<16x32xf32>
    %cst_6 = arith.constant 1.000000e+00 : f32
    %10 = vector.broadcast %cst_6 : f32 to vector<16x32xf32>
    %11 = arith.addf %9, %10 : vector<16x32xf32>
    %12 = math.floor %11 : vector<16x32xf32>
    %cst_7 = arith.constant 0.000000e+00 : f32
    %cst_8 = arith.constant 8.000000e+00 : f32
    %13 = vector.broadcast %cst_7 : f32 to vector<16x32xf32>
    %14 = arith.maximumf %13, %12 : vector<16x32xf32>
    %15 = vector.broadcast %cst_8 : f32 to vector<16x32xf32>
    %16 = arith.minimumf %15, %14 : vector<16x32xf32>
    %17 = arith.truncf %16 : vector<16x32xf32> to vector<16x32xbf16>
    %c0_9 = arith.constant 0 : index
    %c0_10 = arith.constant 0 : index
    %c0_11 = arith.constant 0 : index
    %18 = vector.load %arg4[%c0_9, %c0_10, %c0_11] : memref<1x16x32xbf16, #tpu.memory_space<vmem>>, vector<1x16x32xbf16>
    %19 = vector.shape_cast %18 : vector<1x16x32xbf16> to vector<16x32xbf16>
    %20 = vector.shape_cast %17 : vector<16x32xbf16> to vector<1x16x32xbf16>
    tpu.vector_store %arg4[%c0_9, %c0_10, %c0_11], %20 {strides = array<i32>} : memref<1x16x32xbf16, #tpu.memory_space<vmem>>, vector<1x16x32xbf16>,
    return
  }
  func.func @transform_0(%arg0: i32) -> (i32, i32, i32) {
    %c0_i32 = arith.constant 0 : i32
    %c0_i32_0 = arith.constant 0 : i32
    %c0_i32_1 = arith.constant 0 : i32
    return %c0_i32, %arg0, %c0_i32_0 : i32, i32, i32
  }
  func.func @transform_1(%arg0: i32) -> (i32, i32) {
    %c0_i32 = arith.constant 0 : i32
    %c0_i32_0 = arith.constant 0 : i32
    %c0_i32_1 = arith.constant 0 : i32
    return %c0_i32, %c0_i32_0 : i32, i32
  }
  func.func @transform_2(%arg0: i32) -> (i32, i32) {
    %c0_i32 = arith.constant 0 : i32
    %c0_i32_0 = arith.constant 0 : i32
    %c0_i32_1 = arith.constant 0 : i32
    return %c0_i32, %c0_i32_0 : i32, i32
  }
  func.func @transform_3(%arg0: i32) -> (i32, i32, i32) {
    %c0_i32 = arith.constant 0 : i32
    %c0_i32_0 = arith.constant 0 : i32
    %c0_i32_1 = arith.constant 0 : i32
    return %c0_i32, %arg0, %c0_i32_0 : i32, i32, i32
  }
}

module attributes {stable_mosaic.version = 11 : i64} {
  func.func @_msf_kernel(%arg0: i32, %arg1: memref<1x16x32xf32, #tpu.memory_space<vmem>>, %arg2: memref<1x32xf32, #tpu.memory_space<vmem>>, %arg3: memref<1x32xf32, #tpu.memory_space<vmem>>, %arg4: memref<1x16x32xf32, #tpu.memory_space<vmem>>, %arg5: memref<1x32xf32, #tpu.memory_space<vmem>>, %arg6: memref<1x32xf32, #tpu.memory_space<vmem>>, %arg7: memref<1x16x32xbf16, #tpu.memory_space<vmem>>) attributes {dimension_semantics = [#tpu.dimension_semantics<parallel>], iteration_bounds = array<i64: 1>, scalar_prefetch = 0 : i64, scratch_operands = 0 : i64, tpu.core_type = #tpu.core_type<tc>, window_params = [{transform_indices = @transform_0, window_bounds = array<i64: 1, 16, 32>}, {pipeline_mode = #tpu.pipeline_mode<synchronous>, transform_indices = @transform_1, window_bounds = array<i64: 1, 32>}, {pipeline_mode = #tpu.pipeline_mode<synchronous>, transform_indices = @transform_2, window_bounds = array<i64: 1, 32>}, {transform_indices = @transform_3, window_bounds = array<i64: 1, 16, 32>}, {pipeline_mode = #tpu.pipeline_mode<synchronous>, transform_indices = @transform_4, window_bounds = array<i64: 1, 32>}, {pipeline_mode = #tpu.pipeline_mode<synchronous>, transform_indices = @transform_5, window_bounds = array<i64: 1, 32>}, {transform_indices = @transform_6, window_bounds = array<i64: 1, 16, 32>}]} {
    %c0 = arith.constant 0 : index
    %c0_0 = arith.constant 0 : index
    %c0_1 = arith.constant 0 : index
    %0 = vector.load %arg1[%c0, %c0_0, %c0_1] : memref<1x16x32xf32, #tpu.memory_space<vmem>>, vector<1x16x32xf32>
    %1 = vector.shape_cast %0 : vector<1x16x32xf32> to vector<16x32xf32>
    %c0_2 = arith.constant 0 : index
    %c0_3 = arith.constant 0 : index
    %2 = vector.load %arg2[%c0_2, %c0_3] : memref<1x32xf32, #tpu.memory_space<vmem>>, vector<1x32xf32>
    %3 = vector.broadcast %2 : vector<1x32xf32> to vector<16x32xf32>
    %4 = arith.mulf %1, %3 : vector<16x32xf32>
    %c0_4 = arith.constant 0 : index
    %c0_5 = arith.constant 0 : index
    %5 = vector.load %arg3[%c0_4, %c0_5] : memref<1x32xf32, #tpu.memory_space<vmem>>, vector<1x32xf32>
    %6 = vector.broadcast %5 : vector<1x32xf32> to vector<16x32xf32>
    %7 = arith.addf %4, %6 : vector<16x32xf32>
    %c0_6 = arith.constant 0 : index
    %c0_7 = arith.constant 0 : index
    %c0_8 = arith.constant 0 : index
    %8 = vector.load %arg4[%c0_6, %c0_7, %c0_8] : memref<1x16x32xf32, #tpu.memory_space<vmem>>, vector<1x16x32xf32>
    %9 = vector.shape_cast %8 : vector<1x16x32xf32> to vector<16x32xf32>
    %c0_9 = arith.constant 0 : index
    %c0_10 = arith.constant 0 : index
    %10 = vector.load %arg5[%c0_9, %c0_10] : memref<1x32xf32, #tpu.memory_space<vmem>>, vector<1x32xf32>
    %11 = vector.broadcast %10 : vector<1x32xf32> to vector<16x32xf32>
    %12 = arith.mulf %9, %11 : vector<16x32xf32>
    %13 = arith.addf %7, %12 : vector<16x32xf32>
    %c0_11 = arith.constant 0 : index
    %c0_12 = arith.constant 0 : index
    %14 = vector.load %arg6[%c0_11, %c0_12] : memref<1x32xf32, #tpu.memory_space<vmem>>, vector<1x32xf32>
    %15 = vector.broadcast %14 : vector<1x32xf32> to vector<16x32xf32>
    %16 = arith.addf %13, %15 : vector<16x32xf32>
    %cst = arith.constant 1.000000e+00 : f32
    %17 = vector.broadcast %cst : f32 to vector<16x32xf32>
    %18 = arith.subf %16, %17 : vector<16x32xf32>
    %cst_13 = arith.constant 1.000000e+00 : f32
    %19 = vector.broadcast %cst_13 : f32 to vector<16x32xf32>
    %20 = arith.addf %18, %19 : vector<16x32xf32>
    %21 = math.floor %20 : vector<16x32xf32>
    %cst_14 = arith.constant 0.000000e+00 : f32
    %cst_15 = arith.constant 8.000000e+00 : f32
    %22 = vector.broadcast %cst_14 : f32 to vector<16x32xf32>
    %23 = arith.maximumf %22, %21 : vector<16x32xf32>
    %24 = vector.broadcast %cst_15 : f32 to vector<16x32xf32>
    %25 = arith.minimumf %24, %23 : vector<16x32xf32>
    %26 = arith.truncf %25 : vector<16x32xf32> to vector<16x32xbf16>
    %c0_16 = arith.constant 0 : index
    %c0_17 = arith.constant 0 : index
    %c0_18 = arith.constant 0 : index
    %27 = vector.load %arg7[%c0_16, %c0_17, %c0_18] : memref<1x16x32xbf16, #tpu.memory_space<vmem>>, vector<1x16x32xbf16>
    %28 = vector.shape_cast %27 : vector<1x16x32xbf16> to vector<16x32xbf16>
    %29 = vector.shape_cast %26 : vector<16x32xbf16> to vector<1x16x32xbf16>
    tpu.vector_store %arg7[%c0_16, %c0_17, %c0_18], %29 {strides = array<i32>} : memref<1x16x32xbf16, #tpu.memory_space<vmem>>, vector<1x16x32xbf16>,
    return
  }
  func.func @transform_0(%arg0: i32) -> (i32, i32, i32) {
    %c0_i32 = arith.constant 0 : i32
    %c0_i32_0 = arith.constant 0 : i32
    %c0_i32_1 = arith.constant 0 : i32
    return %c0_i32, %arg0, %c0_i32_0 : i32, i32, i32
  }
  func.func @transform_1(%arg0: i32) -> (i32, i32) {
    %c0_i32 = arith.constant 0 : i32
    %c0_i32_0 = arith.constant 0 : i32
    %c0_i32_1 = arith.constant 0 : i32
    return %c0_i32, %c0_i32_0 : i32, i32
  }
  func.func @transform_2(%arg0: i32) -> (i32, i32) {
    %c0_i32 = arith.constant 0 : i32
    %c0_i32_0 = arith.constant 0 : i32
    %c0_i32_1 = arith.constant 0 : i32
    return %c0_i32, %c0_i32_0 : i32, i32
  }
  func.func @transform_3(%arg0: i32) -> (i32, i32, i32) {
    %c0_i32 = arith.constant 0 : i32
    %c0_i32_0 = arith.constant 0 : i32
    %c0_i32_1 = arith.constant 0 : i32
    return %c0_i32, %arg0, %c0_i32_0 : i32, i32, i32
  }
  func.func @transform_4(%arg0: i32) -> (i32, i32) {
    %c0_i32 = arith.constant 0 : i32
    %c0_i32_0 = arith.constant 0 : i32
    %c0_i32_1 = arith.constant 0 : i32
    return %c0_i32, %c0_i32_0 : i32, i32
  }
  func.func @transform_5(%arg0: i32) -> (i32, i32) {
    %c0_i32 = arith.constant 0 : i32
    %c0_i32_0 = arith.constant 0 : i32
    %c0_i32_1 = arith.constant 0 : i32
    return %c0_i32, %c0_i32_0 : i32, i32
  }
  func.func @transform_6(%arg0: i32) -> (i32, i32, i32) {
    %c0_i32 = arith.constant 0 : i32
    %c0_i32_0 = arith.constant 0 : i32
    %c0_i32_1 = arith.constant 0 : i32
    return %c0_i32, %arg0, %c0_i32_0 : i32, i32, i32
  }
}

module attributes {stable_mosaic.version = 11 : i64} {
  func.func @_matmul_stats_kernel(%arg0: i32, %arg1: i32, %arg2: i32, %arg3: memref<4x256xbf16, #tpu.memory_space<vmem>>, %arg4: memref<256x256xbf16, #tpu.memory_space<vmem>>, %arg5: memref<4x256xf32, #tpu.memory_space<vmem>>, %arg6: memref<1x1x256xf32, #tpu.memory_space<vmem>>, %arg7: memref<1x1x256xf32, #tpu.memory_space<vmem>>, %arg8: memref<4x256xf32, #tpu.memory_space<vmem>>) attributes {dimension_semantics = [#tpu.dimension_semantics<parallel>, #tpu.dimension_semantics<parallel>, #tpu.dimension_semantics<arbitrary>], iteration_bounds = array<i64: 1, 2, 1>, scalar_prefetch = 0 : i64, scratch_operands = 1 : i64, tpu.core_type = #tpu.core_type<tc>, window_params = [{transform_indices = @transform_0, window_bounds = array<i64: 4, 256>}, {transform_indices = @transform_1, window_bounds = array<i64: 256, 256>}, {transform_indices = @transform_2, window_bounds = array<i64: 4, 256>}, {transform_indices = @transform_3, window_bounds = array<i64: 1, 1, 256>}, {transform_indices = @transform_4, window_bounds = array<i64: 1, 1, 256>}]} {
    %c0_i32 = arith.constant 0 : i32
    %0 = arith.cmpi eq, %arg2, %c0_i32 : i32
    %1 = arith.extui %0 : i1 to i32
    %c0_i32_0 = arith.constant 0 : i32
    %2 = arith.cmpi ne, %1, %c0_i32_0 : i32
    scf.if %2 {
      %cst_10 = arith.constant 0.000000e+00 : f32
      %12 = vector.broadcast %cst_10 : f32 to vector<4x256xf32>
      %c0_11 = arith.constant 0 : index
      %c0_12 = arith.constant 0 : index
      %13 = vector.load %arg8[%c0_11, %c0_12] : memref<4x256xf32, #tpu.memory_space<vmem>>, vector<4x256xf32>
      tpu.vector_store %arg8[%c0_11, %c0_12], %12 {strides = array<i32>} : memref<4x256xf32, #tpu.memory_space<vmem>>, vector<4x256xf32>,
    } else {
    }
    %c0 = arith.constant 0 : index
    %c0_1 = arith.constant 0 : index
    %3 = vector.load %arg8[%c0, %c0_1] : memref<4x256xf32, #tpu.memory_space<vmem>>, vector<4x256xf32>
    %c0_2 = arith.constant 0 : index
    %c0_3 = arith.constant 0 : index
    %4 = vector.load %arg3[%c0_2, %c0_3] : memref<4x256xbf16, #tpu.memory_space<vmem>>, vector<4x256xbf16>
    %c0_4 = arith.constant 0 : index
    %c0_5 = arith.constant 0 : index
    %5 = vector.load %arg4[%c0_4, %c0_5] : memref<256x256xbf16, #tpu.memory_space<vmem>>, vector<256x256xbf16>
    %cst = arith.constant dense<0.000000e+00> : vector<4x256xf32>
    %6 = tpu.matmul %4, %5, %cst {dimension_numbers = #tpu.dot_dimension_numbers<[1], [0], [0], [1], [0, 0, 1, 1], [], []>} : vector<4x256xbf16>, vector<256x256xbf16>, vector<4x256xf32> -> vector<4x256xf32>
    %7 = arith.addf %3, %6 : vector<4x256xf32>
    %c0_6 = arith.constant 0 : index
    %c0_7 = arith.constant 0 : index
    %8 = vector.load %arg8[%c0_6, %c0_7] : memref<4x256xf32, #tpu.memory_space<vmem>>, vector<4x256xf32>
    tpu.vector_store %arg8[%c0_6, %c0_7], %7 {strides = array<i32>} : memref<4x256xf32, #tpu.memory_space<vmem>>, vector<4x256xf32>,
    %c0_i32_8 = arith.constant 0 : i32
    %9 = arith.cmpi eq, %arg2, %c0_i32_8 : i32
    %10 = arith.extui %9 : i1 to i32
    %c0_i32_9 = arith.constant 0 : i32
    %11 = arith.cmpi ne, %10, %c0_i32_9 : i32
    scf.if %11 {
      %c0_10 = arith.constant 0 : index
      %c0_11 = arith.constant 0 : index
      %12 = vector.load %arg8[%c0_10, %c0_11] : memref<4x256xf32, #tpu.memory_space<vmem>>, vector<4x256xf32>
      %c0_12 = arith.constant 0 : index
      %c0_13 = arith.constant 0 : index
      %13 = vector.load %arg5[%c0_12, %c0_13] : memref<4x256xf32, #tpu.memory_space<vmem>>, vector<4x256xf32>
      tpu.vector_store %arg5[%c0_12, %c0_13], %12 {strides = array<i32>} : memref<4x256xf32, #tpu.memory_space<vmem>>, vector<4x256xf32>,
      %cst_14 = arith.constant dense<0.000000e+00> : vector<256xf32>
      %14 = vector.multi_reduction <add>, %12, %cst_14 [0] : vector<4x256xf32> to vector<256xf32>
      %15 = vector.shape_cast %14 : vector<256xf32> to vector<1x256xf32>
      %16 = vector.shape_cast %15 : vector<1x256xf32> to vector<1x1x256xf32>
      %c0_15 = arith.constant 0 : index
      %c0_16 = arith.constant 0 : index
      %c0_17 = arith.constant 0 : index
      %17 = vector.load %arg6[%c0_15, %c0_16, %c0_17] : memref<1x1x256xf32, #tpu.memory_space<vmem>>, vector<1x1x256xf32>
      tpu.vector_store %arg6[%c0_15, %c0_16, %c0_17], %16 {strides = array<i32>} : memref<1x1x256xf32, #tpu.memory_space<vmem>>, vector<1x1x256xf32>,
      %18 = arith.mulf %12, %12 : vector<4x256xf32>
      %cst_18 = arith.constant dense<0.000000e+00> : vector<256xf32>
      %19 = vector.multi_reduction <add>, %18, %cst_18 [0] : vector<4x256xf32> to vector<256xf32>
      %20 = vector.shape_cast %19 : vector<256xf32> to vector<1x256xf32>
      %21 = vector.shape_cast %20 : vector<1x256xf32> to vector<1x1x256xf32>
      %c0_19 = arith.constant 0 : index
      %c0_20 = arith.constant 0 : index
      %c0_21 = arith.constant 0 : index
      %22 = vector.load %arg7[%c0_19, %c0_20, %c0_21] : memref<1x1x256xf32, #tpu.memory_space<vmem>>, vector<1x1x256xf32>
      tpu.vector_store %arg7[%c0_19, %c0_20, %c0_21], %21 {strides = array<i32>} : memref<1x1x256xf32, #tpu.memory_space<vmem>>, vector<1x1x256xf32>,
    } else {
    }
    return
  }
  func.func @transform_0(%arg0: i32, %arg1: i32, %arg2: i32) -> (i32, i32) {
    %c0_i32 = arith.constant 0 : i32
    return %arg0, %arg2 : i32, i32
  }
  func.func @transform_1(%arg0: i32, %arg1: i32, %arg2: i32) -> (i32, i32) {
    %c0_i32 = arith.constant 0 : i32
    return %arg2, %arg1 : i32, i32
  }
  func.func @transform_2(%arg0: i32, %arg1: i32, %arg2: i32) -> (i32, i32) {
    %c0_i32 = arith.constant 0 : i32
    return %arg0, %arg1 : i32, i32
  }
  func.func @transform_3(%arg0: i32, %arg1: i32, %arg2: i32) -> (i32, i32, i32) {
    %c0_i32 = arith.constant 0 : i32
    %c0_i32_0 = arith.constant 0 : i32
    return %arg0, %c0_i32, %arg1 : i32, i32, i32
  }
  func.func @transform_4(%arg0: i32, %arg1: i32, %arg2: i32) -> (i32, i32, i32) {
    %c0_i32 = arith.constant 0 : i32
    %c0_i32_0 = arith.constant 0 : i32
    return %arg0, %c0_i32, %arg1 : i32, i32, i32
  }
}

module attributes {stable_mosaic.version = 11 : i64} {
  func.func @_matmul_stats_kernel(%arg0: i32, %arg1: i32, %arg2: i32, %arg3: memref<16x256xbf16, #tpu.memory_space<vmem>>, %arg4: memref<256x256xbf16, #tpu.memory_space<vmem>>, %arg5: memref<16x256xf32, #tpu.memory_space<vmem>>, %arg6: memref<1x1x256xf32, #tpu.memory_space<vmem>>, %arg7: memref<1x1x256xf32, #tpu.memory_space<vmem>>, %arg8: memref<16x256xf32, #tpu.memory_space<vmem>>) attributes {dimension_semantics = [#tpu.dimension_semantics<parallel>, #tpu.dimension_semantics<parallel>, #tpu.dimension_semantics<arbitrary>], iteration_bounds = array<i64: 1, 1, 1>, scalar_prefetch = 0 : i64, scratch_operands = 1 : i64, tpu.core_type = #tpu.core_type<tc>, window_params = [{transform_indices = @transform_0, window_bounds = array<i64: 16, 256>}, {transform_indices = @transform_1, window_bounds = array<i64: 256, 256>}, {transform_indices = @transform_2, window_bounds = array<i64: 16, 256>}, {transform_indices = @transform_3, window_bounds = array<i64: 1, 1, 256>}, {transform_indices = @transform_4, window_bounds = array<i64: 1, 1, 256>}]} {
    %c0_i32 = arith.constant 0 : i32
    %0 = arith.cmpi eq, %arg2, %c0_i32 : i32
    %1 = arith.extui %0 : i1 to i32
    %c0_i32_0 = arith.constant 0 : i32
    %2 = arith.cmpi ne, %1, %c0_i32_0 : i32
    scf.if %2 {
      %cst_10 = arith.constant 0.000000e+00 : f32
      %12 = vector.broadcast %cst_10 : f32 to vector<16x256xf32>
      %c0_11 = arith.constant 0 : index
      %c0_12 = arith.constant 0 : index
      %13 = vector.load %arg8[%c0_11, %c0_12] : memref<16x256xf32, #tpu.memory_space<vmem>>, vector<16x256xf32>
      tpu.vector_store %arg8[%c0_11, %c0_12], %12 {strides = array<i32>} : memref<16x256xf32, #tpu.memory_space<vmem>>, vector<16x256xf32>,
    } else {
    }
    %c0 = arith.constant 0 : index
    %c0_1 = arith.constant 0 : index
    %3 = vector.load %arg8[%c0, %c0_1] : memref<16x256xf32, #tpu.memory_space<vmem>>, vector<16x256xf32>
    %c0_2 = arith.constant 0 : index
    %c0_3 = arith.constant 0 : index
    %4 = vector.load %arg3[%c0_2, %c0_3] : memref<16x256xbf16, #tpu.memory_space<vmem>>, vector<16x256xbf16>
    %c0_4 = arith.constant 0 : index
    %c0_5 = arith.constant 0 : index
    %5 = vector.load %arg4[%c0_4, %c0_5] : memref<256x256xbf16, #tpu.memory_space<vmem>>, vector<256x256xbf16>
    %cst = arith.constant dense<0.000000e+00> : vector<16x256xf32>
    %6 = tpu.matmul %4, %5, %cst {dimension_numbers = #tpu.dot_dimension_numbers<[1], [0], [0], [1], [0, 0, 1, 1], [], []>} : vector<16x256xbf16>, vector<256x256xbf16>, vector<16x256xf32> -> vector<16x256xf32>
    %7 = arith.addf %3, %6 : vector<16x256xf32>
    %c0_6 = arith.constant 0 : index
    %c0_7 = arith.constant 0 : index
    %8 = vector.load %arg8[%c0_6, %c0_7] : memref<16x256xf32, #tpu.memory_space<vmem>>, vector<16x256xf32>
    tpu.vector_store %arg8[%c0_6, %c0_7], %7 {strides = array<i32>} : memref<16x256xf32, #tpu.memory_space<vmem>>, vector<16x256xf32>,
    %c0_i32_8 = arith.constant 0 : i32
    %9 = arith.cmpi eq, %arg2, %c0_i32_8 : i32
    %10 = arith.extui %9 : i1 to i32
    %c0_i32_9 = arith.constant 0 : i32
    %11 = arith.cmpi ne, %10, %c0_i32_9 : i32
    scf.if %11 {
      %c0_10 = arith.constant 0 : index
      %c0_11 = arith.constant 0 : index
      %12 = vector.load %arg8[%c0_10, %c0_11] : memref<16x256xf32, #tpu.memory_space<vmem>>, vector<16x256xf32>
      %c0_12 = arith.constant 0 : index
      %c0_13 = arith.constant 0 : index
      %13 = vector.load %arg5[%c0_12, %c0_13] : memref<16x256xf32, #tpu.memory_space<vmem>>, vector<16x256xf32>
      tpu.vector_store %arg5[%c0_12, %c0_13], %12 {strides = array<i32>} : memref<16x256xf32, #tpu.memory_space<vmem>>, vector<16x256xf32>,
      %cst_14 = arith.constant dense<0.000000e+00> : vector<256xf32>
      %14 = vector.multi_reduction <add>, %12, %cst_14 [0] : vector<16x256xf32> to vector<256xf32>
      %15 = vector.shape_cast %14 : vector<256xf32> to vector<1x256xf32>
      %16 = vector.shape_cast %15 : vector<1x256xf32> to vector<1x1x256xf32>
      %c0_15 = arith.constant 0 : index
      %c0_16 = arith.constant 0 : index
      %c0_17 = arith.constant 0 : index
      %17 = vector.load %arg6[%c0_15, %c0_16, %c0_17] : memref<1x1x256xf32, #tpu.memory_space<vmem>>, vector<1x1x256xf32>
      tpu.vector_store %arg6[%c0_15, %c0_16, %c0_17], %16 {strides = array<i32>} : memref<1x1x256xf32, #tpu.memory_space<vmem>>, vector<1x1x256xf32>,
      %18 = arith.mulf %12, %12 : vector<16x256xf32>
      %cst_18 = arith.constant dense<0.000000e+00> : vector<256xf32>
      %19 = vector.multi_reduction <add>, %18, %cst_18 [0] : vector<16x256xf32> to vector<256xf32>
      %20 = vector.shape_cast %19 : vector<256xf32> to vector<1x256xf32>
      %21 = vector.shape_cast %20 : vector<1x256xf32> to vector<1x1x256xf32>
      %c0_19 = arith.constant 0 : index
      %c0_20 = arith.constant 0 : index
      %c0_21 = arith.constant 0 : index
      %22 = vector.load %arg7[%c0_19, %c0_20, %c0_21] : memref<1x1x256xf32, #tpu.memory_space<vmem>>, vector<1x1x256xf32>
      tpu.vector_store %arg7[%c0_19, %c0_20, %c0_21], %21 {strides = array<i32>} : memref<1x1x256xf32, #tpu.memory_space<vmem>>, vector<1x1x256xf32>,
    } else {
    }
    return
  }
  func.func @transform_0(%arg0: i32, %arg1: i32, %arg2: i32) -> (i32, i32) {
    %c0_i32 = arith.constant 0 : i32
    return %arg0, %arg2 : i32, i32
  }
  func.func @transform_1(%arg0: i32, %arg1: i32, %arg2: i32) -> (i32, i32) {
    %c0_i32 = arith.constant 0 : i32
    return %arg2, %arg1 : i32, i32
  }
  func.func @transform_2(%arg0: i32, %arg1: i32, %arg2: i32) -> (i32, i32) {
    %c0_i32 = arith.constant 0 : i32
    return %arg0, %arg1 : i32, i32
  }
  func.func @transform_3(%arg0: i32, %arg1: i32, %arg2: i32) -> (i32, i32, i32) {
    %c0_i32 = arith.constant 0 : i32
    %c0_i32_0 = arith.constant 0 : i32
    return %arg0, %c0_i32, %arg1 : i32, i32, i32
  }
  func.func @transform_4(%arg0: i32, %arg1: i32, %arg2: i32) -> (i32, i32, i32) {
    %c0_i32 = arith.constant 0 : i32
    %c0_i32_0 = arith.constant 0 : i32
    return %arg0, %c0_i32, %arg1 : i32, i32, i32
  }
}

module attributes {stable_mosaic.version = 11 : i64} {
  func.func @_msf_kernel(%arg0: i32, %arg1: memref<1x16x192xf32, #tpu.memory_space<vmem>>, %arg2: memref<1x192xf32, #tpu.memory_space<vmem>>, %arg3: memref<1x192xf32, #tpu.memory_space<vmem>>, %arg4: memref<1x16x192xbf16, #tpu.memory_space<vmem>>) attributes {dimension_semantics = [#tpu.dimension_semantics<parallel>], iteration_bounds = array<i64: 1>, scalar_prefetch = 0 : i64, scratch_operands = 0 : i64, tpu.core_type = #tpu.core_type<tc>, window_params = [{transform_indices = @transform_0, window_bounds = array<i64: 1, 16, 192>}, {pipeline_mode = #tpu.pipeline_mode<synchronous>, transform_indices = @transform_1, window_bounds = array<i64: 1, 192>}, {pipeline_mode = #tpu.pipeline_mode<synchronous>, transform_indices = @transform_2, window_bounds = array<i64: 1, 192>}, {transform_indices = @transform_3, window_bounds = array<i64: 1, 16, 192>}]} {
    %c0 = arith.constant 0 : index
    %c0_0 = arith.constant 0 : index
    %c0_1 = arith.constant 0 : index
    %0 = vector.load %arg1[%c0, %c0_0, %c0_1] : memref<1x16x192xf32, #tpu.memory_space<vmem>>, vector<1x16x192xf32>
    %1 = vector.shape_cast %0 : vector<1x16x192xf32> to vector<16x192xf32>
    %c0_2 = arith.constant 0 : index
    %c0_3 = arith.constant 0 : index
    %2 = vector.load %arg2[%c0_2, %c0_3] : memref<1x192xf32, #tpu.memory_space<vmem>>, vector<1x192xf32>
    %3 = vector.broadcast %2 : vector<1x192xf32> to vector<16x192xf32>
    %4 = arith.mulf %1, %3 : vector<16x192xf32>
    %c0_4 = arith.constant 0 : index
    %c0_5 = arith.constant 0 : index
    %5 = vector.load %arg3[%c0_4, %c0_5] : memref<1x192xf32, #tpu.memory_space<vmem>>, vector<1x192xf32>
    %6 = vector.broadcast %5 : vector<1x192xf32> to vector<16x192xf32>
    %7 = arith.addf %4, %6 : vector<16x192xf32>
    %cst = arith.constant 1.000000e+00 : f32
    %8 = vector.broadcast %cst : f32 to vector<16x192xf32>
    %9 = arith.subf %7, %8 : vector<16x192xf32>
    %cst_6 = arith.constant 1.000000e+00 : f32
    %10 = vector.broadcast %cst_6 : f32 to vector<16x192xf32>
    %11 = arith.addf %9, %10 : vector<16x192xf32>
    %12 = math.floor %11 : vector<16x192xf32>
    %cst_7 = arith.constant 0.000000e+00 : f32
    %cst_8 = arith.constant 8.000000e+00 : f32
    %13 = vector.broadcast %cst_7 : f32 to vector<16x192xf32>
    %14 = arith.maximumf %13, %12 : vector<16x192xf32>
    %15 = vector.broadcast %cst_8 : f32 to vector<16x192xf32>
    %16 = arith.minimumf %15, %14 : vector<16x192xf32>
    %17 = arith.truncf %16 : vector<16x192xf32> to vector<16x192xbf16>
    %c0_9 = arith.constant 0 : index
    %c0_10 = arith.constant 0 : index
    %c0_11 = arith.constant 0 : index
    %18 = vector.load %arg4[%c0_9, %c0_10, %c0_11] : memref<1x16x192xbf16, #tpu.memory_space<vmem>>, vector<1x16x192xbf16>
    %19 = vector.shape_cast %18 : vector<1x16x192xbf16> to vector<16x192xbf16>
    %20 = vector.shape_cast %17 : vector<16x192xbf16> to vector<1x16x192xbf16>
    tpu.vector_store %arg4[%c0_9, %c0_10, %c0_11], %20 {strides = array<i32>} : memref<1x16x192xbf16, #tpu.memory_space<vmem>>, vector<1x16x192xbf16>,
    return
  }
  func.func @transform_0(%arg0: i32) -> (i32, i32, i32) {
    %c0_i32 = arith.constant 0 : i32
    %c0_i32_0 = arith.constant 0 : i32
    %c0_i32_1 = arith.constant 0 : i32
    return %c0_i32, %arg0, %c0_i32_0 : i32, i32, i32
  }
  func.func @transform_1(%arg0: i32) -> (i32, i32) {
    %c0_i32 = arith.constant 0 : i32
    %c0_i32_0 = arith.constant 0 : i32
    %c0_i32_1 = arith.constant 0 : i32
    return %c0_i32, %c0_i32_0 : i32, i32
  }
  func.func @transform_2(%arg0: i32) -> (i32, i32) {
    %c0_i32 = arith.constant 0 : i32
    %c0_i32_0 = arith.constant 0 : i32
    %c0_i32_1 = arith.constant 0 : i32
    return %c0_i32, %c0_i32_0 : i32, i32
  }
  func.func @transform_3(%arg0: i32) -> (i32, i32, i32) {
    %c0_i32 = arith.constant 0 : i32
    %c0_i32_0 = arith.constant 0 : i32
    %c0_i32_1 = arith.constant 0 : i32
    return %c0_i32, %arg0, %c0_i32_0 : i32, i32, i32
  }
}

module attributes {stable_mosaic.version = 11 : i64} {
  func.func @_matmul_stats_kernel(%arg0: i32, %arg1: i32, %arg2: i32, %arg3: memref<4x128xbf16, #tpu.memory_space<vmem>>, %arg4: memref<128x64xbf16, #tpu.memory_space<vmem>>, %arg5: memref<4x64xf32, #tpu.memory_space<vmem>>, %arg6: memref<1x1x64xf32, #tpu.memory_space<vmem>>, %arg7: memref<1x1x64xf32, #tpu.memory_space<vmem>>, %arg8: memref<4x64xf32, #tpu.memory_space<vmem>>) attributes {dimension_semantics = [#tpu.dimension_semantics<parallel>, #tpu.dimension_semantics<parallel>, #tpu.dimension_semantics<arbitrary>], iteration_bounds = array<i64: 1, 1, 5>, scalar_prefetch = 0 : i64, scratch_operands = 1 : i64, tpu.core_type = #tpu.core_type<tc>, window_params = [{transform_indices = @transform_0, window_bounds = array<i64: 4, 128>}, {transform_indices = @transform_1, window_bounds = array<i64: 128, 64>}, {transform_indices = @transform_2, window_bounds = array<i64: 4, 64>}, {transform_indices = @transform_3, window_bounds = array<i64: 1, 1, 64>}, {transform_indices = @transform_4, window_bounds = array<i64: 1, 1, 64>}]} {
    %c0_i32 = arith.constant 0 : i32
    %0 = arith.cmpi eq, %arg2, %c0_i32 : i32
    %1 = arith.extui %0 : i1 to i32
    %c0_i32_0 = arith.constant 0 : i32
    %2 = arith.cmpi ne, %1, %c0_i32_0 : i32
    scf.if %2 {
      %cst_9 = arith.constant 0.000000e+00 : f32
      %12 = vector.broadcast %cst_9 : f32 to vector<4x64xf32>
      %c0_10 = arith.constant 0 : index
      %c0_11 = arith.constant 0 : index
      %13 = vector.load %arg8[%c0_10, %c0_11] : memref<4x64xf32, #tpu.memory_space<vmem>>, vector<4x64xf32>
      tpu.vector_store %arg8[%c0_10, %c0_11], %12 {strides = array<i32>} : memref<4x64xf32, #tpu.memory_space<vmem>>, vector<4x64xf32>,
    } else {
    }
    %c0 = arith.constant 0 : index
    %c0_1 = arith.constant 0 : index
    %3 = vector.load %arg8[%c0, %c0_1] : memref<4x64xf32, #tpu.memory_space<vmem>>, vector<4x64xf32>
    %c0_2 = arith.constant 0 : index
    %c0_3 = arith.constant 0 : index
    %4 = vector.load %arg3[%c0_2, %c0_3] : memref<4x128xbf16, #tpu.memory_space<vmem>>, vector<4x128xbf16>
    %c0_4 = arith.constant 0 : index
    %c0_5 = arith.constant 0 : index
    %5 = vector.load %arg4[%c0_4, %c0_5] : memref<128x64xbf16, #tpu.memory_space<vmem>>, vector<128x64xbf16>
    %cst = arith.constant dense<0.000000e+00> : vector<4x64xf32>
    %6 = tpu.matmul %4, %5, %cst {dimension_numbers = #tpu.dot_dimension_numbers<[1], [0], [0], [1], [0, 0, 1, 1], [], []>} : vector<4x128xbf16>, vector<128x64xbf16>, vector<4x64xf32> -> vector<4x64xf32>
    %7 = arith.addf %3, %6 : vector<4x64xf32>
    %c0_6 = arith.constant 0 : index
    %c0_7 = arith.constant 0 : index
    %8 = vector.load %arg8[%c0_6, %c0_7] : memref<4x64xf32, #tpu.memory_space<vmem>>, vector<4x64xf32>
    tpu.vector_store %arg8[%c0_6, %c0_7], %7 {strides = array<i32>} : memref<4x64xf32, #tpu.memory_space<vmem>>, vector<4x64xf32>,
    %c4_i32 = arith.constant 4 : i32
    %9 = arith.cmpi eq, %arg2, %c4_i32 : i32
    %10 = arith.extui %9 : i1 to i32
    %c0_i32_8 = arith.constant 0 : i32
    %11 = arith.cmpi ne, %10, %c0_i32_8 : i32
    scf.if %11 {
      %c0_9 = arith.constant 0 : index
      %c0_10 = arith.constant 0 : index
      %12 = vector.load %arg8[%c0_9, %c0_10] : memref<4x64xf32, #tpu.memory_space<vmem>>, vector<4x64xf32>
      %c0_11 = arith.constant 0 : index
      %c0_12 = arith.constant 0 : index
      %13 = vector.load %arg5[%c0_11, %c0_12] : memref<4x64xf32, #tpu.memory_space<vmem>>, vector<4x64xf32>
      tpu.vector_store %arg5[%c0_11, %c0_12], %12 {strides = array<i32>} : memref<4x64xf32, #tpu.memory_space<vmem>>, vector<4x64xf32>,
      %cst_13 = arith.constant dense<0.000000e+00> : vector<64xf32>
      %14 = vector.multi_reduction <add>, %12, %cst_13 [0] : vector<4x64xf32> to vector<64xf32>
      %15 = vector.shape_cast %14 : vector<64xf32> to vector<1x64xf32>
      %16 = vector.shape_cast %15 : vector<1x64xf32> to vector<1x1x64xf32>
      %c0_14 = arith.constant 0 : index
      %c0_15 = arith.constant 0 : index
      %c0_16 = arith.constant 0 : index
      %17 = vector.load %arg6[%c0_14, %c0_15, %c0_16] : memref<1x1x64xf32, #tpu.memory_space<vmem>>, vector<1x1x64xf32>
      tpu.vector_store %arg6[%c0_14, %c0_15, %c0_16], %16 {strides = array<i32>} : memref<1x1x64xf32, #tpu.memory_space<vmem>>, vector<1x1x64xf32>,
      %18 = arith.mulf %12, %12 : vector<4x64xf32>
      %cst_17 = arith.constant dense<0.000000e+00> : vector<64xf32>
      %19 = vector.multi_reduction <add>, %18, %cst_17 [0] : vector<4x64xf32> to vector<64xf32>
      %20 = vector.shape_cast %19 : vector<64xf32> to vector<1x64xf32>
      %21 = vector.shape_cast %20 : vector<1x64xf32> to vector<1x1x64xf32>
      %c0_18 = arith.constant 0 : index
      %c0_19 = arith.constant 0 : index
      %c0_20 = arith.constant 0 : index
      %22 = vector.load %arg7[%c0_18, %c0_19, %c0_20] : memref<1x1x64xf32, #tpu.memory_space<vmem>>, vector<1x1x64xf32>
      tpu.vector_store %arg7[%c0_18, %c0_19, %c0_20], %21 {strides = array<i32>} : memref<1x1x64xf32, #tpu.memory_space<vmem>>, vector<1x1x64xf32>,
    } else {
    }
    return
  }
  func.func @transform_0(%arg0: i32, %arg1: i32, %arg2: i32) -> (i32, i32) {
    %c0_i32 = arith.constant 0 : i32
    return %arg0, %arg2 : i32, i32
  }
  func.func @transform_1(%arg0: i32, %arg1: i32, %arg2: i32) -> (i32, i32) {
    %c0_i32 = arith.constant 0 : i32
    return %arg2, %arg1 : i32, i32
  }
  func.func @transform_2(%arg0: i32, %arg1: i32, %arg2: i32) -> (i32, i32) {
    %c0_i32 = arith.constant 0 : i32
    return %arg0, %arg1 : i32, i32
  }
  func.func @transform_3(%arg0: i32, %arg1: i32, %arg2: i32) -> (i32, i32, i32) {
    %c0_i32 = arith.constant 0 : i32
    %c0_i32_0 = arith.constant 0 : i32
    return %arg0, %c0_i32, %arg1 : i32, i32, i32
  }
  func.func @transform_4(%arg0: i32, %arg1: i32, %arg2: i32) -> (i32, i32, i32) {
    %c0_i32 = arith.constant 0 : i32
    %c0_i32_0 = arith.constant 0 : i32
    return %arg0, %c0_i32, %arg1 : i32, i32, i32
  }
}

module attributes {stable_mosaic.version = 11 : i64} {
  func.func @_affine_kernel(%arg0: i32, %arg1: memref<16x64xf32, #tpu.memory_space<vmem>>, %arg2: memref<1x64xf32, #tpu.memory_space<vmem>>, %arg3: memref<1x64xf32, #tpu.memory_space<vmem>>, %arg4: memref<16x64xf32, #tpu.memory_space<vmem>>) attributes {dimension_semantics = [#tpu.dimension_semantics<parallel>], iteration_bounds = array<i64: 1>, scalar_prefetch = 0 : i64, scratch_operands = 0 : i64, tpu.core_type = #tpu.core_type<tc>, window_params = [{transform_indices = @transform_0, window_bounds = array<i64: 16, 64>}, {pipeline_mode = #tpu.pipeline_mode<synchronous>, transform_indices = @transform_1, window_bounds = array<i64: 1, 64>}, {pipeline_mode = #tpu.pipeline_mode<synchronous>, transform_indices = @transform_2, window_bounds = array<i64: 1, 64>}, {transform_indices = @transform_3, window_bounds = array<i64: 16, 64>}]} {
    %c0 = arith.constant 0 : index
    %c0_0 = arith.constant 0 : index
    %0 = vector.load %arg1[%c0, %c0_0] : memref<16x64xf32, #tpu.memory_space<vmem>>, vector<16x64xf32>
    %c0_1 = arith.constant 0 : index
    %c0_2 = arith.constant 0 : index
    %1 = vector.load %arg2[%c0_1, %c0_2] : memref<1x64xf32, #tpu.memory_space<vmem>>, vector<1x64xf32>
    %2 = vector.broadcast %1 : vector<1x64xf32> to vector<16x64xf32>
    %3 = arith.mulf %0, %2 : vector<16x64xf32>
    %c0_3 = arith.constant 0 : index
    %c0_4 = arith.constant 0 : index
    %4 = vector.load %arg3[%c0_3, %c0_4] : memref<1x64xf32, #tpu.memory_space<vmem>>, vector<1x64xf32>
    %5 = vector.broadcast %4 : vector<1x64xf32> to vector<16x64xf32>
    %6 = arith.addf %3, %5 : vector<16x64xf32>
    %c0_5 = arith.constant 0 : index
    %c0_6 = arith.constant 0 : index
    %7 = vector.load %arg4[%c0_5, %c0_6] : memref<16x64xf32, #tpu.memory_space<vmem>>, vector<16x64xf32>
    tpu.vector_store %arg4[%c0_5, %c0_6], %6 {strides = array<i32>} : memref<16x64xf32, #tpu.memory_space<vmem>>, vector<16x64xf32>,
    return
  }
  func.func @transform_0(%arg0: i32) -> (i32, i32) {
    %c0_i32 = arith.constant 0 : i32
    %c0_i32_0 = arith.constant 0 : i32
    return %arg0, %c0_i32 : i32, i32
  }
  func.func @transform_1(%arg0: i32) -> (i32, i32) {
    %c0_i32 = arith.constant 0 : i32
    %c0_i32_0 = arith.constant 0 : i32
    %c0_i32_1 = arith.constant 0 : i32
    return %c0_i32, %c0_i32_0 : i32, i32
  }
  func.func @transform_2(%arg0: i32) -> (i32, i32) {
    %c0_i32 = arith.constant 0 : i32
    %c0_i32_0 = arith.constant 0 : i32
    %c0_i32_1 = arith.constant 0 : i32
    return %c0_i32, %c0_i32_0 : i32, i32
  }
  func.func @transform_3(%arg0: i32) -> (i32, i32) {
    %c0_i32 = arith.constant 0 : i32
    %c0_i32_0 = arith.constant 0 : i32
    return %arg0, %c0_i32 : i32, i32
  }
}

module attributes {stable_mosaic.version = 11 : i64} {
  func.func @_msf_kernel(%arg0: i32, %arg1: memref<1x4x256xf32, #tpu.memory_space<vmem>>, %arg2: memref<1x256xf32, #tpu.memory_space<vmem>>, %arg3: memref<1x256xf32, #tpu.memory_space<vmem>>, %arg4: memref<1x4x256xbf16, #tpu.memory_space<vmem>>) attributes {dimension_semantics = [#tpu.dimension_semantics<parallel>], iteration_bounds = array<i64: 1>, scalar_prefetch = 0 : i64, scratch_operands = 0 : i64, tpu.core_type = #tpu.core_type<tc>, window_params = [{transform_indices = @transform_0, window_bounds = array<i64: 1, 4, 256>}, {pipeline_mode = #tpu.pipeline_mode<synchronous>, transform_indices = @transform_1, window_bounds = array<i64: 1, 256>}, {pipeline_mode = #tpu.pipeline_mode<synchronous>, transform_indices = @transform_2, window_bounds = array<i64: 1, 256>}, {transform_indices = @transform_3, window_bounds = array<i64: 1, 4, 256>}]} {
    %c0 = arith.constant 0 : index
    %c0_0 = arith.constant 0 : index
    %c0_1 = arith.constant 0 : index
    %0 = vector.load %arg1[%c0, %c0_0, %c0_1] : memref<1x4x256xf32, #tpu.memory_space<vmem>>, vector<1x4x256xf32>
    %1 = vector.shape_cast %0 : vector<1x4x256xf32> to vector<4x256xf32>
    %c0_2 = arith.constant 0 : index
    %c0_3 = arith.constant 0 : index
    %2 = vector.load %arg2[%c0_2, %c0_3] : memref<1x256xf32, #tpu.memory_space<vmem>>, vector<1x256xf32>
    %3 = vector.broadcast %2 : vector<1x256xf32> to vector<4x256xf32>
    %4 = arith.mulf %1, %3 : vector<4x256xf32>
    %c0_4 = arith.constant 0 : index
    %c0_5 = arith.constant 0 : index
    %5 = vector.load %arg3[%c0_4, %c0_5] : memref<1x256xf32, #tpu.memory_space<vmem>>, vector<1x256xf32>
    %6 = vector.broadcast %5 : vector<1x256xf32> to vector<4x256xf32>
    %7 = arith.addf %4, %6 : vector<4x256xf32>
    %cst = arith.constant 1.000000e+00 : f32
    %8 = vector.broadcast %cst : f32 to vector<4x256xf32>
    %9 = arith.subf %7, %8 : vector<4x256xf32>
    %cst_6 = arith.constant 1.000000e+00 : f32
    %10 = vector.broadcast %cst_6 : f32 to vector<4x256xf32>
    %11 = arith.addf %9, %10 : vector<4x256xf32>
    %12 = math.floor %11 : vector<4x256xf32>
    %cst_7 = arith.constant 0.000000e+00 : f32
    %cst_8 = arith.constant 8.000000e+00 : f32
    %13 = vector.broadcast %cst_7 : f32 to vector<4x256xf32>
    %14 = arith.maximumf %13, %12 : vector<4x256xf32>
    %15 = vector.broadcast %cst_8 : f32 to vector<4x256xf32>
    %16 = arith.minimumf %15, %14 : vector<4x256xf32>
    %17 = arith.truncf %16 : vector<4x256xf32> to vector<4x256xbf16>
    %c0_9 = arith.constant 0 : index
    %c0_10 = arith.constant 0 : index
    %c0_11 = arith.constant 0 : index
    %18 = vector.load %arg4[%c0_9, %c0_10, %c0_11] : memref<1x4x256xbf16, #tpu.memory_space<vmem>>, vector<1x4x256xbf16>
    %19 = vector.shape_cast %18 : vector<1x4x256xbf16> to vector<4x256xbf16>
    %20 = vector.shape_cast %17 : vector<4x256xbf16> to vector<1x4x256xbf16>
    tpu.vector_store %arg4[%c0_9, %c0_10, %c0_11], %20 {strides = array<i32>} : memref<1x4x256xbf16, #tpu.memory_space<vmem>>, vector<1x4x256xbf16>,
    return
  }
  func.func @transform_0(%arg0: i32) -> (i32, i32, i32) {
    %c0_i32 = arith.constant 0 : i32
    %c0_i32_0 = arith.constant 0 : i32
    %c0_i32_1 = arith.constant 0 : i32
    return %c0_i32, %arg0, %c0_i32_0 : i32, i32, i32
  }
  func.func @transform_1(%arg0: i32) -> (i32, i32) {
    %c0_i32 = arith.constant 0 : i32
    %c0_i32_0 = arith.constant 0 : i32
    %c0_i32_1 = arith.constant 0 : i32
    return %c0_i32, %c0_i32_0 : i32, i32
  }
  func.func @transform_2(%arg0: i32) -> (i32, i32) {
    %c0_i32 = arith.constant 0 : i32
    %c0_i32_0 = arith.constant 0 : i32
    %c0_i32_1 = arith.constant 0 : i32
    return %c0_i32, %c0_i32_0 : i32, i32
  }
  func.func @transform_3(%arg0: i32) -> (i32, i32, i32) {
    %c0_i32 = arith.constant 0 : i32
    %c0_i32_0 = arith.constant 0 : i32
    %c0_i32_1 = arith.constant 0 : i32
    return %c0_i32, %arg0, %c0_i32_0 : i32, i32, i32
  }
}

module attributes {stable_mosaic.version = 11 : i64} {
  func.func @_residual_kernel(%arg0: i32, %arg1: memref<4x512xf32, #tpu.memory_space<vmem>>, %arg2: memref<1x512xf32, #tpu.memory_space<vmem>>, %arg3: memref<1x512xf32, #tpu.memory_space<vmem>>, %arg4: memref<4x512xf32, #tpu.memory_space<vmem>>, %arg5: memref<1x512xf32, #tpu.memory_space<vmem>>, %arg6: memref<1x512xf32, #tpu.memory_space<vmem>>, %arg7: memref<4x512xf32, #tpu.memory_space<vmem>>) attributes {dimension_semantics = [#tpu.dimension_semantics<parallel>], iteration_bounds = array<i64: 1>, scalar_prefetch = 0 : i64, scratch_operands = 0 : i64, tpu.core_type = #tpu.core_type<tc>, window_params = [{transform_indices = @transform_0, window_bounds = array<i64: 4, 512>}, {pipeline_mode = #tpu.pipeline_mode<synchronous>, transform_indices = @transform_1, window_bounds = array<i64: 1, 512>}, {pipeline_mode = #tpu.pipeline_mode<synchronous>, transform_indices = @transform_2, window_bounds = array<i64: 1, 512>}, {transform_indices = @transform_3, window_bounds = array<i64: 4, 512>}, {pipeline_mode = #tpu.pipeline_mode<synchronous>, transform_indices = @transform_4, window_bounds = array<i64: 1, 512>}, {pipeline_mode = #tpu.pipeline_mode<synchronous>, transform_indices = @transform_5, window_bounds = array<i64: 1, 512>}, {transform_indices = @transform_6, window_bounds = array<i64: 4, 512>}]} {
    %c0 = arith.constant 0 : index
    %c0_0 = arith.constant 0 : index
    %0 = vector.load %arg1[%c0, %c0_0] : memref<4x512xf32, #tpu.memory_space<vmem>>, vector<4x512xf32>
    %c0_1 = arith.constant 0 : index
    %c0_2 = arith.constant 0 : index
    %1 = vector.load %arg2[%c0_1, %c0_2] : memref<1x512xf32, #tpu.memory_space<vmem>>, vector<1x512xf32>
    %2 = vector.broadcast %1 : vector<1x512xf32> to vector<4x512xf32>
    %3 = arith.mulf %0, %2 : vector<4x512xf32>
    %c0_3 = arith.constant 0 : index
    %c0_4 = arith.constant 0 : index
    %4 = vector.load %arg3[%c0_3, %c0_4] : memref<1x512xf32, #tpu.memory_space<vmem>>, vector<1x512xf32>
    %5 = vector.broadcast %4 : vector<1x512xf32> to vector<4x512xf32>
    %6 = arith.addf %3, %5 : vector<4x512xf32>
    %c0_5 = arith.constant 0 : index
    %c0_6 = arith.constant 0 : index
    %7 = vector.load %arg4[%c0_5, %c0_6] : memref<4x512xf32, #tpu.memory_space<vmem>>, vector<4x512xf32>
    %c0_7 = arith.constant 0 : index
    %c0_8 = arith.constant 0 : index
    %8 = vector.load %arg5[%c0_7, %c0_8] : memref<1x512xf32, #tpu.memory_space<vmem>>, vector<1x512xf32>
    %9 = vector.broadcast %8 : vector<1x512xf32> to vector<4x512xf32>
    %10 = arith.mulf %7, %9 : vector<4x512xf32>
    %11 = arith.addf %6, %10 : vector<4x512xf32>
    %c0_9 = arith.constant 0 : index
    %c0_10 = arith.constant 0 : index
    %12 = vector.load %arg6[%c0_9, %c0_10] : memref<1x512xf32, #tpu.memory_space<vmem>>, vector<1x512xf32>
    %13 = vector.broadcast %12 : vector<1x512xf32> to vector<4x512xf32>
    %14 = arith.addf %11, %13 : vector<4x512xf32>
    %c0_11 = arith.constant 0 : index
    %c0_12 = arith.constant 0 : index
    %15 = vector.load %arg7[%c0_11, %c0_12] : memref<4x512xf32, #tpu.memory_space<vmem>>, vector<4x512xf32>
    tpu.vector_store %arg7[%c0_11, %c0_12], %14 {strides = array<i32>} : memref<4x512xf32, #tpu.memory_space<vmem>>, vector<4x512xf32>,
    return
  }
  func.func @transform_0(%arg0: i32) -> (i32, i32) {
    %c0_i32 = arith.constant 0 : i32
    %c0_i32_0 = arith.constant 0 : i32
    return %arg0, %c0_i32 : i32, i32
  }
  func.func @transform_1(%arg0: i32) -> (i32, i32) {
    %c0_i32 = arith.constant 0 : i32
    %c0_i32_0 = arith.constant 0 : i32
    %c0_i32_1 = arith.constant 0 : i32
    return %c0_i32, %c0_i32_0 : i32, i32
  }
  func.func @transform_2(%arg0: i32) -> (i32, i32) {
    %c0_i32 = arith.constant 0 : i32
    %c0_i32_0 = arith.constant 0 : i32
    %c0_i32_1 = arith.constant 0 : i32
    return %c0_i32, %c0_i32_0 : i32, i32
  }
  func.func @transform_3(%arg0: i32) -> (i32, i32) {
    %c0_i32 = arith.constant 0 : i32
    %c0_i32_0 = arith.constant 0 : i32
    return %arg0, %c0_i32 : i32, i32
  }
  func.func @transform_4(%arg0: i32) -> (i32, i32) {
    %c0_i32 = arith.constant 0 : i32
    %c0_i32_0 = arith.constant 0 : i32
    %c0_i32_1 = arith.constant 0 : i32
    return %c0_i32, %c0_i32_0 : i32, i32
  }
  func.func @transform_5(%arg0: i32) -> (i32, i32) {
    %c0_i32 = arith.constant 0 : i32
    %c0_i32_0 = arith.constant 0 : i32
    %c0_i32_1 = arith.constant 0 : i32
    return %c0_i32, %c0_i32_0 : i32, i32
  }
  func.func @transform_6(%arg0: i32) -> (i32, i32) {
    %c0_i32 = arith.constant 0 : i32
    %c0_i32_0 = arith.constant 0 : i32
    return %arg0, %c0_i32 : i32, i32
  }
}

module attributes {stable_mosaic.version = 11 : i64} {
  func.func @_matmul_stats_kernel(%arg0: i32, %arg1: i32, %arg2: i32, %arg3: memref<1x512xbf16, #tpu.memory_space<vmem>>, %arg4: memref<512x256xbf16, #tpu.memory_space<vmem>>, %arg5: memref<1x256xf32, #tpu.memory_space<vmem>>, %arg6: memref<1x1x256xf32, #tpu.memory_space<vmem>>, %arg7: memref<1x1x256xf32, #tpu.memory_space<vmem>>, %arg8: memref<1x256xf32, #tpu.memory_space<vmem>>) attributes {dimension_semantics = [#tpu.dimension_semantics<parallel>, #tpu.dimension_semantics<parallel>, #tpu.dimension_semantics<arbitrary>], iteration_bounds = array<i64: 1, 4, 1>, scalar_prefetch = 0 : i64, scratch_operands = 1 : i64, tpu.core_type = #tpu.core_type<tc>, window_params = [{transform_indices = @transform_0, window_bounds = array<i64: 1, 512>}, {transform_indices = @transform_1, window_bounds = array<i64: 512, 256>}, {transform_indices = @transform_2, window_bounds = array<i64: 1, 256>}, {transform_indices = @transform_3, window_bounds = array<i64: 1, 1, 256>}, {transform_indices = @transform_4, window_bounds = array<i64: 1, 1, 256>}]} {
    %c0_i32 = arith.constant 0 : i32
    %0 = arith.cmpi eq, %arg2, %c0_i32 : i32
    %1 = arith.extui %0 : i1 to i32
    %c0_i32_0 = arith.constant 0 : i32
    %2 = arith.cmpi ne, %1, %c0_i32_0 : i32
    scf.if %2 {
      %cst_10 = arith.constant 0.000000e+00 : f32
      %12 = vector.broadcast %cst_10 : f32 to vector<1x256xf32>
      %c0_11 = arith.constant 0 : index
      %c0_12 = arith.constant 0 : index
      %13 = vector.load %arg8[%c0_11, %c0_12] : memref<1x256xf32, #tpu.memory_space<vmem>>, vector<1x256xf32>
      tpu.vector_store %arg8[%c0_11, %c0_12], %12 {strides = array<i32>} : memref<1x256xf32, #tpu.memory_space<vmem>>, vector<1x256xf32>,
    } else {
    }
    %c0 = arith.constant 0 : index
    %c0_1 = arith.constant 0 : index
    %3 = vector.load %arg8[%c0, %c0_1] : memref<1x256xf32, #tpu.memory_space<vmem>>, vector<1x256xf32>
    %c0_2 = arith.constant 0 : index
    %c0_3 = arith.constant 0 : index
    %4 = vector.load %arg3[%c0_2, %c0_3] : memref<1x512xbf16, #tpu.memory_space<vmem>>, vector<1x512xbf16>
    %c0_4 = arith.constant 0 : index
    %c0_5 = arith.constant 0 : index
    %5 = vector.load %arg4[%c0_4, %c0_5] : memref<512x256xbf16, #tpu.memory_space<vmem>>, vector<512x256xbf16>
    %cst = arith.constant dense<0.000000e+00> : vector<1x256xf32>
    %6 = tpu.matmul %4, %5, %cst {dimension_numbers = #tpu.dot_dimension_numbers<[1], [0], [0], [1], [0, 0, 1, 1], [], []>} : vector<1x512xbf16>, vector<512x256xbf16>, vector<1x256xf32> -> vector<1x256xf32>
    %7 = arith.addf %3, %6 : vector<1x256xf32>
    %c0_6 = arith.constant 0 : index
    %c0_7 = arith.constant 0 : index
    %8 = vector.load %arg8[%c0_6, %c0_7] : memref<1x256xf32, #tpu.memory_space<vmem>>, vector<1x256xf32>
    tpu.vector_store %arg8[%c0_6, %c0_7], %7 {strides = array<i32>} : memref<1x256xf32, #tpu.memory_space<vmem>>, vector<1x256xf32>,
    %c0_i32_8 = arith.constant 0 : i32
    %9 = arith.cmpi eq, %arg2, %c0_i32_8 : i32
    %10 = arith.extui %9 : i1 to i32
    %c0_i32_9 = arith.constant 0 : i32
    %11 = arith.cmpi ne, %10, %c0_i32_9 : i32
    scf.if %11 {
      %c0_10 = arith.constant 0 : index
      %c0_11 = arith.constant 0 : index
      %12 = vector.load %arg8[%c0_10, %c0_11] : memref<1x256xf32, #tpu.memory_space<vmem>>, vector<1x256xf32>
      %c0_12 = arith.constant 0 : index
      %c0_13 = arith.constant 0 : index
      %13 = vector.load %arg5[%c0_12, %c0_13] : memref<1x256xf32, #tpu.memory_space<vmem>>, vector<1x256xf32>
      tpu.vector_store %arg5[%c0_12, %c0_13], %12 {strides = array<i32>} : memref<1x256xf32, #tpu.memory_space<vmem>>, vector<1x256xf32>,
      %cst_14 = arith.constant dense<0.000000e+00> : vector<256xf32>
      %14 = vector.multi_reduction <add>, %12, %cst_14 [0] : vector<1x256xf32> to vector<256xf32>
      %15 = vector.shape_cast %14 : vector<256xf32> to vector<1x256xf32>
      %16 = vector.shape_cast %15 : vector<1x256xf32> to vector<1x1x256xf32>
      %c0_15 = arith.constant 0 : index
      %c0_16 = arith.constant 0 : index
      %c0_17 = arith.constant 0 : index
      %17 = vector.load %arg6[%c0_15, %c0_16, %c0_17] : memref<1x1x256xf32, #tpu.memory_space<vmem>>, vector<1x1x256xf32>
      tpu.vector_store %arg6[%c0_15, %c0_16, %c0_17], %16 {strides = array<i32>} : memref<1x1x256xf32, #tpu.memory_space<vmem>>, vector<1x1x256xf32>,
      %18 = arith.mulf %12, %12 : vector<1x256xf32>
      %cst_18 = arith.constant dense<0.000000e+00> : vector<256xf32>
      %19 = vector.multi_reduction <add>, %18, %cst_18 [0] : vector<1x256xf32> to vector<256xf32>
      %20 = vector.shape_cast %19 : vector<256xf32> to vector<1x256xf32>
      %21 = vector.shape_cast %20 : vector<1x256xf32> to vector<1x1x256xf32>
      %c0_19 = arith.constant 0 : index
      %c0_20 = arith.constant 0 : index
      %c0_21 = arith.constant 0 : index
      %22 = vector.load %arg7[%c0_19, %c0_20, %c0_21] : memref<1x1x256xf32, #tpu.memory_space<vmem>>, vector<1x1x256xf32>
      tpu.vector_store %arg7[%c0_19, %c0_20, %c0_21], %21 {strides = array<i32>} : memref<1x1x256xf32, #tpu.memory_space<vmem>>, vector<1x1x256xf32>,
    } else {
    }
    return
  }
  func.func @transform_0(%arg0: i32, %arg1: i32, %arg2: i32) -> (i32, i32) {
    %c0_i32 = arith.constant 0 : i32
    return %arg0, %arg2 : i32, i32
  }
  func.func @transform_1(%arg0: i32, %arg1: i32, %arg2: i32) -> (i32, i32) {
    %c0_i32 = arith.constant 0 : i32
    return %arg2, %arg1 : i32, i32
  }
  func.func @transform_2(%arg0: i32, %arg1: i32, %arg2: i32) -> (i32, i32) {
    %c0_i32 = arith.constant 0 : i32
    return %arg0, %arg1 : i32, i32
  }
  func.func @transform_3(%arg0: i32, %arg1: i32, %arg2: i32) -> (i32, i32, i32) {
    %c0_i32 = arith.constant 0 : i32
    %c0_i32_0 = arith.constant 0 : i32
    return %arg0, %c0_i32, %arg1 : i32, i32, i32
  }
  func.func @transform_4(%arg0: i32, %arg1: i32, %arg2: i32) -> (i32, i32, i32) {
    %c0_i32 = arith.constant 0 : i32
    %c0_i32_0 = arith.constant 0 : i32
    return %arg0, %c0_i32, %arg1 : i32, i32, i32
  }
}

module attributes {stable_mosaic.version = 11 : i64} {
  func.func @_matmul_stats_kernel(%arg0: i32, %arg1: i32, %arg2: i32, %arg3: memref<4x512xbf16, #tpu.memory_space<vmem>>, %arg4: memref<512x256xbf16, #tpu.memory_space<vmem>>, %arg5: memref<4x256xf32, #tpu.memory_space<vmem>>, %arg6: memref<1x1x256xf32, #tpu.memory_space<vmem>>, %arg7: memref<1x1x256xf32, #tpu.memory_space<vmem>>, %arg8: memref<4x256xf32, #tpu.memory_space<vmem>>) attributes {dimension_semantics = [#tpu.dimension_semantics<parallel>, #tpu.dimension_semantics<parallel>, #tpu.dimension_semantics<arbitrary>], iteration_bounds = array<i64: 1, 2, 1>, scalar_prefetch = 0 : i64, scratch_operands = 1 : i64, tpu.core_type = #tpu.core_type<tc>, window_params = [{transform_indices = @transform_0, window_bounds = array<i64: 4, 512>}, {transform_indices = @transform_1, window_bounds = array<i64: 512, 256>}, {transform_indices = @transform_2, window_bounds = array<i64: 4, 256>}, {transform_indices = @transform_3, window_bounds = array<i64: 1, 1, 256>}, {transform_indices = @transform_4, window_bounds = array<i64: 1, 1, 256>}]} {
    %c0_i32 = arith.constant 0 : i32
    %0 = arith.cmpi eq, %arg2, %c0_i32 : i32
    %1 = arith.extui %0 : i1 to i32
    %c0_i32_0 = arith.constant 0 : i32
    %2 = arith.cmpi ne, %1, %c0_i32_0 : i32
    scf.if %2 {
      %cst_10 = arith.constant 0.000000e+00 : f32
      %12 = vector.broadcast %cst_10 : f32 to vector<4x256xf32>
      %c0_11 = arith.constant 0 : index
      %c0_12 = arith.constant 0 : index
      %13 = vector.load %arg8[%c0_11, %c0_12] : memref<4x256xf32, #tpu.memory_space<vmem>>, vector<4x256xf32>
      tpu.vector_store %arg8[%c0_11, %c0_12], %12 {strides = array<i32>} : memref<4x256xf32, #tpu.memory_space<vmem>>, vector<4x256xf32>,
    } else {
    }
    %c0 = arith.constant 0 : index
    %c0_1 = arith.constant 0 : index
    %3 = vector.load %arg8[%c0, %c0_1] : memref<4x256xf32, #tpu.memory_space<vmem>>, vector<4x256xf32>
    %c0_2 = arith.constant 0 : index
    %c0_3 = arith.constant 0 : index
    %4 = vector.load %arg3[%c0_2, %c0_3] : memref<4x512xbf16, #tpu.memory_space<vmem>>, vector<4x512xbf16>
    %c0_4 = arith.constant 0 : index
    %c0_5 = arith.constant 0 : index
    %5 = vector.load %arg4[%c0_4, %c0_5] : memref<512x256xbf16, #tpu.memory_space<vmem>>, vector<512x256xbf16>
    %cst = arith.constant dense<0.000000e+00> : vector<4x256xf32>
    %6 = tpu.matmul %4, %5, %cst {dimension_numbers = #tpu.dot_dimension_numbers<[1], [0], [0], [1], [0, 0, 1, 1], [], []>} : vector<4x512xbf16>, vector<512x256xbf16>, vector<4x256xf32> -> vector<4x256xf32>
    %7 = arith.addf %3, %6 : vector<4x256xf32>
    %c0_6 = arith.constant 0 : index
    %c0_7 = arith.constant 0 : index
    %8 = vector.load %arg8[%c0_6, %c0_7] : memref<4x256xf32, #tpu.memory_space<vmem>>, vector<4x256xf32>
    tpu.vector_store %arg8[%c0_6, %c0_7], %7 {strides = array<i32>} : memref<4x256xf32, #tpu.memory_space<vmem>>, vector<4x256xf32>,
    %c0_i32_8 = arith.constant 0 : i32
    %9 = arith.cmpi eq, %arg2, %c0_i32_8 : i32
    %10 = arith.extui %9 : i1 to i32
    %c0_i32_9 = arith.constant 0 : i32
    %11 = arith.cmpi ne, %10, %c0_i32_9 : i32
    scf.if %11 {
      %c0_10 = arith.constant 0 : index
      %c0_11 = arith.constant 0 : index
      %12 = vector.load %arg8[%c0_10, %c0_11] : memref<4x256xf32, #tpu.memory_space<vmem>>, vector<4x256xf32>
      %c0_12 = arith.constant 0 : index
      %c0_13 = arith.constant 0 : index
      %13 = vector.load %arg5[%c0_12, %c0_13] : memref<4x256xf32, #tpu.memory_space<vmem>>, vector<4x256xf32>
      tpu.vector_store %arg5[%c0_12, %c0_13], %12 {strides = array<i32>} : memref<4x256xf32, #tpu.memory_space<vmem>>, vector<4x256xf32>,
      %cst_14 = arith.constant dense<0.000000e+00> : vector<256xf32>
      %14 = vector.multi_reduction <add>, %12, %cst_14 [0] : vector<4x256xf32> to vector<256xf32>
      %15 = vector.shape_cast %14 : vector<256xf32> to vector<1x256xf32>
      %16 = vector.shape_cast %15 : vector<1x256xf32> to vector<1x1x256xf32>
      %c0_15 = arith.constant 0 : index
      %c0_16 = arith.constant 0 : index
      %c0_17 = arith.constant 0 : index
      %17 = vector.load %arg6[%c0_15, %c0_16, %c0_17] : memref<1x1x256xf32, #tpu.memory_space<vmem>>, vector<1x1x256xf32>
      tpu.vector_store %arg6[%c0_15, %c0_16, %c0_17], %16 {strides = array<i32>} : memref<1x1x256xf32, #tpu.memory_space<vmem>>, vector<1x1x256xf32>,
      %18 = arith.mulf %12, %12 : vector<4x256xf32>
      %cst_18 = arith.constant dense<0.000000e+00> : vector<256xf32>
      %19 = vector.multi_reduction <add>, %18, %cst_18 [0] : vector<4x256xf32> to vector<256xf32>
      %20 = vector.shape_cast %19 : vector<256xf32> to vector<1x256xf32>
      %21 = vector.shape_cast %20 : vector<1x256xf32> to vector<1x1x256xf32>
      %c0_19 = arith.constant 0 : index
      %c0_20 = arith.constant 0 : index
      %c0_21 = arith.constant 0 : index
      %22 = vector.load %arg7[%c0_19, %c0_20, %c0_21] : memref<1x1x256xf32, #tpu.memory_space<vmem>>, vector<1x1x256xf32>
      tpu.vector_store %arg7[%c0_19, %c0_20, %c0_21], %21 {strides = array<i32>} : memref<1x1x256xf32, #tpu.memory_space<vmem>>, vector<1x1x256xf32>,
    } else {
    }
    return
  }
  func.func @transform_0(%arg0: i32, %arg1: i32, %arg2: i32) -> (i32, i32) {
    %c0_i32 = arith.constant 0 : i32
    return %arg0, %arg2 : i32, i32
  }
  func.func @transform_1(%arg0: i32, %arg1: i32, %arg2: i32) -> (i32, i32) {
    %c0_i32 = arith.constant 0 : i32
    return %arg2, %arg1 : i32, i32
  }
  func.func @transform_2(%arg0: i32, %arg1: i32, %arg2: i32) -> (i32, i32) {
    %c0_i32 = arith.constant 0 : i32
    return %arg0, %arg1 : i32, i32
  }
  func.func @transform_3(%arg0: i32, %arg1: i32, %arg2: i32) -> (i32, i32, i32) {
    %c0_i32 = arith.constant 0 : i32
    %c0_i32_0 = arith.constant 0 : i32
    return %arg0, %c0_i32, %arg1 : i32, i32, i32
  }
  func.func @transform_4(%arg0: i32, %arg1: i32, %arg2: i32) -> (i32, i32, i32) {
    %c0_i32 = arith.constant 0 : i32
    %c0_i32_0 = arith.constant 0 : i32
    return %arg0, %c0_i32, %arg1 : i32, i32, i32
  }
}

module attributes {stable_mosaic.version = 11 : i64} {
  func.func @_msf_kernel(%arg0: i32, %arg1: memref<1x4x512xf32, #tpu.memory_space<vmem>>, %arg2: memref<1x512xf32, #tpu.memory_space<vmem>>, %arg3: memref<1x512xf32, #tpu.memory_space<vmem>>, %arg4: memref<1x4x512xbf16, #tpu.memory_space<vmem>>) attributes {dimension_semantics = [#tpu.dimension_semantics<parallel>], iteration_bounds = array<i64: 1>, scalar_prefetch = 0 : i64, scratch_operands = 0 : i64, tpu.core_type = #tpu.core_type<tc>, window_params = [{transform_indices = @transform_0, window_bounds = array<i64: 1, 4, 512>}, {pipeline_mode = #tpu.pipeline_mode<synchronous>, transform_indices = @transform_1, window_bounds = array<i64: 1, 512>}, {pipeline_mode = #tpu.pipeline_mode<synchronous>, transform_indices = @transform_2, window_bounds = array<i64: 1, 512>}, {transform_indices = @transform_3, window_bounds = array<i64: 1, 4, 512>}]} {
    %c0 = arith.constant 0 : index
    %c0_0 = arith.constant 0 : index
    %c0_1 = arith.constant 0 : index
    %0 = vector.load %arg1[%c0, %c0_0, %c0_1] : memref<1x4x512xf32, #tpu.memory_space<vmem>>, vector<1x4x512xf32>
    %1 = vector.shape_cast %0 : vector<1x4x512xf32> to vector<4x512xf32>
    %c0_2 = arith.constant 0 : index
    %c0_3 = arith.constant 0 : index
    %2 = vector.load %arg2[%c0_2, %c0_3] : memref<1x512xf32, #tpu.memory_space<vmem>>, vector<1x512xf32>
    %3 = vector.broadcast %2 : vector<1x512xf32> to vector<4x512xf32>
    %4 = arith.mulf %1, %3 : vector<4x512xf32>
    %c0_4 = arith.constant 0 : index
    %c0_5 = arith.constant 0 : index
    %5 = vector.load %arg3[%c0_4, %c0_5] : memref<1x512xf32, #tpu.memory_space<vmem>>, vector<1x512xf32>
    %6 = vector.broadcast %5 : vector<1x512xf32> to vector<4x512xf32>
    %7 = arith.addf %4, %6 : vector<4x512xf32>
    %cst = arith.constant 1.000000e+00 : f32
    %8 = vector.broadcast %cst : f32 to vector<4x512xf32>
    %9 = arith.subf %7, %8 : vector<4x512xf32>
    %cst_6 = arith.constant 1.000000e+00 : f32
    %10 = vector.broadcast %cst_6 : f32 to vector<4x512xf32>
    %11 = arith.addf %9, %10 : vector<4x512xf32>
    %12 = math.floor %11 : vector<4x512xf32>
    %cst_7 = arith.constant 0.000000e+00 : f32
    %cst_8 = arith.constant 8.000000e+00 : f32
    %13 = vector.broadcast %cst_7 : f32 to vector<4x512xf32>
    %14 = arith.maximumf %13, %12 : vector<4x512xf32>
    %15 = vector.broadcast %cst_8 : f32 to vector<4x512xf32>
    %16 = arith.minimumf %15, %14 : vector<4x512xf32>
    %17 = arith.truncf %16 : vector<4x512xf32> to vector<4x512xbf16>
    %c0_9 = arith.constant 0 : index
    %c0_10 = arith.constant 0 : index
    %c0_11 = arith.constant 0 : index
    %18 = vector.load %arg4[%c0_9, %c0_10, %c0_11] : memref<1x4x512xbf16, #tpu.memory_space<vmem>>, vector<1x4x512xbf16>
    %19 = vector.shape_cast %18 : vector<1x4x512xbf16> to vector<4x512xbf16>
    %20 = vector.shape_cast %17 : vector<4x512xbf16> to vector<1x4x512xbf16>
    tpu.vector_store %arg4[%c0_9, %c0_10, %c0_11], %20 {strides = array<i32>} : memref<1x4x512xbf16, #tpu.memory_space<vmem>>, vector<1x4x512xbf16>,
    return
  }
  func.func @transform_0(%arg0: i32) -> (i32, i32, i32) {
    %c0_i32 = arith.constant 0 : i32
    %c0_i32_0 = arith.constant 0 : i32
    %c0_i32_1 = arith.constant 0 : i32
    return %c0_i32, %arg0, %c0_i32_0 : i32, i32, i32
  }
  func.func @transform_1(%arg0: i32) -> (i32, i32) {
    %c0_i32 = arith.constant 0 : i32
    %c0_i32_0 = arith.constant 0 : i32
    %c0_i32_1 = arith.constant 0 : i32
    return %c0_i32, %c0_i32_0 : i32, i32
  }
  func.func @transform_2(%arg0: i32) -> (i32, i32) {
    %c0_i32 = arith.constant 0 : i32
    %c0_i32_0 = arith.constant 0 : i32
    %c0_i32_1 = arith.constant 0 : i32
    return %c0_i32, %c0_i32_0 : i32, i32
  }
  func.func @transform_3(%arg0: i32) -> (i32, i32, i32) {
    %c0_i32 = arith.constant 0 : i32
    %c0_i32_0 = arith.constant 0 : i32
    %c0_i32_1 = arith.constant 0 : i32
    return %c0_i32, %arg0, %c0_i32_0 : i32, i32, i32
  }
}

module attributes {stable_mosaic.version = 11 : i64} {
  func.func @_msf_kernel(%arg0: i32, %arg1: memref<1x4x384xf32, #tpu.memory_space<vmem>>, %arg2: memref<1x384xf32, #tpu.memory_space<vmem>>, %arg3: memref<1x384xf32, #tpu.memory_space<vmem>>, %arg4: memref<1x4x384xbf16, #tpu.memory_space<vmem>>) attributes {dimension_semantics = [#tpu.dimension_semantics<parallel>], iteration_bounds = array<i64: 1>, scalar_prefetch = 0 : i64, scratch_operands = 0 : i64, tpu.core_type = #tpu.core_type<tc>, window_params = [{transform_indices = @transform_0, window_bounds = array<i64: 1, 4, 384>}, {pipeline_mode = #tpu.pipeline_mode<synchronous>, transform_indices = @transform_1, window_bounds = array<i64: 1, 384>}, {pipeline_mode = #tpu.pipeline_mode<synchronous>, transform_indices = @transform_2, window_bounds = array<i64: 1, 384>}, {transform_indices = @transform_3, window_bounds = array<i64: 1, 4, 384>}]} {
    %c0 = arith.constant 0 : index
    %c0_0 = arith.constant 0 : index
    %c0_1 = arith.constant 0 : index
    %0 = vector.load %arg1[%c0, %c0_0, %c0_1] : memref<1x4x384xf32, #tpu.memory_space<vmem>>, vector<1x4x384xf32>
    %1 = vector.shape_cast %0 : vector<1x4x384xf32> to vector<4x384xf32>
    %c0_2 = arith.constant 0 : index
    %c0_3 = arith.constant 0 : index
    %2 = vector.load %arg2[%c0_2, %c0_3] : memref<1x384xf32, #tpu.memory_space<vmem>>, vector<1x384xf32>
    %3 = vector.broadcast %2 : vector<1x384xf32> to vector<4x384xf32>
    %4 = arith.mulf %1, %3 : vector<4x384xf32>
    %c0_4 = arith.constant 0 : index
    %c0_5 = arith.constant 0 : index
    %5 = vector.load %arg3[%c0_4, %c0_5] : memref<1x384xf32, #tpu.memory_space<vmem>>, vector<1x384xf32>
    %6 = vector.broadcast %5 : vector<1x384xf32> to vector<4x384xf32>
    %7 = arith.addf %4, %6 : vector<4x384xf32>
    %cst = arith.constant 1.000000e+00 : f32
    %8 = vector.broadcast %cst : f32 to vector<4x384xf32>
    %9 = arith.subf %7, %8 : vector<4x384xf32>
    %cst_6 = arith.constant 1.000000e+00 : f32
    %10 = vector.broadcast %cst_6 : f32 to vector<4x384xf32>
    %11 = arith.addf %9, %10 : vector<4x384xf32>
    %12 = math.floor %11 : vector<4x384xf32>
    %cst_7 = arith.constant 0.000000e+00 : f32
    %cst_8 = arith.constant 8.000000e+00 : f32
    %13 = vector.broadcast %cst_7 : f32 to vector<4x384xf32>
    %14 = arith.maximumf %13, %12 : vector<4x384xf32>
    %15 = vector.broadcast %cst_8 : f32 to vector<4x384xf32>
    %16 = arith.minimumf %15, %14 : vector<4x384xf32>
    %17 = arith.truncf %16 : vector<4x384xf32> to vector<4x384xbf16>
    %c0_9 = arith.constant 0 : index
    %c0_10 = arith.constant 0 : index
    %c0_11 = arith.constant 0 : index
    %18 = vector.load %arg4[%c0_9, %c0_10, %c0_11] : memref<1x4x384xbf16, #tpu.memory_space<vmem>>, vector<1x4x384xbf16>
    %19 = vector.shape_cast %18 : vector<1x4x384xbf16> to vector<4x384xbf16>
    %20 = vector.shape_cast %17 : vector<4x384xbf16> to vector<1x4x384xbf16>
    tpu.vector_store %arg4[%c0_9, %c0_10, %c0_11], %20 {strides = array<i32>} : memref<1x4x384xbf16, #tpu.memory_space<vmem>>, vector<1x4x384xbf16>,
    return
  }
  func.func @transform_0(%arg0: i32) -> (i32, i32, i32) {
    %c0_i32 = arith.constant 0 : i32
    %c0_i32_0 = arith.constant 0 : i32
    %c0_i32_1 = arith.constant 0 : i32
    return %c0_i32, %arg0, %c0_i32_0 : i32, i32, i32
  }
  func.func @transform_1(%arg0: i32) -> (i32, i32) {
    %c0_i32 = arith.constant 0 : i32
    %c0_i32_0 = arith.constant 0 : i32
    %c0_i32_1 = arith.constant 0 : i32
    return %c0_i32, %c0_i32_0 : i32, i32
  }
  func.func @transform_2(%arg0: i32) -> (i32, i32) {
    %c0_i32 = arith.constant 0 : i32
    %c0_i32_0 = arith.constant 0 : i32
    %c0_i32_1 = arith.constant 0 : i32
    return %c0_i32, %c0_i32_0 : i32, i32
  }
  func.func @transform_3(%arg0: i32) -> (i32, i32, i32) {
    %c0_i32 = arith.constant 0 : i32
    %c0_i32_0 = arith.constant 0 : i32
    %c0_i32_1 = arith.constant 0 : i32
    return %c0_i32, %arg0, %c0_i32_0 : i32, i32, i32
  }
}

module attributes {stable_mosaic.version = 11 : i64} {
  func.func @_matmul_stats_kernel(%arg0: i32, %arg1: i32, %arg2: i32, %arg3: memref<1x128xbf16, #tpu.memory_space<vmem>>, %arg4: memref<128x128xbf16, #tpu.memory_space<vmem>>, %arg5: memref<1x128xf32, #tpu.memory_space<vmem>>, %arg6: memref<1x1x128xf32, #tpu.memory_space<vmem>>, %arg7: memref<1x1x128xf32, #tpu.memory_space<vmem>>, %arg8: memref<1x128xf32, #tpu.memory_space<vmem>>) attributes {dimension_semantics = [#tpu.dimension_semantics<parallel>, #tpu.dimension_semantics<parallel>, #tpu.dimension_semantics<arbitrary>], iteration_bounds = array<i64: 1, 1, 9>, scalar_prefetch = 0 : i64, scratch_operands = 1 : i64, tpu.core_type = #tpu.core_type<tc>, window_params = [{transform_indices = @transform_0, window_bounds = array<i64: 1, 128>}, {transform_indices = @transform_1, window_bounds = array<i64: 128, 128>}, {transform_indices = @transform_2, window_bounds = array<i64: 1, 128>}, {transform_indices = @transform_3, window_bounds = array<i64: 1, 1, 128>}, {transform_indices = @transform_4, window_bounds = array<i64: 1, 1, 128>}]} {
    %c0_i32 = arith.constant 0 : i32
    %0 = arith.cmpi eq, %arg2, %c0_i32 : i32
    %1 = arith.extui %0 : i1 to i32
    %c0_i32_0 = arith.constant 0 : i32
    %2 = arith.cmpi ne, %1, %c0_i32_0 : i32
    scf.if %2 {
      %cst_9 = arith.constant 0.000000e+00 : f32
      %12 = vector.broadcast %cst_9 : f32 to vector<1x128xf32>
      %c0_10 = arith.constant 0 : index
      %c0_11 = arith.constant 0 : index
      %13 = vector.load %arg8[%c0_10, %c0_11] : memref<1x128xf32, #tpu.memory_space<vmem>>, vector<1x128xf32>
      tpu.vector_store %arg8[%c0_10, %c0_11], %12 {strides = array<i32>} : memref<1x128xf32, #tpu.memory_space<vmem>>, vector<1x128xf32>,
    } else {
    }
    %c0 = arith.constant 0 : index
    %c0_1 = arith.constant 0 : index
    %3 = vector.load %arg8[%c0, %c0_1] : memref<1x128xf32, #tpu.memory_space<vmem>>, vector<1x128xf32>
    %c0_2 = arith.constant 0 : index
    %c0_3 = arith.constant 0 : index
    %4 = vector.load %arg3[%c0_2, %c0_3] : memref<1x128xbf16, #tpu.memory_space<vmem>>, vector<1x128xbf16>
    %c0_4 = arith.constant 0 : index
    %c0_5 = arith.constant 0 : index
    %5 = vector.load %arg4[%c0_4, %c0_5] : memref<128x128xbf16, #tpu.memory_space<vmem>>, vector<128x128xbf16>
    %cst = arith.constant dense<0.000000e+00> : vector<1x128xf32>
    %6 = tpu.matmul %4, %5, %cst {dimension_numbers = #tpu.dot_dimension_numbers<[1], [0], [0], [1], [0, 0, 1, 1], [], []>} : vector<1x128xbf16>, vector<128x128xbf16>, vector<1x128xf32> -> vector<1x128xf32>
    %7 = arith.addf %3, %6 : vector<1x128xf32>
    %c0_6 = arith.constant 0 : index
    %c0_7 = arith.constant 0 : index
    %8 = vector.load %arg8[%c0_6, %c0_7] : memref<1x128xf32, #tpu.memory_space<vmem>>, vector<1x128xf32>
    tpu.vector_store %arg8[%c0_6, %c0_7], %7 {strides = array<i32>} : memref<1x128xf32, #tpu.memory_space<vmem>>, vector<1x128xf32>,
    %c8_i32 = arith.constant 8 : i32
    %9 = arith.cmpi eq, %arg2, %c8_i32 : i32
    %10 = arith.extui %9 : i1 to i32
    %c0_i32_8 = arith.constant 0 : i32
    %11 = arith.cmpi ne, %10, %c0_i32_8 : i32
    scf.if %11 {
      %c0_9 = arith.constant 0 : index
      %c0_10 = arith.constant 0 : index
      %12 = vector.load %arg8[%c0_9, %c0_10] : memref<1x128xf32, #tpu.memory_space<vmem>>, vector<1x128xf32>
      %c0_11 = arith.constant 0 : index
      %c0_12 = arith.constant 0 : index
      %13 = vector.load %arg5[%c0_11, %c0_12] : memref<1x128xf32, #tpu.memory_space<vmem>>, vector<1x128xf32>
      tpu.vector_store %arg5[%c0_11, %c0_12], %12 {strides = array<i32>} : memref<1x128xf32, #tpu.memory_space<vmem>>, vector<1x128xf32>,
      %cst_13 = arith.constant dense<0.000000e+00> : vector<128xf32>
      %14 = vector.multi_reduction <add>, %12, %cst_13 [0] : vector<1x128xf32> to vector<128xf32>
      %15 = vector.shape_cast %14 : vector<128xf32> to vector<1x128xf32>
      %16 = vector.shape_cast %15 : vector<1x128xf32> to vector<1x1x128xf32>
      %c0_14 = arith.constant 0 : index
      %c0_15 = arith.constant 0 : index
      %c0_16 = arith.constant 0 : index
      %17 = vector.load %arg6[%c0_14, %c0_15, %c0_16] : memref<1x1x128xf32, #tpu.memory_space<vmem>>, vector<1x1x128xf32>
      tpu.vector_store %arg6[%c0_14, %c0_15, %c0_16], %16 {strides = array<i32>} : memref<1x1x128xf32, #tpu.memory_space<vmem>>, vector<1x1x128xf32>,
      %18 = arith.mulf %12, %12 : vector<1x128xf32>
      %cst_17 = arith.constant dense<0.000000e+00> : vector<128xf32>
      %19 = vector.multi_reduction <add>, %18, %cst_17 [0] : vector<1x128xf32> to vector<128xf32>
      %20 = vector.shape_cast %19 : vector<128xf32> to vector<1x128xf32>
      %21 = vector.shape_cast %20 : vector<1x128xf32> to vector<1x1x128xf32>
      %c0_18 = arith.constant 0 : index
      %c0_19 = arith.constant 0 : index
      %c0_20 = arith.constant 0 : index
      %22 = vector.load %arg7[%c0_18, %c0_19, %c0_20] : memref<1x1x128xf32, #tpu.memory_space<vmem>>, vector<1x1x128xf32>
      tpu.vector_store %arg7[%c0_18, %c0_19, %c0_20], %21 {strides = array<i32>} : memref<1x1x128xf32, #tpu.memory_space<vmem>>, vector<1x1x128xf32>,
    } else {
    }
    return
  }
  func.func @transform_0(%arg0: i32, %arg1: i32, %arg2: i32) -> (i32, i32) {
    %c0_i32 = arith.constant 0 : i32
    return %arg0, %arg2 : i32, i32
  }
  func.func @transform_1(%arg0: i32, %arg1: i32, %arg2: i32) -> (i32, i32) {
    %c0_i32 = arith.constant 0 : i32
    return %arg2, %arg1 : i32, i32
  }
  func.func @transform_2(%arg0: i32, %arg1: i32, %arg2: i32) -> (i32, i32) {
    %c0_i32 = arith.constant 0 : i32
    return %arg0, %arg1 : i32, i32
  }
  func.func @transform_3(%arg0: i32, %arg1: i32, %arg2: i32) -> (i32, i32, i32) {
    %c0_i32 = arith.constant 0 : i32
    %c0_i32_0 = arith.constant 0 : i32
    return %arg0, %c0_i32, %arg1 : i32, i32, i32
  }
  func.func @transform_4(%arg0: i32, %arg1: i32, %arg2: i32) -> (i32, i32, i32) {
    %c0_i32 = arith.constant 0 : i32
    %c0_i32_0 = arith.constant 0 : i32
    return %arg0, %c0_i32, %arg1 : i32, i32, i32
  }
}

module attributes {stable_mosaic.version = 11 : i64} {
  func.func @_affine_kernel(%arg0: i32, %arg1: memref<4x128xf32, #tpu.memory_space<vmem>>, %arg2: memref<1x128xf32, #tpu.memory_space<vmem>>, %arg3: memref<1x128xf32, #tpu.memory_space<vmem>>, %arg4: memref<4x128xf32, #tpu.memory_space<vmem>>) attributes {dimension_semantics = [#tpu.dimension_semantics<parallel>], iteration_bounds = array<i64: 1>, scalar_prefetch = 0 : i64, scratch_operands = 0 : i64, tpu.core_type = #tpu.core_type<tc>, window_params = [{transform_indices = @transform_0, window_bounds = array<i64: 4, 128>}, {pipeline_mode = #tpu.pipeline_mode<synchronous>, transform_indices = @transform_1, window_bounds = array<i64: 1, 128>}, {pipeline_mode = #tpu.pipeline_mode<synchronous>, transform_indices = @transform_2, window_bounds = array<i64: 1, 128>}, {transform_indices = @transform_3, window_bounds = array<i64: 4, 128>}]} {
    %c0 = arith.constant 0 : index
    %c0_0 = arith.constant 0 : index
    %0 = vector.load %arg1[%c0, %c0_0] : memref<4x128xf32, #tpu.memory_space<vmem>>, vector<4x128xf32>
    %c0_1 = arith.constant 0 : index
    %c0_2 = arith.constant 0 : index
    %1 = vector.load %arg2[%c0_1, %c0_2] : memref<1x128xf32, #tpu.memory_space<vmem>>, vector<1x128xf32>
    %2 = vector.broadcast %1 : vector<1x128xf32> to vector<4x128xf32>
    %3 = arith.mulf %0, %2 : vector<4x128xf32>
    %c0_3 = arith.constant 0 : index
    %c0_4 = arith.constant 0 : index
    %4 = vector.load %arg3[%c0_3, %c0_4] : memref<1x128xf32, #tpu.memory_space<vmem>>, vector<1x128xf32>
    %5 = vector.broadcast %4 : vector<1x128xf32> to vector<4x128xf32>
    %6 = arith.addf %3, %5 : vector<4x128xf32>
    %c0_5 = arith.constant 0 : index
    %c0_6 = arith.constant 0 : index
    %7 = vector.load %arg4[%c0_5, %c0_6] : memref<4x128xf32, #tpu.memory_space<vmem>>, vector<4x128xf32>
    tpu.vector_store %arg4[%c0_5, %c0_6], %6 {strides = array<i32>} : memref<4x128xf32, #tpu.memory_space<vmem>>, vector<4x128xf32>,
    return
  }
  func.func @transform_0(%arg0: i32) -> (i32, i32) {
    %c0_i32 = arith.constant 0 : i32
    %c0_i32_0 = arith.constant 0 : i32
    return %arg0, %c0_i32 : i32, i32
  }
  func.func @transform_1(%arg0: i32) -> (i32, i32) {
    %c0_i32 = arith.constant 0 : i32
    %c0_i32_0 = arith.constant 0 : i32
    %c0_i32_1 = arith.constant 0 : i32
    return %c0_i32, %c0_i32_0 : i32, i32
  }
  func.func @transform_2(%arg0: i32) -> (i32, i32) {
    %c0_i32 = arith.constant 0 : i32
    %c0_i32_0 = arith.constant 0 : i32
    %c0_i32_1 = arith.constant 0 : i32
    return %c0_i32, %c0_i32_0 : i32, i32
  }
  func.func @transform_3(%arg0: i32) -> (i32, i32) {
    %c0_i32 = arith.constant 0 : i32
    %c0_i32_0 = arith.constant 0 : i32
    return %arg0, %c0_i32 : i32, i32
  }
}

module attributes {stable_mosaic.version = 11 : i64} {
  func.func @_msf_kernel(%arg0: i32, %arg1: memref<1x1x512xf32, #tpu.memory_space<vmem>>, %arg2: memref<1x512xf32, #tpu.memory_space<vmem>>, %arg3: memref<1x512xf32, #tpu.memory_space<vmem>>, %arg4: memref<1x1x512xbf16, #tpu.memory_space<vmem>>) attributes {dimension_semantics = [#tpu.dimension_semantics<parallel>], iteration_bounds = array<i64: 1>, scalar_prefetch = 0 : i64, scratch_operands = 0 : i64, tpu.core_type = #tpu.core_type<tc>, window_params = [{transform_indices = @transform_0, window_bounds = array<i64: 1, 1, 512>}, {pipeline_mode = #tpu.pipeline_mode<synchronous>, transform_indices = @transform_1, window_bounds = array<i64: 1, 512>}, {pipeline_mode = #tpu.pipeline_mode<synchronous>, transform_indices = @transform_2, window_bounds = array<i64: 1, 512>}, {transform_indices = @transform_3, window_bounds = array<i64: 1, 1, 512>}]} {
    %c0 = arith.constant 0 : index
    %c0_0 = arith.constant 0 : index
    %c0_1 = arith.constant 0 : index
    %0 = vector.load %arg1[%c0, %c0_0, %c0_1] : memref<1x1x512xf32, #tpu.memory_space<vmem>>, vector<1x1x512xf32>
    %1 = vector.shape_cast %0 : vector<1x1x512xf32> to vector<1x512xf32>
    %c0_2 = arith.constant 0 : index
    %c0_3 = arith.constant 0 : index
    %2 = vector.load %arg2[%c0_2, %c0_3] : memref<1x512xf32, #tpu.memory_space<vmem>>, vector<1x512xf32>
    %3 = arith.mulf %1, %2 : vector<1x512xf32>
    %c0_4 = arith.constant 0 : index
    %c0_5 = arith.constant 0 : index
    %4 = vector.load %arg3[%c0_4, %c0_5] : memref<1x512xf32, #tpu.memory_space<vmem>>, vector<1x512xf32>
    %5 = arith.addf %3, %4 : vector<1x512xf32>
    %cst = arith.constant 1.000000e+00 : f32
    %6 = vector.broadcast %cst : f32 to vector<1x512xf32>
    %7 = arith.subf %5, %6 : vector<1x512xf32>
    %cst_6 = arith.constant 1.000000e+00 : f32
    %8 = vector.broadcast %cst_6 : f32 to vector<1x512xf32>
    %9 = arith.addf %7, %8 : vector<1x512xf32>
    %10 = math.floor %9 : vector<1x512xf32>
    %cst_7 = arith.constant 0.000000e+00 : f32
    %cst_8 = arith.constant 8.000000e+00 : f32
    %11 = vector.broadcast %cst_7 : f32 to vector<1x512xf32>
    %12 = arith.maximumf %11, %10 : vector<1x512xf32>
    %13 = vector.broadcast %cst_8 : f32 to vector<1x512xf32>
    %14 = arith.minimumf %13, %12 : vector<1x512xf32>
    %15 = arith.truncf %14 : vector<1x512xf32> to vector<1x512xbf16>
    %c0_9 = arith.constant 0 : index
    %c0_10 = arith.constant 0 : index
    %c0_11 = arith.constant 0 : index
    %16 = vector.load %arg4[%c0_9, %c0_10, %c0_11] : memref<1x1x512xbf16, #tpu.memory_space<vmem>>, vector<1x1x512xbf16>
    %17 = vector.shape_cast %16 : vector<1x1x512xbf16> to vector<1x512xbf16>
    %18 = vector.shape_cast %15 : vector<1x512xbf16> to vector<1x1x512xbf16>
    tpu.vector_store %arg4[%c0_9, %c0_10, %c0_11], %18 {strides = array<i32>} : memref<1x1x512xbf16, #tpu.memory_space<vmem>>, vector<1x1x512xbf16>,
    return
  }
  func.func @transform_0(%arg0: i32) -> (i32, i32, i32) {
    %c0_i32 = arith.constant 0 : i32
    %c0_i32_0 = arith.constant 0 : i32
    %c0_i32_1 = arith.constant 0 : i32
    return %c0_i32, %arg0, %c0_i32_0 : i32, i32, i32
  }
  func.func @transform_1(%arg0: i32) -> (i32, i32) {
    %c0_i32 = arith.constant 0 : i32
    %c0_i32_0 = arith.constant 0 : i32
    %c0_i32_1 = arith.constant 0 : i32
    return %c0_i32, %c0_i32_0 : i32, i32
  }
  func.func @transform_2(%arg0: i32) -> (i32, i32) {
    %c0_i32 = arith.constant 0 : i32
    %c0_i32_0 = arith.constant 0 : i32
    %c0_i32_1 = arith.constant 0 : i32
    return %c0_i32, %c0_i32_0 : i32, i32
  }
  func.func @transform_3(%arg0: i32) -> (i32, i32, i32) {
    %c0_i32 = arith.constant 0 : i32
    %c0_i32_0 = arith.constant 0 : i32
    %c0_i32_1 = arith.constant 0 : i32
    return %c0_i32, %arg0, %c0_i32_0 : i32, i32, i32
  }
}

module attributes {stable_mosaic.version = 11 : i64} {
  func.func @_residual_kernel(%arg0: i32, %arg1: memref<1x1024xf32, #tpu.memory_space<vmem>>, %arg2: memref<1x1024xf32, #tpu.memory_space<vmem>>, %arg3: memref<1x1024xf32, #tpu.memory_space<vmem>>, %arg4: memref<1x1024xf32, #tpu.memory_space<vmem>>, %arg5: memref<1x1024xf32, #tpu.memory_space<vmem>>, %arg6: memref<1x1024xf32, #tpu.memory_space<vmem>>, %arg7: memref<1x1024xf32, #tpu.memory_space<vmem>>) attributes {dimension_semantics = [#tpu.dimension_semantics<parallel>], iteration_bounds = array<i64: 1>, scalar_prefetch = 0 : i64, scratch_operands = 0 : i64, tpu.core_type = #tpu.core_type<tc>, window_params = [{transform_indices = @transform_0, window_bounds = array<i64: 1, 1024>}, {pipeline_mode = #tpu.pipeline_mode<synchronous>, transform_indices = @transform_1, window_bounds = array<i64: 1, 1024>}, {pipeline_mode = #tpu.pipeline_mode<synchronous>, transform_indices = @transform_2, window_bounds = array<i64: 1, 1024>}, {transform_indices = @transform_3, window_bounds = array<i64: 1, 1024>}, {pipeline_mode = #tpu.pipeline_mode<synchronous>, transform_indices = @transform_4, window_bounds = array<i64: 1, 1024>}, {pipeline_mode = #tpu.pipeline_mode<synchronous>, transform_indices = @transform_5, window_bounds = array<i64: 1, 1024>}, {transform_indices = @transform_6, window_bounds = array<i64: 1, 1024>}]} {
    %c0 = arith.constant 0 : index
    %c0_0 = arith.constant 0 : index
    %0 = vector.load %arg1[%c0, %c0_0] : memref<1x1024xf32, #tpu.memory_space<vmem>>, vector<1x1024xf32>
    %c0_1 = arith.constant 0 : index
    %c0_2 = arith.constant 0 : index
    %1 = vector.load %arg2[%c0_1, %c0_2] : memref<1x1024xf32, #tpu.memory_space<vmem>>, vector<1x1024xf32>
    %2 = arith.mulf %0, %1 : vector<1x1024xf32>
    %c0_3 = arith.constant 0 : index
    %c0_4 = arith.constant 0 : index
    %3 = vector.load %arg3[%c0_3, %c0_4] : memref<1x1024xf32, #tpu.memory_space<vmem>>, vector<1x1024xf32>
    %4 = arith.addf %2, %3 : vector<1x1024xf32>
    %c0_5 = arith.constant 0 : index
    %c0_6 = arith.constant 0 : index
    %5 = vector.load %arg4[%c0_5, %c0_6] : memref<1x1024xf32, #tpu.memory_space<vmem>>, vector<1x1024xf32>
    %c0_7 = arith.constant 0 : index
    %c0_8 = arith.constant 0 : index
    %6 = vector.load %arg5[%c0_7, %c0_8] : memref<1x1024xf32, #tpu.memory_space<vmem>>, vector<1x1024xf32>
    %7 = arith.mulf %5, %6 : vector<1x1024xf32>
    %8 = arith.addf %4, %7 : vector<1x1024xf32>
    %c0_9 = arith.constant 0 : index
    %c0_10 = arith.constant 0 : index
    %9 = vector.load %arg6[%c0_9, %c0_10] : memref<1x1024xf32, #tpu.memory_space<vmem>>, vector<1x1024xf32>
    %10 = arith.addf %8, %9 : vector<1x1024xf32>
    %c0_11 = arith.constant 0 : index
    %c0_12 = arith.constant 0 : index
    %11 = vector.load %arg7[%c0_11, %c0_12] : memref<1x1024xf32, #tpu.memory_space<vmem>>, vector<1x1024xf32>
    tpu.vector_store %arg7[%c0_11, %c0_12], %10 {strides = array<i32>} : memref<1x1024xf32, #tpu.memory_space<vmem>>, vector<1x1024xf32>,
    return
  }
  func.func @transform_0(%arg0: i32) -> (i32, i32) {
    %c0_i32 = arith.constant 0 : i32
    %c0_i32_0 = arith.constant 0 : i32
    return %arg0, %c0_i32 : i32, i32
  }
  func.func @transform_1(%arg0: i32) -> (i32, i32) {
    %c0_i32 = arith.constant 0 : i32
    %c0_i32_0 = arith.constant 0 : i32
    %c0_i32_1 = arith.constant 0 : i32
    return %c0_i32, %c0_i32_0 : i32, i32
  }
  func.func @transform_2(%arg0: i32) -> (i32, i32) {
    %c0_i32 = arith.constant 0 : i32
    %c0_i32_0 = arith.constant 0 : i32
    %c0_i32_1 = arith.constant 0 : i32
    return %c0_i32, %c0_i32_0 : i32, i32
  }
  func.func @transform_3(%arg0: i32) -> (i32, i32) {
    %c0_i32 = arith.constant 0 : i32
    %c0_i32_0 = arith.constant 0 : i32
    return %arg0, %c0_i32 : i32, i32
  }
  func.func @transform_4(%arg0: i32) -> (i32, i32) {
    %c0_i32 = arith.constant 0 : i32
    %c0_i32_0 = arith.constant 0 : i32
    %c0_i32_1 = arith.constant 0 : i32
    return %c0_i32, %c0_i32_0 : i32, i32
  }
  func.func @transform_5(%arg0: i32) -> (i32, i32) {
    %c0_i32 = arith.constant 0 : i32
    %c0_i32_0 = arith.constant 0 : i32
    %c0_i32_1 = arith.constant 0 : i32
    return %c0_i32, %c0_i32_0 : i32, i32
  }
  func.func @transform_6(%arg0: i32) -> (i32, i32) {
    %c0_i32 = arith.constant 0 : i32
    %c0_i32_0 = arith.constant 0 : i32
    return %arg0, %c0_i32 : i32, i32
  }
}

</mosaic_0001>

<bundles_post_ra>
// kernel: _lambda_.58
= control target key start
LH: loop header
LB: loop body
LE: loop exit
PB: predicated region body
PF: predicated region fallthrough
CT: control target
= control target key end

     0   :  { %vm46_vm0 = vcmask 523264   ;;  %s143_s0 = inlined_call_operand.vmem [shape: f32[64,64], index: 0, kind: input, shape index: {}]   ;;  %s144_s1 = inlined_call_operand.vmem [shape: f32[1,64], index: 1, kind: input, shape index: {}]   ;;  %s145_s2 = inlined_call_operand.vmem [shape: f32[1,64], index: 2, kind: input, shape index: {}]   ;;  %s146_s3 = inlined_call_operand.vmem [shape: f32[64,64], index: 3, kind: output, shape index: {}]  }
   0x1   :  { %v14_v0 = vld [vmem:[%s143_s0] sm:$0xff]  ;;  %v15_v3 = vld [vmem:[%s143_s0 + $0x8] sm:$0xff]  ;;  %v16_v6 = vld [vmem:[%s143_s0 + $0x10] sm:$0xff] }
   0x2   :  { %v59_v1 = vld [vmem:[%s144_s1] ss:$0 sm:$0xff]  ;;  %v17_v7 = vld [vmem:[%s143_s0 + $0x18] sm:$0xff]  ;;  %v19_v12 = vld [vmem:[%s143_s0 + $0x28] sm:$0xff] }
   0x3   :  { %v60_v2 = vld [vmem:[%s145_s2] ss:$0 sm:$0xff]  ;;  %v26_v4 = vmul.f32 %v59_v1, %v14_v0  ;;  %v27_v5 = vmul.f32 %v59_v1, %v15_v3  ;;  %v28_v9 = vmul.f32 %v59_v1, %v16_v6  ;;  %v29_v10 = vmul.f32 %v59_v1, %v17_v7  ;;  %v20_v13 = vld [vmem:[%s143_s0 + $0x30] sm:$0xff]  ;;  %v21_v14 = vld [vmem:[%s143_s0 + $0x38] sm:$0xff] }
   0x4   :  { %v18_v8 = vld [vmem:[%s143_s0 + $0x20] sm:$0xff]  ;;  %v31_v17 = vmul.f32 %v59_v1, %v19_v12  ;;  %v32_v18 = vmul.f32 %v59_v1, %v20_v13  ;;  %v33_v21 = vmul.f32 %v59_v1, %v21_v14 }
   0x5   :  { %v30_v11 = vmul.f32 %v59_v1, %v18_v8  ;;  %v38_v15 = vadd.f32 %v60_v2, %v26_v4  ;;  %v39_v16 = vadd.f32 %v60_v2, %v27_v5  ;;  %v40_v19 = vadd.f32 %v60_v2, %v28_v9 }
   0x6   :  { %v41_v20 = vadd.f32 %v60_v2, %v29_v10  ;;  %v43_v23 = vadd.f32 %v60_v2, %v31_v17  ;;  %v44_v24 = vadd.f32 %v60_v2, %v32_v18  ;;  %v45_v25 = vadd.f32 %v60_v2, %v33_v21 }
   0x7   :  { %47 = vst.msk [vmem:[%s146_s3] sm:$0xff] %vm46_vm0, %v38_v15  ;;  %v42_v22 = vadd.f32 %v60_v2, %v30_v11 }
   0x8   :  { %48 = vst.msk [vmem:[%s146_s3 + $0x8] sm:$0xff] %vm46_vm0, %v39_v16 }
   0x9   :  { %49 = vst.msk [vmem:[%s146_s3 + $0x10] sm:$0xff] %vm46_vm0, %v40_v19 }
   0xa   :  { %50 = vst.msk [vmem:[%s146_s3 + $0x18] sm:$0xff] %vm46_vm0, %v41_v20 }
   0xb   :  { %51 = vst.msk [vmem:[%s146_s3 + $0x20] sm:$0xff] %vm46_vm0, %v42_v22 }
   0xc   :  { %52 = vst.msk [vmem:[%s146_s3 + $0x28] sm:$0xff] %vm46_vm0, %v43_v23 }
   0xd   :  { %53 = vst.msk [vmem:[%s146_s3 + $0x30] sm:$0xff] %vm46_vm0, %v44_v24 }
   0xe   :  { %54 = vst.msk [vmem:[%s146_s3 + $0x38] sm:$0xff] %vm46_vm0, %v45_v25 }

// kernel: _lambda_.68
= control target key start
LH: loop header
LB: loop body
LE: loop exit
PB: predicated region body
PF: predicated region fallthrough
CT: control target
= control target key end

     0   :  { %vm95_vm0 = vcmask 523264   ;;  %s355_s1 = inlined_call_operand.vmem [shape: bf16[64,128], index: 1, kind: input, shape index: {}]   ;;  %s356_s0 = inlined_call_operand.vmem [shape: bf16[64,64], index: 0, kind: input, shape index: {}]   ;;  %s357_s2 = inlined_call_operand.vmem [shape: f32[64,128], index: 2, kind: output, shape index: {0}]   ;;  %s358_s3 = inlined_call_operand.vmem [shape: f32[1,1,128], index: 3, kind: output, shape index: {1}]   ;;  %s359_s4 = inlined_call_operand.vmem [shape: f32[1,1,128], index: 4, kind: output, shape index: {2}]  }
   0x1   :  { %v263_v0 = vld [vmem:[%s355_s1 + $0x18] sm:$0xff]  ;;  %v262_v1 = vld [vmem:[%s355_s1 + $0x10] sm:$0xff]  ;;  %v261_v2 = vld [vmem:[%s355_s1 + $0x8] sm:$0xff] }
   0x2   :  { %112 = vmatpush.bf16.msra.mxu0 %v263_v0  ;;  %264 = vmatpush.bf16.msra.mxu1 %v263_v0  ;;  %v260_v3 = vld [vmem:[%s355_s1] sm:$0xff]  ;;  %v257_v5 = vld [vmem:[%s356_s0 + $0x8] sm:$0xff]  ;;  %v258_v6 = vld [vmem:[%s356_s0 + $0x10] sm:$0xff] }
   0x3   :  { %265 = vmatpush.bf16.msra.mxu2 %v263_v0  ;;  %266 = vmatpush.bf16.msra.mxu3 %v263_v0  ;;  %v256_v4 = vld [vmem:[%s356_s0] sm:$0xff]  ;;  %v259_v7 = vld [vmem:[%s356_s0 + $0x18] sm:$0xff] }
   0x6   :  { %113 = vmatpush.bf16.msra.mxu0 %v262_v1  ;;  %267 = vmatpush.bf16.msra.mxu1 %v262_v1 }
   0x7   :  { %268 = vmatpush.bf16.msra.mxu2 %v262_v1  ;;  %269 = vmatpush.bf16.msra.mxu3 %v262_v1 }
   0xa   :  { %114 = vmatpush.bf16.msra.mxu0 %v261_v2  ;;  %270 = vmatpush.bf16.msra.mxu1 %v261_v2 }
   0xb   :  { %271 = vmatpush.bf16.msra.mxu2 %v261_v2  ;;  %272 = vmatpush.bf16.msra.mxu3 %v261_v2 }
   0xe   :  { %115 = vmatpush.bf16.msra.mxu0 %v260_v3  ;;  %273 = vmatpush.bf16.msra.mxu1 %v260_v3 }
   0xf   :  { %274 = vmatpush.bf16.msra.mxu2 %v260_v3  ;;  %275 = vmatpush.bf16.msra.mxu3 %v260_v3 }
  0x11   :  { %252 = vmatmul.msk.bf16.vlgmr.msra.gmra.mxu0 %vm95_vm0, %v256_v4  ;;  %253 = vmatmul.msk.bf16.vlgmr.msra.gmra.mxu1 %vm95_vm0, %v257_v5 }
  0x12   :  { %254 = vmatmul.msk.bf16.vlgmr.msra.gmra.mxu2 %vm95_vm0, %v258_v6  ;;  %255 = vmatmul.msk.bf16.vlgmr.msra.gmra.mxu3 %vm95_vm0, %v259_v7 }
  0x8e   :  { %v117_v8 = vpop.f32.mrf.mxu0  ;;  %v122_v9 = vpop.f32.mrf.mxu1 }
  0x8f   :  { %164 = vst [vmem:[%s357_s2] sm:$0xff] %v117_v8  ;;  %v186_v14 = vmul.f32 %v117_v8, %v117_v8  ;;  %v188_v17 = vmul.f32 %v122_v9, %v122_v9 }
  0x90   :  { %166 = vst [vmem:[%s357_s2 + $0x10] sm:$0xff] %v122_v9 }
  0x95   :  { %v127_v10 = vpop.f32.mrf.mxu2  ;;  %v132_v11 = vpop.f32.mrf.mxu3 }
  0x96   :  { %168 = vst [vmem:[%s357_s2 + $0x20] sm:$0xff] %v127_v10  ;;  %v119_v12 = vpop.f32.mrf.mxu0  ;;  %v124_v13 = vpop.f32.mrf.mxu1  ;;  %v190_v23 = vmul.f32 %v127_v10, %v127_v10  ;;  %v192_v31 = vmul.f32 %v132_v11, %v132_v11 }
  0x97   :  { %170 = vst [vmem:[%s357_s2 + $0x30] sm:$0xff] %v132_v11  ;;  %v172_v15 = vadd.f32 %v119_v12, %v117_v8  ;;  %v187_v16 = vmul.f32 %v119_v12, %v119_v12  ;;  %v189_v21 = vmul.f32 %v124_v13, %v124_v13 }
  0x98   :  { %165 = vst [vmem:[%s357_s2 + $0x8] sm:$0xff] %v119_v12 }
  0x99   :  { %v194_v18 = vadd.f32 %v187_v16, %v186_v14  ;;  %167 = vst [vmem:[%s357_s2 + $0x18] sm:$0xff] %v124_v13  ;;  %v173_v19 = vadd.f32 %v172_v15, %v122_v9 }
  0x9b   :  { %v174_v20 = vadd.f32 %v173_v19, %v124_v13  ;;  %v195_v22 = vadd.f32 %v194_v18, %v188_v17 }
  0x9d   :  { %v196_v24 = vadd.f32 %v195_v22, %v189_v21  ;;  %v129_v25 = vpop.f32.mrf.mxu2  ;;  %v175_v26 = vadd.f32 %v174_v20, %v127_v10  ;;  %v134_v27 = vpop.f32.mrf.mxu3 }
  0x9e   :  { %169 = vst [vmem:[%s357_s2 + $0x28] sm:$0xff] %v129_v25  ;;  %v191_v29 = vmul.f32 %v129_v25, %v129_v25  ;;  %v193_v35 = vmul.f32 %v134_v27, %v134_v27 }
  0x9f   :  { %v176_v28 = vadd.f32 %v175_v26, %v129_v25  ;;  %v197_v30 = vadd.f32 %v196_v24, %v190_v23  ;;  %171 = vst [vmem:[%s357_s2 + $0x38] sm:$0xff] %v134_v27 }
  0xa1   :  { %v198_v32 = vadd.f32 %v197_v30, %v191_v29  ;;  %v177_v33 = vadd.f32 %v176_v28, %v132_v11 }
  0xa3   :  { %v178_v34 = vadd.f32 %v177_v33, %v134_v27  ;;  %v199_v36 = vadd.f32 %v198_v32, %v192_v31 }
  0xa5   :  { %v179_v37 = vrot.slane %v178_v34, 4  ;;  %v200_v38 = vadd.f32 %v199_v36, %v193_v35 }
  0xa7   :  { %v180_v39 = vadd.f32 %v179_v37, %v178_v34  ;;  %v201_v40 = vrot.slane %v200_v38, 4 }
  0xa9   :  { %v181_v41 = vrot.slane %v180_v39, 2  ;;  %v202_v42 = vadd.f32 %v201_v40, %v200_v38 }
  0xab   :  { %v182_v43 = vadd.f32 %v181_v41, %v180_v39  ;;  %v203_v44 = vrot.slane %v202_v42, 2 }
  0xad   :  { %v183_v45 = vrot.slane %v182_v43, 1  ;;  %v204_v46 = vadd.f32 %v203_v44, %v202_v42 }
  0xaf   :  { %v184_v47 = vadd.f32 %v183_v45, %v182_v43  ;;  %v205_v48 = vrot.slane %v204_v46, 1 }
  0xb1   :  { %185 = vst [vmem:[%s358_s3] sm:$0x1] %v184_v47  ;;  %v206_v49 = vadd.f32 %v205_v48, %v204_v46 }
  0xb3   :  { %207 = vst [vmem:[%s359_s4] sm:$0x1] %v206_v49 }

// kernel: _lambda_.57
= control target key start
LH: loop header
LB: loop body
LE: loop exit
PB: predicated region body
PF: predicated region fallthrough
CT: control target
= control target key end

     0   :  { %vm18_vm0 = vcmask 523264   ;;  %vm782_vm1 = vcmask 516096   ;;  %s1833_s1 = inlined_call_operand.vmem [shape: bf16[256,64], index: 1, kind: input, shape index: {}]   ;;  %s1834_s0 = inlined_call_operand.vmem [shape: bf16[256,256], index: 0, kind: input, shape index: {}]   ;;  %s1835_s2 = inlined_call_operand.vmem [shape: f32[256,64], index: 2, kind: output, shape index: {0}]   ;;  %s1836_s3 = inlined_call_operand.vmem [shape: f32[1,1,64], index: 3, kind: output, shape index: {1}]   ;;  %s1837_s4 = inlined_call_operand.vmem [shape: f32[1,1,64], index: 4, kind: output, shape index: {2}]  }
   0x1   :  { %v1129_v0 = vld [vmem:[%s1833_s1 + $0x38] sm:$0xff]  ;;  %v1128_v2 = vld [vmem:[%s1833_s1 + $0x30] sm:$0xff]  ;;  %v1127_v4 = vld [vmem:[%s1833_s1 + $0x28] sm:$0xff] }
   0x2   :  { %v1137_v1 = vld [vmem:[%s1833_s1 + $0x78] sm:$0xff]  ;;  %403 = vmatpush.bf16.msra.mxu0 %v1129_v0  ;;  %v1136_v3 = vld [vmem:[%s1833_s1 + $0x70] sm:$0xff]  ;;  %1138 = vmatpush.bf16.msra.mxu2 %v1129_v0  ;;  %v1135_v5 = vld [vmem:[%s1833_s1 + $0x68] sm:$0xff] }
   0x3   :  { %492 = vmatpush.bf16.msra.mxu1 %v1137_v1  ;;  %1146 = vmatpush.bf16.msra.mxu3 %v1137_v1  ;;  %v1126_v6 = vld [vmem:[%s1833_s1 + $0x20] sm:$0xff]  ;;  %v1125_v8 = vld [vmem:[%s1833_s1 + $0x18] sm:$0xff]  ;;  %v1124_v10 = vld [vmem:[%s1833_s1 + $0x10] sm:$0xff] }
   0x4   :  { %v1134_v7 = vld [vmem:[%s1833_s1 + $0x60] sm:$0xff]  ;;  %v1133_v9 = vld [vmem:[%s1833_s1 + $0x58] sm:$0xff]  ;;  %v1132_v11 = vld [vmem:[%s1833_s1 + $0x50] sm:$0xff] }
   0x5   :  { %v1123_v12 = vld [vmem:[%s1833_s1 + $0x8] sm:$0xff]  ;;  %v1122_v14 = vld [vmem:[%s1833_s1] sm:$0xff]  ;;  %v908_v28 = vld [vmem:[%s1834_s0 + $0x10] sm:$0xf] }
   0x6   :  { %404 = vmatpush.bf16.msra.mxu0 %v1128_v2  ;;  %1139 = vmatpush.bf16.msra.mxu2 %v1128_v2  ;;  %v1131_v13 = vld [vmem:[%s1833_s1 + $0x48] sm:$0xff]  ;;  %v1130_v15 = vld [vmem:[%s1833_s1 + $0x40] sm:$0xff]  ;;  %v1093_v29 = vld [vmem:[%s1834_s0 + $0x14] sm:$0xf0] }
   0x7   :  { %493 = vmatpush.bf16.msra.mxu1 %v1136_v3  ;;  %1147 = vmatpush.bf16.msra.mxu3 %v1136_v3  ;;  %v900_v16 = vld [vmem:[%s1834_s0] sm:$0xf]  ;;  %v1091_v17 = vld [vmem:[%s1834_s0 + $0x4] sm:$0xf0]  ;;  %v1090_v18 = vld [vmem:[%s1834_s0 + $0x4] sm:$0xf]  ;;  %v909_v36 = vor.u32 %v1093_v29, %v908_v28 }
   0x8   :  { %v902_v19 = vld [vmem:[%s1834_s0 + $0x8] sm:$0xf0]  ;;  %v964_v20 = vld [vmem:[%s1834_s0 + $0x80] sm:$0xf]  ;;  %v1107_v21 = vld [vmem:[%s1834_s0 + $0x84] sm:$0xf0]  ;;  %v901_v24 = vor.u32 %v1091_v17, %v900_v16 }
   0x9   :  { %v1106_v22 = vld [vmem:[%s1834_s0 + $0x84] sm:$0xf]  ;;  %v966_v23 = vld [vmem:[%s1834_s0 + $0x88] sm:$0xf0]  ;;  %v905_v25 = vor.u32 %v1090_v18, %v902_v19  ;;  %v965_v26 = vor.u32 %v1107_v21, %v964_v20  ;;  %v1092_v30 = vld [vmem:[%s1834_s0 + $0x14] sm:$0xf] }
   0xa   :  { %405 = vmatpush.bf16.msra.mxu0 %v1127_v4  ;;  %1140 = vmatpush.bf16.msra.mxu2 %v1127_v4  ;;  %v969_v27 = vor.u32 %v1106_v22, %v966_v23  ;;  %v910_v31 = vld [vmem:[%s1834_s0 + $0x18] sm:$0xf0]  ;;  %v972_v32 = vld [vmem:[%s1834_s0 + $0x90] sm:$0xf]  ;;  %v1109_v33 = vld [vmem:[%s1834_s0 + $0x94] sm:$0xf0] }
   0xb   :  { %494 = vmatpush.bf16.msra.mxu1 %v1135_v5  ;;  %1148 = vmatpush.bf16.msra.mxu3 %v1135_v5  ;;  %v1108_v34 = vld [vmem:[%s1834_s0 + $0x94] sm:$0xf]  ;;  %v974_v35 = vld [vmem:[%s1834_s0 + $0x98] sm:$0xf0]  ;;  %v913_v37 = vor.u32 %v1092_v30, %v910_v31  ;;  %v973_v38 = vor.u32 %v1109_v33, %v972_v32  ;;  %v916_v40 = vld [vmem:[%s1834_s0 + $0x20] sm:$0xf] }
   0xc   :  { %v977_v39 = vor.u32 %v1108_v34, %v974_v35  ;;  %v1095_v41 = vld [vmem:[%s1834_s0 + $0x24] sm:$0xf0]  ;;  %v1094_v42 = vld [vmem:[%s1834_s0 + $0x24] sm:$0xf]  ;;  %v918_v43 = vld [vmem:[%s1834_s0 + $0x28] sm:$0xf0] }
   0xd   :  { %v980_v44 = vld [vmem:[%s1834_s0 + $0xa0] sm:$0xf]  ;;  %v1111_v45 = vld [vmem:[%s1834_s0 + $0xa4] sm:$0xf0]  ;;  %v1110_v46 = vld [vmem:[%s1834_s0 + $0xa4] sm:$0xf]  ;;  %v917_v48 = vor.u32 %v1095_v41, %v916_v40  ;;  %v921_v49 = vor.u32 %v1094_v42, %v918_v43 }
   0xe   :  { %406 = vmatpush.bf16.msra.mxu0 %v1126_v6  ;;  %1141 = vmatpush.bf16.msra.mxu2 %v1126_v6  ;;  %v982_v47 = vld [vmem:[%s1834_s0 + $0xa8] sm:$0xf0]  ;;  %v981_v50 = vor.u32 %v1111_v45, %v980_v44  ;;  %v924_v52 = vld [vmem:[%s1834_s0 + $0x30] sm:$0xf]  ;;  %v1097_v53 = vld [vmem:[%s1834_s0 + $0x34] sm:$0xf0] }
   0xf   :  { %495 = vmatpush.bf16.msra.mxu1 %v1134_v7  ;;  %1149 = vmatpush.bf16.msra.mxu3 %v1134_v7  ;;  %v985_v51 = vor.u32 %v1110_v46, %v982_v47  ;;  %v1096_v54 = vld [vmem:[%s1834_s0 + $0x34] sm:$0xf]  ;;  %v926_v55 = vld [vmem:[%s1834_s0 + $0x38] sm:$0xf0]  ;;  %v988_v56 = vld [vmem:[%s1834_s0 + $0xb0] sm:$0xf]  ;;  %v925_v60 = vor.u32 %v1097_v53, %v924_v52 }
  0x10   :  { %v1113_v57 = vld [vmem:[%s1834_s0 + $0xb4] sm:$0xf0]  ;;  %v1112_v58 = vld [vmem:[%s1834_s0 + $0xb4] sm:$0xf]  ;;  %v990_v59 = vld [vmem:[%s1834_s0 + $0xb8] sm:$0xf0]  ;;  %v929_v61 = vor.u32 %v1096_v54, %v926_v55 }
  0x11   :  { %v989_v62 = vor.u32 %v1113_v57, %v988_v56  ;;  %v993_v63 = vor.u32 %v1112_v58, %v990_v59  ;;  %v932_v0 = vld [vmem:[%s1834_s0 + $0x40] sm:$0xf]  ;;  %v1099_v1 = vld [vmem:[%s1834_s0 + $0x44] sm:$0xf0]  ;;  %v1098_v2 = vld [vmem:[%s1834_s0 + $0x44] sm:$0xf] }
  0x12   :  { %407 = vmatpush.bf16.msra.mxu0 %v1125_v8  ;;  %1142 = vmatpush.bf16.msra.mxu2 %v1125_v8  ;;  %v934_v3 = vld [vmem:[%s1834_s0 + $0x48] sm:$0xf0]  ;;  %v996_v4 = vld [vmem:[%s1834_s0 + $0xc0] sm:$0xf]  ;;  %v1115_v5 = vld [vmem:[%s1834_s0 + $0xc4] sm:$0xf0]  ;;  %v933_v8 = vor.u32 %v1099_v1, %v932_v0 }
  0x13   :  { %496 = vmatpush.bf16.msra.mxu1 %v1133_v9  ;;  %1150 = vmatpush.bf16.msra.mxu3 %v1133_v9  ;;  %v1114_v6 = vld [vmem:[%s1834_s0 + $0xc4] sm:$0xf]  ;;  %v998_v7 = vld [vmem:[%s1834_s0 + $0xc8] sm:$0xf0]  ;;  %v937_v9 = vor.u32 %v1098_v2, %v934_v3  ;;  %v1004_v16 = vld [vmem:[%s1834_s0 + $0xd0] sm:$0xf] }
  0x14   :  { %v1117_v17 = vld [vmem:[%s1834_s0 + $0xd4] sm:$0xf0]  ;;  %v1116_v18 = vld [vmem:[%s1834_s0 + $0xd4] sm:$0xf]  ;;  %v1006_v19 = vld [vmem:[%s1834_s0 + $0xd8] sm:$0xf0] }
  0x15   :  { %v1005_v22 = vor.u32 %v1117_v17, %v1004_v16  ;;  %v1009_v23 = vor.u32 %v1116_v18, %v1006_v19  ;;  %v1155_v28 = vmov 0.0   ;;  %v1012_v29 = vld [vmem:[%s1834_s0 + $0xe0] sm:$0xf]  ;;  %v1119_v30 = vld [vmem:[%s1834_s0 + $0xe4] sm:$0xf0] }
  0x16   :  { %408 = vmatpush.bf16.msra.mxu0 %v1124_v10  ;;  %1143 = vmatpush.bf16.msra.mxu2 %v1124_v10  ;;  %v997_v10 = vor.u32 %v1115_v5, %v996_v4  ;;  %19 = vst.msk [vmem:[#allocation2] sm:$0xff] %vm18_vm0, %v1155_v28  ;;  %v1118_v31 = vld [vmem:[%s1834_s0 + $0xe4] sm:$0xf]  ;;  %v1014_v32 = vld [vmem:[%s1834_s0 + $0xe8] sm:$0xf0]  ;;  %v1013_v35 = vor.u32 %v1119_v30, %v1012_v29 }
  0x17   :  { %497 = vmatpush.bf16.msra.mxu1 %v1132_v11  ;;  %1151 = vmatpush.bf16.msra.mxu3 %v1132_v11  ;;  %v1001_v11 = vor.u32 %v1114_v6, %v998_v7  ;;  %20 = vst.msk [vmem:[#allocation2 + $0x8] sm:$0xff] %vm18_vm0, %v1155_v28  ;;  %v958_v40 = vld [vmem:[%s1834_s0 + $0x78] sm:$0xf0]  ;;  %v1020_v41 = vld [vmem:[%s1834_s0 + $0xf0] sm:$0xf] }
  0x18   :  { %21 = vst.msk [vmem:[#allocation2 + $0x10] sm:$0xff] %vm18_vm0, %v1155_v28  ;;  %v1121_v42 = vld [vmem:[%s1834_s0 + $0xf4] sm:$0xf0]  ;;  %v1120_v43 = vld [vmem:[%s1834_s0 + $0xf4] sm:$0xf] }
  0x19   :  { %22 = vst.msk [vmem:[#allocation2 + $0x18] sm:$0xff] %vm18_vm0, %v1155_v28  ;;  %v1022_v44 = vld [vmem:[%s1834_s0 + $0xf8] sm:$0xf0]  ;;  %v1021_v47 = vor.u32 %v1121_v42, %v1020_v41 }
  0x1a   :  { %409 = vmatpush.bf16.msra.mxu0 %v1123_v12  ;;  %1144 = vmatpush.bf16.msra.mxu2 %v1123_v12  ;;  %v940_v12 = vld [vmem:[%s1834_s0 + $0x50] sm:$0xf]  ;;  %23 = vst.msk [vmem:[#allocation2 + $0x20] sm:$0xff] %vm18_vm0, %v1155_v28 }
  0x1b   :  { %498 = vmatpush.bf16.msra.mxu1 %v1131_v13  ;;  %1152 = vmatpush.bf16.msra.mxu3 %v1131_v13  ;;  %v1101_v13 = vld [vmem:[%s1834_s0 + $0x54] sm:$0xf0]  ;;  %24 = vst.msk [vmem:[#allocation2 + $0x28] sm:$0xff] %vm18_vm0, %v1155_v28 }
  0x1c   :  { %v941_v20 = vor.u32 %v1101_v13, %v940_v12  ;;  %25 = vst.msk [vmem:[#allocation2 + $0x30] sm:$0xff] %vm18_vm0, %v1155_v28 }
  0x1d   :  { %26 = vst.msk [vmem:[#allocation2 + $0x38] sm:$0xff] %vm18_vm0, %v1155_v28 }
  0x1e   :  { %410 = vmatpush.bf16.msra.mxu0 %v1122_v14  ;;  %1145 = vmatpush.bf16.msra.mxu2 %v1122_v14  ;;  %v1100_v14 = vld [vmem:[%s1834_s0 + $0x54] sm:$0xf]  ;;  %27 = vst.msk [vmem:[#allocation2 + $0x40] sm:$0xff] %vm18_vm0, %v1155_v28  ;;  %v52_v58 = vld [vmem:[#allocation2 + $0x8] sm:$0xff] }
  0x1f   :  { %499 = vmatpush.bf16.msra.mxu1 %v1130_v15  ;;  %1153 = vmatpush.bf16.msra.mxu3 %v1130_v15  ;;  %v942_v15 = vld [vmem:[%s1834_s0 + $0x58] sm:$0xf0]  ;;  %28 = vst.msk [vmem:[#allocation2 + $0x48] sm:$0xff] %vm18_vm0, %v1155_v28  ;;  %v53_v4 = vld [vmem:[#allocation2 + $0x10] sm:$0xff] }
  0x20   :  { %v945_v21 = vor.u32 %v1100_v14, %v942_v15  ;;  %29 = vst.msk [vmem:[#allocation2 + $0x50] sm:$0xff] %vm18_vm0, %v1155_v28 }
  0x21   :  { %411 = vmatmul.bf16.vlgmr.msra.gmra.mxu0 %v901_v24  ;;  %451 = vmatmul.bf16.vlgmr.msra.gmra.mxu2 %v965_v26  ;;  %v948_v24 = vld [vmem:[%s1834_s0 + $0x60] sm:$0xf]  ;;  %v1102_v26 = vld [vmem:[%s1834_s0 + $0x64] sm:$0xf]  ;;  %30 = vst.msk [vmem:[#allocation2 + $0x58] sm:$0xff] %vm18_vm0, %v1155_v28 }
  0x22   :  { %500 = vmatmul.bf16.vlgmr.msra.gmra.mxu1 %v905_v25  ;;  %540 = vmatmul.bf16.vlgmr.msra.gmra.mxu3 %v969_v27  ;;  %v1103_v25 = vld [vmem:[%s1834_s0 + $0x64] sm:$0xf0]  ;;  %v950_v27 = vld [vmem:[%s1834_s0 + $0x68] sm:$0xf0]  ;;  %31 = vst.msk [vmem:[#allocation2 + $0x60] sm:$0xff] %vm18_vm0, %v1155_v28  ;;  %v55_v41 = vld [vmem:[#allocation2 + $0x20] sm:$0xff] }
  0x23   :  { %v949_v33 = vor.u32 %v1103_v25, %v948_v24  ;;  %v953_v34 = vor.u32 %v1102_v26, %v950_v27  ;;  %32 = vst.msk [vmem:[#allocation2 + $0x68] sm:$0xff] %vm18_vm0, %v1155_v28  ;;  %v54_v24 = vld [vmem:[#allocation2 + $0x18] sm:$0xff] }
  0x24   :  { %33 = vst.msk [vmem:[#allocation2 + $0x70] sm:$0xff] %vm18_vm0, %v1155_v28 }
  0x25   :  { %34 = vst.msk [vmem:[#allocation2 + $0x78] sm:$0xff] %vm18_vm0, %v1155_v28 }
  0x26   :  { %35 = vst.msk [vmem:[#allocation2 + $0x80] sm:$0xff] %vm18_vm0, %v1155_v28 }
  0x27   :  { %36 = vst.msk [vmem:[#allocation2 + $0x88] sm:$0xff] %vm18_vm0, %v1155_v28 }
  0x28   :  { %37 = vst.msk [vmem:[#allocation2 + $0x90] sm:$0xff] %vm18_vm0, %v1155_v28 }
  0x29   :  { %38 = vst.msk [vmem:[#allocation2 + $0x98] sm:$0xff] %vm18_vm0, %v1155_v28 }
  0x2a   :  { %39 = vst.msk [vmem:[#allocation2 + $0xa0] sm:$0xff] %vm18_vm0, %v1155_v28 }
  0x2b   :  { %40 = vst.msk [vmem:[#allocation2 + $0xa8] sm:$0xff] %vm18_vm0, %v1155_v28 }
  0x2c   :  { %41 = vst.msk [vmem:[#allocation2 + $0xb0] sm:$0xff] %vm18_vm0, %v1155_v28 }
  0x2d   :  { %42 = vst.msk [vmem:[#allocation2 + $0xb8] sm:$0xff] %vm18_vm0, %v1155_v28  ;;  %v67_v55 = vld [vmem:[#allocation2 + $0x80] sm:$0xff] }
  0x2e   :  { %43 = vst.msk [vmem:[#allocation2 + $0xc0] sm:$0xff] %vm18_vm0, %v1155_v28  ;;  %v68_v6 = vld [vmem:[#allocation2 + $0x88] sm:$0xff] }
  0x2f   :  { %44 = vst.msk [vmem:[#allocation2 + $0xc8] sm:$0xff] %vm18_vm0, %v1155_v28  ;;  %v69_v19 = vld [vmem:[#allocation2 + $0x90] sm:$0xff] }
  0x30   :  { %45 = vst.msk [vmem:[#allocation2 + $0xd0] sm:$0xff] %vm18_vm0, %v1155_v28 }
  0x31   :  { %416 = vmatmul.bf16.gmra.mxu0 %v909_v36  ;;  %456 = vmatmul.bf16.gmra.mxu2 %v973_v38  ;;  %v1017_v36 = vor.u32 %v1118_v31, %v1014_v32  ;;  %v1105_v38 = vld [vmem:[%s1834_s0 + $0x74] sm:$0xf0]  ;;  %46 = vst.msk [vmem:[#allocation2 + $0xd8] sm:$0xff] %vm18_vm0, %v1155_v28 }
  0x32   :  { %505 = vmatmul.bf16.gmra.mxu1 %v913_v37  ;;  %545 = vmatmul.bf16.gmra.mxu3 %v977_v39  ;;  %v956_v37 = vld [vmem:[%s1834_s0 + $0x70] sm:$0xf]  ;;  %v1104_v39 = vld [vmem:[%s1834_s0 + $0x74] sm:$0xf]  ;;  %47 = vst.msk [vmem:[#allocation2 + $0xe0] sm:$0xff] %vm18_vm0, %v1155_v28 }
  0x33   :  { %v957_v45 = vor.u32 %v1105_v38, %v956_v37  ;;  %v961_v46 = vor.u32 %v1104_v39, %v958_v40  ;;  %48 = vst.msk [vmem:[#allocation2 + $0xe8] sm:$0xff] %vm18_vm0, %v1155_v28 }
  0x34   :  { %49 = vst.msk [vmem:[#allocation2 + $0xf0] sm:$0xff] %vm18_vm0, %v1155_v28 }
  0x35   :  { %50 = vst.msk [vmem:[#allocation2 + $0xf8] sm:$0xff] %vm18_vm0, %v1155_v28 }
  0x41   :  { %421 = vmatmul.bf16.gmra.mxu0 %v917_v48  ;;  %461 = vmatmul.bf16.gmra.mxu2 %v981_v50  ;;  %v1025_v48 = vor.u32 %v1120_v43, %v1022_v44  ;;  %v51_v50 = vld [vmem:[#allocation2] sm:$0xff]  ;;  %v70_v43 = vld [vmem:[#allocation2 + $0x98] sm:$0xff] }
  0x42   :  { %510 = vmatmul.bf16.gmra.mxu1 %v921_v49  ;;  %550 = vmatmul.bf16.gmra.mxu3 %v985_v51 }
  0x51   :  { %426 = vmatmul.bf16.gmra.mxu0 %v925_v60  ;;  %466 = vmatmul.bf16.gmra.mxu2 %v989_v62 }
  0x52   :  { %515 = vmatmul.bf16.gmra.mxu1 %v929_v61  ;;  %555 = vmatmul.bf16.gmra.mxu3 %v993_v63 }
  0x61   :  { %431 = vmatmul.bf16.gmra.mxu0 %v933_v8  ;;  %471 = vmatmul.bf16.gmra.mxu2 %v997_v10 }
  0x62   :  { %520 = vmatmul.bf16.gmra.mxu1 %v937_v9  ;;  %560 = vmatmul.bf16.gmra.mxu3 %v1001_v11 }
  0x71   :  { %436 = vmatmul.bf16.gmra.mxu0 %v941_v20  ;;  %476 = vmatmul.bf16.gmra.mxu2 %v1005_v22 }
  0x72   :  { %525 = vmatmul.bf16.gmra.mxu1 %v945_v21  ;;  %565 = vmatmul.bf16.gmra.mxu3 %v1009_v23 }
  0x81   :  { %441 = vmatmul.bf16.gmra.mxu0 %v949_v33  ;;  %481 = vmatmul.bf16.gmra.mxu2 %v1013_v35 }
  0x82   :  { %530 = vmatmul.bf16.gmra.mxu1 %v953_v34  ;;  %570 = vmatmul.bf16.gmra.mxu3 %v1017_v36 }
  0x91   :  { %446 = vmatmul.bf16.gmra.mxu0 %v957_v45  ;;  %486 = vmatmul.bf16.gmra.mxu2 %v1021_v47 }
  0x92   :  { %535 = vmatmul.bf16.gmra.mxu1 %v961_v46  ;;  %575 = vmatmul.bf16.gmra.mxu3 %v1025_v48 }
  0x9e   :  { %v412_v49 = vpop.f32.mrf.mxu0 }
  0x9f   :  { %v501_v51 = vpop.f32.mrf.mxu1 }
  0xa0   :  { %v502_v52 = vadd.f32 %v501_v51, %v412_v49 }
  0xa2   :  { %v581_v53 = vadd.f32 %v502_v52, %v51_v50 }
  0xa4   :  { %614 = vst.msk [vmem:[#allocation2] sm:$0xff] %vm18_vm0, %v581_v53  ;;  %v452_v54 = vpop.f32.mrf.mxu2 }
  0xa5   :  { %v541_v56 = vpop.f32.mrf.mxu3 }
  0xa6   :  { %v414_v57 = vpop.f32.mrf.mxu0  ;;  %v542_v60 = vadd.f32 %v541_v56, %v452_v54  ;;  %v71_v54 = vld [vmem:[#allocation2 + $0xa0] sm:$0xff] }
  0xa7   :  { %v503_v59 = vpop.f32.mrf.mxu1 }
  0xa8   :  { %v504_v61 = vadd.f32 %v503_v59, %v414_v57  ;;  %v597_v62 = vadd.f32 %v542_v60, %v67_v55 }
  0xaa   :  { %v582_v63 = vadd.f32 %v504_v61, %v52_v58  ;;  %630 = vst.msk [vmem:[#allocation2 + $0x80] sm:$0xff] %vm18_vm0, %v597_v62  ;;  %v56_v58 = vld [vmem:[#allocation2 + $0x28] sm:$0xff] }
  0xab   :  { %v649_v0 = vld [vmem:[#allocation2] sm:$0xff] }
  0xac   :  { %681 = vst.msk [vmem:[%s1835_s2] sm:$0xff] %vm18_vm0, %v649_v0  ;;  %v454_v1 = vpop.f32.mrf.mxu2  ;;  %v784_v12 = vmul.f32 %v649_v0, %v649_v0  ;;  %v713_v14 = vsel %vm18_vm0, %v649_v0, 0.0 }
  0xad   :  { %615 = vst.msk [vmem:[#allocation2 + $0x8] sm:$0xff] %vm18_vm0, %v582_v63  ;;  %v543_v2 = vpop.f32.mrf.mxu3 }
  0xae   :  { %v417_v3 = vpop.f32.mrf.mxu0  ;;  %v544_v7 = vadd.f32 %v543_v2, %v454_v1  ;;  %v816_v21 = vsel %vm18_vm0, %v784_v12, 0.0  ;;  %v57_v12 = vld [vmem:[#allocation2 + $0x30] sm:$0xff] }
  0xaf   :  { %v506_v5 = vpop.f32.mrf.mxu1 }
  0xb0   :  { %v507_v8 = vadd.f32 %v506_v5, %v417_v3  ;;  %v598_v11 = vadd.f32 %v544_v7, %v68_v6 }
  0xb1   :  { %v1460_v10 = vld [vmem:[#allocation2 + $0x80] sm:$0xff] }
  0xb2   :  { %v583_v9 = vadd.f32 %v507_v8, %v53_v4  ;;  %697 = vst.msk [vmem:[%s1835_s2 + $0x80] sm:$0xff] %vm18_vm0, %v1460_v10 }
  0xb3   :  { %631 = vst.msk [vmem:[#allocation2 + $0x88] sm:$0xff] %vm18_vm0, %v598_v11 }
  0xb4   :  { %v650_v13 = vld [vmem:[#allocation2 + $0x8] sm:$0xff]  ;;  %616 = vst.msk [vmem:[#allocation2 + $0x10] sm:$0xff] %vm18_vm0, %v583_v9  ;;  %v457_v18 = vpop.f32.mrf.mxu2 }
  0xb5   :  { %682 = vst.msk [vmem:[%s1835_s2 + $0x8] sm:$0xff] %vm18_vm0, %v650_v13  ;;  %v714_v15 = vsel %vm18_vm0, %v650_v13, 0.0  ;;  %v785_v16 = vmul.f32 %v650_v13, %v650_v13  ;;  %v546_v20 = vpop.f32.mrf.mxu3 }
  0xb6   :  { %v715_v17 = vadd.f32 %v714_v15, %v713_v14  ;;  %v419_v23 = vpop.f32.mrf.mxu0  ;;  %v547_v26 = vadd.f32 %v546_v20, %v457_v18  ;;  %v72_v14 = vld [vmem:[#allocation2 + $0xa8] sm:$0xff] }
  0xb7   :  { %v817_v22 = vsel %vm18_vm0, %v785_v16, 0.0  ;;  %v508_v25 = vpop.f32.mrf.mxu1 }
  0xb8   :  { %v818_v27 = vadd.f32 %v817_v22, %v816_v21  ;;  %v509_v28 = vadd.f32 %v508_v25, %v419_v23  ;;  %v599_v29 = vadd.f32 %v547_v26, %v69_v19  ;;  %v73_v22 = vld [vmem:[#allocation2 + $0xb0] sm:$0xff]  ;;  %v58_v25 = vld [vmem:[#allocation2 + $0x38] sm:$0xff] }
  0xba   :  { %v584_v30 = vadd.f32 %v509_v28, %v54_v24  ;;  %632 = vst.msk [vmem:[#allocation2 + $0x90] sm:$0xff] %vm18_vm0, %v599_v29  ;;  %v1484_v35 = vld [vmem:[#allocation2 + $0x88] sm:$0xff] }
  0xbb   :  { %v651_v31 = vld [vmem:[#allocation2 + $0x10] sm:$0xff]  ;;  %698 = vst.msk [vmem:[%s1835_s2 + $0x88] sm:$0xff] %vm18_vm0, %v1484_v35 }
  0xbc   :  { %683 = vst.msk [vmem:[%s1835_s2 + $0x10] sm:$0xff] %vm18_vm0, %v651_v31  ;;  %v716_v32 = vsel %vm18_vm0, %v651_v31, 0.0  ;;  %v786_v33 = vmul.f32 %v651_v31, %v651_v31  ;;  %v459_v37 = vpop.f32.mrf.mxu2 }
  0xbd   :  { %v717_v34 = vadd.f32 %v716_v32, %v715_v17  ;;  %617 = vst.msk [vmem:[#allocation2 + $0x18] sm:$0xff] %vm18_vm0, %v584_v30  ;;  %v548_v38 = vpop.f32.mrf.mxu3 }
  0xbe   :  { %v819_v36 = vsel %vm18_vm0, %v786_v33, 0.0  ;;  %v422_v40 = vpop.f32.mrf.mxu0  ;;  %v549_v44 = vadd.f32 %v548_v38, %v459_v37  ;;  %v59_v37 = vld [vmem:[#allocation2 + $0x40] sm:$0xff] }
  0xbf   :  { %v820_v39 = vadd.f32 %v819_v36, %v818_v27  ;;  %v511_v42 = vpop.f32.mrf.mxu1 }
  0xc0   :  { %v512_v45 = vadd.f32 %v511_v42, %v422_v40  ;;  %v600_v48 = vadd.f32 %v549_v44, %v70_v43 }
  0xc1   :  { %v1492_v47 = vld [vmem:[#allocation2 + $0x90] sm:$0xff] }
  0xc2   :  { %v585_v46 = vadd.f32 %v512_v45, %v55_v41  ;;  %699 = vst.msk [vmem:[%s1835_s2 + $0x90] sm:$0xff] %vm18_vm0, %v1492_v47 }
  0xc3   :  { %633 = vst.msk [vmem:[#allocation2 + $0x98] sm:$0xff] %vm18_vm0, %v600_v48  ;;  %v75_v48 = vld [vmem:[#allocation2 + $0xc0] sm:$0xff] }
  0xc4   :  { %v652_v49 = vld [vmem:[#allocation2 + $0x18] sm:$0xff]  ;;  %618 = vst.msk [vmem:[#allocation2 + $0x20] sm:$0xff] %vm18_vm0, %v585_v46  ;;  %v462_v53 = vpop.f32.mrf.mxu2 }
  0xc5   :  { %684 = vst.msk [vmem:[%s1835_s2 + $0x18] sm:$0xff] %vm18_vm0, %v652_v49  ;;  %v718_v50 = vsel %vm18_vm0, %v652_v49, 0.0  ;;  %v787_v51 = vmul.f32 %v652_v49, %v652_v49  ;;  %v551_v55 = vpop.f32.mrf.mxu3 }
  0xc6   :  { %v719_v52 = vadd.f32 %v718_v50, %v717_v34  ;;  %v424_v57 = vpop.f32.mrf.mxu0  ;;  %v552_v60 = vadd.f32 %v551_v55, %v462_v53 }
  0xc7   :  { %v821_v56 = vsel %vm18_vm0, %v787_v51, 0.0  ;;  %v513_v59 = vpop.f32.mrf.mxu1  ;;  %v60_v51 = vld [vmem:[#allocation2 + $0x48] sm:$0xff] }
  0xc8   :  { %v822_v61 = vadd.f32 %v821_v56, %v820_v39  ;;  %v514_v62 = vadd.f32 %v513_v59, %v424_v57  ;;  %v601_v63 = vadd.f32 %v552_v60, %v71_v54  ;;  %v74_v39 = vld [vmem:[#allocation2 + $0xb8] sm:$0xff] }
  0xca   :  { %v586_v0 = vadd.f32 %v514_v62, %v56_v58  ;;  %634 = vst.msk [vmem:[#allocation2 + $0xa0] sm:$0xff] %vm18_vm0, %v601_v63  ;;  %v1516_v5 = vld [vmem:[#allocation2 + $0x98] sm:$0xff]  ;;  %v61_v62 = vld [vmem:[#allocation2 + $0x50] sm:$0xff] }
  0xcb   :  { %v653_v1 = vld [vmem:[#allocation2 + $0x20] sm:$0xff]  ;;  %700 = vst.msk [vmem:[%s1835_s2 + $0x98] sm:$0xff] %vm18_vm0, %v1516_v5 }
  0xcc   :  { %685 = vst.msk [vmem:[%s1835_s2 + $0x20] sm:$0xff] %vm18_vm0, %v653_v1  ;;  %v720_v2 = vsel %vm18_vm0, %v653_v1, 0.0  ;;  %v788_v3 = vmul.f32 %v653_v1, %v653_v1  ;;  %v464_v7 = vpop.f32.mrf.mxu2 }
  0xcd   :  { %v1513_v4 = vadd.f32 %v720_v2, %v719_v52  ;;  %619 = vst.msk [vmem:[#allocation2 + $0x28] sm:$0xff] %vm18_vm0, %v586_v0  ;;  %v553_v8 = vpop.f32.mrf.mxu3  ;;  %v76_v0 = vld [vmem:[#allocation2 + $0xc8] sm:$0xff] }
  0xce   :  { %v823_v6 = vsel %vm18_vm0, %v788_v3, 0.0  ;;  %v427_v11 = vpop.f32.mrf.mxu0  ;;  %v554_v15 = vadd.f32 %v553_v8, %v464_v7 }
  0xcf   :  { %v1524_v9 = vadd.f32 %v823_v6, %v822_v61  ;;  %v516_v13 = vpop.f32.mrf.mxu1 }
  0xd0   :  { %v517_v16 = vadd.f32 %v516_v13, %v427_v11  ;;  %v602_v19 = vadd.f32 %v554_v15, %v72_v14  ;;  %v62_v15 = vld [vmem:[#allocation2 + $0x58] sm:$0xff] }
  0xd1   :  { %v1526_v18 = vld [vmem:[#allocation2 + $0xa0] sm:$0xff] }
  0xd2   :  { %v587_v17 = vadd.f32 %v517_v16, %v57_v12  ;;  %701 = vst.msk [vmem:[%s1835_s2 + $0xa0] sm:$0xff] %vm18_vm0, %v1526_v18  ;;  %v77_v12 = vld [vmem:[#allocation2 + $0xd0] sm:$0xff] }
  0xd3   :  { %635 = vst.msk [vmem:[#allocation2 + $0xa8] sm:$0xff] %vm18_vm0, %v602_v19 }
  0xd4   :  { %v1533_v20 = vld [vmem:[#allocation2 + $0x28] sm:$0xff]  ;;  %620 = vst.msk [vmem:[#allocation2 + $0x30] sm:$0xff] %vm18_vm0, %v587_v17  ;;  %v467_v21 = vpop.f32.mrf.mxu2 }
  0xd5   :  { %686 = vst.msk [vmem:[%s1835_s2 + $0x28] sm:$0xff] %vm18_vm0, %v1533_v20  ;;  %v556_v23 = vpop.f32.mrf.mxu3 }
  0xd6   :  { %v429_v24 = vpop.f32.mrf.mxu0  ;;  %v557_v27 = vadd.f32 %v556_v23, %v467_v21 }
  0xd7   :  { %v518_v26 = vpop.f32.mrf.mxu1 }
  0xd8   :  { %v519_v28 = vadd.f32 %v518_v26, %v429_v24  ;;  %v603_v29 = vadd.f32 %v557_v27, %v73_v22 }
  0xda   :  { %v588_v30 = vadd.f32 %v519_v28, %v58_v25  ;;  %636 = vst.msk [vmem:[#allocation2 + $0xb0] sm:$0xff] %vm18_vm0, %v603_v29  ;;  %v1551_v32 = vld [vmem:[#allocation2 + $0xa8] sm:$0xff]  ;;  %v63_v28 = vld [vmem:[#allocation2 + $0x60] sm:$0xff] }
  0xdb   :  { %v1542_v31 = vld [vmem:[#allocation2 + $0x30] sm:$0xff]  ;;  %702 = vst.msk [vmem:[%s1835_s2 + $0xa8] sm:$0xff] %vm18_vm0, %v1551_v32 }
  0xdc   :  { %687 = vst.msk [vmem:[%s1835_s2 + $0x30] sm:$0xff] %vm18_vm0, %v1542_v31  ;;  %v469_v33 = vpop.f32.mrf.mxu2 }
  0xdd   :  { %621 = vst.msk [vmem:[#allocation2 + $0x38] sm:$0xff] %vm18_vm0, %v588_v30  ;;  %v558_v34 = vpop.f32.mrf.mxu3  ;;  %v78_v30 = vld [vmem:[#allocation2 + $0xd8] sm:$0xff] }
  0xde   :  { %v432_v36 = vpop.f32.mrf.mxu0  ;;  %v559_v40 = vadd.f32 %v558_v34, %v469_v33 }
  0xdf   :  { %v521_v38 = vpop.f32.mrf.mxu1 }
  0xe0   :  { %v522_v41 = vadd.f32 %v521_v38, %v432_v36  ;;  %v604_v44 = vadd.f32 %v559_v40, %v74_v39 }
  0xe1   :  { %v1558_v43 = vld [vmem:[#allocation2 + $0xb0] sm:$0xff] }
  0xe2   :  { %v589_v42 = vadd.f32 %v522_v41, %v59_v37  ;;  %703 = vst.msk [vmem:[%s1835_s2 + $0xb0] sm:$0xff] %vm18_vm0, %v1558_v43  ;;  %v79_v41 = vld [vmem:[#allocation2 + $0xe0] sm:$0xff] }
  0xe3   :  { %637 = vst.msk [vmem:[#allocation2 + $0xb8] sm:$0xff] %vm18_vm0, %v604_v44 }
  0xe4   :  { %v1565_v45 = vld [vmem:[#allocation2 + $0x38] sm:$0xff]  ;;  %622 = vst.msk [vmem:[#allocation2 + $0x40] sm:$0xff] %vm18_vm0, %v589_v42  ;;  %v472_v46 = vpop.f32.mrf.mxu2 }
  0xe5   :  { %688 = vst.msk [vmem:[%s1835_s2 + $0x38] sm:$0xff] %vm18_vm0, %v1565_v45  ;;  %v561_v49 = vpop.f32.mrf.mxu3 }
  0xe6   :  { %v434_v50 = vpop.f32.mrf.mxu0  ;;  %v562_v53 = vadd.f32 %v561_v49, %v472_v46  ;;  %v64_v46 = vld [vmem:[#allocation2 + $0x68] sm:$0xff] }
  0xe7   :  { %v523_v52 = vpop.f32.mrf.mxu1 }
  0xe8   :  { %v524_v54 = vadd.f32 %v523_v52, %v434_v50  ;;  %v605_v55 = vadd.f32 %v562_v53, %v75_v48 }
  0xea   :  { %v590_v56 = vadd.f32 %v524_v54, %v60_v51  ;;  %638 = vst.msk [vmem:[#allocation2 + $0xc0] sm:$0xff] %vm18_vm0, %v605_v55  ;;  %v1583_v58 = vld [vmem:[#allocation2 + $0xb8] sm:$0xff]  ;;  %v789_v54 = vmul.f32 %v1533_v20, %v1533_v20 }
  0xeb   :  { %v1574_v57 = vld [vmem:[#allocation2 + $0x40] sm:$0xff]  ;;  %704 = vst.msk [vmem:[%s1835_s2 + $0xb8] sm:$0xff] %vm18_vm0, %v1583_v58 }
  0xec   :  { %689 = vst.msk [vmem:[%s1835_s2 + $0x40] sm:$0xff] %vm18_vm0, %v1574_v57  ;;  %v474_v59 = vpop.f32.mrf.mxu2 }
  0xed   :  { %623 = vst.msk [vmem:[#allocation2 + $0x48] sm:$0xff] %vm18_vm0, %v590_v56  ;;  %v563_v60 = vpop.f32.mrf.mxu3 }
  0xee   :  { %v437_v61 = vpop.f32.mrf.mxu0  ;;  %v564_v1 = vadd.f32 %v563_v60, %v474_v59  ;;  %v722_v60 = vsel %vm18_vm0, %v1533_v20, 0.0 }
  0xef   :  { %v526_v63 = vpop.f32.mrf.mxu1 }
  0xf0   :  { %v527_v2 = vadd.f32 %v526_v63, %v437_v61  ;;  %v606_v7 = vadd.f32 %v564_v1, %v76_v0  ;;  %v790_v61 = vmul.f32 %v1542_v31, %v1542_v31  ;;  %v65_v63 = vld [vmem:[#allocation2 + $0x70] sm:$0xff]  ;;  %v80_v1 = vld [vmem:[#allocation2 + $0xe8] sm:$0xff] }
  0xf1   :  { %v1590_v6 = vld [vmem:[#allocation2 + $0xc0] sm:$0xff] }
  0xf2   :  { %v591_v3 = vadd.f32 %v527_v2, %v61_v62  ;;  %705 = vst.msk [vmem:[%s1835_s2 + $0xc0] sm:$0xff] %vm18_vm0, %v1590_v6 }
  0xf3   :  { %639 = vst.msk [vmem:[#allocation2 + $0xc8] sm:$0xff] %vm18_vm0, %v606_v7  ;;  %v825_v7 = vsel %vm18_vm0, %v789_v54, 0.0 }
  0xf4   :  { %v1597_v8 = vld [vmem:[#allocation2 + $0x48] sm:$0xff]  ;;  %624 = vst.msk [vmem:[#allocation2 + $0x50] sm:$0xff] %vm18_vm0, %v591_v3  ;;  %v477_v11 = vpop.f32.mrf.mxu2 }
  0xf5   :  { %690 = vst.msk [vmem:[%s1835_s2 + $0x48] sm:$0xff] %vm18_vm0, %v1597_v8  ;;  %v566_v13 = vpop.f32.mrf.mxu3 }
  0xf6   :  { %v439_v14 = vpop.f32.mrf.mxu0  ;;  %v567_v17 = vadd.f32 %v566_v13, %v477_v11  ;;  %v724_v11 = vsel %vm18_vm0, %v1542_v31, 0.0  ;;  %v723_v13 = vadd.f32 %v722_v60, %v1513_v4  ;;  %v826_v4 = vadd.f32 %v825_v7, %v1524_v9  ;;  %v82_v7 = vld [vmem:[#allocation2 + $0xf8] sm:$0xff] }
  0xf7   :  { %v528_v16 = vpop.f32.mrf.mxu1 }
  0xf8   :  { %v529_v19 = vadd.f32 %v528_v16, %v439_v14  ;;  %v607_v21 = vadd.f32 %v567_v17, %v77_v12  ;;  %v791_v12 = vmul.f32 %v1565_v45, %v1565_v45  ;;  %v827_v16 = vsel %vm18_vm0, %v790_v61, 0.0 }
  0xf9   :  { %v726_v17 = vsel %vm18_vm0, %v1565_v45, 0.0  ;;  %v725_v31 = vadd.f32 %v724_v11, %v723_v13  ;;  %v728_v45 = vsel %vm18_vm0, %v1574_v57, 0.0 }
  0xfa   :  { %v592_v22 = vadd.f32 %v529_v19, %v62_v15  ;;  %640 = vst.msk [vmem:[#allocation2 + $0xd0] sm:$0xff] %vm18_vm0, %v607_v21  ;;  %v1615_v24 = vld [vmem:[#allocation2 + $0xc8] sm:$0xff]  ;;  %v792_v19 = vmul.f32 %v1574_v57, %v1574_v57  ;;  %v730_v57 = vsel %vm18_vm0, %v1597_v8, 0.0 }
  0xfb   :  { %v1606_v23 = vld [vmem:[#allocation2 + $0x50] sm:$0xff]  ;;  %706 = vst.msk [vmem:[%s1835_s2 + $0xc8] sm:$0xff] %vm18_vm0, %v1615_v24 }
  0xfc   :  { %691 = vst.msk [vmem:[%s1835_s2 + $0x50] sm:$0xff] %vm18_vm0, %v1606_v23  ;;  %v479_v25 = vpop.f32.mrf.mxu2 }
  0xfd   :  { %625 = vst.msk [vmem:[#allocation2 + $0x58] sm:$0xff] %vm18_vm0, %v592_v22  ;;  %v568_v26 = vpop.f32.mrf.mxu3  ;;  %v829_v22 = vsel %vm18_vm0, %v791_v12, 0.0 }
  0xfe   :  { %v442_v27 = vpop.f32.mrf.mxu0  ;;  %v569_v33 = vadd.f32 %v568_v26, %v479_v25  ;;  %v793_v25 = vmul.f32 %v1597_v8, %v1597_v8  ;;  %v828_v26 = vadd.f32 %v827_v16, %v826_v4 }
  0xff   :  { %v531_v29 = vpop.f32.mrf.mxu1 }
 0x100   :  { %v532_v34 = vadd.f32 %v531_v29, %v442_v27  ;;  %v608_v38 = vadd.f32 %v569_v33, %v78_v30  ;;  %v727_v27 = vadd.f32 %v726_v17, %v725_v31  ;;  %v831_v30 = vsel %vm18_vm0, %v792_v19, 0.0 }
 0x101   :  { %v1622_v37 = vld [vmem:[#allocation2 + $0xd0] sm:$0xff]  ;;  %v794_v33 = vmul.f32 %v1606_v23, %v1606_v23 }
 0x102   :  { %v593_v36 = vadd.f32 %v532_v34, %v63_v28  ;;  %707 = vst.msk [vmem:[%s1835_s2 + $0xd0] sm:$0xff] %vm18_vm0, %v1622_v37  ;;  %v81_v28 = vld [vmem:[#allocation2 + $0xf0] sm:$0xff] }
 0x103   :  { %641 = vst.msk [vmem:[#allocation2 + $0xd8] sm:$0xff] %vm18_vm0, %v608_v38  ;;  %v835_v54 = vsel %vm18_vm0, %v794_v33, 0.0  ;;  %v744_v33 = vsel %vm18_vm0, %v1460_v10, 0.0 }
 0x104   :  { %v1629_v39 = vld [vmem:[#allocation2 + $0x58] sm:$0xff]  ;;  %626 = vst.msk [vmem:[#allocation2 + $0x60] sm:$0xff] %vm18_vm0, %v593_v36  ;;  %v482_v40 = vpop.f32.mrf.mxu2 }
 0x105   :  { %692 = vst.msk [vmem:[%s1835_s2 + $0x58] sm:$0xff] %vm18_vm0, %v1629_v39  ;;  %v571_v42 = vpop.f32.mrf.mxu3  ;;  %v66_v36 = vld [vmem:[#allocation2 + $0x78] sm:$0xff] }
 0x106   :  { %v444_v44 = vpop.f32.mrf.mxu0  ;;  %v572_v49 = vadd.f32 %v571_v42, %v482_v40  ;;  %v729_v42 = vadd.f32 %v728_v45, %v727_v27 }
 0x107   :  { %v533_v48 = vpop.f32.mrf.mxu1 }
 0x108   :  { %v534_v50 = vadd.f32 %v533_v48, %v444_v44  ;;  %v609_v51 = vadd.f32 %v572_v49, %v79_v41  ;;  %v830_v41 = vadd.f32 %v829_v22, %v828_v26  ;;  %v732_v48 = vsel %vm18_vm0, %v1606_v23, 0.0 }
 0x109   :  { %v795_v49 = vmul.f32 %v1629_v39, %v1629_v39 }
 0x10a   :  { %v594_v52 = vadd.f32 %v534_v50, %v64_v46  ;;  %642 = vst.msk [vmem:[#allocation2 + $0xe0] sm:$0xff] %vm18_vm0, %v609_v51  ;;  %v1649_v55 = vld [vmem:[#allocation2 + $0xd8] sm:$0xff]  ;;  %v833_v46 = vsel %vm18_vm0, %v793_v25, 0.0  ;;  %v832_v8 = vadd.f32 %v831_v30, %v830_v41  ;;  %v731_v51 = vadd.f32 %v730_v57, %v729_v42 }
 0x10b   :  { %v1638_v53 = vld [vmem:[#allocation2 + $0x60] sm:$0xff]  ;;  %708 = vst.msk [vmem:[%s1835_s2 + $0xd8] sm:$0xff] %vm18_vm0, %v1649_v55  ;;  %v746_v42 = vsel %vm18_vm0, %v1484_v35, 0.0 }
 0x10c   :  { %693 = vst.msk [vmem:[%s1835_s2 + $0x60] sm:$0xff] %vm18_vm0, %v1638_v53  ;;  %v484_v56 = vpop.f32.mrf.mxu2  ;;  %v834_v61 = vadd.f32 %v833_v46, %v832_v8  ;;  %v733_v23 = vadd.f32 %v732_v48, %v731_v51 }
 0x10d   :  { %627 = vst.msk [vmem:[#allocation2 + $0x68] sm:$0xff] %vm18_vm0, %v594_v52  ;;  %v573_v59 = vpop.f32.mrf.mxu3 }
 0x10e   :  { %v447_v62 = vpop.f32.mrf.mxu0  ;;  %v574_v2 = vadd.f32 %v573_v59, %v484_v56  ;;  %v734_v56 = vsel %vm18_vm0, %v1629_v39, 0.0  ;;  %v796_v59 = vmul.f32 %v1638_v53, %v1638_v53 }
 0x10f   :  { %v536_v0 = vpop.f32.mrf.mxu1 }
 0x110   :  { %v537_v3 = vadd.f32 %v536_v0, %v447_v62  ;;  %v610_v15 = vadd.f32 %v574_v2, %v80_v1  ;;  %v837_v62 = vsel %vm18_vm0, %v795_v49, 0.0  ;;  %v836_v1 = vadd.f32 %v835_v54, %v834_v61 }
 0x111   :  { %v1666_v14 = vld [vmem:[#allocation2 + $0xe0] sm:$0xff]  ;;  %v735_v2 = vadd.f32 %v734_v56, %v733_v23  ;;  %v839_v12 = vsel %vm18_vm0, %v796_v59, 0.0  ;;  %v750_v54 = vsel %vm18_vm0, %v1516_v5, 0.0  ;;  %v752_v61 = vsel %vm18_vm0, %v1526_v18, 0.0 }
 0x112   :  { %v595_v20 = vadd.f32 %v537_v3, %v65_v63  ;;  %709 = vst.msk [vmem:[%s1835_s2 + $0xe0] sm:$0xff] %vm18_vm0, %v1666_v14  ;;  %v736_v63 = vsel %vm18_vm0, %v1638_v53, 0.0  ;;  %v805_v23 = vmul.f32 %v1551_v32, %v1551_v32 }
 0x113   :  { %643 = vst.msk [vmem:[#allocation2 + $0xe8] sm:$0xff] %vm18_vm0, %v610_v15  ;;  %v838_v15 = vadd.f32 %v837_v62, %v836_v1  ;;  %v737_v16 = vadd.f32 %v736_v63, %v735_v2  ;;  %v806_v1 = vmul.f32 %v1558_v43, %v1558_v43 }
 0x114   :  { %v662_v21 = vld [vmem:[#allocation2 + $0x68] sm:$0xff]  ;;  %628 = vst.msk [vmem:[#allocation2 + $0x70] sm:$0xff] %vm18_vm0, %v595_v20  ;;  %v487_v9 = vpop.f32.mrf.mxu2 }
 0x115   :  { %694 = vst.msk [vmem:[%s1835_s2 + $0x68] sm:$0xff] %vm18_vm0, %v662_v21  ;;  %v576_v29 = vpop.f32.mrf.mxu3  ;;  %v797_v0 = vmul.f32 %v662_v21, %v662_v21  ;;  %v738_v53 = vsel %vm18_vm0, %v662_v21, 0.0  ;;  %v840_v31 = vadd.f32 %v839_v12, %v838_v15 }
 0x116   :  { %v449_v34 = vpop.f32.mrf.mxu0  ;;  %v577_v40 = vadd.f32 %v576_v29, %v487_v9  ;;  %v739_v22 = vadd.f32 %v738_v53, %v737_v16  ;;  %v800_v9 = vmul.f32 %v1460_v10, %v1460_v10  ;;  %v748_v10 = vsel %vm18_vm0, %v1492_v47, 0.0 }
 0x117   :  { %v538_v38 = vpop.f32.mrf.mxu1  ;;  %v841_v17 = vsel %vm18_vm0, %v797_v0, 0.0 }
 0x118   :  { %v539_v44 = vadd.f32 %v538_v38, %v449_v34  ;;  %v611_v50 = vadd.f32 %v577_v40, %v81_v28  ;;  %v842_v21 = vadd.f32 %v841_v17, %v840_v31  ;;  %v801_v34 = vmul.f32 %v1484_v35, %v1484_v35 }
 0x119   :  { %v847_v41 = vsel %vm18_vm0, %v800_v9, 0.0  ;;  %v811_v9 = vmul.f32 %v1649_v55, %v1649_v55 }
 0x11a   :  { %v596_v52 = vadd.f32 %v539_v44, %v66_v36  ;;  %644 = vst.msk [vmem:[#allocation2 + $0xf0] sm:$0xff] %vm18_vm0, %v611_v50  ;;  %v1714_v39 = vld [vmem:[#allocation2 + $0xe8] sm:$0xff]  ;;  %v802_v44 = vmul.f32 %v1492_v47, %v1492_v47  ;;  %v849_v49 = vsel %vm18_vm0, %v801_v34, 0.0  ;;  %v803_v50 = vmul.f32 %v1516_v5, %v1516_v5 }
 0x11b   :  { %v663_v60 = vld [vmem:[#allocation2 + $0x70] sm:$0xff]  ;;  %710 = vst.msk [vmem:[%s1835_s2 + $0xe8] sm:$0xff] %vm18_vm0, %v1714_v39  ;;  %v804_v47 = vmul.f32 %v1526_v18, %v1526_v18  ;;  %v754_v5 = vsel %vm18_vm0, %v1551_v32, 0.0  ;;  %v756_v18 = vsel %vm18_vm0, %v1558_v43, 0.0  ;;  %v758_v32 = vsel %vm18_vm0, %v1583_v58, 0.0 }
 0x11c   :  { %695 = vst.msk [vmem:[%s1835_s2 + $0x70] sm:$0xff] %vm18_vm0, %v663_v60  ;;  %v489_v3 = vpop.f32.mrf.mxu2  ;;  %v798_v13 = vmul.f32 %v663_v60, %v663_v60  ;;  %v740_v19 = vsel %vm18_vm0, %v663_v60, 0.0  ;;  %v851_v35 = vsel %vm18_vm0, %v802_v44, 0.0  ;;  %v853_v60 = vsel %vm18_vm0, %v803_v50, 0.0 }
 0x11d   :  { %629 = vst.msk [vmem:[#allocation2 + $0x78] sm:$0xff] %vm18_vm0, %v596_v52  ;;  %v578_v11 = vpop.f32.mrf.mxu3  ;;  %v741_v26 = vadd.f32 %v740_v19, %v739_v22  ;;  %v855_v0 = vsel %vm18_vm0, %v804_v47, 0.0  ;;  %v760_v43 = vsel %vm18_vm0, %v1590_v6, 0.0  ;;  %v809_v19 = vmul.f32 %v1615_v24, %v1615_v24 }
 0x11e   :  { %v579_v20 = vadd.f32 %v578_v11, %v489_v3  ;;  %v843_v25 = vsel %vm18_vm0, %v798_v13, 0.0  ;;  %v807_v11 = vmul.f32 %v1583_v58, %v1583_v58  ;;  %v859_v13 = vsel %vm18_vm0, %v806_v1, 0.0 }
 0x11f   :  { %v844_v30 = vadd.f32 %v843_v25, %v842_v21  ;;  %v762_v58 = vsel %vm18_vm0, %v1615_v24, 0.0  ;;  %v810_v25 = vmul.f32 %v1622_v37, %v1622_v37  ;;  %v766_v24 = vsel %vm18_vm0, %v1649_v55, 0.0 }
 0x120   :  { %v612_v4 = vadd.f32 %v579_v20, %v82_v7  ;;  %v857_v7 = vsel %vm18_vm0, %v805_v23, 0.0  ;;  %v808_v20 = vmul.f32 %v1590_v6, %v1590_v6  ;;  %v861_v17 = vsel %vm18_vm0, %v807_v11, 0.0 }
 0x121   :  { %v1725_v45 = vld [vmem:[#allocation2 + $0xf0] sm:$0xff]  ;;  %v764_v6 = vsel %vm18_vm0, %v1622_v37, 0.0  ;;  %v768_v37 = vsel %vm18_vm0, %v1666_v14, 0.0  ;;  %v770_v55 = vsel %vm18_vm0, %v1714_v39, 0.0 }
 0x122   :  { %711 = vst.msk [vmem:[%s1835_s2 + $0xf0] sm:$0xff] %vm18_vm0, %v1725_v45  ;;  %v863_v22 = vsel %vm18_vm0, %v808_v20, 0.0  ;;  %v814_v44 = vmul.f32 %v1725_v45, %v1725_v45 }
 0x123   :  { %645 = vst.msk [vmem:[#allocation2 + $0xf8] sm:$0xff] %vm18_vm0, %v612_v4 }
 0x124   :  { %v664_v27 = vld [vmem:[#allocation2 + $0x78] sm:$0xff] }
 0x125   :  { %696 = vst.msk [vmem:[%s1835_s2 + $0x78] sm:$0xff] %vm18_vm0, %v664_v27  ;;  %v742_v28 = vsel %vm18_vm0, %v664_v27, 0.0  ;;  %v799_v29 = vmul.f32 %v664_v27, %v664_v27  ;;  %v865_v27 = vsel %vm18_vm0, %v809_v19, 0.0 }
 0x126   :  { %v743_v57 = vadd.f32 %v742_v28, %v741_v26 }
 0x127   :  { %v845_v36 = vsel %vm18_vm0, %v799_v29, 0.0 }
 0x128   :  { %v745_v38 = vadd.f32 %v744_v33, %v743_v57  ;;  %v846_v40 = vadd.f32 %v845_v36, %v844_v30  ;;  %v867_v30 = vsel %vm18_vm0, %v810_v25, 0.0  ;;  %v812_v57 = vmul.f32 %v1666_v14, %v1666_v14 }
 0x129   :  { %v869_v36 = vsel %vm18_vm0, %v811_v9, 0.0  ;;  %v772_v14 = vsel %vm18_vm0, %v1725_v45, 0.0 }
 0x12a   :  { %v747_v46 = vadd.f32 %v746_v42, %v745_v38  ;;  %v848_v48 = vadd.f32 %v847_v41, %v846_v40  ;;  %v1756_v8 = vld [vmem:[#allocation2 + $0xf8] sm:$0xff]  ;;  %v813_v38 = vmul.f32 %v1714_v39, %v1714_v39  ;;  %v871_v42 = vsel %vm18_vm0, %v812_v57, 0.0 }
 0x12b   :  { %712 = vst.msk [vmem:[%s1835_s2 + $0xf8] sm:$0xff] %vm18_vm0, %v1756_v8  ;;  %v774_v39 = vsel %vm18_vm0, %v1756_v8, 0.0 }
 0x12c   :  { %v749_v51 = vadd.f32 %v748_v10, %v747_v46  ;;  %v850_v52 = vadd.f32 %v849_v49, %v848_v48  ;;  %v873_v49 = vsel %vm18_vm0, %v813_v38, 0.0  ;;  %v815_v10 = vmul.f32 %v1756_v8, %v1756_v8 }
 0x12e   :  { %v751_v56 = vadd.f32 %v750_v54, %v749_v51  ;;  %v852_v59 = vadd.f32 %v851_v35, %v850_v52  ;;  %v875_v52 = vsel %vm18_vm0, %v814_v44, 0.0  ;;  %v877_v47 = vsel %vm18_vm0, %v815_v10, 0.0 }
 0x130   :  { %v753_v62 = vadd.f32 %v752_v61, %v751_v56  ;;  %v854_v63 = vadd.f32 %v853_v60, %v852_v59 }
 0x132   :  { %v755_v2 = vadd.f32 %v754_v5, %v753_v62  ;;  %v856_v3 = vadd.f32 %v855_v0, %v854_v63 }
 0x134   :  { %v858_v12 = vadd.f32 %v857_v7, %v856_v3  ;;  %v757_v53 = vadd.f32 %v756_v18, %v755_v2 }
 0x136   :  { %v759_v15 = vadd.f32 %v758_v32, %v757_v53  ;;  %v860_v16 = vadd.f32 %v859_v13, %v858_v12 }
 0x138   :  { %v761_v4 = vadd.f32 %v760_v43, %v759_v15  ;;  %v862_v31 = vadd.f32 %v861_v17, %v860_v16 }
 0x13a   :  { %v763_v21 = vadd.f32 %v762_v58, %v761_v4  ;;  %v864_v26 = vadd.f32 %v863_v22, %v862_v31 }
 0x13c   :  { %v765_v28 = vadd.f32 %v764_v6, %v763_v21  ;;  %v866_v29 = vadd.f32 %v865_v27, %v864_v26 }
 0x13e   :  { %v767_v33 = vadd.f32 %v766_v24, %v765_v28  ;;  %v868_v34 = vadd.f32 %v867_v30, %v866_v29 }
 0x140   :  { %v769_v40 = vadd.f32 %v768_v37, %v767_v33  ;;  %v870_v41 = vadd.f32 %v869_v36, %v868_v34 }
 0x142   :  { %v872_v46 = vadd.f32 %v871_v42, %v870_v41  ;;  %v771_v48 = vadd.f32 %v770_v55, %v769_v40 }
 0x144   :  { %v874_v50 = vadd.f32 %v873_v49, %v872_v46  ;;  %v773_v51 = vadd.f32 %v772_v14, %v771_v48 }
 0x146   :  { %v876_v35 = vadd.f32 %v875_v52, %v874_v50  ;;  %v775_v54 = vadd.f32 %v774_v39, %v773_v51 }
 0x148   :  { %v776_v56 = vrot.slane %v775_v54, 4  ;;  %v878_v59 = vadd.f32 %v877_v47, %v876_v35 }
 0x14a   :  { %v777_v60 = vadd.f32 %v776_v56, %v775_v54  ;;  %v879_v61 = vrot.slane %v878_v59, 4 }
 0x14c   :  { %v778_v23 = vrot.slane %v777_v60, 2  ;;  %v880_v45 = vadd.f32 %v879_v61, %v878_v59 }
 0x14e   :  { %v779_v62 = vadd.f32 %v778_v23, %v777_v60  ;;  %v881_v63 = vrot.slane %v880_v45, 2 }
 0x150   :  { %v780_v0 = vrot.slane %v779_v62, 1  ;;  %v882_v5 = vadd.f32 %v881_v63, %v880_v45 }
 0x152   :  { %v781_v1 = vadd.f32 %v780_v0, %v779_v62  ;;  %v883_v2 = vrot.slane %v882_v5, 1 }
 0x154   :  { %783 = vst.msk [vmem:[%s1836_s3] sm:$0x1] %vm782_vm1, %v781_v1  ;;  %v884_v8 = vadd.f32 %v883_v2, %v882_v5 }
 0x156   :  { %885 = vst.msk [vmem:[%s1837_s4] sm:$0x1] %vm782_vm1, %v884_v8 }

// kernel: _lambda_.59
= control target key start
LH: loop header
LB: loop body
LE: loop exit
PB: predicated region body
PF: predicated region fallthrough
CT: control target
= control target key end

     0   :  { %vm94_vm0 = vcmask 519168   ;;  %s199_s0 = inlined_call_operand.vmem [shape: f32[1,64,64], index: 0, kind: input, shape index: {}]   ;;  %s200_s1 = inlined_call_operand.vmem [shape: f32[1,64], index: 1, kind: input, shape index: {}]   ;;  %s201_s2 = inlined_call_operand.vmem [shape: f32[1,64], index: 2, kind: input, shape index: {}]   ;;  %s202_s3 = inlined_call_operand.vmem [shape: bf16[1,64,64], index: 3, kind: output, shape index: {}]  }
   0x1   :  { %v14_v0 = vld [vmem:[%s199_s0] sm:$0xff]  ;;  %v15_v3 = vld [vmem:[%s199_s0 + $0x8] sm:$0xff]  ;;  %v16_v6 = vld [vmem:[%s199_s0 + $0x10] sm:$0xff] }
   0x2   :  { %v115_v1 = vld [vmem:[%s200_s1] ss:$0 sm:$0xff]  ;;  %v17_v7 = vld [vmem:[%s199_s0 + $0x18] sm:$0xff]  ;;  %v19_v12 = vld [vmem:[%s199_s0 + $0x28] sm:$0xff] }
   0x3   :  { %v116_v2 = vld [vmem:[%s201_s2] ss:$0 sm:$0xff]  ;;  %v26_v4 = vmul.f32 %v115_v1, %v14_v0  ;;  %v27_v5 = vmul.f32 %v115_v1, %v15_v3  ;;  %v28_v9 = vmul.f32 %v115_v1, %v16_v6  ;;  %v29_v10 = vmul.f32 %v115_v1, %v17_v7  ;;  %v20_v13 = vld [vmem:[%s199_s0 + $0x30] sm:$0xff]  ;;  %v21_v14 = vld [vmem:[%s199_s0 + $0x38] sm:$0xff] }
   0x4   :  { %v18_v8 = vld [vmem:[%s199_s0 + $0x20] sm:$0xff]  ;;  %v31_v17 = vmul.f32 %v115_v1, %v19_v12  ;;  %v32_v18 = vmul.f32 %v115_v1, %v20_v13  ;;  %v33_v22 = vmul.f32 %v115_v1, %v21_v14 }
   0x5   :  { %v30_v11 = vmul.f32 %v115_v1, %v18_v8  ;;  %v38_v15 = vadd.f32 %v116_v2, %v26_v4  ;;  %v39_v16 = vadd.f32 %v116_v2, %v27_v5  ;;  %v40_v19 = vadd.f32 %v116_v2, %v28_v9 }
   0x6   :  { %v41_v20 = vadd.f32 %v116_v2, %v29_v10  ;;  %v43_v25 = vadd.f32 %v116_v2, %v31_v17  ;;  %v44_v26 = vadd.f32 %v116_v2, %v32_v18  ;;  %v45_v30 = vadd.f32 %v116_v2, %v33_v22 }
   0x7   :  { %v42_v21 = vadd.f32 %v116_v2, %v30_v11  ;;  %v107_v23 = vadd.f32 -1.0, %v38_v15  ;;  %v108_v24 = vadd.f32 -1.0, %v39_v16  ;;  %v109_v27 = vadd.f32 -1.0, %v40_v19 }
   0x8   :  { %v110_v28 = vadd.f32 -1.0, %v41_v20  ;;  %v112_v33 = vadd.f32 -1.0, %v43_v25  ;;  %v113_v34 = vadd.f32 -1.0, %v44_v26  ;;  %v114_v38 = vadd.f32 -1.0, %v45_v30 }
   0x9   :  { %v111_v29 = vadd.f32 -1.0, %v42_v21  ;;  %v54_v31 = vadd.f32 1.0, %v107_v23  ;;  %v55_v32 = vadd.f32 1.0, %v108_v24  ;;  %v56_v35 = vadd.f32 1.0, %v109_v27 }
   0xa   :  { %v57_v36 = vadd.f32 1.0, %v110_v28  ;;  %v59_v41 = vadd.f32 1.0, %v112_v33  ;;  %v60_v42 = vadd.f32 1.0, %v113_v34  ;;  %v61_v46 = vadd.f32 1.0, %v114_v38 }
   0xb   :  { %v58_v37 = vadd.f32 1.0, %v111_v29  ;;  %v62_v39 = vfloor.f32 %v54_v31  ;;  %v63_v40 = vfloor.f32 %v55_v32  ;;  %v64_v43 = vfloor.f32 %v56_v35 }
   0xc   :  { %v65_v44 = vfloor.f32 %v57_v36  ;;  %v67_v49 = vfloor.f32 %v59_v41  ;;  %v68_v50 = vfloor.f32 %v60_v42  ;;  %v69_v54 = vfloor.f32 %v61_v46 }
   0xd   :  { %v66_v45 = vfloor.f32 %v58_v37  ;;  %v70_v47 = vmax.f32 %v62_v39, 0.0  ;;  %v71_v48 = vmax.f32 %v63_v40, 0.0  ;;  %v72_v51 = vmax.f32 %v64_v43, 0.0 }
   0xe   :  { %v73_v52 = vmax.f32 %v65_v44, 0.0  ;;  %v75_v57 = vmax.f32 %v67_v49, 0.0  ;;  %v76_v58 = vmax.f32 %v68_v50, 0.0  ;;  %v77_v62 = vmax.f32 %v69_v54, 0.0 }
   0xf   :  { %v74_v53 = vmax.f32 %v66_v45, 0.0  ;;  %v78_v55 = vmin.f32 %v70_v47, 8.0  ;;  %v79_v56 = vmin.f32 %v71_v48, 8.0  ;;  %v80_v59 = vmin.f32 %v72_v51, 8.0 }
  0x10   :  { %v81_v60 = vmin.f32 %v73_v52, 8.0  ;;  %v83_v1 = vmin.f32 %v75_v57, 8.0  ;;  %v84_v2 = vmin.f32 %v76_v58, 8.0  ;;  %v85_v5 = vmin.f32 %v77_v62, 8.0 }
  0x11   :  { %v82_v61 = vmin.f32 %v74_v53, 8.0  ;;  %v86_v63 = vpack.c.bf16 %v78_v55, %v78_v55  ;;  %v87_v0 = vpack.c.bf16 %v79_v56, %v79_v56  ;;  %v88_v3 = vpack.c.bf16 %v80_v59, %v80_v59 }
  0x12   :  { %v89_v4 = vpack.c.bf16 %v81_v60, %v81_v60  ;;  %v91_v7 = vpack.c.bf16 %v83_v1, %v83_v1  ;;  %v92_v8 = vpack.c.bf16 %v84_v2, %v84_v2  ;;  %v93_v9 = vpack.c.bf16 %v85_v5, %v85_v5 }
  0x13   :  { %95 = vst.msk [vmem:[%s202_s3] sm:$0xf] %vm94_vm0, %v86_v63  ;;  %v90_v6 = vpack.c.bf16 %v82_v61, %v82_v61 }
  0x14   :  { %96 = vst.msk [vmem:[%s202_s3 + $0x4] sm:$0xf] %vm94_vm0, %v87_v0 }
  0x15   :  { %97 = vst.msk [vmem:[%s202_s3 + $0x8] sm:$0xf] %vm94_vm0, %v88_v3 }
  0x16   :  { %98 = vst.msk [vmem:[%s202_s3 + $0xc] sm:$0xf] %vm94_vm0, %v89_v4 }
  0x17   :  { %99 = vst.msk [vmem:[%s202_s3 + $0x10] sm:$0xf] %vm94_vm0, %v90_v6 }
  0x18   :  { %100 = vst.msk [vmem:[%s202_s3 + $0x14] sm:$0xf] %vm94_vm0, %v91_v7 }
  0x19   :  { %101 = vst.msk [vmem:[%s202_s3 + $0x18] sm:$0xf] %vm94_vm0, %v92_v8 }
  0x1a   :  { %102 = vst.msk [vmem:[%s202_s3 + $0x1c] sm:$0xf] %vm94_vm0, %v93_v9 }

// kernel: _lambda_.61
= control target key start
LH: loop header
LB: loop body
LE: loop exit
PB: predicated region body
PF: predicated region fallthrough
CT: control target
= control target key end

     0   :  { %vm94_vm0 = vcmask 388096   ;;  %s199_s0 = inlined_call_operand.vmem [shape: f32[1,64,48], index: 0, kind: input, shape index: {}]   ;;  %s200_s1 = inlined_call_operand.vmem [shape: f32[1,48], index: 1, kind: input, shape index: {}]   ;;  %s201_s2 = inlined_call_operand.vmem [shape: f32[1,48], index: 2, kind: input, shape index: {}]   ;;  %s202_s3 = inlined_call_operand.vmem [shape: bf16[1,64,48], index: 3, kind: output, shape index: {}]  }
   0x1   :  { %v14_v0 = vld [vmem:[%s199_s0] sm:$0xff]  ;;  %v15_v3 = vld [vmem:[%s199_s0 + $0x8] sm:$0xff]  ;;  %v16_v6 = vld [vmem:[%s199_s0 + $0x10] sm:$0xff] }
   0x2   :  { %v115_v1 = vld [vmem:[%s200_s1] ss:$0 sm:$0xff]  ;;  %v17_v7 = vld [vmem:[%s199_s0 + $0x18] sm:$0xff]  ;;  %v19_v12 = vld [vmem:[%s199_s0 + $0x28] sm:$0xff] }
   0x3   :  { %v116_v2 = vld [vmem:[%s201_s2] ss:$0 sm:$0xff]  ;;  %v26_v4 = vmul.f32 %v115_v1, %v14_v0  ;;  %v27_v5 = vmul.f32 %v115_v1, %v15_v3  ;;  %v28_v9 = vmul.f32 %v115_v1, %v16_v6  ;;  %v29_v10 = vmul.f32 %v115_v1, %v17_v7  ;;  %v20_v13 = vld [vmem:[%s199_s0 + $0x30] sm:$0xff]  ;;  %v21_v14 = vld [vmem:[%s199_s0 + $0x38] sm:$0xff] }
   0x4   :  { %v18_v8 = vld [vmem:[%s199_s0 + $0x20] sm:$0xff]  ;;  %v31_v17 = vmul.f32 %v115_v1, %v19_v12  ;;  %v32_v18 = vmul.f32 %v115_v1, %v20_v13  ;;  %v33_v22 = vmul.f32 %v115_v1, %v21_v14 }
   0x5   :  { %v30_v11 = vmul.f32 %v115_v1, %v18_v8  ;;  %v38_v15 = vadd.f32 %v116_v2, %v26_v4  ;;  %v39_v16 = vadd.f32 %v116_v2, %v27_v5  ;;  %v40_v19 = vadd.f32 %v116_v2, %v28_v9 }
   0x6   :  { %v41_v20 = vadd.f32 %v116_v2, %v29_v10  ;;  %v43_v25 = vadd.f32 %v116_v2, %v31_v17  ;;  %v44_v26 = vadd.f32 %v116_v2, %v32_v18  ;;  %v45_v30 = vadd.f32 %v116_v2, %v33_v22 }
   0x7   :  { %v42_v21 = vadd.f32 %v116_v2, %v30_v11  ;;  %v107_v23 = vadd.f32 -1.0, %v38_v15  ;;  %v108_v24 = vadd.f32 -1.0, %v39_v16  ;;  %v109_v27 = vadd.f32 -1.0, %v40_v19 }
   0x8   :  { %v110_v28 = vadd.f32 -1.0, %v41_v20  ;;  %v112_v33 = vadd.f32 -1.0, %v43_v25  ;;  %v113_v34 = vadd.f32 -1.0, %v44_v26  ;;  %v114_v38 = vadd.f32 -1.0, %v45_v30 }
   0x9   :  { %v111_v29 = vadd.f32 -1.0, %v42_v21  ;;  %v54_v31 = vadd.f32 1.0, %v107_v23  ;;  %v55_v32 = vadd.f32 1.0, %v108_v24  ;;  %v56_v35 = vadd.f32 1.0, %v109_v27 }
   0xa   :  { %v57_v36 = vadd.f32 1.0, %v110_v28  ;;  %v59_v41 = vadd.f32 1.0, %v112_v33  ;;  %v60_v42 = vadd.f32 1.0, %v113_v34  ;;  %v61_v46 = vadd.f32 1.0, %v114_v38 }
   0xb   :  { %v58_v37 = vadd.f32 1.0, %v111_v29  ;;  %v62_v39 = vfloor.f32 %v54_v31  ;;  %v63_v40 = vfloor.f32 %v55_v32  ;;  %v64_v43 = vfloor.f32 %v56_v35 }
   0xc   :  { %v65_v44 = vfloor.f32 %v57_v36  ;;  %v67_v49 = vfloor.f32 %v59_v41  ;;  %v68_v50 = vfloor.f32 %v60_v42  ;;  %v69_v54 = vfloor.f32 %v61_v46 }
   0xd   :  { %v66_v45 = vfloor.f32 %v58_v37  ;;  %v70_v47 = vmax.f32 %v62_v39, 0.0  ;;  %v71_v48 = vmax.f32 %v63_v40, 0.0  ;;  %v72_v51 = vmax.f32 %v64_v43, 0.0 }
   0xe   :  { %v73_v52 = vmax.f32 %v65_v44, 0.0  ;;  %v75_v57 = vmax.f32 %v67_v49, 0.0  ;;  %v76_v58 = vmax.f32 %v68_v50, 0.0  ;;  %v77_v62 = vmax.f32 %v69_v54, 0.0 }
   0xf   :  { %v74_v53 = vmax.f32 %v66_v45, 0.0  ;;  %v78_v55 = vmin.f32 %v70_v47, 8.0  ;;  %v79_v56 = vmin.f32 %v71_v48, 8.0  ;;  %v80_v59 = vmin.f32 %v72_v51, 8.0 }
  0x10   :  { %v81_v60 = vmin.f32 %v73_v52, 8.0  ;;  %v83_v1 = vmin.f32 %v75_v57, 8.0  ;;  %v84_v2 = vmin.f32 %v76_v58, 8.0  ;;  %v85_v5 = vmin.f32 %v77_v62, 8.0 }
  0x11   :  { %v82_v61 = vmin.f32 %v74_v53, 8.0  ;;  %v86_v63 = vpack.c.bf16 %v78_v55, %v78_v55  ;;  %v87_v0 = vpack.c.bf16 %v79_v56, %v79_v56  ;;  %v88_v3 = vpack.c.bf16 %v80_v59, %v80_v59 }
  0x12   :  { %v89_v4 = vpack.c.bf16 %v81_v60, %v81_v60  ;;  %v91_v7 = vpack.c.bf16 %v83_v1, %v83_v1  ;;  %v92_v8 = vpack.c.bf16 %v84_v2, %v84_v2  ;;  %v93_v9 = vpack.c.bf16 %v85_v5, %v85_v5 }
  0x13   :  { %95 = vst.msk [vmem:[%s202_s3] sm:$0xf] %vm94_vm0, %v86_v63  ;;  %v90_v6 = vpack.c.bf16 %v82_v61, %v82_v61 }
  0x14   :  { %96 = vst.msk [vmem:[%s202_s3 + $0x4] sm:$0xf] %vm94_vm0, %v87_v0 }
  0x15   :  { %97 = vst.msk [vmem:[%s202_s3 + $0x8] sm:$0xf] %vm94_vm0, %v88_v3 }
  0x16   :  { %98 = vst.msk [vmem:[%s202_s3 + $0xc] sm:$0xf] %vm94_vm0, %v89_v4 }
  0x17   :  { %99 = vst.msk [vmem:[%s202_s3 + $0x10] sm:$0xf] %vm94_vm0, %v90_v6 }
  0x18   :  { %100 = vst.msk [vmem:[%s202_s3 + $0x14] sm:$0xf] %vm94_vm0, %v91_v7 }
  0x19   :  { %101 = vst.msk [vmem:[%s202_s3 + $0x18] sm:$0xf] %vm94_vm0, %v92_v8 }
  0x1a   :  { %102 = vst.msk [vmem:[%s202_s3 + $0x1c] sm:$0xf] %vm94_vm0, %v93_v9 }

// kernel: _lambda_.60
= control target key start
LH: loop header
LB: loop body
LE: loop exit
PB: predicated region body
PF: predicated region fallthrough
CT: control target
= control target key end

     0   :  { %vm19_vm0 = vcmask 523264   ;;  %v295_v1 = vmov 0.0   ;;  %vm194_vm1 = vcmask 516096   ;;  %s419_s1 = inlined_call_operand.vmem [shape: bf16[64,64], index: 1, kind: input, shape index: {}]   ;;  %s420_s0 = inlined_call_operand.vmem [shape: bf16[64,64], index: 0, kind: input, shape index: {}]   ;;  %s421_s2 = inlined_call_operand.vmem [shape: f32[64,64], index: 2, kind: output, shape index: {0}]   ;;  %s422_s3 = inlined_call_operand.vmem [shape: f32[1,1,64], index: 3, kind: output, shape index: {1}]   ;;  %s423_s4 = inlined_call_operand.vmem [shape: f32[1,1,64], index: 4, kind: output, shape index: {2}]  }
   0x1   :  { %v281_v0 = vld [vmem:[%s419_s1 + $0x18] sm:$0xff]  ;;  %20 = vst.msk [vmem:[#allocation2] sm:$0xff] %vm19_vm0, %v295_v1  ;;  %v280_v2 = vld [vmem:[%s419_s1 + $0x10] sm:$0xff]  ;;  %v279_v3 = vld [vmem:[%s419_s1 + $0x8] sm:$0xff] }
   0x2   :  { %21 = vst.msk [vmem:[#allocation2 + $0x8] sm:$0xff] %vm19_vm0, %v295_v1  ;;  %113 = vmatpush.bf16.msra.mxu0 %v281_v0  ;;  %282 = vmatpush.bf16.msra.mxu1 %v281_v0  ;;  %v278_v4 = vld [vmem:[%s419_s1] sm:$0xff]  ;;  %v275_v6 = vld [vmem:[%s420_s0 + $0x8] sm:$0xff]  ;;  %v276_v7 = vld [vmem:[%s420_s0 + $0x10] sm:$0xff] }
   0x3   :  { %22 = vst.msk [vmem:[#allocation2 + $0x10] sm:$0xff] %vm19_vm0, %v295_v1  ;;  %283 = vmatpush.bf16.msra.mxu2 %v281_v0  ;;  %284 = vmatpush.bf16.msra.mxu3 %v281_v0  ;;  %v274_v5 = vld [vmem:[%s420_s0] sm:$0xff]  ;;  %v277_v8 = vld [vmem:[%s420_s0 + $0x18] sm:$0xff] }
   0x4   :  { %23 = vst.msk [vmem:[#allocation2 + $0x18] sm:$0xff] %vm19_vm0, %v295_v1 }
   0x5   :  { %24 = vst.msk [vmem:[#allocation2 + $0x20] sm:$0xff] %vm19_vm0, %v295_v1 }
   0x6   :  { %25 = vst.msk [vmem:[#allocation2 + $0x28] sm:$0xff] %vm19_vm0, %v295_v1  ;;  %114 = vmatpush.bf16.msra.mxu0 %v280_v2  ;;  %285 = vmatpush.bf16.msra.mxu1 %v280_v2 }
   0x7   :  { %26 = vst.msk [vmem:[#allocation2 + $0x30] sm:$0xff] %vm19_vm0, %v295_v1  ;;  %286 = vmatpush.bf16.msra.mxu2 %v280_v2  ;;  %287 = vmatpush.bf16.msra.mxu3 %v280_v2 }
   0x8   :  { %27 = vst.msk [vmem:[#allocation2 + $0x38] sm:$0xff] %vm19_vm0, %v295_v1  ;;  %v28_v9 = vld [vmem:[#allocation2] sm:$0xff] }
   0x9   :  { %v29_v19 = vld [vmem:[#allocation2 + $0x8] sm:$0xff] }
   0xa   :  { %115 = vmatpush.bf16.msra.mxu0 %v279_v3  ;;  %288 = vmatpush.bf16.msra.mxu1 %v279_v3  ;;  %v30_v10 = vld [vmem:[#allocation2 + $0x10] sm:$0xff] }
   0xb   :  { %289 = vmatpush.bf16.msra.mxu2 %v279_v3  ;;  %290 = vmatpush.bf16.msra.mxu3 %v279_v3  ;;  %v31_v22 = vld [vmem:[#allocation2 + $0x18] sm:$0xff] }
   0xc   :  { %v32_v15 = vld [vmem:[#allocation2 + $0x20] sm:$0xff] }
   0xd   :  { %v33_v29 = vld [vmem:[#allocation2 + $0x28] sm:$0xff] }
   0xe   :  { %116 = vmatpush.bf16.msra.mxu0 %v278_v4  ;;  %291 = vmatpush.bf16.msra.mxu1 %v278_v4  ;;  %v34_v16 = vld [vmem:[#allocation2 + $0x30] sm:$0xff] }
   0xf   :  { %292 = vmatpush.bf16.msra.mxu2 %v278_v4  ;;  %293 = vmatpush.bf16.msra.mxu3 %v278_v4  ;;  %v35_v30 = vld [vmem:[#allocation2 + $0x38] sm:$0xff] }
  0x11   :  { %270 = vmatmul.msk.bf16.vlgmr.msra.gmra.mxu0 %vm19_vm0, %v274_v5  ;;  %271 = vmatmul.msk.bf16.vlgmr.msra.gmra.mxu1 %vm19_vm0, %v275_v6 }
  0x12   :  { %272 = vmatmul.msk.bf16.vlgmr.msra.gmra.mxu2 %vm19_vm0, %v276_v7  ;;  %273 = vmatmul.msk.bf16.vlgmr.msra.gmra.mxu3 %vm19_vm0, %v277_v8 }
  0x8e   :  { %v118_v11 = vpop.f32.mrf.mxu0  ;;  %v123_v12 = vpop.f32.mrf.mxu1 }
  0x8f   :  { %v138_v13 = vadd.f32 %v118_v11, %v28_v9  ;;  %v140_v14 = vadd.f32 %v123_v12, %v30_v10 }
  0x91   :  { %146 = vst.msk [vmem:[#allocation2] sm:$0xff] %vm19_vm0, %v138_v13 }
  0x92   :  { %148 = vst.msk [vmem:[#allocation2 + $0x10] sm:$0xff] %vm19_vm0, %v140_v14 }
  0x95   :  { %v128_v17 = vpop.f32.mrf.mxu2  ;;  %v133_v18 = vpop.f32.mrf.mxu3 }
  0x96   :  { %v142_v20 = vadd.f32 %v128_v17, %v32_v15  ;;  %v120_v21 = vpop.f32.mrf.mxu0  ;;  %v125_v23 = vpop.f32.mrf.mxu1  ;;  %v144_v24 = vadd.f32 %v133_v18, %v34_v16 }
  0x97   :  { %v139_v26 = vadd.f32 %v120_v21, %v29_v19  ;;  %v141_v28 = vadd.f32 %v125_v23, %v31_v22 }
  0x98   :  { %v157_v25 = vld [vmem:[#allocation2] sm:$0xff]  ;;  %150 = vst.msk [vmem:[#allocation2 + $0x20] sm:$0xff] %vm19_vm0, %v142_v20 }
  0x99   :  { %165 = vst.msk [vmem:[%s421_s2] sm:$0xff] %vm19_vm0, %v157_v25  ;;  %v159_v27 = vld [vmem:[#allocation2 + $0x10] sm:$0xff]  ;;  %v196_v36 = vmul.f32 %v157_v25, %v157_v25  ;;  %v173_v39 = vsel %vm19_vm0, %v157_v25, 0.0 }
  0x9a   :  { %167 = vst.msk [vmem:[%s421_s2 + $0x10] sm:$0xff] %vm19_vm0, %v159_v27  ;;  %v198_v40 = vmul.f32 %v159_v27, %v159_v27  ;;  %v176_v46 = vsel %vm19_vm0, %v159_v27, 0.0 }
  0x9b   :  { %152 = vst.msk [vmem:[#allocation2 + $0x30] sm:$0xff] %vm19_vm0, %v144_v24  ;;  %v204_v45 = vsel %vm19_vm0, %v196_v36, 0.0 }
  0x9c   :  { %147 = vst.msk [vmem:[#allocation2 + $0x8] sm:$0xff] %vm19_vm0, %v139_v26  ;;  %v207_v51 = vsel %vm19_vm0, %v198_v40, 0.0 }
  0x9d   :  { %149 = vst.msk [vmem:[#allocation2 + $0x18] sm:$0xff] %vm19_vm0, %v141_v28  ;;  %v130_v31 = vpop.f32.mrf.mxu2  ;;  %v135_v32 = vpop.f32.mrf.mxu3 }
  0x9e   :  { %v143_v33 = vadd.f32 %v130_v31, %v33_v29  ;;  %v145_v34 = vadd.f32 %v135_v32, %v35_v30 }
  0x9f   :  { %v161_v35 = vld [vmem:[#allocation2 + $0x20] sm:$0xff] }
  0xa0   :  { %169 = vst.msk [vmem:[%s421_s2 + $0x20] sm:$0xff] %vm19_vm0, %v161_v35  ;;  %v200_v52 = vmul.f32 %v161_v35, %v161_v35  ;;  %v180_v58 = vsel %vm19_vm0, %v161_v35, 0.0 }
  0xa1   :  { %151 = vst.msk [vmem:[#allocation2 + $0x28] sm:$0xff] %vm19_vm0, %v143_v33 }
  0xa2   :  { %v163_v37 = vld [vmem:[#allocation2 + $0x30] sm:$0xff]  ;;  %153 = vst.msk [vmem:[#allocation2 + $0x38] sm:$0xff] %vm19_vm0, %v145_v34  ;;  %v211_v63 = vsel %vm19_vm0, %v200_v52, 0.0 }
  0xa3   :  { %171 = vst.msk [vmem:[%s421_s2 + $0x30] sm:$0xff] %vm19_vm0, %v163_v37  ;;  %v158_v38 = vld [vmem:[#allocation2 + $0x8] sm:$0xff]  ;;  %v202_v0 = vmul.f32 %v163_v37, %v163_v37  ;;  %v184_v4 = vsel %vm19_vm0, %v163_v37, 0.0 }
  0xa4   :  { %166 = vst.msk [vmem:[%s421_s2 + $0x8] sm:$0xff] %vm19_vm0, %v158_v38  ;;  %v174_v41 = vsel %vm19_vm0, %v158_v38, 0.0  ;;  %v197_v42 = vmul.f32 %v158_v38, %v158_v38  ;;  %v160_v43 = vld [vmem:[#allocation2 + $0x18] sm:$0xff] }
  0xa5   :  { %v175_v44 = vadd.f32 %v174_v41, %v173_v39  ;;  %168 = vst.msk [vmem:[%s421_s2 + $0x18] sm:$0xff] %vm19_vm0, %v160_v43  ;;  %v199_v48 = vmul.f32 %v160_v43, %v160_v43  ;;  %v178_v53 = vsel %vm19_vm0, %v160_v43, 0.0  ;;  %v215_v9 = vsel %vm19_vm0, %v202_v0, 0.0 }
  0xa6   :  { %v205_v47 = vsel %vm19_vm0, %v197_v42, 0.0 }
  0xa7   :  { %v206_v49 = vadd.f32 %v205_v47, %v204_v45  ;;  %v177_v50 = vadd.f32 %v176_v46, %v175_v44  ;;  %v209_v59 = vsel %vm19_vm0, %v199_v48, 0.0 }
  0xa8   :  { %v162_v54 = vld [vmem:[#allocation2 + $0x28] sm:$0xff] }
  0xa9   :  { %v179_v55 = vadd.f32 %v178_v53, %v177_v50  ;;  %v208_v56 = vadd.f32 %v207_v51, %v206_v49  ;;  %170 = vst.msk [vmem:[%s421_s2 + $0x28] sm:$0xff] %vm19_vm0, %v162_v54  ;;  %v164_v57 = vld [vmem:[#allocation2 + $0x38] sm:$0xff]  ;;  %v201_v60 = vmul.f32 %v162_v54, %v162_v54  ;;  %v182_v1 = vsel %vm19_vm0, %v162_v54, 0.0 }
  0xaa   :  { %172 = vst.msk [vmem:[%s421_s2 + $0x38] sm:$0xff] %vm19_vm0, %v164_v57  ;;  %v203_v6 = vmul.f32 %v164_v57, %v164_v57  ;;  %v186_v10 = vsel %vm19_vm0, %v164_v57, 0.0 }
  0xab   :  { %v210_v61 = vadd.f32 %v209_v59, %v208_v56  ;;  %v181_v62 = vadd.f32 %v180_v58, %v179_v55  ;;  %v213_v5 = vsel %vm19_vm0, %v201_v60, 0.0 }
  0xac   :  { %v217_v13 = vsel %vm19_vm0, %v203_v6, 0.0 }
  0xad   :  { %v183_v2 = vadd.f32 %v182_v1, %v181_v62  ;;  %v212_v3 = vadd.f32 %v211_v63, %v210_v61 }
  0xaf   :  { %v214_v7 = vadd.f32 %v213_v5, %v212_v3  ;;  %v185_v8 = vadd.f32 %v184_v4, %v183_v2 }
  0xb1   :  { %v187_v11 = vadd.f32 %v186_v10, %v185_v8  ;;  %v216_v12 = vadd.f32 %v215_v9, %v214_v7 }
  0xb3   :  { %v188_v14 = vrot.slane %v187_v11, 4  ;;  %v218_v15 = vadd.f32 %v217_v13, %v216_v12 }
  0xb5   :  { %v189_v16 = vadd.f32 %v188_v14, %v187_v11  ;;  %v219_v17 = vrot.slane %v218_v15, 4 }
  0xb7   :  { %v190_v18 = vrot.slane %v189_v16, 2  ;;  %v220_v19 = vadd.f32 %v219_v17, %v218_v15 }
  0xb9   :  { %v191_v20 = vadd.f32 %v190_v18, %v189_v16  ;;  %v221_v21 = vrot.slane %v220_v19, 2 }
  0xbb   :  { %v192_v22 = vrot.slane %v191_v20, 1  ;;  %v222_v23 = vadd.f32 %v221_v21, %v220_v19 }
  0xbd   :  { %v193_v24 = vadd.f32 %v192_v22, %v191_v20  ;;  %v223_v25 = vrot.slane %v222_v23, 1 }
  0xbf   :  { %195 = vst.msk [vmem:[%s422_s3] sm:$0x1] %vm194_vm1, %v193_v24  ;;  %v224_v26 = vadd.f32 %v223_v25, %v222_v23 }
  0xc1   :  { %225 = vst.msk [vmem:[%s423_s4] sm:$0x1] %vm194_vm1, %v224_v26 }

// kernel: _lambda_.65
= control target key start
LH: loop header
LB: loop body
LE: loop exit
PB: predicated region body
PF: predicated region fallthrough
CT: control target
= control target key end

     0   :  { %vm46_vm0 = vcmask 130048   ;;  %s143_s0 = inlined_call_operand.vmem [shape: f32[64,16], index: 0, kind: input, shape index: {}]   ;;  %s144_s1 = inlined_call_operand.vmem [shape: f32[1,16], index: 1, kind: input, shape index: {}]   ;;  %s145_s2 = inlined_call_operand.vmem [shape: f32[1,16], index: 2, kind: input, shape index: {}]   ;;  %s146_s3 = inlined_call_operand.vmem [shape: f32[64,16], index: 3, kind: output, shape index: {}]  }
   0x1   :  { %v14_v0 = vld [vmem:[%s143_s0] sm:$0xff]  ;;  %v15_v3 = vld [vmem:[%s143_s0 + $0x8] sm:$0xff]  ;;  %v16_v6 = vld [vmem:[%s143_s0 + $0x10] sm:$0xff] }
   0x2   :  { %v59_v1 = vld [vmem:[%s144_s1] ss:$0 sm:$0xff]  ;;  %v17_v7 = vld [vmem:[%s143_s0 + $0x18] sm:$0xff]  ;;  %v19_v12 = vld [vmem:[%s143_s0 + $0x28] sm:$0xff] }
   0x3   :  { %v60_v2 = vld [vmem:[%s145_s2] ss:$0 sm:$0xff]  ;;  %v26_v4 = vmul.f32 %v59_v1, %v14_v0  ;;  %v27_v5 = vmul.f32 %v59_v1, %v15_v3  ;;  %v28_v9 = vmul.f32 %v59_v1, %v16_v6  ;;  %v29_v10 = vmul.f32 %v59_v1, %v17_v7  ;;  %v20_v13 = vld [vmem:[%s143_s0 + $0x30] sm:$0xff]  ;;  %v21_v14 = vld [vmem:[%s143_s0 + $0x38] sm:$0xff] }
   0x4   :  { %v18_v8 = vld [vmem:[%s143_s0 + $0x20] sm:$0xff]  ;;  %v31_v17 = vmul.f32 %v59_v1, %v19_v12  ;;  %v32_v18 = vmul.f32 %v59_v1, %v20_v13  ;;  %v33_v21 = vmul.f32 %v59_v1, %v21_v14 }
   0x5   :  { %v30_v11 = vmul.f32 %v59_v1, %v18_v8  ;;  %v38_v15 = vadd.f32 %v60_v2, %v26_v4  ;;  %v39_v16 = vadd.f32 %v60_v2, %v27_v5  ;;  %v40_v19 = vadd.f32 %v60_v2, %v28_v9 }
   0x6   :  { %v41_v20 = vadd.f32 %v60_v2, %v29_v10  ;;  %v43_v23 = vadd.f32 %v60_v2, %v31_v17  ;;  %v44_v24 = vadd.f32 %v60_v2, %v32_v18  ;;  %v45_v25 = vadd.f32 %v60_v2, %v33_v21 }
   0x7   :  { %47 = vst.msk [vmem:[%s146_s3] sm:$0xff] %vm46_vm0, %v38_v15  ;;  %v42_v22 = vadd.f32 %v60_v2, %v30_v11 }
   0x8   :  { %48 = vst.msk [vmem:[%s146_s3 + $0x8] sm:$0xff] %vm46_vm0, %v39_v16 }
   0x9   :  { %49 = vst.msk [vmem:[%s146_s3 + $0x10] sm:$0xff] %vm46_vm0, %v40_v19 }
   0xa   :  { %50 = vst.msk [vmem:[%s146_s3 + $0x18] sm:$0xff] %vm46_vm0, %v41_v20 }
   0xb   :  { %51 = vst.msk [vmem:[%s146_s3 + $0x20] sm:$0xff] %vm46_vm0, %v42_v22 }
   0xc   :  { %52 = vst.msk [vmem:[%s146_s3 + $0x28] sm:$0xff] %vm46_vm0, %v43_v23 }
   0xd   :  { %53 = vst.msk [vmem:[%s146_s3 + $0x30] sm:$0xff] %vm46_vm0, %v44_v24 }
   0xe   :  { %54 = vst.msk [vmem:[%s146_s3 + $0x38] sm:$0xff] %vm46_vm0, %v45_v25 }

// kernel: _lambda_.62
= control target key start
LH: loop header
LB: loop body
LE: loop exit
PB: predicated region body
PF: predicated region fallthrough
CT: control target
= control target key end

     0   :  { %vm18_vm0 = vcmask 130048   ;;  %v507_v40 = vmov 0.0   ;;  %vm326_vm1 = vcmask 122880   ;;  %s699_s1 = inlined_call_operand.vmem [shape: bf16[256,16], index: 1, kind: input, shape index: {}]   ;;  %s700_s0 = inlined_call_operand.vmem [shape: bf16[64,256], index: 0, kind: input, shape index: {}]   ;;  %s701_s2 = inlined_call_operand.vmem [shape: f32[64,16], index: 2, kind: output, shape index: {0}]   ;;  %s702_s3 = inlined_call_operand.vmem [shape: f32[1,1,16], index: 3, kind: output, shape index: {1}]   ;;  %s703_s4 = inlined_call_operand.vmem [shape: f32[1,1,16], index: 4, kind: output, shape index: {2}]  }
   0x1   :  { %v481_v0 = vld [vmem:[%s699_s1 + $0x38] sm:$0xff]  ;;  %v480_v2 = vld [vmem:[%s699_s1 + $0x30] sm:$0xff]  ;;  %v479_v4 = vld [vmem:[%s699_s1 + $0x28] sm:$0xff]  ;;  %19 = vst.msk [vmem:[#allocation2] sm:$0xff] %vm18_vm0, %v507_v40 }
   0x2   :  { %v489_v1 = vld [vmem:[%s699_s1 + $0x78] sm:$0xff]  ;;  %211 = vmatpush.bf16.msra.mxu0 %v481_v0  ;;  %490 = vmatpush.bf16.msra.mxu2 %v481_v0  ;;  %v488_v3 = vld [vmem:[%s699_s1 + $0x70] sm:$0xff]  ;;  %v487_v5 = vld [vmem:[%s699_s1 + $0x68] sm:$0xff]  ;;  %20 = vst.msk [vmem:[#allocation2 + $0x8] sm:$0xff] %vm18_vm0, %v507_v40 }
   0x3   :  { %240 = vmatpush.bf16.msra.mxu1 %v489_v1  ;;  %498 = vmatpush.bf16.msra.mxu3 %v489_v1  ;;  %v478_v6 = vld [vmem:[%s699_s1 + $0x20] sm:$0xff]  ;;  %v477_v8 = vld [vmem:[%s699_s1 + $0x18] sm:$0xff]  ;;  %v476_v10 = vld [vmem:[%s699_s1 + $0x10] sm:$0xff]  ;;  %21 = vst.msk [vmem:[#allocation2 + $0x10] sm:$0xff] %vm18_vm0, %v507_v40 }
   0x4   :  { %v486_v7 = vld [vmem:[%s699_s1 + $0x60] sm:$0xff]  ;;  %v485_v9 = vld [vmem:[%s699_s1 + $0x58] sm:$0xff]  ;;  %v484_v11 = vld [vmem:[%s699_s1 + $0x50] sm:$0xff]  ;;  %22 = vst.msk [vmem:[#allocation2 + $0x18] sm:$0xff] %vm18_vm0, %v507_v40 }
   0x5   :  { %v475_v12 = vld [vmem:[%s699_s1 + $0x8] sm:$0xff]  ;;  %v474_v14 = vld [vmem:[%s699_s1] sm:$0xff]  ;;  %v380_v28 = vld [vmem:[%s700_s0 + $0x10] sm:$0xf]  ;;  %23 = vst.msk [vmem:[#allocation2 + $0x20] sm:$0xff] %vm18_vm0, %v507_v40 }
   0x6   :  { %212 = vmatpush.bf16.msra.mxu0 %v480_v2  ;;  %491 = vmatpush.bf16.msra.mxu2 %v480_v2  ;;  %v483_v13 = vld [vmem:[%s699_s1 + $0x48] sm:$0xff]  ;;  %v482_v15 = vld [vmem:[%s699_s1 + $0x40] sm:$0xff]  ;;  %v469_v29 = vld [vmem:[%s700_s0 + $0x14] sm:$0xf0]  ;;  %24 = vst.msk [vmem:[#allocation2 + $0x28] sm:$0xff] %vm18_vm0, %v507_v40 }
   0x7   :  { %241 = vmatpush.bf16.msra.mxu1 %v488_v3  ;;  %499 = vmatpush.bf16.msra.mxu3 %v488_v3  ;;  %v372_v16 = vld [vmem:[%s700_s0] sm:$0xf]  ;;  %v467_v17 = vld [vmem:[%s700_s0 + $0x4] sm:$0xf0]  ;;  %v466_v20 = vld [vmem:[%s700_s0 + $0x4] sm:$0xf]  ;;  %v381_v36 = vor.u32 %v469_v29, %v380_v28 }
   0x8   :  { %v388_v18 = vld [vmem:[%s700_s0 + $0x20] sm:$0xf]  ;;  %v471_v19 = vld [vmem:[%s700_s0 + $0x24] sm:$0xf0]  ;;  %v374_v21 = vld [vmem:[%s700_s0 + $0x8] sm:$0xf0]  ;;  %v373_v24 = vor.u32 %v467_v17, %v372_v16 }
   0x9   :  { %v470_v22 = vld [vmem:[%s700_s0 + $0x24] sm:$0xf]  ;;  %v390_v23 = vld [vmem:[%s700_s0 + $0x28] sm:$0xf0]  ;;  %v389_v25 = vor.u32 %v471_v19, %v388_v18  ;;  %v377_v26 = vor.u32 %v466_v20, %v374_v21  ;;  %v396_v30 = vld [vmem:[%s700_s0 + $0x30] sm:$0xf] }
   0xa   :  { %213 = vmatpush.bf16.msra.mxu0 %v479_v4  ;;  %492 = vmatpush.bf16.msra.mxu2 %v479_v4  ;;  %v393_v27 = vor.u32 %v470_v22, %v390_v23  ;;  %v473_v31 = vld [vmem:[%s700_s0 + $0x34] sm:$0xf0]  ;;  %v468_v32 = vld [vmem:[%s700_s0 + $0x14] sm:$0xf]  ;;  %v382_v33 = vld [vmem:[%s700_s0 + $0x18] sm:$0xf0] }
   0xb   :  { %242 = vmatpush.bf16.msra.mxu1 %v487_v5  ;;  %500 = vmatpush.bf16.msra.mxu3 %v487_v5  ;;  %v472_v34 = vld [vmem:[%s700_s0 + $0x34] sm:$0xf]  ;;  %v398_v35 = vld [vmem:[%s700_s0 + $0x38] sm:$0xf0]  ;;  %v397_v37 = vor.u32 %v473_v31, %v396_v30  ;;  %v385_v38 = vor.u32 %v468_v32, %v382_v33  ;;  %25 = vst.msk [vmem:[#allocation2 + $0x30] sm:$0xff] %vm18_vm0, %v507_v40  ;;  %v27_v42 = vld [vmem:[#allocation2] sm:$0xff] }
   0xc   :  { %v401_v39 = vor.u32 %v472_v34, %v398_v35  ;;  %26 = vst.msk [vmem:[#allocation2 + $0x38] sm:$0xff] %vm18_vm0, %v507_v40  ;;  %v31_v47 = vld [vmem:[#allocation2 + $0x20] sm:$0xff]  ;;  %v28_v51 = vld [vmem:[#allocation2 + $0x8] sm:$0xff]  ;;  %v29_v62 = vld [vmem:[#allocation2 + $0x10] sm:$0xff] }
   0xd   :  { %v32_v58 = vld [vmem:[#allocation2 + $0x28] sm:$0xff] }
   0xe   :  { %214 = vmatpush.bf16.msra.mxu0 %v478_v6  ;;  %493 = vmatpush.bf16.msra.mxu2 %v478_v6 }
   0xf   :  { %243 = vmatpush.bf16.msra.mxu1 %v486_v7  ;;  %501 = vmatpush.bf16.msra.mxu3 %v486_v7 }
  0x12   :  { %215 = vmatpush.bf16.msra.mxu0 %v477_v8  ;;  %494 = vmatpush.bf16.msra.mxu2 %v477_v8  ;;  %v33_v6 = vld [vmem:[#allocation2 + $0x30] sm:$0xff] }
  0x13   :  { %244 = vmatpush.bf16.msra.mxu1 %v485_v9  ;;  %502 = vmatpush.bf16.msra.mxu3 %v485_v9  ;;  %v34_v19 = vld [vmem:[#allocation2 + $0x38] sm:$0xff] }
  0x16   :  { %216 = vmatpush.bf16.msra.mxu0 %v476_v10  ;;  %495 = vmatpush.bf16.msra.mxu2 %v476_v10  ;;  %v30_v10 = vld [vmem:[#allocation2 + $0x18] sm:$0xff] }
  0x17   :  { %245 = vmatpush.bf16.msra.mxu1 %v484_v11  ;;  %503 = vmatpush.bf16.msra.mxu3 %v484_v11 }
  0x1a   :  { %217 = vmatpush.bf16.msra.mxu0 %v475_v12  ;;  %496 = vmatpush.bf16.msra.mxu2 %v475_v12 }
  0x1b   :  { %246 = vmatpush.bf16.msra.mxu1 %v483_v13  ;;  %504 = vmatpush.bf16.msra.mxu3 %v483_v13 }
  0x1e   :  { %218 = vmatpush.bf16.msra.mxu0 %v474_v14  ;;  %497 = vmatpush.bf16.msra.mxu2 %v474_v14 }
  0x1f   :  { %247 = vmatpush.bf16.msra.mxu1 %v482_v15  ;;  %505 = vmatpush.bf16.msra.mxu3 %v482_v15 }
  0x21   :  { %219 = vmatmul.bf16.vlgmr.msra.gmra.mxu0 %v373_v24  ;;  %229 = vmatmul.bf16.vlgmr.msra.gmra.mxu2 %v389_v25 }
  0x22   :  { %248 = vmatmul.bf16.vlgmr.msra.gmra.mxu1 %v377_v26  ;;  %258 = vmatmul.bf16.vlgmr.msra.gmra.mxu3 %v393_v27 }
  0x31   :  { %224 = vmatmul.bf16.gmra.mxu0 %v381_v36  ;;  %234 = vmatmul.bf16.gmra.mxu2 %v397_v37 }
  0x32   :  { %253 = vmatmul.bf16.gmra.mxu1 %v385_v38  ;;  %263 = vmatmul.bf16.gmra.mxu3 %v401_v39 }
  0x9e   :  { %v220_v41 = vpop.f32.mrf.mxu0 }
  0x9f   :  { %v249_v43 = vpop.f32.mrf.mxu1 }
  0xa0   :  { %v250_v44 = vadd.f32 %v249_v43, %v220_v41 }
  0xa2   :  { %v269_v45 = vadd.f32 %v250_v44, %v27_v42 }
  0xa4   :  { %278 = vst.msk [vmem:[#allocation2] sm:$0xff] %vm18_vm0, %v269_v45  ;;  %v230_v46 = vpop.f32.mrf.mxu2 }
  0xa5   :  { %v259_v48 = vpop.f32.mrf.mxu3 }
  0xa6   :  { %v260_v49 = vadd.f32 %v259_v48, %v230_v46  ;;  %v222_v50 = vpop.f32.mrf.mxu0 }
  0xa7   :  { %v251_v52 = vpop.f32.mrf.mxu1 }
  0xa8   :  { %v273_v53 = vadd.f32 %v260_v49, %v31_v47  ;;  %v252_v54 = vadd.f32 %v251_v52, %v222_v50 }
  0xaa   :  { %282 = vst.msk [vmem:[#allocation2 + $0x20] sm:$0xff] %vm18_vm0, %v273_v53  ;;  %v270_v55 = vadd.f32 %v252_v54, %v28_v51 }
  0xab   :  { %v289_v56 = vld [vmem:[#allocation2] sm:$0xff] }
  0xac   :  { %297 = vst.msk [vmem:[%s701_s2] sm:$0xff] %vm18_vm0, %v289_v56  ;;  %v232_v57 = vpop.f32.mrf.mxu2  ;;  %v328_v22 = vmul.f32 %v289_v56, %v289_v56  ;;  %v305_v26 = vsel %vm18_vm0, %v289_v56, 0.0 }
  0xad   :  { %279 = vst.msk [vmem:[#allocation2 + $0x8] sm:$0xff] %vm18_vm0, %v270_v55  ;;  %v261_v59 = vpop.f32.mrf.mxu3 }
  0xae   :  { %v262_v60 = vadd.f32 %v261_v59, %v232_v57  ;;  %v225_v61 = vpop.f32.mrf.mxu0  ;;  %v336_v31 = vsel %vm18_vm0, %v328_v22, 0.0 }
  0xaf   :  { %v254_v63 = vpop.f32.mrf.mxu1 }
  0xb0   :  { %v274_v0 = vadd.f32 %v262_v60, %v32_v58  ;;  %v255_v1 = vadd.f32 %v254_v63, %v225_v61 }
  0xb1   :  { %v293_v2 = vld [vmem:[#allocation2 + $0x20] sm:$0xff] }
  0xb2   :  { %301 = vst.msk [vmem:[%s701_s2 + $0x20] sm:$0xff] %vm18_vm0, %v293_v2  ;;  %v271_v3 = vadd.f32 %v255_v1, %v29_v62  ;;  %v332_v36 = vmul.f32 %v293_v2, %v293_v2  ;;  %v312_v41 = vsel %vm18_vm0, %v293_v2, 0.0 }
  0xb3   :  { %283 = vst.msk [vmem:[#allocation2 + $0x28] sm:$0xff] %vm18_vm0, %v274_v0 }
  0xb4   :  { %v290_v4 = vld [vmem:[#allocation2 + $0x8] sm:$0xff]  ;;  %280 = vst.msk [vmem:[#allocation2 + $0x10] sm:$0xff] %vm18_vm0, %v271_v3  ;;  %v235_v5 = vpop.f32.mrf.mxu2  ;;  %v343_v46 = vsel %vm18_vm0, %v332_v36, 0.0 }
  0xb5   :  { %298 = vst.msk [vmem:[%s701_s2 + $0x8] sm:$0xff] %vm18_vm0, %v290_v4  ;;  %v264_v7 = vpop.f32.mrf.mxu3  ;;  %v329_v18 = vmul.f32 %v290_v4, %v290_v4  ;;  %v306_v23 = vsel %vm18_vm0, %v290_v4, 0.0 }
  0xb6   :  { %v265_v8 = vadd.f32 %v264_v7, %v235_v5  ;;  %v227_v9 = vpop.f32.mrf.mxu0  ;;  %v307_v30 = vadd.f32 %v306_v23, %v305_v26 }
  0xb7   :  { %v256_v11 = vpop.f32.mrf.mxu1  ;;  %v337_v27 = vsel %vm18_vm0, %v329_v18, 0.0 }
  0xb8   :  { %v275_v12 = vadd.f32 %v265_v8, %v33_v6  ;;  %v257_v13 = vadd.f32 %v256_v11, %v227_v9  ;;  %v338_v33 = vadd.f32 %v337_v27, %v336_v31 }
  0xba   :  { %v294_v14 = vld [vmem:[#allocation2 + $0x28] sm:$0xff]  ;;  %284 = vst.msk [vmem:[#allocation2 + $0x30] sm:$0xff] %vm18_vm0, %v275_v12  ;;  %v272_v15 = vadd.f32 %v257_v13, %v30_v10 }
  0xbb   :  { %302 = vst.msk [vmem:[%s701_s2 + $0x28] sm:$0xff] %vm18_vm0, %v294_v14  ;;  %v291_v16 = vld [vmem:[#allocation2 + $0x10] sm:$0xff]  ;;  %v333_v42 = vmul.f32 %v294_v14, %v294_v14  ;;  %v314_v47 = vsel %vm18_vm0, %v294_v14, 0.0 }
  0xbc   :  { %299 = vst.msk [vmem:[%s701_s2 + $0x10] sm:$0xff] %vm18_vm0, %v291_v16  ;;  %v237_v17 = vpop.f32.mrf.mxu2  ;;  %v330_v24 = vmul.f32 %v291_v16, %v291_v16  ;;  %v308_v28 = vsel %vm18_vm0, %v291_v16, 0.0 }
  0xbd   :  { %281 = vst.msk [vmem:[#allocation2 + $0x18] sm:$0xff] %vm18_vm0, %v272_v15  ;;  %v266_v20 = vpop.f32.mrf.mxu3  ;;  %v309_v34 = vadd.f32 %v308_v28, %v307_v30  ;;  %v345_v52 = vsel %vm18_vm0, %v333_v42, 0.0 }
  0xbe   :  { %v267_v21 = vadd.f32 %v266_v20, %v237_v17  ;;  %v339_v32 = vsel %vm18_vm0, %v330_v24, 0.0 }
  0xbf   :  { %v340_v39 = vadd.f32 %v339_v32, %v338_v33 }
  0xc0   :  { %v276_v25 = vadd.f32 %v267_v21, %v34_v19 }
  0xc1   :  { %v295_v29 = vld [vmem:[#allocation2 + $0x30] sm:$0xff] }
  0xc2   :  { %303 = vst.msk [vmem:[%s701_s2 + $0x30] sm:$0xff] %vm18_vm0, %v295_v29  ;;  %v334_v48 = vmul.f32 %v295_v29, %v295_v29  ;;  %v316_v53 = vsel %vm18_vm0, %v295_v29, 0.0 }
  0xc3   :  { %285 = vst.msk [vmem:[#allocation2 + $0x38] sm:$0xff] %vm18_vm0, %v276_v25 }
  0xc4   :  { %v292_v35 = vld [vmem:[#allocation2 + $0x18] sm:$0xff]  ;;  %v347_v57 = vsel %vm18_vm0, %v334_v48, 0.0 }
  0xc5   :  { %300 = vst.msk [vmem:[%s701_s2 + $0x18] sm:$0xff] %vm18_vm0, %v292_v35  ;;  %v310_v37 = vsel %vm18_vm0, %v292_v35, 0.0  ;;  %v331_v38 = vmul.f32 %v292_v35, %v292_v35 }
  0xc6   :  { %v311_v40 = vadd.f32 %v310_v37, %v309_v34 }
  0xc7   :  { %v341_v43 = vsel %vm18_vm0, %v331_v38, 0.0 }
  0xc8   :  { %v313_v44 = vadd.f32 %v312_v41, %v311_v40  ;;  %v342_v45 = vadd.f32 %v341_v43, %v340_v39 }
  0xca   :  { %v344_v49 = vadd.f32 %v343_v46, %v342_v45  ;;  %v296_v50 = vld [vmem:[#allocation2 + $0x38] sm:$0xff]  ;;  %v315_v51 = vadd.f32 %v314_v47, %v313_v44 }
  0xcb   :  { %304 = vst.msk [vmem:[%s701_s2 + $0x38] sm:$0xff] %vm18_vm0, %v296_v50  ;;  %v335_v54 = vmul.f32 %v296_v50, %v296_v50  ;;  %v318_v58 = vsel %vm18_vm0, %v296_v50, 0.0 }
  0xcc   :  { %v317_v55 = vadd.f32 %v316_v53, %v315_v51  ;;  %v346_v56 = vadd.f32 %v345_v52, %v344_v49 }
  0xcd   :  { %v349_v61 = vsel %vm18_vm0, %v335_v54, 0.0 }
  0xce   :  { %v319_v59 = vadd.f32 %v318_v58, %v317_v55  ;;  %v348_v60 = vadd.f32 %v347_v57, %v346_v56 }
  0xd0   :  { %v320_v62 = vrot.slane %v319_v59, 4  ;;  %v350_v63 = vadd.f32 %v349_v61, %v348_v60 }
  0xd2   :  { %v321_v0 = vadd.f32 %v320_v62, %v319_v59  ;;  %v351_v1 = vrot.slane %v350_v63, 4 }
  0xd4   :  { %v322_v2 = vrot.slane %v321_v0, 2  ;;  %v352_v3 = vadd.f32 %v351_v1, %v350_v63 }
  0xd6   :  { %v323_v4 = vadd.f32 %v322_v2, %v321_v0  ;;  %v353_v5 = vrot.slane %v352_v3, 2 }
  0xd8   :  { %v324_v6 = vrot.slane %v323_v4, 1  ;;  %v354_v7 = vadd.f32 %v353_v5, %v352_v3 }
  0xda   :  { %v325_v8 = vadd.f32 %v324_v6, %v323_v4  ;;  %v355_v9 = vrot.slane %v354_v7, 1 }
  0xdc   :  { %327 = vst.msk [vmem:[%s702_s3] sm:$0x1] %vm326_vm1, %v325_v8  ;;  %v356_v10 = vadd.f32 %v355_v9, %v354_v7 }
  0xde   :  { %357 = vst.msk [vmem:[%s703_s4] sm:$0x1] %vm326_vm1, %v356_v10 }

// kernel: _lambda_.70
= control target key start
LH: loop header
LB: loop body
LE: loop exit
PB: predicated region body
PF: predicated region fallthrough
CT: control target
= control target key end

     0   :  { %s201_s0 = inlined_call_operand.vmem [shape: f32[1,64,128], index: 0, kind: input, shape index: {}]   ;;  %s202_s1 = inlined_call_operand.vmem [shape: f32[1,128], index: 1, kind: input, shape index: {}]   ;;  %s203_s2 = inlined_call_operand.vmem [shape: f32[1,128], index: 2, kind: input, shape index: {}]   ;;  %s204_s3 = inlined_call_operand.vmem [shape: bf16[1,64,128], index: 3, kind: output, shape index: {}]  }
   0x1   :  { %v14_v0 = vld [vmem:[%s201_s0] sm:$0xff]  ;;  %v15_v1 = vld [vmem:[%s201_s0 + $0x8] sm:$0xff]  ;;  %v16_v4 = vld [vmem:[%s201_s0 + $0x10] sm:$0xff] }
   0x2   :  { %v137_v2 = vld [vmem:[%s202_s1] ss:$0 sm:$0xff]  ;;  %v17_v5 = vld [vmem:[%s201_s0 + $0x18] sm:$0xff]  ;;  %v19_v11 = vld [vmem:[%s201_s0 + $0x28] sm:$0xff] }
   0x3   :  { %v138_v3 = vld [vmem:[%s203_s2] ss:$0 sm:$0xff]  ;;  %v26_v7 = vmul.f32 %v137_v2, %v14_v0  ;;  %v27_v8 = vmul.f32 %v137_v2, %v15_v1  ;;  %v28_v9 = vmul.f32 %v137_v2, %v16_v4  ;;  %v29_v10 = vmul.f32 %v137_v2, %v17_v5  ;;  %v20_v12 = vld [vmem:[%s201_s0 + $0x30] sm:$0xff]  ;;  %v21_v13 = vld [vmem:[%s201_s0 + $0x38] sm:$0xff] }
   0x4   :  { %v18_v6 = vld [vmem:[%s201_s0 + $0x20] sm:$0xff]  ;;  %v31_v15 = vmul.f32 %v137_v2, %v19_v11  ;;  %v32_v16 = vmul.f32 %v137_v2, %v20_v12  ;;  %v33_v17 = vmul.f32 %v137_v2, %v21_v13 }
   0x5   :  { %v30_v14 = vmul.f32 %v137_v2, %v18_v6  ;;  %v38_v18 = vadd.f32 %v138_v3, %v26_v7  ;;  %v39_v19 = vadd.f32 %v138_v3, %v27_v8  ;;  %v40_v20 = vadd.f32 %v138_v3, %v28_v9 }
   0x6   :  { %v41_v21 = vadd.f32 %v138_v3, %v29_v10  ;;  %v43_v23 = vadd.f32 %v138_v3, %v31_v15  ;;  %v44_v24 = vadd.f32 %v138_v3, %v32_v16  ;;  %v45_v25 = vadd.f32 %v138_v3, %v33_v17 }
   0x7   :  { %v42_v22 = vadd.f32 %v138_v3, %v30_v14  ;;  %v106_v26 = vadd.f32 -1.0, %v38_v18  ;;  %v107_v27 = vadd.f32 -1.0, %v39_v19  ;;  %v108_v28 = vadd.f32 -1.0, %v40_v20 }
   0x8   :  { %v109_v29 = vadd.f32 -1.0, %v41_v21  ;;  %v111_v31 = vadd.f32 -1.0, %v43_v23  ;;  %v112_v32 = vadd.f32 -1.0, %v44_v24  ;;  %v113_v33 = vadd.f32 -1.0, %v45_v25 }
   0x9   :  { %v110_v30 = vadd.f32 -1.0, %v42_v22  ;;  %v54_v34 = vadd.f32 1.0, %v106_v26  ;;  %v55_v35 = vadd.f32 1.0, %v107_v27  ;;  %v56_v36 = vadd.f32 1.0, %v108_v28 }
   0xa   :  { %v57_v37 = vadd.f32 1.0, %v109_v29  ;;  %v59_v39 = vadd.f32 1.0, %v111_v31  ;;  %v60_v40 = vadd.f32 1.0, %v112_v32  ;;  %v61_v41 = vadd.f32 1.0, %v113_v33 }
   0xb   :  { %v58_v38 = vadd.f32 1.0, %v110_v30  ;;  %v62_v42 = vfloor.f32 %v54_v34  ;;  %v63_v43 = vfloor.f32 %v55_v35  ;;  %v64_v44 = vfloor.f32 %v56_v36 }
   0xc   :  { %v65_v45 = vfloor.f32 %v57_v37  ;;  %v67_v47 = vfloor.f32 %v59_v39  ;;  %v68_v48 = vfloor.f32 %v60_v40  ;;  %v69_v49 = vfloor.f32 %v61_v41 }
   0xd   :  { %v66_v46 = vfloor.f32 %v58_v38  ;;  %v70_v50 = vmax.f32 %v62_v42, 0.0  ;;  %v71_v51 = vmax.f32 %v63_v43, 0.0  ;;  %v72_v52 = vmax.f32 %v64_v44, 0.0 }
   0xe   :  { %v73_v53 = vmax.f32 %v65_v45, 0.0  ;;  %v75_v55 = vmax.f32 %v67_v47, 0.0  ;;  %v76_v56 = vmax.f32 %v68_v48, 0.0  ;;  %v77_v57 = vmax.f32 %v69_v49, 0.0 }
   0xf   :  { %v74_v54 = vmax.f32 %v66_v46, 0.0  ;;  %v78_v58 = vmin.f32 %v70_v50, 8.0  ;;  %v79_v59 = vmin.f32 %v71_v51, 8.0  ;;  %v80_v60 = vmin.f32 %v72_v52, 8.0 }
  0x10   :  { %v81_v61 = vmin.f32 %v73_v53, 8.0  ;;  %v83_v63 = vmin.f32 %v75_v55, 8.0  ;;  %v84_v0 = vmin.f32 %v76_v56, 8.0  ;;  %v85_v1 = vmin.f32 %v77_v57, 8.0 }
  0x11   :  { %v82_v62 = vmin.f32 %v74_v54, 8.0  ;;  %v117_v2 = vpack.c.bf16 %v79_v59, %v78_v58 }
  0x12   :  { %v122_v3 = vpack.c.bf16 %v81_v61, %v80_v60  ;;  %v132_v5 = vpack.c.bf16 %v85_v1, %v84_v0 }
  0x13   :  { %v127_v4 = vpack.c.bf16 %v83_v63, %v82_v62  ;;  %118 = vst [vmem:[%s204_s3] sm:$0xff] %v117_v2  }
  0x14   :  { %134 = vst [vmem:[%s204_s3 + $0x8] sm:$0xff] %v122_v3  }
  0x15   :  { %135 = vst [vmem:[%s204_s3 + $0x10] sm:$0xff] %v127_v4  }
  0x16   :  { %136 = vst [vmem:[%s204_s3 + $0x18] sm:$0xff] %v132_v5  }

// kernel: _lambda_.79
= control target key start
LH: loop header
LB: loop body
LE: loop exit
PB: predicated region body
PF: predicated region fallthrough
CT: control target
= control target key end

     0   :  { %vm194_vm0 = vcmask 1040384   ;;  %s465_s1 = inlined_call_operand.vmem [shape: bf16[128,256], index: 1, kind: input, shape index: {}]   ;;  %s466_s0 = inlined_call_operand.vmem [shape: bf16[16,128], index: 0, kind: input, shape index: {}]   ;;  %s467_s2 = inlined_call_operand.vmem [shape: f32[16,256], index: 2, kind: output, shape index: {0}]   ;;  %s468_s3 = inlined_call_operand.vmem [shape: f32[1,1,256], index: 3, kind: output, shape index: {1}]   ;;  %s469_s4 = inlined_call_operand.vmem [shape: f32[1,1,256], index: 4, kind: output, shape index: {2}]  }
   0x1   :  { %v300_v0 = vld [vmem:[%s465_s1 + $0x70] sm:$0xf]  ;;  %v322_v1 = vld [vmem:[%s465_s1 + $0x74] sm:$0xf0]  ;;  %v321_v2 = vld [vmem:[%s465_s1 + $0x74] sm:$0xf] }
   0x2   :  { %v301_v3 = vor.u32 %v322_v1, %v300_v0  ;;  %v302_v4 = vld [vmem:[%s465_s1 + $0x78] sm:$0xf0]  ;;  %v292_v5 = vld [vmem:[%s465_s1 + $0x60] sm:$0xf]  ;;  %v320_v6 = vld [vmem:[%s465_s1 + $0x64] sm:$0xf0] }
   0x3   :  { %v305_v7 = vor.u32 %v321_v2, %v302_v4  ;;  %v319_v8 = vld [vmem:[%s465_s1 + $0x64] sm:$0xf]  ;;  %v294_v9 = vld [vmem:[%s465_s1 + $0x68] sm:$0xf0]  ;;  %v293_v10 = vor.u32 %v320_v6, %v292_v5  ;;  %v284_v12 = vld [vmem:[%s465_s1 + $0x50] sm:$0xf] }
   0x4   :  { %130 = vmatpush.bf16.msra.mxu0 %v301_v3  ;;  %v297_v11 = vor.u32 %v319_v8, %v294_v9  ;;  %v318_v13 = vld [vmem:[%s465_s1 + $0x54] sm:$0xf0]  ;;  %v317_v14 = vld [vmem:[%s465_s1 + $0x54] sm:$0xf]  ;;  %v286_v15 = vld [vmem:[%s465_s1 + $0x58] sm:$0xf0] }
   0x5   :  { %144 = vmatpush.bf16.msra.mxu1 %v305_v7  ;;  %v285_v16 = vor.u32 %v318_v13, %v284_v12  ;;  %v289_v17 = vor.u32 %v317_v14, %v286_v15  ;;  %v276_v18 = vld [vmem:[%s465_s1 + $0x40] sm:$0xf]  ;;  %v316_v19 = vld [vmem:[%s465_s1 + $0x44] sm:$0xf0]  ;;  %v315_v20 = vld [vmem:[%s465_s1 + $0x44] sm:$0xf]  ;;  %v197_v14 = vlaneseq }
   0x6   :  { %v278_v21 = vld [vmem:[%s465_s1 + $0x48] sm:$0xf0]  ;;  %v277_v22 = vor.u32 %v316_v19, %v276_v18  ;;  %v268_v24 = vld [vmem:[%s465_s1 + $0x30] sm:$0xf]  ;;  %v314_v25 = vld [vmem:[%s465_s1 + $0x34] sm:$0xf0] }
   0x7   :  { %v281_v23 = vor.u32 %v315_v20, %v278_v21  ;;  %v313_v26 = vld [vmem:[%s465_s1 + $0x34] sm:$0xf]  ;;  %v270_v27 = vld [vmem:[%s465_s1 + $0x38] sm:$0xf0]  ;;  %v269_v28 = vor.u32 %v314_v25, %v268_v24  ;;  %v260_v30 = vld [vmem:[%s465_s1 + $0x20] sm:$0xf] }
   0x8   :  { %131 = vmatpush.bf16.msra.mxu0 %v293_v10  ;;  %v273_v29 = vor.u32 %v313_v26, %v270_v27  ;;  %v312_v31 = vld [vmem:[%s465_s1 + $0x24] sm:$0xf0]  ;;  %v311_v32 = vld [vmem:[%s465_s1 + $0x24] sm:$0xf]  ;;  %v262_v33 = vld [vmem:[%s465_s1 + $0x28] sm:$0xf0] }
   0x9   :  { %145 = vmatpush.bf16.msra.mxu1 %v297_v11  ;;  %v261_v34 = vor.u32 %v312_v31, %v260_v30  ;;  %v265_v35 = vor.u32 %v311_v32, %v262_v33  ;;  %v252_v36 = vld [vmem:[%s465_s1 + $0x10] sm:$0xf]  ;;  %v310_v37 = vld [vmem:[%s465_s1 + $0x14] sm:$0xf0]  ;;  %v309_v38 = vld [vmem:[%s465_s1 + $0x14] sm:$0xf] }
   0xa   :  { %v254_v39 = vld [vmem:[%s465_s1 + $0x18] sm:$0xf0]  ;;  %v253_v40 = vor.u32 %v310_v37, %v252_v36  ;;  %v244_v42 = vld [vmem:[%s465_s1] sm:$0xf]  ;;  %v308_v43 = vld [vmem:[%s465_s1 + $0x4] sm:$0xf0] }
   0xb   :  { %v257_v41 = vor.u32 %v309_v38, %v254_v39  ;;  %v307_v44 = vld [vmem:[%s465_s1 + $0x4] sm:$0xf]  ;;  %v246_v45 = vld [vmem:[%s465_s1 + $0x8] sm:$0xf0]  ;;  %v245_v46 = vor.u32 %v308_v43, %v244_v42  ;;  %vm199_vm1 = vcmp.lt.s32.totalorder %v197_v14, 256 }
   0xc   :  { %132 = vmatpush.bf16.msra.mxu0 %v285_v16  ;;  %v249_v47 = vor.u32 %v307_v44, %v246_v45  ;;  %v306_v48 = vld [vmem:[%s466_s0] sm:$0xff] }
   0xd   :  { %146 = vmatpush.bf16.msra.mxu1 %v289_v17 }
  0x10   :  { %133 = vmatpush.bf16.msra.mxu0 %v277_v22 }
  0x11   :  { %147 = vmatpush.bf16.msra.mxu1 %v281_v23 }
  0x14   :  { %134 = vmatpush.bf16.msra.mxu0 %v269_v28 }
  0x15   :  { %148 = vmatpush.bf16.msra.mxu1 %v273_v29 }
  0x18   :  { %135 = vmatpush.bf16.msra.mxu0 %v261_v34 }
  0x19   :  { %149 = vmatpush.bf16.msra.mxu1 %v265_v35 }
  0x1c   :  { %136 = vmatpush.bf16.msra.mxu0 %v253_v40 }
  0x1d   :  { %150 = vmatpush.bf16.msra.mxu1 %v257_v41 }
  0x20   :  { %137 = vmatpush.bf16.msra.mxu0 %v245_v46 }
  0x21   :  { %151 = vmatpush.bf16.msra.mxu1 %v249_v47 }
  0x23   :  { %138 = vmatmul.bf16.vlgmr.msra.gmra.mxu0 %v306_v48 }
  0x24   :  { %152 = vmatmul.bf16.vlgmr.msra.gmra.mxu1 %v306_v48 }
  0xa0   :  { %v139_v49 = vpop.f32.mrf.mxu0 }
  0xa1   :  { %173 = vst [vmem:[%s467_s2] sm:$0xff] %v139_v49  ;;  %v153_v50 = vpop.f32.mrf.mxu1  ;;  %v202_v52 = vmul.f32 %v139_v49, %v139_v49 }
  0xa2   :  { %174 = vst [vmem:[%s467_s2 + $0x8] sm:$0xff] %v153_v50  ;;  %v203_v56 = vmul.f32 %v153_v50, %v153_v50 }
  0xa8   :  { %v141_v51 = vpop.f32.mrf.mxu0 }
  0xa9   :  { %175 = vst [vmem:[%s467_s2 + $0x10] sm:$0xff] %v141_v51  ;;  %v177_v53 = vadd.f32 %v141_v51, %v139_v49  ;;  %v204_v54 = vmul.f32 %v141_v51, %v141_v51  ;;  %v155_v55 = vpop.f32.mrf.mxu1 }
  0xaa   :  { %176 = vst [vmem:[%s467_s2 + $0x18] sm:$0xff] %v155_v55  ;;  %v184_v57 = vadd.f32 %v155_v55, %v153_v50  ;;  %v205_v58 = vmul.f32 %v155_v55, %v155_v55 }
  0xab   :  { %v178_v59 = vrot.slane %v177_v53, 4  ;;  %v206_v60 = vadd.f32 %v204_v54, %v202_v52 }
  0xac   :  { %v185_v61 = vrot.slane %v184_v57, 4  ;;  %v213_v62 = vadd.f32 %v205_v58, %v203_v56 }
  0xad   :  { %v179_v63 = vadd.f32 %v178_v59, %v177_v53  ;;  %v207_v0 = vrot.slane %v206_v60, 4 }
  0xae   :  { %v186_v1 = vadd.f32 %v185_v61, %v184_v57  ;;  %v214_v2 = vrot.slane %v213_v62, 4 }
  0xaf   :  { %v180_v3 = vrot.slane %v179_v63, 2  ;;  %v208_v4 = vadd.f32 %v207_v0, %v206_v60 }
  0xb0   :  { %v187_v5 = vrot.slane %v186_v1, 2  ;;  %v215_v6 = vadd.f32 %v214_v2, %v213_v62 }
  0xb1   :  { %v181_v7 = vadd.f32 %v180_v3, %v179_v63  ;;  %v209_v8 = vrot.slane %v208_v4, 2 }
  0xb2   :  { %v188_v9 = vadd.f32 %v187_v5, %v186_v1  ;;  %v216_v10 = vrot.slane %v215_v6, 2 }
  0xb3   :  { %v210_v11 = vadd.f32 %v209_v8, %v208_v4  ;;  %v182_v12 = vrot.slane %v181_v7, 1 }
  0xb4   :  { %v189_v13 = vrot.slane %v188_v9, 1  ;;  %v217_v15 = vadd.f32 %v216_v10, %v215_v6 }
  0xb5   :  { %v211_v16 = vrot.slane %v210_v11, 1  ;;  %v183_v19 = vadd.f32 %v182_v12, %v181_v7 }
  0xb6   :  { %v190_v17 = vadd.f32 %v189_v13, %v188_v9  ;;  %v218_v18 = vrot.slane %v217_v15, 1 }
  0xb7   :  { %v212_v22 = vadd.f32 %v211_v16, %v210_v11 }
  0xb8   :  { %v193_v20 = vrot.slane %v190_v17, 7  ;;  %v219_v21 = vadd.f32 %v218_v18, %v217_v15 }
  0xba   :  { %v195_v23 = vsel %vm194_vm0, %v183_v19, %v193_v20  ;;  %v222_v24 = vrot.slane %v219_v21, 7 }
  0xbb   :  { %201 = vst.msk [vmem:[%s468_s3] sm:$0x3] %vm199_vm1, %v195_v23 }
  0xbc   :  { %v223_v25 = vsel %vm194_vm0, %v212_v22, %v222_v24 }
  0xbd   :  { %225 = vst.msk [vmem:[%s469_s4] sm:$0x3] %vm199_vm1, %v223_v25 }

// kernel: _lambda_.69
= control target key start
LH: loop header
LB: loop body
LE: loop exit
PB: predicated region body
PF: predicated region fallthrough
CT: control target
= control target key end

     0   :  { %s230_s0 = inlined_call_operand.vmem [shape: f32[64,128], index: 0, kind: input, shape index: {}]   ;;  %s231_s1 = inlined_call_operand.vmem [shape: f32[1,128], index: 1, kind: input, shape index: {}]   ;;  %s232_s2 = inlined_call_operand.vmem [shape: f32[1,128], index: 2, kind: input, shape index: {}]   ;;  %s233_s3 = inlined_call_operand.vmem [shape: f32[64,128], index: 3, kind: input, shape index: {}]   ;;  %s234_s4 = inlined_call_operand.vmem [shape: f32[1,128], index: 4, kind: input, shape index: {}]   ;;  %s235_s5 = inlined_call_operand.vmem [shape: f32[1,128], index: 5, kind: input, shape index: {}]   ;;  %s236_s6 = inlined_call_operand.vmem [shape: f32[64,128], index: 6, kind: output, shape index: {}]  }
   0x1   :  { %v23_v0 = vld [vmem:[%s230_s0] sm:$0xff]  ;;  %v24_v7 = vld [vmem:[%s230_s0 + $0x8] sm:$0xff]  ;;  %v25_v13 = vld [vmem:[%s230_s0 + $0x10] sm:$0xff] }
   0x2   :  { %v107_v1 = vld [vmem:[%s231_s1] ss:$0 sm:$0xff]  ;;  %v56_v8 = vld [vmem:[%s233_s3 + $0x8] sm:$0xff]  ;;  %v57_v14 = vld [vmem:[%s233_s3 + $0x10] sm:$0xff] }
   0x3   :  { %v108_v2 = vld [vmem:[%s232_s2] ss:$0 sm:$0xff]  ;;  %v35_v4 = vmul.f32 %v107_v1, %v23_v0  ;;  %v36_v11 = vmul.f32 %v107_v1, %v24_v7  ;;  %v26_v15 = vld [vmem:[%s230_s0 + $0x18] sm:$0xff]  ;;  %v37_v16 = vmul.f32 %v107_v1, %v25_v13  ;;  %v28_v26 = vld [vmem:[%s230_s0 + $0x28] sm:$0xff] }
   0x4   :  { %v55_v3 = vld [vmem:[%s233_s3] sm:$0xff]  ;;  %v38_v18 = vmul.f32 %v107_v1, %v26_v15  ;;  %v58_v19 = vld [vmem:[%s233_s3 + $0x18] sm:$0xff]  ;;  %v60_v27 = vld [vmem:[%s233_s3 + $0x28] sm:$0xff]  ;;  %v40_v32 = vmul.f32 %v107_v1, %v28_v26 }
   0x5   :  { %v109_v5 = vld [vmem:[%s234_s4] ss:$0 sm:$0xff]  ;;  %v47_v9 = vadd.f32 %v108_v2, %v35_v4  ;;  %v48_v23 = vadd.f32 %v108_v2, %v36_v11  ;;  %v29_v28 = vld [vmem:[%s230_s0 + $0x30] sm:$0xff]  ;;  %v49_v29 = vadd.f32 %v108_v2, %v37_v16  ;;  %v30_v34 = vld [vmem:[%s230_s0 + $0x38] sm:$0xff] }
   0x6   :  { %v110_v6 = vld [vmem:[%s235_s5] ss:$0 sm:$0xff]  ;;  %v67_v10 = vmul.f32 %v109_v5, %v55_v3  ;;  %v68_v12 = vmul.f32 %v109_v5, %v56_v8  ;;  %v69_v17 = vmul.f32 %v109_v5, %v57_v14  ;;  %v70_v24 = vmul.f32 %v109_v5, %v58_v19  ;;  %v61_v33 = vld [vmem:[%s233_s3 + $0x30] sm:$0xff]  ;;  %v62_v43 = vld [vmem:[%s233_s3 + $0x38] sm:$0xff] }
   0x7   :  { %v27_v20 = vld [vmem:[%s230_s0 + $0x20] sm:$0xff]  ;;  %v50_v30 = vadd.f32 %v108_v2, %v38_v18  ;;  %v72_v38 = vmul.f32 %v109_v5, %v60_v27  ;;  %v52_v41 = vadd.f32 %v108_v2, %v40_v32  ;;  %v41_v42 = vmul.f32 %v107_v1, %v29_v28 }
   0x8   :  { %v59_v21 = vld [vmem:[%s233_s3 + $0x20] sm:$0xff]  ;;  %v75_v22 = vadd.f32 %v67_v10, %v47_v9  ;;  %v39_v25 = vmul.f32 %v107_v1, %v27_v20  ;;  %v76_v36 = vadd.f32 %v68_v12, %v48_v23  ;;  %v77_v39 = vadd.f32 %v69_v17, %v49_v29 }
   0x9   :  { %v71_v31 = vmul.f32 %v109_v5, %v59_v21  ;;  %v78_v40 = vadd.f32 %v70_v24, %v50_v30  ;;  %v73_v46 = vmul.f32 %v109_v5, %v61_v33  ;;  %v42_v47 = vmul.f32 %v107_v1, %v30_v34 }
   0xa   :  { %v87_v35 = vadd.f32 %v110_v6, %v75_v22  ;;  %v51_v37 = vadd.f32 %v108_v2, %v39_v25  ;;  %v88_v44 = vadd.f32 %v110_v6, %v76_v36  ;;  %v89_v48 = vadd.f32 %v110_v6, %v77_v39 }
   0xb   :  { %v90_v49 = vadd.f32 %v110_v6, %v78_v40  ;;  %v80_v50 = vadd.f32 %v72_v38, %v52_v41  ;;  %v53_v51 = vadd.f32 %v108_v2, %v41_v42  ;;  %v54_v53 = vadd.f32 %v108_v2, %v42_v47 }
   0xc   :  { %95 = vst [vmem:[%s236_s6] sm:$0xff] %v87_v35  ;;  %v79_v45 = vadd.f32 %v71_v31, %v51_v37  ;;  %v74_v54 = vmul.f32 %v109_v5, %v62_v43 }
   0xd   :  { %96 = vst [vmem:[%s236_s6 + $0x8] sm:$0xff] %v88_v44  ;;  %v92_v55 = vadd.f32 %v110_v6, %v80_v50  ;;  %v81_v56 = vadd.f32 %v73_v46, %v53_v51 }
   0xe   :  { %v91_v52 = vadd.f32 %v110_v6, %v79_v45  ;;  %97 = vst [vmem:[%s236_s6 + $0x10] sm:$0xff] %v89_v48  ;;  %v82_v57 = vadd.f32 %v74_v54, %v54_v53 }
   0xf   :  { %98 = vst [vmem:[%s236_s6 + $0x18] sm:$0xff] %v90_v49  ;;  %v93_v58 = vadd.f32 %v110_v6, %v81_v56 }
  0x10   :  { %99 = vst [vmem:[%s236_s6 + $0x20] sm:$0xff] %v91_v52  ;;  %v94_v59 = vadd.f32 %v110_v6, %v82_v57 }
  0x11   :  { %100 = vst [vmem:[%s236_s6 + $0x28] sm:$0xff] %v92_v55 }
  0x12   :  { %101 = vst [vmem:[%s236_s6 + $0x30] sm:$0xff] %v93_v58 }
  0x13   :  { %102 = vst [vmem:[%s236_s6 + $0x38] sm:$0xff] %v94_v59 }

// kernel: _lambda_.71
= control target key start
LH: loop header
LB: loop body
LE: loop exit
PB: predicated region body
PF: predicated region fallthrough
CT: control target
= control target key end

     0   :  { %s417_s1 = inlined_call_operand.vmem [shape: bf16[128,128], index: 1, kind: input, shape index: {}]   ;;  %s418_s0 = inlined_call_operand.vmem [shape: bf16[64,128], index: 0, kind: input, shape index: {}]   ;;  %s419_s2 = inlined_call_operand.vmem [shape: f32[64,128], index: 2, kind: output, shape index: {0}]   ;;  %s420_s3 = inlined_call_operand.vmem [shape: f32[1,1,128], index: 3, kind: output, shape index: {1}]   ;;  %s421_s4 = inlined_call_operand.vmem [shape: f32[1,1,128], index: 4, kind: output, shape index: {2}]  }
   0x1   :  { %v301_v0 = vld [vmem:[%s417_s1 + $0x38] sm:$0xff]  ;;  %v300_v1 = vld [vmem:[%s417_s1 + $0x30] sm:$0xff]  ;;  %v299_v2 = vld [vmem:[%s417_s1 + $0x28] sm:$0xff] }
   0x2   :  { %130 = vmatpush.bf16.msra.mxu0 %v301_v0  ;;  %302 = vmatpush.bf16.msra.mxu1 %v301_v0  ;;  %v298_v3 = vld [vmem:[%s417_s1 + $0x20] sm:$0xff]  ;;  %v297_v4 = vld [vmem:[%s417_s1 + $0x18] sm:$0xff]  ;;  %v296_v5 = vld [vmem:[%s417_s1 + $0x10] sm:$0xff] }
   0x3   :  { %303 = vmatpush.bf16.msra.mxu2 %v301_v0  ;;  %304 = vmatpush.bf16.msra.mxu3 %v301_v0  ;;  %v295_v6 = vld [vmem:[%s417_s1 + $0x8] sm:$0xff]  ;;  %v294_v7 = vld [vmem:[%s417_s1] sm:$0xff]  ;;  %v292_v10 = vld [vmem:[%s418_s0 + $0x10] sm:$0xff] }
   0x4   :  { %v290_v8 = vld [vmem:[%s418_s0] sm:$0xff]  ;;  %v291_v9 = vld [vmem:[%s418_s0 + $0x8] sm:$0xff]  ;;  %v293_v11 = vld [vmem:[%s418_s0 + $0x18] sm:$0xff] }
   0x6   :  { %131 = vmatpush.bf16.msra.mxu0 %v300_v1  ;;  %305 = vmatpush.bf16.msra.mxu1 %v300_v1 }
   0x7   :  { %306 = vmatpush.bf16.msra.mxu2 %v300_v1  ;;  %307 = vmatpush.bf16.msra.mxu3 %v300_v1 }
   0xa   :  { %132 = vmatpush.bf16.msra.mxu0 %v299_v2  ;;  %308 = vmatpush.bf16.msra.mxu1 %v299_v2 }
   0xb   :  { %309 = vmatpush.bf16.msra.mxu2 %v299_v2  ;;  %310 = vmatpush.bf16.msra.mxu3 %v299_v2 }
   0xe   :  { %133 = vmatpush.bf16.msra.mxu0 %v298_v3  ;;  %311 = vmatpush.bf16.msra.mxu1 %v298_v3 }
   0xf   :  { %312 = vmatpush.bf16.msra.mxu2 %v298_v3  ;;  %313 = vmatpush.bf16.msra.mxu3 %v298_v3 }
  0x12   :  { %134 = vmatpush.bf16.msra.mxu0 %v297_v4  ;;  %314 = vmatpush.bf16.msra.mxu1 %v297_v4 }
  0x13   :  { %315 = vmatpush.bf16.msra.mxu2 %v297_v4  ;;  %316 = vmatpush.bf16.msra.mxu3 %v297_v4 }
  0x16   :  { %135 = vmatpush.bf16.msra.mxu0 %v296_v5  ;;  %317 = vmatpush.bf16.msra.mxu1 %v296_v5 }
  0x17   :  { %318 = vmatpush.bf16.msra.mxu2 %v296_v5  ;;  %319 = vmatpush.bf16.msra.mxu3 %v296_v5 }
  0x1a   :  { %136 = vmatpush.bf16.msra.mxu0 %v295_v6  ;;  %320 = vmatpush.bf16.msra.mxu1 %v295_v6 }
  0x1b   :  { %321 = vmatpush.bf16.msra.mxu2 %v295_v6  ;;  %322 = vmatpush.bf16.msra.mxu3 %v295_v6 }
  0x1e   :  { %137 = vmatpush.bf16.msra.mxu0 %v294_v7  ;;  %323 = vmatpush.bf16.msra.mxu1 %v294_v7 }
  0x1f   :  { %324 = vmatpush.bf16.msra.mxu2 %v294_v7  ;;  %325 = vmatpush.bf16.msra.mxu3 %v294_v7 }
  0x21   :  { %138 = vmatmul.bf16.vlgmr.msra.gmra.mxu0 %v290_v8  ;;  %143 = vmatmul.bf16.vlgmr.msra.gmra.mxu1 %v291_v9 }
  0x22   :  { %148 = vmatmul.bf16.vlgmr.msra.gmra.mxu2 %v292_v10  ;;  %153 = vmatmul.bf16.vlgmr.msra.gmra.mxu3 %v293_v11 }
  0x9e   :  { %v139_v12 = vpop.f32.mrf.mxu0  ;;  %v144_v13 = vpop.f32.mrf.mxu1 }
  0x9f   :  { %186 = vst [vmem:[%s419_s2] sm:$0xff] %v139_v12  ;;  %v208_v18 = vmul.f32 %v139_v12, %v139_v12  ;;  %v210_v21 = vmul.f32 %v144_v13, %v144_v13 }
  0xa0   :  { %188 = vst [vmem:[%s419_s2 + $0x10] sm:$0xff] %v144_v13 }
  0xa5   :  { %v149_v14 = vpop.f32.mrf.mxu2  ;;  %v154_v15 = vpop.f32.mrf.mxu3 }
  0xa6   :  { %190 = vst [vmem:[%s419_s2 + $0x20] sm:$0xff] %v149_v14  ;;  %v141_v16 = vpop.f32.mrf.mxu0  ;;  %v146_v17 = vpop.f32.mrf.mxu1  ;;  %v212_v27 = vmul.f32 %v149_v14, %v149_v14  ;;  %v214_v35 = vmul.f32 %v154_v15, %v154_v15 }
  0xa7   :  { %192 = vst [vmem:[%s419_s2 + $0x30] sm:$0xff] %v154_v15  ;;  %v194_v19 = vadd.f32 %v141_v16, %v139_v12  ;;  %v209_v20 = vmul.f32 %v141_v16, %v141_v16  ;;  %v211_v25 = vmul.f32 %v146_v17, %v146_v17 }
  0xa8   :  { %187 = vst [vmem:[%s419_s2 + $0x8] sm:$0xff] %v141_v16 }
  0xa9   :  { %v216_v22 = vadd.f32 %v209_v20, %v208_v18  ;;  %189 = vst [vmem:[%s419_s2 + $0x18] sm:$0xff] %v146_v17  ;;  %v195_v23 = vadd.f32 %v194_v19, %v144_v13 }
  0xab   :  { %v196_v24 = vadd.f32 %v195_v23, %v146_v17  ;;  %v217_v26 = vadd.f32 %v216_v22, %v210_v21 }
  0xad   :  { %v218_v28 = vadd.f32 %v217_v26, %v211_v25  ;;  %v151_v29 = vpop.f32.mrf.mxu2  ;;  %v197_v30 = vadd.f32 %v196_v24, %v149_v14  ;;  %v156_v31 = vpop.f32.mrf.mxu3 }
  0xae   :  { %191 = vst [vmem:[%s419_s2 + $0x28] sm:$0xff] %v151_v29  ;;  %v213_v33 = vmul.f32 %v151_v29, %v151_v29  ;;  %v215_v39 = vmul.f32 %v156_v31, %v156_v31 }
  0xaf   :  { %v198_v32 = vadd.f32 %v197_v30, %v151_v29  ;;  %v219_v34 = vadd.f32 %v218_v28, %v212_v27  ;;  %193 = vst [vmem:[%s419_s2 + $0x38] sm:$0xff] %v156_v31 }
  0xb1   :  { %v220_v36 = vadd.f32 %v219_v34, %v213_v33  ;;  %v199_v37 = vadd.f32 %v198_v32, %v154_v15 }
  0xb3   :  { %v200_v38 = vadd.f32 %v199_v37, %v156_v31  ;;  %v221_v40 = vadd.f32 %v220_v36, %v214_v35 }
  0xb5   :  { %v201_v41 = vrot.slane %v200_v38, 4  ;;  %v222_v42 = vadd.f32 %v221_v40, %v215_v39 }
  0xb7   :  { %v202_v43 = vadd.f32 %v201_v41, %v200_v38  ;;  %v223_v44 = vrot.slane %v222_v42, 4 }
  0xb9   :  { %v203_v45 = vrot.slane %v202_v43, 2  ;;  %v224_v46 = vadd.f32 %v223_v44, %v222_v42 }
  0xbb   :  { %v204_v47 = vadd.f32 %v203_v45, %v202_v43  ;;  %v225_v48 = vrot.slane %v224_v46, 2 }
  0xbd   :  { %v205_v49 = vrot.slane %v204_v47, 1  ;;  %v226_v50 = vadd.f32 %v225_v48, %v224_v46 }
  0xbf   :  { %v206_v51 = vadd.f32 %v205_v49, %v204_v47  ;;  %v227_v52 = vrot.slane %v226_v50, 1 }
  0xc1   :  { %207 = vst [vmem:[%s420_s3] sm:$0x1] %v206_v51  ;;  %v228_v53 = vadd.f32 %v227_v52, %v226_v50 }
  0xc3   :  { %229 = vst [vmem:[%s421_s4] sm:$0x1] %v228_v53 }

// kernel: _lambda_.72
= control target key start
LH: loop header
LB: loop body
LE: loop exit
PB: predicated region body
PF: predicated region fallthrough
CT: control target
= control target key end

     0   :  { %vm94_vm0 = vcmask 781312   ;;  %s199_s0 = inlined_call_operand.vmem [shape: f32[1,64,96], index: 0, kind: input, shape index: {}]   ;;  %s200_s1 = inlined_call_operand.vmem [shape: f32[1,96], index: 1, kind: input, shape index: {}]   ;;  %s201_s2 = inlined_call_operand.vmem [shape: f32[1,96], index: 2, kind: input, shape index: {}]   ;;  %s202_s3 = inlined_call_operand.vmem [shape: bf16[1,64,96], index: 3, kind: output, shape index: {}]  }
   0x1   :  { %v14_v0 = vld [vmem:[%s199_s0] sm:$0xff]  ;;  %v15_v3 = vld [vmem:[%s199_s0 + $0x8] sm:$0xff]  ;;  %v16_v6 = vld [vmem:[%s199_s0 + $0x10] sm:$0xff] }
   0x2   :  { %v115_v1 = vld [vmem:[%s200_s1] ss:$0 sm:$0xff]  ;;  %v17_v7 = vld [vmem:[%s199_s0 + $0x18] sm:$0xff]  ;;  %v19_v12 = vld [vmem:[%s199_s0 + $0x28] sm:$0xff] }
   0x3   :  { %v116_v2 = vld [vmem:[%s201_s2] ss:$0 sm:$0xff]  ;;  %v26_v4 = vmul.f32 %v115_v1, %v14_v0  ;;  %v27_v5 = vmul.f32 %v115_v1, %v15_v3  ;;  %v28_v9 = vmul.f32 %v115_v1, %v16_v6  ;;  %v29_v10 = vmul.f32 %v115_v1, %v17_v7  ;;  %v20_v13 = vld [vmem:[%s199_s0 + $0x30] sm:$0xff]  ;;  %v21_v14 = vld [vmem:[%s199_s0 + $0x38] sm:$0xff] }
   0x4   :  { %v18_v8 = vld [vmem:[%s199_s0 + $0x20] sm:$0xff]  ;;  %v31_v17 = vmul.f32 %v115_v1, %v19_v12  ;;  %v32_v18 = vmul.f32 %v115_v1, %v20_v13  ;;  %v33_v22 = vmul.f32 %v115_v1, %v21_v14 }
   0x5   :  { %v30_v11 = vmul.f32 %v115_v1, %v18_v8  ;;  %v38_v15 = vadd.f32 %v116_v2, %v26_v4  ;;  %v39_v16 = vadd.f32 %v116_v2, %v27_v5  ;;  %v40_v19 = vadd.f32 %v116_v2, %v28_v9 }
   0x6   :  { %v41_v20 = vadd.f32 %v116_v2, %v29_v10  ;;  %v43_v25 = vadd.f32 %v116_v2, %v31_v17  ;;  %v44_v26 = vadd.f32 %v116_v2, %v32_v18  ;;  %v45_v30 = vadd.f32 %v116_v2, %v33_v22 }
   0x7   :  { %v42_v21 = vadd.f32 %v116_v2, %v30_v11  ;;  %v107_v23 = vadd.f32 -1.0, %v38_v15  ;;  %v108_v24 = vadd.f32 -1.0, %v39_v16  ;;  %v109_v27 = vadd.f32 -1.0, %v40_v19 }
   0x8   :  { %v110_v28 = vadd.f32 -1.0, %v41_v20  ;;  %v112_v33 = vadd.f32 -1.0, %v43_v25  ;;  %v113_v34 = vadd.f32 -1.0, %v44_v26  ;;  %v114_v38 = vadd.f32 -1.0, %v45_v30 }
   0x9   :  { %v111_v29 = vadd.f32 -1.0, %v42_v21  ;;  %v54_v31 = vadd.f32 1.0, %v107_v23  ;;  %v55_v32 = vadd.f32 1.0, %v108_v24  ;;  %v56_v35 = vadd.f32 1.0, %v109_v27 }
   0xa   :  { %v57_v36 = vadd.f32 1.0, %v110_v28  ;;  %v59_v41 = vadd.f32 1.0, %v112_v33  ;;  %v60_v42 = vadd.f32 1.0, %v113_v34  ;;  %v61_v46 = vadd.f32 1.0, %v114_v38 }
   0xb   :  { %v58_v37 = vadd.f32 1.0, %v111_v29  ;;  %v62_v39 = vfloor.f32 %v54_v31  ;;  %v63_v40 = vfloor.f32 %v55_v32  ;;  %v64_v43 = vfloor.f32 %v56_v35 }
   0xc   :  { %v65_v44 = vfloor.f32 %v57_v36  ;;  %v67_v49 = vfloor.f32 %v59_v41  ;;  %v68_v50 = vfloor.f32 %v60_v42  ;;  %v69_v54 = vfloor.f32 %v61_v46 }
   0xd   :  { %v66_v45 = vfloor.f32 %v58_v37  ;;  %v70_v47 = vmax.f32 %v62_v39, 0.0  ;;  %v71_v48 = vmax.f32 %v63_v40, 0.0  ;;  %v72_v51 = vmax.f32 %v64_v43, 0.0 }
   0xe   :  { %v73_v52 = vmax.f32 %v65_v44, 0.0  ;;  %v75_v57 = vmax.f32 %v67_v49, 0.0  ;;  %v76_v58 = vmax.f32 %v68_v50, 0.0  ;;  %v77_v62 = vmax.f32 %v69_v54, 0.0 }
   0xf   :  { %v74_v53 = vmax.f32 %v66_v45, 0.0  ;;  %v78_v55 = vmin.f32 %v70_v47, 8.0  ;;  %v79_v56 = vmin.f32 %v71_v48, 8.0  ;;  %v80_v59 = vmin.f32 %v72_v51, 8.0 }
  0x10   :  { %v81_v60 = vmin.f32 %v73_v52, 8.0  ;;  %v83_v1 = vmin.f32 %v75_v57, 8.0  ;;  %v84_v2 = vmin.f32 %v76_v58, 8.0  ;;  %v85_v5 = vmin.f32 %v77_v62, 8.0 }
  0x11   :  { %v82_v61 = vmin.f32 %v74_v53, 8.0  ;;  %v86_v63 = vpack.c.bf16 %v78_v55, %v78_v55  ;;  %v87_v0 = vpack.c.bf16 %v79_v56, %v79_v56  ;;  %v88_v3 = vpack.c.bf16 %v80_v59, %v80_v59 }
  0x12   :  { %v89_v4 = vpack.c.bf16 %v81_v60, %v81_v60  ;;  %v91_v7 = vpack.c.bf16 %v83_v1, %v83_v1  ;;  %v92_v8 = vpack.c.bf16 %v84_v2, %v84_v2  ;;  %v93_v9 = vpack.c.bf16 %v85_v5, %v85_v5 }
  0x13   :  { %95 = vst.msk [vmem:[%s202_s3] sm:$0xf] %vm94_vm0, %v86_v63  ;;  %v90_v6 = vpack.c.bf16 %v82_v61, %v82_v61 }
  0x14   :  { %96 = vst.msk [vmem:[%s202_s3 + $0x4] sm:$0xf] %vm94_vm0, %v87_v0 }
  0x15   :  { %97 = vst.msk [vmem:[%s202_s3 + $0x8] sm:$0xf] %vm94_vm0, %v88_v3 }
  0x16   :  { %98 = vst.msk [vmem:[%s202_s3 + $0xc] sm:$0xf] %vm94_vm0, %v89_v4 }
  0x17   :  { %99 = vst.msk [vmem:[%s202_s3 + $0x10] sm:$0xf] %vm94_vm0, %v90_v6 }
  0x18   :  { %100 = vst.msk [vmem:[%s202_s3 + $0x14] sm:$0xf] %vm94_vm0, %v91_v7 }
  0x19   :  { %101 = vst.msk [vmem:[%s202_s3 + $0x18] sm:$0xf] %vm94_vm0, %v92_v8 }
  0x1a   :  { %102 = vst.msk [vmem:[%s202_s3 + $0x1c] sm:$0xf] %vm94_vm0, %v93_v9 }

// kernel: _lambda_.76
= control target key start
LH: loop header
LB: loop body
LE: loop exit
PB: predicated region body
PF: predicated region fallthrough
CT: control target
= control target key end

     0   :  { %vm46_vm0 = vcmask 261120   ;;  %s143_s0 = inlined_call_operand.vmem [shape: f32[64,32], index: 0, kind: input, shape index: {}]   ;;  %s144_s1 = inlined_call_operand.vmem [shape: f32[1,32], index: 1, kind: input, shape index: {}]   ;;  %s145_s2 = inlined_call_operand.vmem [shape: f32[1,32], index: 2, kind: input, shape index: {}]   ;;  %s146_s3 = inlined_call_operand.vmem [shape: f32[64,32], index: 3, kind: output, shape index: {}]  }
   0x1   :  { %v14_v0 = vld [vmem:[%s143_s0] sm:$0xff]  ;;  %v15_v3 = vld [vmem:[%s143_s0 + $0x8] sm:$0xff]  ;;  %v16_v6 = vld [vmem:[%s143_s0 + $0x10] sm:$0xff] }
   0x2   :  { %v59_v1 = vld [vmem:[%s144_s1] ss:$0 sm:$0xff]  ;;  %v17_v7 = vld [vmem:[%s143_s0 + $0x18] sm:$0xff]  ;;  %v19_v12 = vld [vmem:[%s143_s0 + $0x28] sm:$0xff] }
   0x3   :  { %v60_v2 = vld [vmem:[%s145_s2] ss:$0 sm:$0xff]  ;;  %v26_v4 = vmul.f32 %v59_v1, %v14_v0  ;;  %v27_v5 = vmul.f32 %v59_v1, %v15_v3  ;;  %v28_v9 = vmul.f32 %v59_v1, %v16_v6  ;;  %v29_v10 = vmul.f32 %v59_v1, %v17_v7  ;;  %v20_v13 = vld [vmem:[%s143_s0 + $0x30] sm:$0xff]  ;;  %v21_v14 = vld [vmem:[%s143_s0 + $0x38] sm:$0xff] }
   0x4   :  { %v18_v8 = vld [vmem:[%s143_s0 + $0x20] sm:$0xff]  ;;  %v31_v17 = vmul.f32 %v59_v1, %v19_v12  ;;  %v32_v18 = vmul.f32 %v59_v1, %v20_v13  ;;  %v33_v21 = vmul.f32 %v59_v1, %v21_v14 }
   0x5   :  { %v30_v11 = vmul.f32 %v59_v1, %v18_v8  ;;  %v38_v15 = vadd.f32 %v60_v2, %v26_v4  ;;  %v39_v16 = vadd.f32 %v60_v2, %v27_v5  ;;  %v40_v19 = vadd.f32 %v60_v2, %v28_v9 }
   0x6   :  { %v41_v20 = vadd.f32 %v60_v2, %v29_v10  ;;  %v43_v23 = vadd.f32 %v60_v2, %v31_v17  ;;  %v44_v24 = vadd.f32 %v60_v2, %v32_v18  ;;  %v45_v25 = vadd.f32 %v60_v2, %v33_v21 }
   0x7   :  { %47 = vst.msk [vmem:[%s146_s3] sm:$0xff] %vm46_vm0, %v38_v15  ;;  %v42_v22 = vadd.f32 %v60_v2, %v30_v11 }
   0x8   :  { %48 = vst.msk [vmem:[%s146_s3 + $0x8] sm:$0xff] %vm46_vm0, %v39_v16 }
   0x9   :  { %49 = vst.msk [vmem:[%s146_s3 + $0x10] sm:$0xff] %vm46_vm0, %v40_v19 }
   0xa   :  { %50 = vst.msk [vmem:[%s146_s3 + $0x18] sm:$0xff] %vm46_vm0, %v41_v20 }
   0xb   :  { %51 = vst.msk [vmem:[%s146_s3 + $0x20] sm:$0xff] %vm46_vm0, %v42_v22 }
   0xc   :  { %52 = vst.msk [vmem:[%s146_s3 + $0x28] sm:$0xff] %vm46_vm0, %v43_v23 }
   0xd   :  { %53 = vst.msk [vmem:[%s146_s3 + $0x30] sm:$0xff] %vm46_vm0, %v44_v24 }
   0xe   :  { %54 = vst.msk [vmem:[%s146_s3 + $0x38] sm:$0xff] %vm46_vm0, %v45_v25 }

// kernel: _lambda_.77
= control target key start
LH: loop header
LB: loop body
LE: loop exit
PB: predicated region body
PF: predicated region fallthrough
CT: control target
= control target key end

     0   :  { %s90_s0 = inlined_call_operand.vmem [shape: f32[1,16,128], index: 0, kind: input, shape index: {}]   ;;  %s91_s1 = inlined_call_operand.vmem [shape: f32[1,128], index: 1, kind: input, shape index: {}]   ;;  %s92_s2 = inlined_call_operand.vmem [shape: f32[1,128], index: 2, kind: input, shape index: {}]   ;;  %s93_s3 = inlined_call_operand.vmem [shape: bf16[1,16,128], index: 3, kind: output, shape index: {}]  }
   0x1   :  { %v14_v0 = vld [vmem:[%s90_s0] sm:$0xff]  ;;  %v15_v1 = vld [vmem:[%s90_s0 + $0x8] sm:$0xff] }
   0x2   :  { %v53_v2 = vld [vmem:[%s91_s1] ss:$0 sm:$0xff] }
   0x3   :  { %v54_v3 = vld [vmem:[%s92_s2] ss:$0 sm:$0xff]  ;;  %v20_v4 = vmul.f32 %v53_v2, %v14_v0  ;;  %v21_v5 = vmul.f32 %v53_v2, %v15_v1 }
   0x5   :  { %v26_v6 = vadd.f32 %v54_v3, %v20_v4  ;;  %v27_v7 = vadd.f32 %v54_v3, %v21_v5 }
   0x7   :  { %v46_v8 = vadd.f32 -1.0, %v26_v6  ;;  %v47_v9 = vadd.f32 -1.0, %v27_v7 }
   0x9   :  { %v30_v10 = vadd.f32 1.0, %v46_v8  ;;  %v31_v11 = vadd.f32 1.0, %v47_v9 }
   0xb   :  { %v32_v12 = vfloor.f32 %v30_v10  ;;  %v33_v13 = vfloor.f32 %v31_v11 }
   0xd   :  { %v34_v14 = vmax.f32 %v32_v12, 0.0  ;;  %v35_v15 = vmax.f32 %v33_v13, 0.0 }
   0xf   :  { %v36_v16 = vmin.f32 %v34_v14, 8.0  ;;  %v37_v17 = vmin.f32 %v35_v15, 8.0 }
  0x11   :  { %v51_v18 = vpack.c.bf16 %v37_v17, %v36_v16 }
  0x13   :  { %52 = vst [vmem:[%s93_s3] sm:$0xff] %v51_v18  }

// kernel: _lambda_.80
= control target key start
LH: loop header
LB: loop body
LE: loop exit
PB: predicated region body
PF: predicated region fallthrough
CT: control target
= control target key end

     0   :  { %s166_s0 = inlined_call_operand.vmem [shape: f32[16,256], index: 0, kind: input, shape index: {}]   ;;  %s167_s1 = inlined_call_operand.vmem [shape: f32[1,256], index: 1, kind: input, shape index: {}]   ;;  %s168_s2 = inlined_call_operand.vmem [shape: f32[1,256], index: 2, kind: input, shape index: {}]   ;;  %s169_s3 = inlined_call_operand.vmem [shape: f32[16,256], index: 3, kind: input, shape index: {}]   ;;  %s170_s4 = inlined_call_operand.vmem [shape: f32[1,256], index: 4, kind: input, shape index: {}]   ;;  %s171_s5 = inlined_call_operand.vmem [shape: f32[1,256], index: 5, kind: input, shape index: {}]   ;;  %s172_s6 = inlined_call_operand.vmem [shape: f32[16,256], index: 6, kind: output, shape index: {}]  }
   0x1   :  { %v23_v0 = vld [vmem:[%s166_s0] sm:$0xff]  ;;  %v24_v7 = vld [vmem:[%s166_s0 + $0x8] sm:$0xff]  ;;  %v25_v16 = vld [vmem:[%s166_s0 + $0x10] sm:$0xff] }
   0x2   :  { %v27_v1 = vld [vmem:[%s167_s1] sm:$0x3]  ;;  %v48_v12 = vld [vmem:[%s169_s3 + $0x8] sm:$0xff]  ;;  %v49_v17 = vld [vmem:[%s169_s3 + $0x10] sm:$0xff] }
   0x3   :  { %v37_v2 = vld [vmem:[%s168_s2] sm:$0x3]  ;;  %v29_v3 = vperm.slane %v27_v1, 0  ;;  %v30_v10 = vperm.slane %v27_v1, 1  ;;  %v26_v18 = vld [vmem:[%s166_s0 + $0x18] sm:$0xff] }
   0x4   :  { %v39_v4 = vperm.slane %v37_v2, 0  ;;  %v47_v5 = vld [vmem:[%s169_s3] sm:$0xff]  ;;  %v40_v11 = vperm.slane %v37_v2, 1  ;;  %v50_v23 = vld [vmem:[%s169_s3 + $0x18] sm:$0xff] }
   0x5   :  { %v51_v6 = vld [vmem:[%s170_s4] sm:$0x3]  ;;  %v33_v13 = vmul.f32 %v29_v3, %v23_v0  ;;  %v34_v20 = vmul.f32 %v30_v10, %v24_v7  ;;  %v35_v21 = vmul.f32 %v29_v3, %v25_v16  ;;  %v36_v26 = vmul.f32 %v30_v10, %v26_v18 }
   0x6   :  { %v53_v8 = vperm.slane %v51_v6, 0  ;;  %v65_v9 = vld [vmem:[%s171_s5] sm:$0x3]  ;;  %v54_v15 = vperm.slane %v51_v6, 1 }
   0x7   :  { %v67_v14 = vperm.slane %v65_v9, 0  ;;  %v43_v24 = vadd.f32 %v39_v4, %v33_v13  ;;  %v44_v28 = vadd.f32 %v40_v11, %v34_v20  ;;  %v68_v29 = vperm.slane %v65_v9, 1 }
   0x8   :  { %v57_v19 = vmul.f32 %v53_v8, %v47_v5  ;;  %v59_v22 = vmul.f32 %v53_v8, %v49_v17  ;;  %v58_v25 = vmul.f32 %v54_v15, %v48_v12  ;;  %v60_v27 = vmul.f32 %v54_v15, %v50_v23 }
   0x9   :  { %v45_v30 = vadd.f32 %v39_v4, %v35_v21  ;;  %v46_v32 = vadd.f32 %v40_v11, %v36_v26 }
   0xa   :  { %v61_v31 = vadd.f32 %v57_v19, %v43_v24  ;;  %v62_v33 = vadd.f32 %v58_v25, %v44_v28 }
   0xb   :  { %v63_v34 = vadd.f32 %v59_v22, %v45_v30  ;;  %v64_v36 = vadd.f32 %v60_v27, %v46_v32 }
   0xc   :  { %v71_v35 = vadd.f32 %v67_v14, %v61_v31  ;;  %v72_v37 = vadd.f32 %v68_v29, %v62_v33 }
   0xd   :  { %v73_v38 = vadd.f32 %v67_v14, %v63_v34  ;;  %v74_v39 = vadd.f32 %v68_v29, %v64_v36 }
   0xe   :  { %75 = vst [vmem:[%s172_s6] sm:$0xff] %v71_v35 }
   0xf   :  { %76 = vst [vmem:[%s172_s6 + $0x8] sm:$0xff] %v72_v37 }
  0x10   :  { %77 = vst [vmem:[%s172_s6 + $0x10] sm:$0xff] %v73_v38 }
  0x11   :  { %78 = vst [vmem:[%s172_s6 + $0x18] sm:$0xff] %v74_v39 }

// kernel: _lambda_.73
= control target key start
LH: loop header
LB: loop body
LE: loop exit
PB: predicated region body
PF: predicated region fallthrough
CT: control target
= control target key end

     0   :  { %s807_s15 = smov 0   ;;  %s809_s16 = smov 0   ;;  %s894_s0 = inlined_call_operand.vmem [shape: bf16[16,384], index: 0, kind: input, shape index: {}]   ;;  %s895_s1 = inlined_call_operand.vmem [shape: bf16[384,32], index: 1, kind: input, shape index: {}]   ;;  %s896_s2 = inlined_call_operand.vmem [shape: f32[16,32], index: 2, kind: output, shape index: {0}]   ;;  %s897_s3 = inlined_call_operand.vmem [shape: f32[1,1,32], index: 3, kind: output, shape index: {1}]   ;;  %s898_s4 = inlined_call_operand.vmem [shape: f32[1,1,32], index: 4, kind: output, shape index: {2}]  }
   0x1   :  { %s811_s17 = smov 0   ;;  %s813_s18 = smov 0  }
   0x2   :  { %s815_s19 = smov 0  }
   0x3 LB: > { %s27_s20 = sadd.s32 1, %s775_s18  ;;  %p50_p1 = scmp.ne.s32.totalorder %s767_s16, %s763_s15  ;;  %s779_s19 = sphi %s815_s19, %s15_s19   ;;  %s775_s18 = sphi %s813_s18, %s902_s18   ;;  %s771_s17 = sphi %s811_s17, %s901_s17   ;;  %s767_s16 = sphi %s809_s16, %s900_s16   ;;  %s763_s15 = sphi %s807_s15, %s899_s15  }
   0x4   : > { %p28_p0 = scmp.ge.s32.totalorder %s27_s20, 3  ;;  %p51_p2 = scmp.eq.s32.totalorder %s779_s19, 0 }
   0x5   : > { %s43_s22 = sadd.s32 1, %s767_s16  ;;  %p640_p5 = scmp.ge.s32.totalorder %s779_s19, 3 }
   0x6   : > { %s904_s20 = smov (%p28_p0, %s27_s20), 0  ;;  %p52_p3 = por %p51_p2, %p50_p1 }
   0x7   : > { %s39_s21 = ssub.s32 %s775_s18, %s904_s20  ;;  %188 = sbr.rel (%p640_p5) target bundleno = 18 (0x12), region = 16 }
   0x8   : > { %p41_p4 = scmp.eq.s32.totalorder %s39_s21, 0 }
   0xa   : > { %s842_s23 = scalar_select %p41_p4, %s767_s16, %s43_s22  }
   0xc   : > { %191 = sbr.rel (!%p52_p3) target bundleno = 18 (0x12), region = 20  ;;  %s193_s24 = sand.u32 (%p52_p3), 1, %s767_s16  }
   0xd   : > { %s642_s25 = sshll.u32 (%p52_p3), %s775_s18, 2  ;;  %s641_s26 = sshll.u32 (%p52_p3), %s193_s24, 3 }
   0xe   : > { %s200_s29 = scalar_lea.vmem (%p52_p3), %s894_s0, %s642_s25  ;;  %s195_s30 = scalar_lea.vmem (%p52_p3), [#allocation3], %s641_s26 }
   0xf   : > { %v217_v0 = vld [vmem:[%s200_s29] sm:$0xf] (%p52_p3)  ;;  %v219_v1 = vld [vmem:[%s200_s29 + $0xc] sm:$0xf] (%p52_p3) }
  0x10   : > { %218 = vst [vmem:[%s195_s30] sm:$0xf] (%p52_p3), %v217_v0 }
  0x11   : > { %220 = vst [vmem:[%s195_s30 + $0x4] sm:$0xf] %v219_v1 }
  0x12 PF: > { %p643_p6 = scmp.ge.s32.totalorder %s779_s19, 1  ;;  %p259_p7 = scmp.lt.s32.totalorder %s779_s19, 4 }
  0x14   : > { %p260_p8 = pnand %p643_p6, %p259_p7 }
  0x15   : > { %s266_s5 = sand.u32 (!%p260_p8), 1, %s763_s15   ;;  %s645_s6 = sshll.u32 (!%p260_p8), %s771_s17, 4 }
  0x16   : > { %263 = sbr.rel (%p260_p8) target bundleno = 229 (0xe5), region = 65  ;;  %s644_s7 = sshll.u32 (!%p260_p8), %s266_s5, 3 }
  0x17   : > { %p316_p9 = scmp.lt.s32.totalorder (!%p260_p8), %s645_s6, 47  ;;  %s268_s12 = scalar_lea.vmem (!%p260_p8), [#allocation3], %s644_s7 }
  0x18   : > { %p647_p10 = scmp.ne.s32.totalorder (!%p260_p8), %s771_s17, 0 }
  0x1b   : > { %s906_s6 = smov (!%p316_p9, %s645_s6), 47  ;;  %348 = sbr.rel (%p647_p10) target bundleno = 35 (0x23), region = 73 }
  0x1c   : > { %s646_s8 = sshll.u32 %s906_s6, 2 }
  0x1d   : > { %s322_s11 = scalar_lea.vmem %s895_s1, %s646_s8 }
  0x20   : > { %vm349_vm0 = vcmask 261120   ;;  %v781_v2 = vmov 0.0  }
  0x21   : > { %350 = vst.msk [vmem:[#allocation2] sm:$0xff] %vm349_vm0, %v781_v2 }
  0x22   : > { %351 = vst.msk [vmem:[#allocation2 + $0x8] sm:$0xff] %vm349_vm0, %v781_v2 }
  0x23 PF: > { %v699_v3 = vld [vmem:[%s322_s11 + $0x38] sm:$0xff]  ;;  %v698_v4 = vld [vmem:[%s322_s11 + $0x30] sm:$0xff]  ;;  %v697_v5 = vld [vmem:[%s322_s11 + $0x28] sm:$0xff]  ;;  %vm442_vm1 = vcmask 261120   ;;  %p684_p11 = scmp.ne.s32.totalorder %s771_s17, 2 }
  0x24   : > { %426 = vmatpush.bf16.msra.mxu0 %v699_v3  ;;  %v696_v6 = vld [vmem:[%s322_s11 + $0x20] sm:$0xff]  ;;  %v695_v7 = vld [vmem:[%s322_s11 + $0x18] sm:$0xff]  ;;  %v694_v8 = vld [vmem:[%s322_s11 + $0x10] sm:$0xff] }
  0x25   : > { %v693_v9 = vld [vmem:[%s322_s11 + $0x8] sm:$0xff]  ;;  %v692_v10 = vld [vmem:[%s322_s11] sm:$0xff]  ;;  %v691_v11 = vld [vmem:[%s268_s12] sm:$0xff] }
  0x28   : > { %427 = vmatpush.bf16.msra.mxu0 %v698_v4  ;;  %v352_v12 = vld [vmem:[#allocation2] sm:$0xff] }
  0x29   : > { %v353_v15 = vld [vmem:[#allocation2 + $0x8] sm:$0xff] }
  0x2c   : > { %428 = vmatpush.bf16.msra.mxu0 %v697_v5 }
  0x30   : > { %429 = vmatpush.bf16.msra.mxu0 %v696_v6 }
  0x34   : > { %430 = vmatpush.bf16.msra.mxu0 %v695_v7 }
  0x38   : > { %431 = vmatpush.bf16.msra.mxu0 %v694_v8 }
  0x3c   : > { %432 = vmatpush.bf16.msra.mxu0 %v693_v9 }
  0x40   : > { %433 = vmatpush.bf16.msra.mxu0 %v692_v10 }
  0x43   : > { %434 = vmatmul.bf16.vlgmr.msra.gmra.mxu0 %v691_v11 }
  0xc0   : > { %v435_v13 = vpop.f32.mrf.mxu0 }
  0xc1   : > { %v440_v14 = vadd.f32 %v435_v13, %v352_v12 }
  0xc3   : > { %443 = vst.msk [vmem:[#allocation2] sm:$0xff] %vm442_vm1, %v440_v14 }
  0xc7   : > { %448 = sbr.rel (%p684_p11) target bundleno = 229 (0xe5), region = 77 }
  0xc8   : > { %v437_v16 = vpop.f32.mrf.mxu0 }
  0xc9   : > { %v441_v17 = vadd.f32 %v437_v16, %v353_v15 }
  0xcb   : > { %444 = vst.msk [vmem:[#allocation2 + $0x8] sm:$0xff] %vm442_vm1, %v441_v17 }
  0xcc   : > { %v449_v18 = vld [vmem:[#allocation2] sm:$0xff]  ;;  %vm462_vm2 = vcmask 253952  }
  0xcd   : > { %451 = vst.msk [vmem:[%s896_s2] sm:$0xff] %vm442_vm1, %v449_v18  ;;  %v453_v20 = vsel %vm442_vm1, %v449_v18, 0.0  ;;  %v464_v21 = vmul.f32 %v449_v18, %v449_v18 }
  0xcf   : > { %v466_v25 = vsel %vm442_vm1, %v464_v21, 0.0 }
  0xd2   : > { %v450_v19 = vld [vmem:[#allocation2 + $0x8] sm:$0xff] }
  0xd3   : > { %v454_v22 = vsel %vm442_vm1, %v450_v19, 0.0  ;;  %v465_v23 = vmul.f32 %v450_v19, %v450_v19  ;;  %452 = vst.msk [vmem:[%s896_s2 + $0x8] sm:$0xff] %vm442_vm1, %v450_v19 }
  0xd4   : > { %v455_v24 = vadd.f32 %v454_v22, %v453_v20 }
  0xd5   : > { %v467_v26 = vsel %vm442_vm1, %v465_v23, 0.0 }
  0xd6   : > { %v456_v27 = vrot.slane %v455_v24, 4  ;;  %v468_v28 = vadd.f32 %v467_v26, %v466_v25 }
  0xd8   : > { %v457_v29 = vadd.f32 %v456_v27, %v455_v24  ;;  %v469_v30 = vrot.slane %v468_v28, 4 }
  0xda   : > { %v458_v31 = vrot.slane %v457_v29, 2  ;;  %v470_v32 = vadd.f32 %v469_v30, %v468_v28 }
  0xdc   : > { %v459_v33 = vadd.f32 %v458_v31, %v457_v29  ;;  %v471_v34 = vrot.slane %v470_v32, 2 }
  0xde   : > { %v460_v35 = vrot.slane %v459_v33, 1  ;;  %v472_v36 = vadd.f32 %v471_v34, %v470_v32 }
  0xe0   : > { %v461_v37 = vadd.f32 %v460_v35, %v459_v33  ;;  %v473_v38 = vrot.slane %v472_v36, 1 }
  0xe2   : > { %463 = vst.msk [vmem:[%s897_s3] sm:$0x1] %vm462_vm2, %v461_v37  ;;  %v474_v39 = vadd.f32 %v473_v38, %v472_v36 }
  0xe4   : > { %475 = vst.msk [vmem:[%s898_s4] sm:$0x1] %vm462_vm2, %v474_v39 }
  0xe5 PF: > { %s15_s19 = sadd.s32 1, %s779_s19   ;;  %s899_s15 = smov %s767_s16 }
  0xe6   : > { %p12_p12 = scmp.ge.s32.totalorder %s15_s19, 5   ;;  %s900_s16 = smov %s842_s23 }
  0xe7   : > { %s901_s17 = smov %s775_s18  ;;  %s902_s18 = smov %s904_s20 }
  0xe8   :  { %14 = sbr.rel (!%p12_p12) target bundleno = 3 (0x3), region = 139 }

// kernel: _lambda_.81
= control target key start
LH: loop header
LB: loop body
LE: loop exit
PB: predicated region body
PF: predicated region fallthrough
CT: control target
= control target key end

     0   :  { %s114_s0 = inlined_call_operand.vmem [shape: f32[1,16,256], index: 0, kind: input, shape index: {}]   ;;  %s115_s1 = inlined_call_operand.vmem [shape: f32[1,256], index: 1, kind: input, shape index: {}]   ;;  %s116_s2 = inlined_call_operand.vmem [shape: f32[1,256], index: 2, kind: input, shape index: {}]   ;;  %s117_s3 = inlined_call_operand.vmem [shape: bf16[1,16,256], index: 3, kind: output, shape index: {}]  }
   0x1   :  { %v14_v0 = vld [vmem:[%s114_s0] sm:$0xff]  ;;  %v15_v1 = vld [vmem:[%s114_s0 + $0x8] sm:$0xff]  ;;  %v16_v6 = vld [vmem:[%s114_s0 + $0x10] sm:$0xff] }
   0x2   :  { %v18_v2 = vld [vmem:[%s115_s1] sm:$0x3]  ;;  %v17_v7 = vld [vmem:[%s114_s0 + $0x18] sm:$0xff] }
   0x3   :  { %v20_v3 = vperm.slane %v18_v2, 0  ;;  %v21_v4 = vperm.slane %v18_v2, 1  ;;  %v28_v5 = vld [vmem:[%s116_s2] sm:$0x3] }
   0x4   :  { %v30_v8 = vperm.slane %v28_v5, 0  ;;  %v31_v9 = vperm.slane %v28_v5, 1 }
   0x5   :  { %v24_v10 = vmul.f32 %v20_v3, %v14_v0  ;;  %v25_v11 = vmul.f32 %v21_v4, %v15_v1  ;;  %v26_v12 = vmul.f32 %v20_v3, %v16_v6  ;;  %v27_v13 = vmul.f32 %v21_v4, %v17_v7 }
   0x7   :  { %v34_v14 = vadd.f32 %v30_v8, %v24_v10  ;;  %v35_v15 = vadd.f32 %v31_v9, %v25_v11  ;;  %v36_v16 = vadd.f32 %v30_v8, %v26_v12  ;;  %v37_v17 = vadd.f32 %v31_v9, %v27_v13 }
   0x9   :  { %v66_v18 = vadd.f32 -1.0, %v34_v14  ;;  %v67_v19 = vadd.f32 -1.0, %v35_v15  ;;  %v68_v20 = vadd.f32 -1.0, %v36_v16  ;;  %v69_v21 = vadd.f32 -1.0, %v37_v17 }
   0xb   :  { %v42_v22 = vadd.f32 1.0, %v66_v18  ;;  %v43_v23 = vadd.f32 1.0, %v67_v19  ;;  %v44_v24 = vadd.f32 1.0, %v68_v20  ;;  %v45_v25 = vadd.f32 1.0, %v69_v21 }
   0xd   :  { %v46_v26 = vfloor.f32 %v42_v22  ;;  %v47_v27 = vfloor.f32 %v43_v23  ;;  %v48_v28 = vfloor.f32 %v44_v24  ;;  %v49_v29 = vfloor.f32 %v45_v25 }
   0xf   :  { %v50_v30 = vmax.f32 %v46_v26, 0.0  ;;  %v51_v31 = vmax.f32 %v47_v27, 0.0  ;;  %v52_v32 = vmax.f32 %v48_v28, 0.0  ;;  %v53_v33 = vmax.f32 %v49_v29, 0.0 }
  0x11   :  { %v54_v34 = vmin.f32 %v50_v30, 8.0  ;;  %v55_v35 = vmin.f32 %v51_v31, 8.0  ;;  %v56_v36 = vmin.f32 %v52_v32, 8.0  ;;  %v57_v37 = vmin.f32 %v53_v33, 8.0 }
  0x13   :  { %v58_v38 = vpack.c.bf16 %v55_v35, %v54_v34  ;;  %v59_v39 = vpack.c.bf16 %v57_v37, %v56_v36 }
  0x15   :  { %60 = vst [vmem:[%s117_s3] sm:$0xff] %v58_v38 }
  0x16   :  { %61 = vst [vmem:[%s117_s3 + $0x8] sm:$0xff] %v59_v39 }

// kernel: _lambda_.82
= control target key start
LH: loop header
LB: loop body
LE: loop exit
PB: predicated region body
PF: predicated region fallthrough
CT: control target
= control target key end

     0   :  { %s418_s1 = inlined_call_operand.vmem [shape: bf16[256,128], index: 1, kind: input, shape index: {}]   ;;  %s419_s0 = inlined_call_operand.vmem [shape: bf16[16,256], index: 0, kind: input, shape index: {}]   ;;  %s420_s2 = inlined_call_operand.vmem [shape: f32[16,128], index: 2, kind: output, shape index: {0}]   ;;  %s421_s3 = inlined_call_operand.vmem [shape: f32[1,1,128], index: 3, kind: output, shape index: {1}]   ;;  %s422_s4 = inlined_call_operand.vmem [shape: f32[1,1,128], index: 4, kind: output, shape index: {2}]  }
   0x1   :  { %v312_v0 = vld [vmem:[%s418_s1 + $0x38] sm:$0xff]  ;;  %v311_v2 = vld [vmem:[%s418_s1 + $0x30] sm:$0xff]  ;;  %v310_v4 = vld [vmem:[%s418_s1 + $0x28] sm:$0xff] }
   0x2   :  { %v320_v1 = vld [vmem:[%s418_s1 + $0x78] sm:$0xff]  ;;  %162 = vmatpush.bf16.msra.mxu0 %v312_v0  ;;  %v319_v3 = vld [vmem:[%s418_s1 + $0x70] sm:$0xff]  ;;  %v318_v5 = vld [vmem:[%s418_s1 + $0x68] sm:$0xff] }
   0x3   :  { %176 = vmatpush.bf16.msra.mxu1 %v320_v1  ;;  %v309_v6 = vld [vmem:[%s418_s1 + $0x20] sm:$0xff]  ;;  %v308_v8 = vld [vmem:[%s418_s1 + $0x18] sm:$0xff]  ;;  %v307_v10 = vld [vmem:[%s418_s1 + $0x10] sm:$0xff] }
   0x4   :  { %v317_v7 = vld [vmem:[%s418_s1 + $0x60] sm:$0xff]  ;;  %v316_v9 = vld [vmem:[%s418_s1 + $0x58] sm:$0xff]  ;;  %v315_v11 = vld [vmem:[%s418_s1 + $0x50] sm:$0xff] }
   0x5   :  { %v306_v12 = vld [vmem:[%s418_s1 + $0x8] sm:$0xff]  ;;  %v305_v14 = vld [vmem:[%s418_s1] sm:$0xff] }
   0x6   :  { %163 = vmatpush.bf16.msra.mxu0 %v311_v2  ;;  %v314_v13 = vld [vmem:[%s418_s1 + $0x48] sm:$0xff]  ;;  %v313_v15 = vld [vmem:[%s418_s1 + $0x40] sm:$0xff] }
   0x7   :  { %177 = vmatpush.bf16.msra.mxu1 %v319_v3  ;;  %v233_v16 = vld [vmem:[%s419_s0] sm:$0xf]  ;;  %v304_v17 = vld [vmem:[%s419_s0 + $0x4] sm:$0xf0]  ;;  %v303_v18 = vld [vmem:[%s419_s0 + $0x4] sm:$0xf] }
   0x8   :  { %v235_v19 = vld [vmem:[%s419_s0 + $0x8] sm:$0xf0]  ;;  %v234_v20 = vor.u32 %v304_v17, %v233_v16 }
   0x9   :  { %v238_v21 = vor.u32 %v303_v18, %v235_v19 }
   0xa   :  { %164 = vmatpush.bf16.msra.mxu0 %v310_v4 }
   0xb   :  { %178 = vmatpush.bf16.msra.mxu1 %v318_v5 }
   0xe   :  { %165 = vmatpush.bf16.msra.mxu0 %v309_v6 }
   0xf   :  { %179 = vmatpush.bf16.msra.mxu1 %v317_v7 }
  0x12   :  { %166 = vmatpush.bf16.msra.mxu0 %v308_v8 }
  0x13   :  { %180 = vmatpush.bf16.msra.mxu1 %v316_v9 }
  0x16   :  { %167 = vmatpush.bf16.msra.mxu0 %v307_v10 }
  0x17   :  { %181 = vmatpush.bf16.msra.mxu1 %v315_v11 }
  0x1a   :  { %168 = vmatpush.bf16.msra.mxu0 %v306_v12 }
  0x1b   :  { %182 = vmatpush.bf16.msra.mxu1 %v314_v13 }
  0x1e   :  { %169 = vmatpush.bf16.msra.mxu0 %v305_v14 }
  0x1f   :  { %183 = vmatpush.bf16.msra.mxu1 %v313_v15 }
  0x21   :  { %170 = vmatmul.bf16.vlgmr.msra.gmra.mxu0 %v234_v20 }
  0x22   :  { %184 = vmatmul.bf16.vlgmr.msra.gmra.mxu1 %v238_v21 }
  0x9e   :  { %v171_v22 = vpop.f32.mrf.mxu0 }
  0x9f   :  { %v185_v23 = vpop.f32.mrf.mxu1 }
  0xa0   :  { %v186_v24 = vadd.f32 %v185_v23, %v171_v22 }
  0xa2   :  { %199 = vst [vmem:[%s420_s2] sm:$0xff] %v186_v24  ;;  %v209_v28 = vmul.f32 %v186_v24, %v186_v24 }
  0xa6   :  { %v173_v25 = vpop.f32.mrf.mxu0 }
  0xa7   :  { %v187_v26 = vpop.f32.mrf.mxu1 }
  0xa8   :  { %v188_v27 = vadd.f32 %v187_v26, %v173_v25 }
  0xaa   :  { %200 = vst [vmem:[%s420_s2 + $0x8] sm:$0xff] %v188_v27  ;;  %v201_v29 = vadd.f32 %v188_v27, %v186_v24  ;;  %v210_v30 = vmul.f32 %v188_v27, %v188_v27 }
  0xac   :  { %v202_v31 = vrot.slane %v201_v29, 4  ;;  %v211_v32 = vadd.f32 %v210_v30, %v209_v28 }
  0xae   :  { %v203_v33 = vadd.f32 %v202_v31, %v201_v29  ;;  %v212_v34 = vrot.slane %v211_v32, 4 }
  0xb0   :  { %v204_v35 = vrot.slane %v203_v33, 2  ;;  %v213_v36 = vadd.f32 %v212_v34, %v211_v32 }
  0xb2   :  { %v205_v37 = vadd.f32 %v204_v35, %v203_v33  ;;  %v214_v38 = vrot.slane %v213_v36, 2 }
  0xb4   :  { %v206_v39 = vrot.slane %v205_v37, 1  ;;  %v215_v40 = vadd.f32 %v214_v38, %v213_v36 }
  0xb6   :  { %v207_v41 = vadd.f32 %v206_v39, %v205_v37  ;;  %v216_v42 = vrot.slane %v215_v40, 1 }
  0xb8   :  { %208 = vst [vmem:[%s421_s3] sm:$0x1] %v207_v41  ;;  %v217_v43 = vadd.f32 %v216_v42, %v215_v40 }
  0xba   :  { %218 = vst [vmem:[%s422_s4] sm:$0x1] %v217_v43 }

// kernel: _lambda_.83
= control target key start
LH: loop header
LB: loop body
LE: loop exit
PB: predicated region body
PF: predicated region fallthrough
CT: control target
= control target key end

     0   :  { %vm40_vm0 = vcmask 257024   ;;  %s89_s0 = inlined_call_operand.vmem [shape: f32[1,16,32], index: 0, kind: input, shape index: {}]   ;;  %s90_s1 = inlined_call_operand.vmem [shape: f32[1,32], index: 1, kind: input, shape index: {}]   ;;  %s91_s2 = inlined_call_operand.vmem [shape: f32[1,32], index: 2, kind: input, shape index: {}]   ;;  %s92_s3 = inlined_call_operand.vmem [shape: bf16[1,16,32], index: 3, kind: output, shape index: {}]  }
   0x1   :  { %v14_v0 = vld [vmem:[%s89_s0] sm:$0xff]  ;;  %v15_v3 = vld [vmem:[%s89_s0 + $0x8] sm:$0xff] }
   0x2   :  { %v49_v1 = vld [vmem:[%s90_s1] ss:$0 sm:$0xff] }
   0x3   :  { %v50_v2 = vld [vmem:[%s91_s2] ss:$0 sm:$0xff]  ;;  %v20_v4 = vmul.f32 %v49_v1, %v14_v0  ;;  %v21_v5 = vmul.f32 %v49_v1, %v15_v3 }
   0x5   :  { %v26_v6 = vadd.f32 %v50_v2, %v20_v4  ;;  %v27_v7 = vadd.f32 %v50_v2, %v21_v5 }
   0x7   :  { %v47_v8 = vadd.f32 -1.0, %v26_v6  ;;  %v48_v9 = vadd.f32 -1.0, %v27_v7 }
   0x9   :  { %v30_v10 = vadd.f32 1.0, %v47_v8  ;;  %v31_v11 = vadd.f32 1.0, %v48_v9 }
   0xb   :  { %v32_v12 = vfloor.f32 %v30_v10  ;;  %v33_v13 = vfloor.f32 %v31_v11 }
   0xd   :  { %v34_v14 = vmax.f32 %v32_v12, 0.0  ;;  %v35_v15 = vmax.f32 %v33_v13, 0.0 }
   0xf   :  { %v36_v16 = vmin.f32 %v34_v14, 8.0  ;;  %v37_v17 = vmin.f32 %v35_v15, 8.0 }
  0x11   :  { %v38_v18 = vpack.c.bf16 %v36_v16, %v36_v16  ;;  %v39_v19 = vpack.c.bf16 %v37_v17, %v37_v17 }
  0x13   :  { %41 = vst.msk [vmem:[%s92_s3] sm:$0xf] %vm40_vm0, %v38_v18 }
  0x14   :  { %42 = vst.msk [vmem:[%s92_s3 + $0x4] sm:$0xf] %vm40_vm0, %v39_v19 }

// kernel: mul.97
= control target key start
LH: loop header
LB: loop body
LE: loop exit
PB: predicated region body
PF: predicated region fallthrough
CT: control target
= control target key end

     0   :  { %s34_s0 = inlined_call_operand.vmem [shape: f32[256], index: 0, kind: input, shape index: {}]   ;;  %s35_s1 = inlined_call_operand.vmem [shape: f32[256], index: 1, kind: input, shape index: {}]   ;;  %s36_s2 = inlined_call_operand.vmem [shape: f32[256], index: 2, kind: output, shape index: {}]  }
   0x1   :  { %v3_v0 = vld [vmem:[%s34_s0] sm:$0x3] }
   0x2   :  { %v4_v1 = vld [vmem:[%s35_s1] sm:$0x3] }
   0x3   :  { %v7_v2 = vmul.f32 %v4_v1, %v3_v0 }
   0x5   :  { %9 = vst [vmem:[%s36_s2] sm:$0x3] %v7_v2 }

// kernel: _lambda_.85
= control target key start
LH: loop header
LB: loop body
LE: loop exit
PB: predicated region body
PF: predicated region fallthrough
CT: control target
= control target key end

     0   :  { %vm65_vm0 = vcmask 257024   ;;  %s143_s0 = inlined_call_operand.vmem [shape: f32[1,16,32], index: 0, kind: input, shape index: {}]   ;;  %s144_s1 = inlined_call_operand.vmem [shape: f32[1,32], index: 1, kind: input, shape index: {}]   ;;  %s145_s2 = inlined_call_operand.vmem [shape: f32[1,32], index: 2, kind: input, shape index: {}]   ;;  %s146_s3 = inlined_call_operand.vmem [shape: f32[1,16,32], index: 3, kind: input, shape index: {}]   ;;  %s147_s4 = inlined_call_operand.vmem [shape: f32[1,32], index: 4, kind: input, shape index: {}]   ;;  %s148_s5 = inlined_call_operand.vmem [shape: f32[1,32], index: 5, kind: input, shape index: {}]   ;;  %s149_s6 = inlined_call_operand.vmem [shape: bf16[1,16,32], index: 6, kind: output, shape index: {}]  }
   0x1   :  { %v23_v0 = vld [vmem:[%s143_s0] sm:$0xff]  ;;  %v24_v6 = vld [vmem:[%s143_s0 + $0x8] sm:$0xff] }
   0x2   :  { %v74_v1 = vld [vmem:[%s144_s1] ss:$0 sm:$0xff]  ;;  %v38_v7 = vld [vmem:[%s146_s3 + $0x8] sm:$0xff] }
   0x3   :  { %v75_v2 = vld [vmem:[%s145_s2] ss:$0 sm:$0xff]  ;;  %v29_v4 = vmul.f32 %v74_v1, %v23_v0  ;;  %v30_v11 = vmul.f32 %v74_v1, %v24_v6 }
   0x4   :  { %v37_v3 = vld [vmem:[%s146_s3] sm:$0xff] }
   0x5   :  { %v76_v5 = vld [vmem:[%s147_s4] ss:$0 sm:$0xff]  ;;  %v35_v8 = vadd.f32 %v75_v2, %v29_v4  ;;  %v36_v14 = vadd.f32 %v75_v2, %v30_v11 }
   0x6   :  { %v43_v9 = vmul.f32 %v76_v5, %v37_v3  ;;  %v77_v10 = vld [vmem:[%s148_s5] ss:$0 sm:$0xff]  ;;  %v44_v12 = vmul.f32 %v76_v5, %v38_v7 }
   0x8   :  { %v45_v13 = vadd.f32 %v43_v9, %v35_v8  ;;  %v46_v16 = vadd.f32 %v44_v12, %v36_v14 }
   0xa   :  { %v51_v15 = vadd.f32 %v77_v10, %v45_v13  ;;  %v52_v18 = vadd.f32 %v77_v10, %v46_v16 }
   0xc   :  { %v72_v17 = vadd.f32 -1.0, %v51_v15  ;;  %v73_v20 = vadd.f32 -1.0, %v52_v18 }
   0xe   :  { %v55_v19 = vadd.f32 1.0, %v72_v17  ;;  %v56_v22 = vadd.f32 1.0, %v73_v20 }
  0x10   :  { %v57_v21 = vfloor.f32 %v55_v19  ;;  %v58_v24 = vfloor.f32 %v56_v22 }
  0x12   :  { %v59_v23 = vmax.f32 %v57_v21, 0.0  ;;  %v60_v26 = vmax.f32 %v58_v24, 0.0 }
  0x14   :  { %v61_v25 = vmin.f32 %v59_v23, 8.0  ;;  %v62_v28 = vmin.f32 %v60_v26, 8.0 }
  0x16   :  { %v63_v27 = vpack.c.bf16 %v61_v25, %v61_v25  ;;  %v64_v29 = vpack.c.bf16 %v62_v28, %v62_v28 }
  0x18   :  { %66 = vst.msk [vmem:[%s149_s6] sm:$0xf] %vm65_vm0, %v63_v27 }
  0x19   :  { %67 = vst.msk [vmem:[%s149_s6 + $0x4] sm:$0xf] %vm65_vm0, %v64_v29 }

// kernel: _lambda_.101
= control target key start
LH: loop header
LB: loop body
LE: loop exit
PB: predicated region body
PF: predicated region fallthrough
CT: control target
= control target key end

     0   :  { %s1286_s15 = smov 0   ;;  %s1288_s16 = smov 0   ;;  %s1514_s0 = inlined_call_operand.vmem [shape: bf16[4,256], index: 0, kind: input, shape index: {}]   ;;  %s1515_s1 = inlined_call_operand.vmem [shape: bf16[256,512], index: 1, kind: input, shape index: {}]   ;;  %s1516_s2 = inlined_call_operand.vmem [shape: f32[4,512], index: 2, kind: output, shape index: {0}]   ;;  %s1517_s3 = inlined_call_operand.vmem [shape: f32[1,1,512], index: 3, kind: output, shape index: {1}]   ;;  %s1518_s4 = inlined_call_operand.vmem [shape: f32[1,1,512], index: 4, kind: output, shape index: {2}]  }
   0x1   :  { %s1290_s17 = smov 0   ;;  %s1292_s18 = smov 0  }
   0x2   :  { %s1294_s19 = smov 0  }
   0x3 LB: > { %s30_s20 = sadd.s32 1, %s1255_s18  ;;  %p78_p1 = scmp.ne.s32.totalorder %s1247_s16, %s1243_s15  ;;  %s1259_s19 = sphi %s1294_s19, %s15_s19   ;;  %s1255_s18 = sphi %s1292_s18, %s1524_s18   ;;  %s1251_s17 = sphi %s1290_s17, %s1523_s17   ;;  %s1247_s16 = sphi %s1288_s16, %s1522_s16   ;;  %s1243_s15 = sphi %s1286_s15, %s1521_s15  }
   0x4   : > { %p32_p0 = scmp.ge.s32.totalorder %s30_s20, 2  ;;  %p79_p2 = scmp.eq.s32.totalorder %s1259_s19, 0 }
   0x5   : > { %s71_s22 = sadd.s32 1, %s1247_s16  ;;  %p1008_p5 = scmp.ge.s32.totalorder %s1259_s19, 2 }
   0x6   : > { %s1526_s20 = smov (%p32_p0, %s30_s20), 0  ;;  %p80_p3 = por %p79_p2, %p78_p1 }
   0x7   : > { %s67_s21 = ssub.s32 %s1255_s18, %s1526_s20  ;;  %201 = sbr.rel (%p1008_p5) target bundleno = 48 (0x30), region = 20 }
   0x8   : > { %p69_p4 = scmp.eq.s32.totalorder %s67_s21, 0 }
   0xa   : > { %s1321_s23 = scalar_select %p69_p4, %s1247_s16, %s71_s22  }
   0xc   : > { %204 = sbr.rel (!%p80_p3) target bundleno = 48 (0x30), region = 24  ;;  %s206_s24 = sand.u32 (%p80_p3), 1, %s1247_s16  }
   0xd   : > { %s1148_s25 = sshll.u32 (%p80_p3), %s1255_s18, 3  ;;  %s1009_s26 = sshll.u32 (%p80_p3), %s206_s24, 8 }
   0xe   : > { %s1329_s29 = scalar_lea.vmem (%p80_p3), %s1515_s1, %s1148_s25  ;;  %s1334_s30 = scalar_lea.vmem (%p80_p3), [#allocation3], %s1009_s26 }
   0xf   : > { %v305_v0 = vld [vmem:[%s1329_s29] sm:$0xff] (%p80_p3)  ;;  %v307_v1 = vld [vmem:[%s1329_s29 + $0x10] sm:$0xff] (%p80_p3) }
  0x10   : > { %v309_v2 = vld [vmem:[%s1329_s29 + $0x20] sm:$0xff] (%p80_p3)  ;;  %306 = vst [vmem:[%s1334_s30] sm:$0xff] (%p80_p3), %v305_v0  ;;  %v311_v3 = vld [vmem:[%s1329_s29 + $0x30] sm:$0xff] (%p80_p3) }
  0x11   : > { %308 = vst [vmem:[%s1334_s30 + $0x8] sm:$0xff] %v307_v1  ;;  %v313_v4 = vld [vmem:[%s1329_s29 + $0x40] sm:$0xff]  ;;  %v315_v5 = vld [vmem:[%s1329_s29 + $0x50] sm:$0xff] }
  0x12   : > { %310 = vst [vmem:[%s1334_s30 + $0x10] sm:$0xff] %v309_v2  ;;  %v317_v6 = vld [vmem:[%s1329_s29 + $0x60] sm:$0xff]  ;;  %v319_v7 = vld [vmem:[%s1329_s29 + $0x70] sm:$0xff] }
  0x13   : > { %312 = vst [vmem:[%s1334_s30 + $0x18] sm:$0xff] %v311_v3  ;;  %v321_v8 = vld [vmem:[%s1329_s29 + $0x80] sm:$0xff]  ;;  %v323_v9 = vld [vmem:[%s1329_s29 + $0x90] sm:$0xff] }
  0x14   : > { %314 = vst [vmem:[%s1334_s30 + $0x20] sm:$0xff] %v313_v4  ;;  %v325_v10 = vld [vmem:[%s1329_s29 + $0xa0] sm:$0xff]  ;;  %v327_v11 = vld [vmem:[%s1329_s29 + $0xb0] sm:$0xff] }
  0x15   : > { %316 = vst [vmem:[%s1334_s30 + $0x28] sm:$0xff] %v315_v5  ;;  %v329_v12 = vld [vmem:[%s1329_s29 + $0xc0] sm:$0xff]  ;;  %v331_v13 = vld [vmem:[%s1329_s29 + $0xd0] sm:$0xff] }
  0x16   : > { %318 = vst [vmem:[%s1334_s30 + $0x30] sm:$0xff] %v317_v6  ;;  %v333_v14 = vld [vmem:[%s1329_s29 + $0xe0] sm:$0xff]  ;;  %v335_v15 = vld [vmem:[%s1329_s29 + $0xf0] sm:$0xff] }
  0x17   : > { %320 = vst [vmem:[%s1334_s30 + $0x38] sm:$0xff] %v319_v7  ;;  %v337_v16 = vld [vmem:[%s1329_s29 + $0x100] sm:$0xff]  ;;  %v339_v17 = vld [vmem:[%s1329_s29 + $0x110] sm:$0xff] }
  0x18   : > { %322 = vst [vmem:[%s1334_s30 + $0x40] sm:$0xff] %v321_v8  ;;  %v341_v18 = vld [vmem:[%s1329_s29 + $0x120] sm:$0xff]  ;;  %v343_v19 = vld [vmem:[%s1329_s29 + $0x130] sm:$0xff] }
  0x19   : > { %324 = vst [vmem:[%s1334_s30 + $0x48] sm:$0xff] %v323_v9  ;;  %v345_v20 = vld [vmem:[%s1329_s29 + $0x140] sm:$0xff]  ;;  %v347_v21 = vld [vmem:[%s1329_s29 + $0x150] sm:$0xff] }
  0x1a   : > { %326 = vst [vmem:[%s1334_s30 + $0x50] sm:$0xff] %v325_v10  ;;  %v349_v22 = vld [vmem:[%s1329_s29 + $0x160] sm:$0xff]  ;;  %v351_v23 = vld [vmem:[%s1329_s29 + $0x170] sm:$0xff] }
  0x1b   : > { %328 = vst [vmem:[%s1334_s30 + $0x58] sm:$0xff] %v327_v11  ;;  %v353_v24 = vld [vmem:[%s1329_s29 + $0x180] sm:$0xff]  ;;  %v355_v25 = vld [vmem:[%s1329_s29 + $0x190] sm:$0xff] }
  0x1c   : > { %330 = vst [vmem:[%s1334_s30 + $0x60] sm:$0xff] %v329_v12  ;;  %v357_v26 = vld [vmem:[%s1329_s29 + $0x1a0] sm:$0xff]  ;;  %v359_v27 = vld [vmem:[%s1329_s29 + $0x1b0] sm:$0xff] }
  0x1d   : > { %332 = vst [vmem:[%s1334_s30 + $0x68] sm:$0xff] %v331_v13  ;;  %v361_v28 = vld [vmem:[%s1329_s29 + $0x1c0] sm:$0xff]  ;;  %v363_v29 = vld [vmem:[%s1329_s29 + $0x1d0] sm:$0xff] }
  0x1e   : > { %334 = vst [vmem:[%s1334_s30 + $0x70] sm:$0xff] %v333_v14  ;;  %v365_v30 = vld [vmem:[%s1329_s29 + $0x1e0] sm:$0xff]  ;;  %v367_v31 = vld [vmem:[%s1329_s29 + $0x1f0] sm:$0xff] }
  0x1f   : > { %336 = vst [vmem:[%s1334_s30 + $0x78] sm:$0xff] %v335_v15 }
  0x20   : > { %338 = vst [vmem:[%s1334_s30 + $0x80] sm:$0xff] %v337_v16 }
  0x21   : > { %340 = vst [vmem:[%s1334_s30 + $0x88] sm:$0xff] %v339_v17 }
  0x22   : > { %342 = vst [vmem:[%s1334_s30 + $0x90] sm:$0xff] %v341_v18 }
  0x23   : > { %344 = vst [vmem:[%s1334_s30 + $0x98] sm:$0xff] %v343_v19 }
  0x24   : > { %346 = vst [vmem:[%s1334_s30 + $0xa0] sm:$0xff] %v345_v20 }
  0x25   : > { %348 = vst [vmem:[%s1334_s30 + $0xa8] sm:$0xff] %v347_v21 }
  0x26   : > { %350 = vst [vmem:[%s1334_s30 + $0xb0] sm:$0xff] %v349_v22 }
  0x27   : > { %352 = vst [vmem:[%s1334_s30 + $0xb8] sm:$0xff] %v351_v23 }
  0x28   : > { %354 = vst [vmem:[%s1334_s30 + $0xc0] sm:$0xff] %v353_v24 }
  0x29   : > { %356 = vst [vmem:[%s1334_s30 + $0xc8] sm:$0xff] %v355_v25 }
  0x2a   : > { %358 = vst [vmem:[%s1334_s30 + $0xd0] sm:$0xff] %v357_v26 }
  0x2b   : > { %360 = vst [vmem:[%s1334_s30 + $0xd8] sm:$0xff] %v359_v27 }
  0x2c   : > { %362 = vst [vmem:[%s1334_s30 + $0xe0] sm:$0xff] %v361_v28 }
  0x2d   : > { %364 = vst [vmem:[%s1334_s30 + $0xe8] sm:$0xff] %v363_v29 }
  0x2e   : > { %366 = vst [vmem:[%s1334_s30 + $0xf0] sm:$0xff] %v365_v30 }
  0x2f   : > { %368 = vst [vmem:[%s1334_s30 + $0xf8] sm:$0xff] %v367_v31 }
  0x30 PF: > { %p1012_p6 = scmp.ge.s32.totalorder %s1259_s19, 1  ;;  %p373_p7 = scmp.lt.s32.totalorder %s1259_s19, 3 }
  0x32   : > { %p374_p8 = pnand %p1012_p6, %p373_p7 }
  0x33   : > { %s380_s5 = sand.u32 (!%p374_p8), 1, %s1243_s15   ;;  %s1014_s10 = sshll.u32 (!%p374_p8), %s1251_s17, 1 }
  0x34   : > { %377 = sbr.rel (%p374_p8) target bundleno = 265 (0x109), region = 62  ;;  %s1013_s8 = sshll.u32 (!%p374_p8), %s380_s5, 8 }
  0x35   : > { %s1403_s9 = scalar_lea.vmem (!%p374_p8), [#allocation3], %s1013_s8  ;;  %p449_p9 = scmp.lt.s32.totalorder (!%p374_p8), %s1014_s10, 3 }
  0x39   : > { %v480_v32 = vld [vmem:[%s1514_s0] sm:$0xf]  ;;  %v1076_v33 = vld [vmem:[%s1403_s9 + $0x70] sm:$0xf]  ;;  %v1163_v38 = vld [vmem:[%s1403_s9 + $0x74] sm:$0xf] }
  0x3a   : > { %514 = vst [vmem:[#allocation1] ss:$4 sm:$0xff] %v480_v32  ;;  %v1164_v34 = vld [vmem:[%s1403_s9 + $0x74] sm:$0xf0]  ;;  %v1140_v35 = vld [vmem:[%s1403_s9 + $0xf0] sm:$0xf] }
  0x3b   : > { %v1077_v36 = vor.u32 %v1164_v34, %v1076_v33  ;;  %v1180_v37 = vld [vmem:[%s1403_s9 + $0xf4] sm:$0xf0]  ;;  %v1078_v39 = vld [vmem:[%s1403_s9 + $0x78] sm:$0xf0]  ;;  %v1179_v42 = vld [vmem:[%s1403_s9 + $0xf4] sm:$0xf] }
  0x3c   : > { %v1141_v40 = vor.u32 %v1180_v37, %v1140_v35  ;;  %v1081_v41 = vor.u32 %v1163_v38, %v1078_v39  ;;  %v1142_v43 = vld [vmem:[%s1403_s9 + $0xf8] sm:$0xf0]  ;;  %v1068_v44 = vld [vmem:[%s1403_s9 + $0x60] sm:$0xf]  ;;  %v1162_v46 = vld [vmem:[%s1403_s9 + $0x64] sm:$0xf0] }
  0x3d   : > { %679 = vmatpush.bf16.msra.mxu0 %v1077_v36  ;;  %v1145_v45 = vor.u32 %v1179_v42, %v1142_v43  ;;  %v1132_v47 = vld [vmem:[%s1403_s9 + $0xe0] sm:$0xf]  ;;  %v1178_v48 = vld [vmem:[%s1403_s9 + $0xe4] sm:$0xf0]  ;;  %v1069_v49 = vor.u32 %v1162_v46, %v1068_v44  ;;  %v1161_v51 = vld [vmem:[%s1403_s9 + $0x64] sm:$0xf] }
  0x3e   : > { %692 = vmatpush.bf16.msra.mxu1 %v1141_v40  ;;  %705 = vmatpush.bf16.msra.mxu2 %v1081_v41  ;;  %v1133_v50 = vor.u32 %v1178_v48, %v1132_v47  ;;  %v1070_v52 = vld [vmem:[%s1403_s9 + $0x68] sm:$0xf0]  ;;  %v1177_v53 = vld [vmem:[%s1403_s9 + $0xe4] sm:$0xf]  ;;  %v1060_v56 = vld [vmem:[%s1403_s9 + $0x50] sm:$0xf] }
  0x3f   : > { %718 = vmatpush.bf16.msra.mxu3 %v1145_v45  ;;  %v1073_v54 = vor.u32 %v1161_v51, %v1070_v52  ;;  %v1134_v55 = vld [vmem:[%s1403_s9 + $0xe8] sm:$0xf0]  ;;  %v1160_v57 = vld [vmem:[%s1403_s9 + $0x54] sm:$0xf0]  ;;  %v1124_v59 = vld [vmem:[%s1403_s9 + $0xd0] sm:$0xf] }
  0x40   : > { %v1137_v58 = vor.u32 %v1177_v53, %v1134_v55  ;;  %v1176_v60 = vld [vmem:[%s1403_s9 + $0xd4] sm:$0xf0]  ;;  %v1159_v61 = vld [vmem:[%s1403_s9 + $0x54] sm:$0xf]  ;;  %v1061_v62 = vor.u32 %v1160_v57, %v1060_v56  ;;  %v1062_v63 = vld [vmem:[%s1403_s9 + $0x58] sm:$0xf0] }
  0x41   : > { %680 = vmatpush.bf16.msra.mxu0 %v1069_v49  ;;  %v1175_v0 = vld [vmem:[%s1403_s9 + $0xd4] sm:$0xf]  ;;  %v1126_v1 = vld [vmem:[%s1403_s9 + $0xd8] sm:$0xf0]  ;;  %v1125_v2 = vor.u32 %v1176_v60, %v1124_v59  ;;  %v1065_v3 = vor.u32 %v1159_v61, %v1062_v63  ;;  %v1052_v4 = vld [vmem:[%s1403_s9 + $0x40] sm:$0xf] }
  0x42   : > { %693 = vmatpush.bf16.msra.mxu1 %v1133_v50  ;;  %706 = vmatpush.bf16.msra.mxu2 %v1073_v54  ;;  %v1158_v5 = vld [vmem:[%s1403_s9 + $0x44] sm:$0xf0]  ;;  %v1116_v6 = vld [vmem:[%s1403_s9 + $0xc0] sm:$0xf]  ;;  %v1129_v7 = vor.u32 %v1175_v0, %v1126_v1  ;;  %v1157_v9 = vld [vmem:[%s1403_s9 + $0x44] sm:$0xf] }
  0x43   : > { %719 = vmatpush.bf16.msra.mxu3 %v1137_v58  ;;  %v1174_v8 = vld [vmem:[%s1403_s9 + $0xc4] sm:$0xf0]  ;;  %v1054_v10 = vld [vmem:[%s1403_s9 + $0x48] sm:$0xf0]  ;;  %v1173_v11 = vld [vmem:[%s1403_s9 + $0xc4] sm:$0xf]  ;;  %v1053_v13 = vor.u32 %v1158_v5, %v1052_v4 }
  0x44   : > { %v1118_v12 = vld [vmem:[%s1403_s9 + $0xc8] sm:$0xf0]  ;;  %v1117_v14 = vor.u32 %v1174_v8, %v1116_v6  ;;  %v1057_v15 = vor.u32 %v1157_v9, %v1054_v10  ;;  %v1044_v16 = vld [vmem:[%s1403_s9 + $0x30] sm:$0xf]  ;;  %v1156_v17 = vld [vmem:[%s1403_s9 + $0x34] sm:$0xf0] }
  0x45   : > { %681 = vmatpush.bf16.msra.mxu0 %v1061_v62  ;;  %v1108_v18 = vld [vmem:[%s1403_s9 + $0xb0] sm:$0xf]  ;;  %v1121_v19 = vor.u32 %v1173_v11, %v1118_v12  ;;  %v1172_v20 = vld [vmem:[%s1403_s9 + $0xb4] sm:$0xf0]  ;;  %v1155_v21 = vld [vmem:[%s1403_s9 + $0x34] sm:$0xf]  ;;  %v1045_v25 = vor.u32 %v1156_v17, %v1044_v16 }
  0x46   : > { %694 = vmatpush.bf16.msra.mxu1 %v1125_v2  ;;  %707 = vmatpush.bf16.msra.mxu2 %v1065_v3  ;;  %v1046_v22 = vld [vmem:[%s1403_s9 + $0x38] sm:$0xf0]  ;;  %v1171_v23 = vld [vmem:[%s1403_s9 + $0xb4] sm:$0xf]  ;;  %v1109_v26 = vor.u32 %v1172_v20, %v1108_v18  ;;  %v1036_v28 = vld [vmem:[%s1403_s9 + $0x20] sm:$0xf] }
  0x47   : > { %720 = vmatpush.bf16.msra.mxu3 %v1129_v7  ;;  %v1110_v24 = vld [vmem:[%s1403_s9 + $0xb8] sm:$0xf0]  ;;  %v1049_v27 = vor.u32 %v1155_v21, %v1046_v22  ;;  %v1154_v29 = vld [vmem:[%s1403_s9 + $0x24] sm:$0xf0]  ;;  %v1100_v30 = vld [vmem:[%s1403_s9 + $0xa0] sm:$0xf] }
  0x48   : > { %v1113_v31 = vor.u32 %v1171_v23, %v1110_v24  ;;  %v1170_v32 = vld [vmem:[%s1403_s9 + $0xa4] sm:$0xf0]  ;;  %v1153_v33 = vld [vmem:[%s1403_s9 + $0x24] sm:$0xf]  ;;  %v1038_v34 = vld [vmem:[%s1403_s9 + $0x28] sm:$0xf0]  ;;  %v1037_v37 = vor.u32 %v1154_v29, %v1036_v28 }
  0x49   : > { %682 = vmatpush.bf16.msra.mxu0 %v1053_v13  ;;  %v1169_v35 = vld [vmem:[%s1403_s9 + $0xa4] sm:$0xf]  ;;  %v1102_v36 = vld [vmem:[%s1403_s9 + $0xa8] sm:$0xf0]  ;;  %v1101_v38 = vor.u32 %v1170_v32, %v1100_v30  ;;  %v1041_v39 = vor.u32 %v1153_v33, %v1038_v34  ;;  %v1028_v40 = vld [vmem:[%s1403_s9 + $0x10] sm:$0xf]  ;;  %v770_v30 = vlaneseq }
  0x4a   : > { %695 = vmatpush.bf16.msra.mxu1 %v1117_v14  ;;  %708 = vmatpush.bf16.msra.mxu2 %v1057_v15  ;;  %v1152_v41 = vld [vmem:[%s1403_s9 + $0x14] sm:$0xf0]  ;;  %v1092_v42 = vld [vmem:[%s1403_s9 + $0x90] sm:$0xf]  ;;  %v1105_v43 = vor.u32 %v1169_v35, %v1102_v36  ;;  %v1151_v45 = vld [vmem:[%s1403_s9 + $0x14] sm:$0xf] }
  0x4b   : > { %721 = vmatpush.bf16.msra.mxu3 %v1121_v19  ;;  %v1168_v44 = vld [vmem:[%s1403_s9 + $0x94] sm:$0xf0]  ;;  %v1030_v46 = vld [vmem:[%s1403_s9 + $0x18] sm:$0xf0]  ;;  %v1167_v47 = vld [vmem:[%s1403_s9 + $0x94] sm:$0xf]  ;;  %v1029_v49 = vor.u32 %v1152_v41, %v1028_v40 }
  0x4c   : > { %v1094_v48 = vld [vmem:[%s1403_s9 + $0x98] sm:$0xf0]  ;;  %v1093_v50 = vor.u32 %v1168_v44, %v1092_v42  ;;  %v1033_v51 = vor.u32 %v1151_v45, %v1030_v46  ;;  %v1020_v52 = vld [vmem:[%s1403_s9] sm:$0xf]  ;;  %v1150_v53 = vld [vmem:[%s1403_s9 + $0x4] sm:$0xf0] }
  0x4d   : > { %683 = vmatpush.bf16.msra.mxu0 %v1045_v25  ;;  %v1084_v54 = vld [vmem:[%s1403_s9 + $0x80] sm:$0xf]  ;;  %v1097_v55 = vor.u32 %v1167_v47, %v1094_v48  ;;  %v1166_v56 = vld [vmem:[%s1403_s9 + $0x84] sm:$0xf0]  ;;  %v1149_v57 = vld [vmem:[%s1403_s9 + $0x4] sm:$0xf]  ;;  %v1021_v61 = vor.u32 %v1150_v53, %v1020_v52 }
  0x4e   : > { %696 = vmatpush.bf16.msra.mxu1 %v1109_v26  ;;  %709 = vmatpush.bf16.msra.mxu2 %v1049_v27  ;;  %v1022_v58 = vld [vmem:[%s1403_s9 + $0x8] sm:$0xf0]  ;;  %v1165_v59 = vld [vmem:[%s1403_s9 + $0x84] sm:$0xf]  ;;  %v1085_v62 = vor.u32 %v1166_v56, %v1084_v54  ;;  %s1528_s10 = smov (!%p449_p9, %s1014_s10), 3  ;;  %vm734_vm0 = vcmask 1043456  }
  0x4f   : > { %722 = vmatpush.bf16.msra.mxu3 %v1113_v31  ;;  %v1086_v60 = vld [vmem:[%s1403_s9 + $0x88] sm:$0xf0]  ;;  %v1025_v63 = vor.u32 %v1149_v57, %v1022_v58  ;;  %v515_v1 = vld.sshfl [vmem:[#allocation1] sm:$0xff pattern:$0x73625140]  ;;  %s1015_s11 = sshll.u32 %s1528_s10, 2  ;;  %s463_s21 = scalar_lea.vmem %s1517_s3, %s1528_s10 }
  0x50   : > { %v1089_v0 = vor.u32 %v1165_v59, %v1086_v60  ;;  %v516_v2 = vld.sshfl [vmem:[#allocation1 + $0x8] sm:$0xff pattern:$0x73625140]  ;;  %s454_s14 = scalar_lea.vmem %s1516_s2, %s1015_s11  ;;  %vm767_vm1 = vcmask 1040384   ;;  %vm1481_vm2 = vcmp.lt.s32.totalorder %v770_v30, 256  ;;  %s472_s25 = scalar_lea.vmem %s1518_s4, %s1528_s10 }
  0x51   : > { %684 = vmatpush.bf16.msra.mxu0 %v1037_v37 }
  0x52   : > { %697 = vmatpush.bf16.msra.mxu1 %v1101_v38  ;;  %710 = vmatpush.bf16.msra.mxu2 %v1041_v39 }
  0x53   : > { %723 = vmatpush.bf16.msra.mxu3 %v1105_v43 }
  0x55   : > { %685 = vmatpush.bf16.msra.mxu0 %v1029_v49 }
  0x56   : > { %698 = vmatpush.bf16.msra.mxu1 %v1093_v50  ;;  %711 = vmatpush.bf16.msra.mxu2 %v1033_v51 }
  0x57   : > { %724 = vmatpush.bf16.msra.mxu3 %v1097_v55 }
  0x59   : > { %686 = vmatpush.bf16.msra.mxu0 %v1021_v61 }
  0x5a   : > { %699 = vmatpush.bf16.msra.mxu1 %v1085_v62  ;;  %712 = vmatpush.bf16.msra.mxu2 %v1025_v63 }
  0x5b   : > { %725 = vmatpush.bf16.msra.mxu3 %v1089_v0 }
  0x5c   : > { %687 = vmatmul.bf16.vlgmr.msra.gmra.mxu0 %v515_v1 }
  0x5d   : > { %700 = vmatmul.bf16.vlgmr.msra.gmra.mxu1 %v516_v2  ;;  %713 = vmatmul.bf16.vlgmr.msra.gmra.mxu2 %v515_v1 }
  0x5e   : > { %726 = vmatmul.bf16.vlgmr.msra.gmra.mxu3 %v516_v2 }
  0xd9   : > { %v688_v3 = vpop.f32.mrf.mxu0 }
  0xda   : > { %v701_v4 = vpop.f32.mrf.mxu1 }
  0xdb   : > { %v702_v8 = vadd.f32 %v701_v4, %v688_v3 }
  0xe0   : > { %v714_v5 = vpop.f32.mrf.mxu2 }
  0xe1   : > { %v727_v6 = vpop.f32.mrf.mxu3  ;;  %v690_v7 = vpop.f32.mrf.mxu0 }
  0xe2   : > { %v728_v9 = vadd.f32 %v727_v6, %v714_v5  ;;  %v703_v10 = vpop.f32.mrf.mxu1 }
  0xe4   : > { %v733_v11 = vrot.slane %v728_v9, 4 }
  0xe6   : > { %v735_v12 = vsel %vm734_vm0, %v702_v8, %v733_v11 }
  0xe7   : > { %743 = vst [vmem:[%s454_s14] sm:$0xff] %v735_v12  ;;  %v775_v15 = vmul.f32 %v735_v12, %v735_v12 }
  0xe8   : > { %745 = vst [vmem:[#allocation1] ss:$2 sm:$0xff] %v735_v12  ;;  %v716_v13 = vpop.f32.mrf.mxu2 }
  0xe9   : > { %v729_v14 = vpop.f32.mrf.mxu3 }
  0xef   : > { %v746_v16 = vld.sshfl [vmem:[#allocation1] sm:$0xff pattern:$0x75316420]  ;;  %v747_v17 = vld.sshfl [vmem:[#allocation1 + $0x8] sm:$0xff pattern:$0x75316420] }
  0xf0   : > { %v750_v18 = vsel %vm734_vm0, %v746_v16, 0.0  ;;  %v757_v19 = vsel %vm734_vm0, %v747_v17, 0.0  ;;  %777 = vst [vmem:[#allocation1] ss:$2 sm:$0xff] %v775_v15 }
  0xf1   : > { %v751_v20 = vrot.slane %v750_v18, 4  ;;  %v758_v21 = vrot.slane %v757_v19, 4 }
  0xf3   : > { %v752_v22 = vadd.f32 %v751_v20, %v750_v18  ;;  %v759_v23 = vadd.f32 %v758_v21, %v757_v19 }
  0xf5   : > { %v753_v24 = vrot.slane %v752_v22, 2  ;;  %v760_v25 = vrot.slane %v759_v23, 2 }
  0xf7   : > { %v754_v26 = vadd.f32 %v753_v24, %v752_v22  ;;  %v761_v27 = vadd.f32 %v760_v25, %v759_v23  ;;  %v778_v28 = vld.sshfl [vmem:[#allocation1] sm:$0xff pattern:$0x75316420]  ;;  %v779_v29 = vld.sshfl [vmem:[#allocation1 + $0x8] sm:$0xff pattern:$0x75316420] }
  0xf8   : > { %v782_v31 = vsel %vm734_vm0, %v778_v28, 0.0  ;;  %v789_v32 = vsel %vm734_vm0, %v779_v29, 0.0 }
  0xf9   : > { %v755_v33 = vrot.slane %v754_v26, 1  ;;  %v762_v34 = vrot.slane %v761_v27, 1  ;;  %v783_v35 = vrot.slane %v782_v31, 4  ;;  %v790_v36 = vrot.slane %v789_v32, 4 }
  0xfb   : > { %v763_v37 = vadd.f32 %v762_v34, %v761_v27  ;;  %v784_v38 = vadd.f32 %v783_v35, %v782_v31  ;;  %v791_v39 = vadd.f32 %v790_v36, %v789_v32  ;;  %v756_v41 = vadd.f32 %v755_v33, %v754_v26 }
  0xfd   : > { %v766_v42 = vrot.slane %v763_v37, 7  ;;  %v785_v43 = vrot.slane %v784_v38, 2  ;;  %v792_v44 = vrot.slane %v791_v39, 2 }
  0xff   : > { %v768_v45 = vsel %vm767_vm1, %v756_v41, %v766_v42  ;;  %v786_v46 = vadd.f32 %v785_v43, %v784_v38  ;;  %v793_v47 = vadd.f32 %v792_v44, %v791_v39 }
 0x100   : > { %774 = vst.msk [vmem:[%s463_s21] sm:$0x3] %vm1481_vm2, %v768_v45 }
 0x101   : > { %v787_v48 = vrot.slane %v786_v46, 1  ;;  %v794_v49 = vrot.slane %v793_v47, 1 }
 0x103   : > { %v795_v50 = vadd.f32 %v794_v49, %v793_v47  ;;  %v788_v51 = vadd.f32 %v787_v48, %v786_v46 }
 0x105   : > { %v798_v52 = vrot.slane %v795_v50, 7 }
 0x107   : > { %v799_v53 = vsel %vm767_vm1, %v788_v51, %v798_v52 }
 0x108   : > { %801 = vst.msk [vmem:[%s472_s25] sm:$0x3] %vm1481_vm2, %v799_v53 }
 0x109 PF: > { %s15_s19 = sadd.s32 1, %s1259_s19   ;;  %s1521_s15 = smov %s1247_s16 }
 0x10a   : > { %p12_p10 = scmp.ge.s32.totalorder %s15_s19, 4   ;;  %s1522_s16 = smov %s1321_s23 }
 0x10b   : > { %s1523_s17 = smov %s1255_s18  ;;  %s1524_s18 = smov %s1526_s20 }
 0x10c   :  { %14 = sbr.rel (!%p12_p10) target bundleno = 3 (0x3), region = 136 }

// kernel: _lambda_.94
= control target key start
LH: loop header
LB: loop body
LE: loop exit
PB: predicated region body
PF: predicated region fallthrough
CT: control target
= control target key end

     0   :  { %vm60_vm0 = vcmask 1043456   ;;  %vm61_vm1 = vcmask 523268   ;;  %s117_s0 = inlined_call_operand.vmem [shape: f32[1,16,192], index: 0, kind: input, shape index: {}]   ;;  %s118_s1 = inlined_call_operand.vmem [shape: f32[1,192], index: 1, kind: input, shape index: {}]   ;;  %s119_s2 = inlined_call_operand.vmem [shape: f32[1,192], index: 2, kind: input, shape index: {}]   ;;  %s120_s3 = inlined_call_operand.vmem [shape: bf16[1,16,192], index: 3, kind: output, shape index: {}]  }
   0x1   :  { %v14_v0 = vld [vmem:[%s117_s0] sm:$0xff]  ;;  %v15_v1 = vld [vmem:[%s117_s0 + $0x8] sm:$0xff]  ;;  %v16_v6 = vld [vmem:[%s117_s0 + $0x10] sm:$0xff] }
   0x2   :  { %v18_v2 = vld [vmem:[%s118_s1] sm:$0x3]  ;;  %v17_v9 = vld [vmem:[%s117_s0 + $0x18] sm:$0xff]  ;;  %vm62_vm2 = vmor %vm61_vm1, %vm60_vm0 }
   0x3   :  { %v20_v3 = vperm.slane %v18_v2, 0  ;;  %v21_v4 = vperm.slane %v18_v2, 1  ;;  %v28_v5 = vld [vmem:[%s119_s2] sm:$0x3] }
   0x4   :  { %v30_v7 = vperm.slane %v28_v5, 0  ;;  %v31_v8 = vperm.slane %v28_v5, 1 }
   0x5   :  { %v24_v10 = vmul.f32 %v20_v3, %v14_v0  ;;  %v25_v11 = vmul.f32 %v21_v4, %v15_v1  ;;  %v26_v12 = vmul.f32 %v20_v3, %v16_v6  ;;  %v27_v13 = vmul.f32 %v21_v4, %v17_v9 }
   0x7   :  { %v34_v14 = vadd.f32 %v30_v7, %v24_v10  ;;  %v35_v15 = vadd.f32 %v31_v8, %v25_v11  ;;  %v36_v16 = vadd.f32 %v30_v7, %v26_v12  ;;  %v37_v17 = vadd.f32 %v31_v8, %v27_v13 }
   0x9   :  { %v69_v18 = vadd.f32 -1.0, %v34_v14  ;;  %v70_v19 = vadd.f32 -1.0, %v35_v15  ;;  %v71_v20 = vadd.f32 -1.0, %v36_v16  ;;  %v72_v21 = vadd.f32 -1.0, %v37_v17 }
   0xb   :  { %v42_v22 = vadd.f32 1.0, %v69_v18  ;;  %v43_v23 = vadd.f32 1.0, %v70_v19  ;;  %v44_v24 = vadd.f32 1.0, %v71_v20  ;;  %v45_v25 = vadd.f32 1.0, %v72_v21 }
   0xd   :  { %v46_v26 = vfloor.f32 %v42_v22  ;;  %v47_v27 = vfloor.f32 %v43_v23  ;;  %v48_v28 = vfloor.f32 %v44_v24  ;;  %v49_v29 = vfloor.f32 %v45_v25 }
   0xf   :  { %v50_v30 = vmax.f32 %v46_v26, 0.0  ;;  %v51_v31 = vmax.f32 %v47_v27, 0.0  ;;  %v52_v32 = vmax.f32 %v48_v28, 0.0  ;;  %v53_v33 = vmax.f32 %v49_v29, 0.0 }
  0x11   :  { %v54_v34 = vmin.f32 %v50_v30, 8.0  ;;  %v55_v35 = vmin.f32 %v51_v31, 8.0  ;;  %v56_v36 = vmin.f32 %v52_v32, 8.0  ;;  %v57_v37 = vmin.f32 %v53_v33, 8.0 }
  0x13   :  { %v58_v38 = vpack.c.bf16 %v55_v35, %v54_v34  ;;  %v59_v39 = vpack.c.bf16 %v57_v37, %v56_v36 }
  0x15   :  { %63 = vst.msk [vmem:[%s120_s3] sm:$0xff] %vm62_vm2, %v58_v38 }
  0x16   :  { %64 = vst.msk [vmem:[%s120_s3 + $0x8] sm:$0xff] %vm62_vm2, %v59_v39 }

// kernel: _lambda_.93
= control target key start
LH: loop header
LB: loop body
LE: loop exit
PB: predicated region body
PF: predicated region fallthrough
CT: control target
= control target key end

     0   :  { %vm322_vm0 = vcmask 1040384   ;;  %s783_s1 = inlined_call_operand.vmem [shape: bf16[256,256], index: 1, kind: input, shape index: {}]   ;;  %s784_s0 = inlined_call_operand.vmem [shape: bf16[16,256], index: 0, kind: input, shape index: {}]   ;;  %s785_s2 = inlined_call_operand.vmem [shape: f32[16,256], index: 2, kind: output, shape index: {0}]   ;;  %s786_s3 = inlined_call_operand.vmem [shape: f32[1,1,256], index: 3, kind: output, shape index: {1}]   ;;  %s787_s4 = inlined_call_operand.vmem [shape: f32[1,1,256], index: 4, kind: output, shape index: {2}]  }
   0x1   :  { %v432_v0 = vld [vmem:[%s783_s1 + $0x70] sm:$0xf]  ;;  %v519_v1 = vld [vmem:[%s783_s1 + $0x74] sm:$0xf0]  ;;  %v518_v5 = vld [vmem:[%s783_s1 + $0x74] sm:$0xf] }
   0x2   :  { %v496_v2 = vld [vmem:[%s783_s1 + $0xf0] sm:$0xf]  ;;  %v433_v3 = vor.u32 %v519_v1, %v432_v0  ;;  %v535_v4 = vld [vmem:[%s783_s1 + $0xf4] sm:$0xf0]  ;;  %v434_v6 = vld [vmem:[%s783_s1 + $0x78] sm:$0xf0] }
   0x3   :  { %v497_v7 = vor.u32 %v535_v4, %v496_v2  ;;  %v437_v8 = vor.u32 %v518_v5, %v434_v6  ;;  %v534_v9 = vld [vmem:[%s783_s1 + $0xf4] sm:$0xf]  ;;  %v498_v10 = vld [vmem:[%s783_s1 + $0xf8] sm:$0xf0]  ;;  %v424_v11 = vld [vmem:[%s783_s1 + $0x60] sm:$0xf] }
   0x4   :  { %230 = vmatpush.bf16.msra.mxu0 %v433_v3  ;;  %v501_v12 = vor.u32 %v534_v9, %v498_v10  ;;  %v517_v13 = vld [vmem:[%s783_s1 + $0x64] sm:$0xf0]  ;;  %v488_v14 = vld [vmem:[%s783_s1 + $0xe0] sm:$0xf]  ;;  %v516_v18 = vld [vmem:[%s783_s1 + $0x64] sm:$0xf] }
   0x5   :  { %v533_v15 = vld [vmem:[%s783_s1 + $0xe4] sm:$0xf0]  ;;  %244 = vmatpush.bf16.msra.mxu1 %v497_v7  ;;  %258 = vmatpush.bf16.msra.mxu2 %v437_v8  ;;  %v425_v16 = vor.u32 %v517_v13, %v424_v11  ;;  %v426_v19 = vld [vmem:[%s783_s1 + $0x68] sm:$0xf0]  ;;  %v532_v20 = vld [vmem:[%s783_s1 + $0xe4] sm:$0xf] }
   0x6   :  { %v489_v17 = vor.u32 %v533_v15, %v488_v14  ;;  %272 = vmatpush.bf16.msra.mxu3 %v501_v12  ;;  %v429_v21 = vor.u32 %v516_v18, %v426_v19  ;;  %v490_v22 = vld [vmem:[%s783_s1 + $0xe8] sm:$0xf0]  ;;  %v416_v23 = vld [vmem:[%s783_s1 + $0x50] sm:$0xf]  ;;  %v515_v24 = vld [vmem:[%s783_s1 + $0x54] sm:$0xf0] }
   0x7   :  { %v493_v25 = vor.u32 %v532_v20, %v490_v22  ;;  %v480_v26 = vld [vmem:[%s783_s1 + $0xd0] sm:$0xf]  ;;  %v531_v27 = vld [vmem:[%s783_s1 + $0xd4] sm:$0xf0]  ;;  %v514_v28 = vld [vmem:[%s783_s1 + $0x54] sm:$0xf]  ;;  %v417_v29 = vor.u32 %v515_v24, %v416_v23 }
   0x8   :  { %231 = vmatpush.bf16.msra.mxu0 %v425_v16  ;;  %v418_v30 = vld [vmem:[%s783_s1 + $0x58] sm:$0xf0]  ;;  %v530_v31 = vld [vmem:[%s783_s1 + $0xd4] sm:$0xf]  ;;  %v481_v33 = vor.u32 %v531_v27, %v480_v26  ;;  %v408_v35 = vld [vmem:[%s783_s1 + $0x40] sm:$0xf] }
   0x9   :  { %v482_v32 = vld [vmem:[%s783_s1 + $0xd8] sm:$0xf0]  ;;  %245 = vmatpush.bf16.msra.mxu1 %v489_v17  ;;  %259 = vmatpush.bf16.msra.mxu2 %v429_v21  ;;  %v421_v34 = vor.u32 %v514_v28, %v418_v30  ;;  %v513_v36 = vld [vmem:[%s783_s1 + $0x44] sm:$0xf0]  ;;  %v472_v37 = vld [vmem:[%s783_s1 + $0xc0] sm:$0xf] }
   0xa   :  { %273 = vmatpush.bf16.msra.mxu3 %v493_v25  ;;  %v485_v38 = vor.u32 %v530_v31, %v482_v32  ;;  %v529_v39 = vld [vmem:[%s783_s1 + $0xc4] sm:$0xf0]  ;;  %v512_v40 = vld [vmem:[%s783_s1 + $0x44] sm:$0xf]  ;;  %v410_v41 = vld [vmem:[%s783_s1 + $0x48] sm:$0xf0]  ;;  %v409_v44 = vor.u32 %v513_v36, %v408_v35 }
   0xb   :  { %v528_v42 = vld [vmem:[%s783_s1 + $0xc4] sm:$0xf]  ;;  %v474_v43 = vld [vmem:[%s783_s1 + $0xc8] sm:$0xf0]  ;;  %v473_v45 = vor.u32 %v529_v39, %v472_v37  ;;  %v413_v46 = vor.u32 %v512_v40, %v410_v41  ;;  %v400_v47 = vld [vmem:[%s783_s1 + $0x30] sm:$0xf] }
   0xc   :  { %232 = vmatpush.bf16.msra.mxu0 %v417_v29  ;;  %v511_v48 = vld [vmem:[%s783_s1 + $0x34] sm:$0xf0]  ;;  %v464_v49 = vld [vmem:[%s783_s1 + $0xb0] sm:$0xf]  ;;  %v477_v50 = vor.u32 %v528_v42, %v474_v43  ;;  %v510_v52 = vld [vmem:[%s783_s1 + $0x34] sm:$0xf] }
   0xd   :  { %246 = vmatpush.bf16.msra.mxu1 %v481_v33  ;;  %260 = vmatpush.bf16.msra.mxu2 %v421_v34  ;;  %v527_v51 = vld [vmem:[%s783_s1 + $0xb4] sm:$0xf0]  ;;  %v402_v53 = vld [vmem:[%s783_s1 + $0x38] sm:$0xf0]  ;;  %v526_v54 = vld [vmem:[%s783_s1 + $0xb4] sm:$0xf]  ;;  %v401_v56 = vor.u32 %v511_v48, %v400_v47 }
   0xe   :  { %274 = vmatpush.bf16.msra.mxu3 %v485_v38  ;;  %v466_v55 = vld [vmem:[%s783_s1 + $0xb8] sm:$0xf0]  ;;  %v465_v57 = vor.u32 %v527_v51, %v464_v49  ;;  %v405_v58 = vor.u32 %v510_v52, %v402_v53  ;;  %v392_v59 = vld [vmem:[%s783_s1 + $0x20] sm:$0xf]  ;;  %v509_v60 = vld [vmem:[%s783_s1 + $0x24] sm:$0xf0] }
   0xf   :  { %v456_v61 = vld [vmem:[%s783_s1 + $0xa0] sm:$0xf]  ;;  %v469_v62 = vor.u32 %v526_v54, %v466_v55  ;;  %v525_v63 = vld [vmem:[%s783_s1 + $0xa4] sm:$0xf0]  ;;  %v508_v0 = vld [vmem:[%s783_s1 + $0x24] sm:$0xf]  ;;  %v393_v4 = vor.u32 %v509_v60, %v392_v59 }
  0x10   :  { %233 = vmatpush.bf16.msra.mxu0 %v409_v44  ;;  %v394_v1 = vld [vmem:[%s783_s1 + $0x28] sm:$0xf0]  ;;  %v524_v2 = vld [vmem:[%s783_s1 + $0xa4] sm:$0xf]  ;;  %v457_v5 = vor.u32 %v525_v63, %v456_v61  ;;  %v384_v7 = vld [vmem:[%s783_s1 + $0x10] sm:$0xf] }
  0x11   :  { %247 = vmatpush.bf16.msra.mxu1 %v473_v45  ;;  %261 = vmatpush.bf16.msra.mxu2 %v413_v46  ;;  %v458_v3 = vld [vmem:[%s783_s1 + $0xa8] sm:$0xf0]  ;;  %v397_v6 = vor.u32 %v508_v0, %v394_v1  ;;  %v507_v8 = vld [vmem:[%s783_s1 + $0x14] sm:$0xf0]  ;;  %v448_v9 = vld [vmem:[%s783_s1 + $0x90] sm:$0xf] }
  0x12   :  { %275 = vmatpush.bf16.msra.mxu3 %v477_v50  ;;  %v461_v10 = vor.u32 %v524_v2, %v458_v3  ;;  %v523_v11 = vld [vmem:[%s783_s1 + $0x94] sm:$0xf0]  ;;  %v506_v12 = vld [vmem:[%s783_s1 + $0x14] sm:$0xf]  ;;  %v386_v13 = vld [vmem:[%s783_s1 + $0x18] sm:$0xf0]  ;;  %v385_v16 = vor.u32 %v507_v8, %v384_v7 }
  0x13   :  { %v522_v14 = vld [vmem:[%s783_s1 + $0x94] sm:$0xf]  ;;  %v450_v15 = vld [vmem:[%s783_s1 + $0x98] sm:$0xf0]  ;;  %v449_v17 = vor.u32 %v523_v11, %v448_v9  ;;  %v389_v18 = vor.u32 %v506_v12, %v386_v13  ;;  %v376_v19 = vld [vmem:[%s783_s1] sm:$0xf]  ;;  %v325_v11 = vlaneseq }
  0x14   :  { %234 = vmatpush.bf16.msra.mxu0 %v401_v56  ;;  %v505_v20 = vld [vmem:[%s783_s1 + $0x4] sm:$0xf0]  ;;  %v440_v21 = vld [vmem:[%s783_s1 + $0x80] sm:$0xf]  ;;  %v453_v22 = vor.u32 %v522_v14, %v450_v15  ;;  %v504_v24 = vld [vmem:[%s783_s1 + $0x4] sm:$0xf] }
  0x15   :  { %248 = vmatpush.bf16.msra.mxu1 %v465_v57  ;;  %262 = vmatpush.bf16.msra.mxu2 %v405_v58  ;;  %v521_v23 = vld [vmem:[%s783_s1 + $0x84] sm:$0xf0]  ;;  %v378_v25 = vld [vmem:[%s783_s1 + $0x8] sm:$0xf0]  ;;  %v520_v26 = vld [vmem:[%s783_s1 + $0x84] sm:$0xf]  ;;  %v377_v28 = vor.u32 %v505_v20, %v376_v19 }
  0x16   :  { %276 = vmatpush.bf16.msra.mxu3 %v469_v62  ;;  %v442_v27 = vld [vmem:[%s783_s1 + $0x88] sm:$0xf0]  ;;  %v368_v29 = vld [vmem:[%s784_s0] sm:$0xf]  ;;  %v503_v30 = vld [vmem:[%s784_s0 + $0x4] sm:$0xf0]  ;;  %v441_v31 = vor.u32 %v521_v23, %v440_v21  ;;  %v381_v32 = vor.u32 %v504_v24, %v378_v25 }
  0x17   :  { %v502_v33 = vld [vmem:[%s784_s0 + $0x4] sm:$0xf]  ;;  %v370_v34 = vld [vmem:[%s784_s0 + $0x8] sm:$0xf0]  ;;  %v445_v35 = vor.u32 %v520_v26, %v442_v27  ;;  %v369_v36 = vor.u32 %v503_v30, %v368_v29  ;;  %vm327_vm1 = vcmp.lt.s32.totalorder %v325_v11, 256 }
  0x18   :  { %235 = vmatpush.bf16.msra.mxu0 %v393_v4  ;;  %v373_v37 = vor.u32 %v502_v33, %v370_v34 }
  0x19   :  { %249 = vmatpush.bf16.msra.mxu1 %v457_v5  ;;  %263 = vmatpush.bf16.msra.mxu2 %v397_v6 }
  0x1a   :  { %277 = vmatpush.bf16.msra.mxu3 %v461_v10 }
  0x1c   :  { %236 = vmatpush.bf16.msra.mxu0 %v385_v16 }
  0x1d   :  { %250 = vmatpush.bf16.msra.mxu1 %v449_v17  ;;  %264 = vmatpush.bf16.msra.mxu2 %v389_v18 }
  0x1e   :  { %278 = vmatpush.bf16.msra.mxu3 %v453_v22 }
  0x20   :  { %237 = vmatpush.bf16.msra.mxu0 %v377_v28 }
  0x21   :  { %251 = vmatpush.bf16.msra.mxu1 %v441_v31  ;;  %265 = vmatpush.bf16.msra.mxu2 %v381_v32 }
  0x22   :  { %279 = vmatpush.bf16.msra.mxu3 %v445_v35 }
  0x23   :  { %238 = vmatmul.bf16.vlgmr.msra.gmra.mxu0 %v369_v36 }
  0x24   :  { %252 = vmatmul.bf16.vlgmr.msra.gmra.mxu1 %v373_v37  ;;  %266 = vmatmul.bf16.vlgmr.msra.gmra.mxu2 %v369_v36 }
  0x25   :  { %280 = vmatmul.bf16.vlgmr.msra.gmra.mxu3 %v373_v37 }
  0xa0   :  { %v239_v38 = vpop.f32.mrf.mxu0 }
  0xa1   :  { %v253_v39 = vpop.f32.mrf.mxu1 }
  0xa2   :  { %v254_v40 = vadd.f32 %v253_v39, %v239_v38 }
  0xa4   :  { %301 = vst [vmem:[%s785_s2] sm:$0xff] %v254_v40  ;;  %v330_v46 = vmul.f32 %v254_v40, %v254_v40 }
  0xa7   :  { %v267_v41 = vpop.f32.mrf.mxu2 }
  0xa8   :  { %v281_v42 = vpop.f32.mrf.mxu3  ;;  %v241_v43 = vpop.f32.mrf.mxu0 }
  0xa9   :  { %v282_v44 = vadd.f32 %v281_v42, %v267_v41  ;;  %v255_v45 = vpop.f32.mrf.mxu1 }
  0xaa   :  { %v256_v47 = vadd.f32 %v255_v45, %v241_v43 }
  0xab   :  { %302 = vst [vmem:[%s785_s2 + $0x8] sm:$0xff] %v282_v44  ;;  %v331_v57 = vmul.f32 %v282_v44, %v282_v44 }
  0xac   :  { %303 = vst [vmem:[%s785_s2 + $0x10] sm:$0xff] %v256_v47  ;;  %v305_v48 = vadd.f32 %v256_v47, %v254_v40  ;;  %v332_v49 = vmul.f32 %v256_v47, %v256_v47 }
  0xae   :  { %v306_v50 = vrot.slane %v305_v48, 4  ;;  %v334_v51 = vadd.f32 %v332_v49, %v330_v46 }
  0xaf   :  { %v269_v52 = vpop.f32.mrf.mxu2 }
  0xb0   :  { %v335_v53 = vrot.slane %v334_v51, 4  ;;  %v283_v54 = vpop.f32.mrf.mxu3  ;;  %v307_v55 = vadd.f32 %v306_v50, %v305_v48 }
  0xb1   :  { %v284_v56 = vadd.f32 %v283_v54, %v269_v52 }
  0xb2   :  { %v336_v58 = vadd.f32 %v335_v53, %v334_v51  ;;  %v308_v61 = vrot.slane %v307_v55, 2 }
  0xb3   :  { %304 = vst [vmem:[%s785_s2 + $0x18] sm:$0xff] %v284_v56  ;;  %v312_v59 = vadd.f32 %v284_v56, %v282_v44  ;;  %v333_v60 = vmul.f32 %v284_v56, %v284_v56 }
  0xb4   :  { %v337_v0 = vrot.slane %v336_v58, 2  ;;  %v309_v3 = vadd.f32 %v308_v61, %v307_v55 }
  0xb5   :  { %v313_v62 = vrot.slane %v312_v59, 4  ;;  %v341_v63 = vadd.f32 %v333_v60, %v331_v57 }
  0xb6   :  { %v338_v6 = vadd.f32 %v337_v0, %v336_v58  ;;  %v310_v9 = vrot.slane %v309_v3, 1 }
  0xb7   :  { %v314_v1 = vadd.f32 %v313_v62, %v312_v59  ;;  %v342_v2 = vrot.slane %v341_v63, 4 }
  0xb8   :  { %v339_v13 = vrot.slane %v338_v6, 1  ;;  %v311_v16 = vadd.f32 %v310_v9, %v309_v3 }
  0xb9   :  { %v315_v4 = vrot.slane %v314_v1, 2  ;;  %v343_v5 = vadd.f32 %v342_v2, %v341_v63 }
  0xba   :  { %v340_v19 = vadd.f32 %v339_v13, %v338_v6 }
  0xbb   :  { %v316_v7 = vadd.f32 %v315_v4, %v314_v1  ;;  %v344_v8 = vrot.slane %v343_v5, 2 }
  0xbd   :  { %v317_v10 = vrot.slane %v316_v7, 1  ;;  %v345_v12 = vadd.f32 %v344_v8, %v343_v5 }
  0xbf   :  { %v318_v14 = vadd.f32 %v317_v10, %v316_v7  ;;  %v346_v15 = vrot.slane %v345_v12, 1 }
  0xc1   :  { %v321_v17 = vrot.slane %v318_v14, 7  ;;  %v347_v18 = vadd.f32 %v346_v15, %v345_v12 }
  0xc3   :  { %v323_v20 = vsel %vm322_vm0, %v311_v16, %v321_v17  ;;  %v350_v21 = vrot.slane %v347_v18, 7 }
  0xc4   :  { %329 = vst.msk [vmem:[%s786_s3] sm:$0x3] %vm327_vm1, %v323_v20 }
  0xc5   :  { %v351_v22 = vsel %vm322_vm0, %v340_v19, %v350_v21 }
  0xc6   :  { %353 = vst.msk [vmem:[%s787_s4] sm:$0x3] %vm327_vm1, %v351_v22 }

// kernel: _lambda_.98
= control target key start
LH: loop header
LB: loop body
LE: loop exit
PB: predicated region body
PF: predicated region fallthrough
CT: control target
= control target key end

     0   :  { %vm28_vm0 = vcmask 523264   ;;  %s75_s0 = inlined_call_operand.vmem [shape: f32[16,64], index: 0, kind: input, shape index: {}]   ;;  %s76_s1 = inlined_call_operand.vmem [shape: f32[1,64], index: 1, kind: input, shape index: {}]   ;;  %s77_s2 = inlined_call_operand.vmem [shape: f32[1,64], index: 2, kind: input, shape index: {}]   ;;  %s78_s3 = inlined_call_operand.vmem [shape: f32[16,64], index: 3, kind: output, shape index: {}]  }
   0x1   :  { %v14_v0 = vld [vmem:[%s75_s0] sm:$0xff]  ;;  %v15_v3 = vld [vmem:[%s75_s0 + $0x8] sm:$0xff] }
   0x2   :  { %v35_v1 = vld [vmem:[%s76_s1] ss:$0 sm:$0xff] }
   0x3   :  { %v36_v2 = vld [vmem:[%s77_s2] ss:$0 sm:$0xff]  ;;  %v20_v4 = vmul.f32 %v35_v1, %v14_v0  ;;  %v21_v5 = vmul.f32 %v35_v1, %v15_v3 }
   0x5   :  { %v26_v6 = vadd.f32 %v36_v2, %v20_v4  ;;  %v27_v7 = vadd.f32 %v36_v2, %v21_v5 }
   0x7   :  { %29 = vst.msk [vmem:[%s78_s3] sm:$0xff] %vm28_vm0, %v26_v6 }
   0x8   :  { %30 = vst.msk [vmem:[%s78_s3 + $0x8] sm:$0xff] %vm28_vm0, %v27_v7 }

// kernel: _lambda_.95
= control target key start
LH: loop header
LB: loop body
LE: loop exit
PB: predicated region body
PF: predicated region fallthrough
CT: control target
= control target key end

     0   :  { %s698_s15 = smov 0   ;;  %s700_s16 = smov 0   ;;  %s747_s0 = inlined_call_operand.vmem [shape: bf16[4,640], index: 0, kind: input, shape index: {}]   ;;  %s748_s1 = inlined_call_operand.vmem [shape: bf16[640,64], index: 1, kind: input, shape index: {}]   ;;  %s749_s2 = inlined_call_operand.vmem [shape: f32[4,64], index: 2, kind: output, shape index: {0}]   ;;  %s750_s3 = inlined_call_operand.vmem [shape: f32[1,1,64], index: 3, kind: output, shape index: {1}]   ;;  %s751_s4 = inlined_call_operand.vmem [shape: f32[1,1,64], index: 4, kind: output, shape index: {2}]  }
   0x1   :  { %s702_s17 = smov 0  }
   0x2 LB: > { %s27_s18 = sadd.s32 1, %s666_s16  ;;  %p572_p0 = scmp.ge.s32.totalorder %s670_s17, 1  ;;  %s670_s17 = sphi %s702_s17, %s15_s17   ;;  %s666_s16 = sphi %s700_s16, %s753_s16   ;;  %s662_s15 = sphi %s698_s15, %s752_s15  }
   0x3   : > { %p28_p1 = scmp.ge.s32.totalorder %s27_s18, 5  ;;  %p213_p2 = scmp.lt.s32.totalorder %s670_s17, 6 }
   0x5   : > { %s755_s18 = smov (%p28_p1, %s27_s18), 0  ;;  %p214_p3 = pnand %p572_p0, %p213_p2 }
   0x6   : > { %p266_p4 = scmp.lt.s32.totalorder (!%p214_p3), %s662_s15, 4  ;;  %s574_s19 = sshll.u32 (!%p214_p3), %s662_s15, 4 }
   0x7   : > { %217 = sbr.rel (%p214_p3) target bundleno = 204 (0xcc), region = 28  ;;  %p273_p5 = scmp.lt.s32.totalorder (!%p214_p3), %s574_s19, 79 }
   0x8   : > { %p576_p6 = scmp.ne.s32.totalorder (!%p214_p3), %s662_s15, 0 }
   0xc   : > { %s267_s20 = scalar_select %p266_p4, %s662_s15, 4 }
   0xd   : > { %s757_s19 = smov (!%p273_p5, %s574_s19), 79  ;;  %303 = sbr.rel (%p576_p6) target bundleno = 20 (0x14), region = 32 }
   0xe   : > { %s573_s21 = sshll.u32 %s267_s20, 1  ;;  %s575_s25 = sshll.u32 %s757_s19, 2 }
   0xf   : > { %s271_s24 = scalar_lea.vmem %s747_s0, %s573_s21  ;;  %s279_s28 = scalar_lea.vmem %s748_s1, %s575_s25 }
  0x12   : > { %vm304_vm0 = vcmask 519168   ;;  %v672_v0 = vmov 0.0  }
  0x13   : > { %305 = vst.msk [vmem:[#allocation2] sm:$0xf] %vm304_vm0, %v672_v0 }
  0x14 PF: > { %v622_v1 = vld [vmem:[%s279_s28 + $0x38] sm:$0xff]  ;;  %v621_v2 = vld [vmem:[%s279_s28 + $0x30] sm:$0xff]  ;;  %v620_v3 = vld [vmem:[%s279_s28 + $0x28] sm:$0xff]  ;;  %vm386_vm1 = vcmask 519168   ;;  %p609_p7 = scmp.ne.s32.totalorder %s662_s15, 4 }
  0x15   : > { %372 = vmatpush.bf16.msra.mxu0 %v622_v1  ;;  %v619_v4 = vld [vmem:[%s279_s28 + $0x20] sm:$0xff]  ;;  %v618_v5 = vld [vmem:[%s279_s28 + $0x18] sm:$0xff]  ;;  %v617_v6 = vld [vmem:[%s279_s28 + $0x10] sm:$0xff] }
  0x16   : > { %v616_v7 = vld [vmem:[%s279_s28 + $0x8] sm:$0xff]  ;;  %v615_v8 = vld [vmem:[%s279_s28] sm:$0xff] }
  0x17   : > { %v307_v9 = vld [vmem:[%s271_s24] sm:$0x3] }
  0x19   : > { %373 = vmatpush.bf16.msra.mxu0 %v621_v2 }
  0x1a   : > { %v306_v10 = vld [vmem:[#allocation2] sm:$0xf] }
  0x1d   : > { %374 = vmatpush.bf16.msra.mxu0 %v620_v3 }
  0x21   : > { %375 = vmatpush.bf16.msra.mxu0 %v619_v4 }
  0x25   : > { %376 = vmatpush.bf16.msra.mxu0 %v618_v5 }
  0x29   : > { %377 = vmatpush.bf16.msra.mxu0 %v617_v6 }
  0x2d   : > { %378 = vmatpush.bf16.msra.mxu0 %v616_v7 }
  0x31   : > { %379 = vmatpush.bf16.msra.mxu0 %v615_v8 }
  0x34   : > { %380 = vmatmul.bf16.vlgmr.msra.gmra.mxu0 %v307_v9 }
  0xb1   : > { %v381_v11 = vpop.f32.mrf.mxu0 }
  0xb2   : > { %v385_v12 = vadd.f32 %v381_v11, %v306_v10 }
  0xb4   : > { %387 = vst.msk [vmem:[#allocation2] sm:$0xf] %vm386_vm1, %v385_v12 }
  0xb5   : > { %391 = sbr.rel (%p609_p7) target bundleno = 204 (0xcc), region = 36 }
  0xb9   : > { %v383_v13 = vpop.f32.mrf.mxu0 }
  0xba   : > { %vm401_vm2 = vcmask 516096  }
  0xbb   : > { %v392_v14 = vld [vmem:[#allocation2] sm:$0xf] }
  0xbc   : > { %393 = vst.msk [vmem:[%s749_s2] sm:$0xf] %vm386_vm1, %v392_v14  ;;  %v394_v15 = vsel %vm386_vm1, %v392_v14, 0.0  ;;  %v403_v16 = vmul.f32 %v392_v14, %v392_v14 }
  0xbd   : > { %v395_v17 = vrot.slane %v394_v15, 4 }
  0xbe   : > { %v404_v18 = vsel %vm386_vm1, %v403_v16, 0.0 }
  0xbf   : > { %v396_v19 = vadd.f32 %v395_v17, %v394_v15  ;;  %v405_v20 = vrot.slane %v404_v18, 4 }
  0xc1   : > { %v397_v21 = vrot.slane %v396_v19, 2  ;;  %v406_v22 = vadd.f32 %v405_v20, %v404_v18 }
  0xc3   : > { %v398_v23 = vadd.f32 %v397_v21, %v396_v19  ;;  %v407_v24 = vrot.slane %v406_v22, 2 }
  0xc5   : > { %v399_v25 = vrot.slane %v398_v23, 1  ;;  %v408_v26 = vadd.f32 %v407_v24, %v406_v22 }
  0xc7   : > { %v400_v27 = vadd.f32 %v399_v25, %v398_v23  ;;  %v409_v28 = vrot.slane %v408_v26, 1 }
  0xc9   : > { %402 = vst.msk [vmem:[%s750_s3] sm:$0x1] %vm401_vm2, %v400_v27  ;;  %v410_v29 = vadd.f32 %v409_v28, %v408_v26 }
  0xcb   : > { %411 = vst.msk [vmem:[%s751_s4] sm:$0x1] %vm401_vm2, %v410_v29 }
  0xcc PF: > { %s15_s17 = sadd.s32 1, %s670_s17   ;;  %s752_s15 = smov %s666_s16 }
  0xcd   : > { %p12_p8 = scmp.ge.s32.totalorder %s15_s17, 7   ;;  %s753_s16 = smov %s755_s18 }
  0xcf   :  { %14 = sbr.rel (!%p12_p8) target bundleno = 2 (0x2), region = 93 }

// kernel: _lambda_.99
= control target key start
LH: loop header
LB: loop body
LE: loop exit
PB: predicated region body
PF: predicated region fallthrough
CT: control target
= control target key end

     0   :  { %vm20_vm0 = vcmask 1043456   ;;  %vm46_vm1 = vcmask 1041408   ;;  %s89_s1 = inlined_call_operand.vmem [shape: f32[1,256], index: 1, kind: input, shape index: {}]   ;;  %s90_s2 = inlined_call_operand.vmem [shape: f32[1,256], index: 2, kind: input, shape index: {}]   ;;  %s91_s0 = inlined_call_operand.vmem [shape: f32[1,4,256], index: 0, kind: input, shape index: {}]   ;;  %s92_s3 = inlined_call_operand.vmem [shape: bf16[1,4,256], index: 3, kind: output, shape index: {}]  }
   0x1   :  { %v15_v0 = vld [vmem:[%s89_s1] sm:$0x3] }
   0x2   :  { %v24_v1 = vld [vmem:[%s90_s2] sm:$0x3]  ;;  %v17_v2 = vperm.slane %v15_v0, 0  ;;  %v18_v3 = vperm.slane %v15_v0, 1 }
   0x3   :  { %v26_v4 = vperm.slane %v24_v1, 0  ;;  %v27_v5 = vperm.slane %v24_v1, 1  ;;  %v14_v6 = vld [vmem:[%s91_s0] sm:$0xff] }
   0x4   :  { %v19_v7 = vrot.slane %v18_v3, 4 }
   0x5   :  { %v28_v8 = vrot.slane %v27_v5, 4 }
   0x6   :  { %v21_v9 = vsel %vm20_vm0, %v17_v2, %v19_v7 }
   0x7   :  { %v29_v10 = vsel %vm20_vm0, %v26_v4, %v28_v8  ;;  %v23_v11 = vmul.f32 %v21_v9, %v14_v6 }
   0x9   :  { %v31_v12 = vadd.f32 %v29_v10, %v23_v11 }
   0xb   :  { %v56_v13 = vadd.f32 -1.0, %v31_v12 }
   0xd   :  { %v33_v14 = vadd.f32 1.0, %v56_v13 }
   0xf   :  { %v34_v15 = vfloor.f32 %v33_v14 }
  0x11   :  { %v35_v16 = vmax.f32 %v34_v15, 0.0 }
  0x13   :  { %v36_v17 = vmin.f32 %v35_v16, 8.0 }
  0x15   :  { %38 = vst [vmem:[#allocation1] ss:$2 sm:$0xff] %v36_v17 }
  0x1c   :  { %v39_v18 = vld.sshfl [vmem:[#allocation1] sm:$0xff pattern:$0x75316420]  ;;  %v40_v19 = vld.sshfl [vmem:[#allocation1 + $0x8] sm:$0xff pattern:$0x75316420] }
  0x1d   :  { %v43_v20 = vpack.c.bf16 %v40_v19, %v39_v18 }
  0x1f   :  { %v45_v21 = vrot.slane %v43_v20, 2 }
  0x21   :  { %v49_v22 = vsel %vm46_vm1, %v43_v20, %v45_v21 }
  0x22   :  { %51 = vst [vmem:[%s92_s3] sm:$0xf] %v49_v22 }

// kernel: _lambda_.102
= control target key start
LH: loop header
LB: loop body
LE: loop exit
PB: predicated region body
PF: predicated region fallthrough
CT: control target
= control target key end

     0   :  { %vm33_vm0 = vcmask 1043456   ;;  %s165_s1 = inlined_call_operand.vmem [shape: f32[1,512], index: 1, kind: input, shape index: {}]   ;;  %s166_s2 = inlined_call_operand.vmem [shape: f32[1,512], index: 2, kind: input, shape index: {}]   ;;  %s167_s4 = inlined_call_operand.vmem [shape: f32[1,512], index: 4, kind: input, shape index: {}]   ;;  %s168_s5 = inlined_call_operand.vmem [shape: f32[1,512], index: 5, kind: input, shape index: {}]   ;;  %s169_s0 = inlined_call_operand.vmem [shape: f32[4,512], index: 0, kind: input, shape index: {}]   ;;  %s170_s3 = inlined_call_operand.vmem [shape: f32[4,512], index: 3, kind: input, shape index: {}]   ;;  %s171_s6 = inlined_call_operand.vmem [shape: f32[4,512], index: 6, kind: output, shape index: {}]  }
   0x1   :  { %v25_v0 = vld [vmem:[%s165_s1] sm:$0xf]  ;;  %v24_v17 = vld [vmem:[%s169_s0 + $0x8] sm:$0xff] }
   0x2   :  { %v40_v1 = vld [vmem:[%s166_s2] sm:$0xf]  ;;  %v27_v2 = vperm.slane %v25_v0, 0  ;;  %v28_v3 = vperm.slane %v25_v0, 1  ;;  %v29_v8 = vperm.slane %v25_v0, 2  ;;  %v30_v9 = vperm.slane %v25_v0, 3 }
   0x3   :  { %v42_v4 = vperm.slane %v40_v1, 0  ;;  %v43_v5 = vperm.slane %v40_v1, 1  ;;  %v56_v6 = vld [vmem:[%s167_s4] sm:$0xf]  ;;  %v44_v19 = vperm.slane %v40_v1, 2  ;;  %v45_v24 = vperm.slane %v40_v1, 3 }
   0x4   :  { %v72_v7 = vld [vmem:[%s168_s5] sm:$0xf]  ;;  %v31_v11 = vrot.slane %v28_v3, 4  ;;  %v58_v13 = vperm.slane %v56_v6, 0  ;;  %v59_v14 = vperm.slane %v56_v6, 1  ;;  %v32_v18 = vrot.slane %v30_v9, 4 }
   0x5   :  { %v23_v10 = vld [vmem:[%s169_s0] sm:$0xff]  ;;  %v46_v12 = vrot.slane %v43_v5, 4  ;;  %v74_v15 = vperm.slane %v72_v7, 0  ;;  %v75_v16 = vperm.slane %v72_v7, 1  ;;  %v60_v28 = vperm.slane %v56_v6, 2  ;;  %v55_v37 = vld [vmem:[%s170_s3 + $0x8] sm:$0xff] }
   0x6   :  { %v34_v20 = vsel %vm33_vm0, %v27_v2, %v31_v11  ;;  %v54_v22 = vld [vmem:[%s170_s3] sm:$0xff]  ;;  %v62_v23 = vrot.slane %v59_v14, 4  ;;  %v35_v27 = vsel %vm33_vm0, %v29_v8, %v32_v18  ;;  %v47_v31 = vrot.slane %v45_v24, 4 }
   0x7   :  { %v48_v21 = vsel %vm33_vm0, %v42_v4, %v46_v12  ;;  %v38_v25 = vmul.f32 %v34_v20, %v23_v10  ;;  %v78_v26 = vrot.slane %v75_v16, 4  ;;  %v39_v30 = vmul.f32 %v35_v27, %v24_v17 }
   0x8   :  { %v64_v29 = vsel %vm33_vm0, %v58_v13, %v62_v23  ;;  %v61_v32 = vperm.slane %v56_v6, 3  ;;  %v49_v36 = vsel %vm33_vm0, %v44_v19, %v47_v31  ;;  %v76_v39 = vperm.slane %v72_v7, 2 }
   0x9   :  { %v52_v33 = vadd.f32 %v48_v21, %v38_v25  ;;  %v68_v34 = vmul.f32 %v64_v29, %v54_v22  ;;  %v80_v35 = vsel %vm33_vm0, %v74_v15, %v78_v26  ;;  %v77_v40 = vperm.slane %v72_v7, 3 }
   0xa   :  { %v63_v38 = vrot.slane %v61_v32, 4  ;;  %v53_v42 = vadd.f32 %v49_v36, %v39_v30 }
   0xb   :  { %v70_v41 = vadd.f32 %v68_v34, %v52_v33  ;;  %v79_v44 = vrot.slane %v77_v40, 4 }
   0xc   :  { %v65_v43 = vsel %vm33_vm0, %v60_v28, %v63_v38 }
   0xd   :  { %v84_v45 = vadd.f32 %v80_v35, %v70_v41  ;;  %v69_v46 = vmul.f32 %v65_v43, %v55_v37  ;;  %v81_v47 = vsel %vm33_vm0, %v76_v39, %v79_v44 }
   0xf   :  { %86 = vst [vmem:[%s171_s6] sm:$0xff] %v84_v45  ;;  %v71_v48 = vadd.f32 %v69_v46, %v53_v42 }
  0x11   :  { %v85_v49 = vadd.f32 %v81_v47, %v71_v48 }
  0x13   :  { %87 = vst [vmem:[%s171_s6 + $0x8] sm:$0xff] %v85_v49 }

// kernel: mul.109
= control target key start
LH: loop header
LB: loop body
LE: loop exit
PB: predicated region body
PF: predicated region fallthrough
CT: control target
= control target key end

     0   :  { %s34_s0 = inlined_call_operand.vmem [shape: f32[512], index: 0, kind: input, shape index: {}]   ;;  %s35_s1 = inlined_call_operand.vmem [shape: f32[512], index: 1, kind: input, shape index: {}]   ;;  %s36_s2 = inlined_call_operand.vmem [shape: f32[512], index: 2, kind: output, shape index: {}]  }
   0x1   :  { %v3_v0 = vld [vmem:[%s34_s0] sm:$0xf] }
   0x2   :  { %v4_v1 = vld [vmem:[%s35_s1] sm:$0xf] }
   0x3   :  { %v7_v2 = vmul.f32 %v4_v1, %v3_v0 }
   0x5   :  { %9 = vst [vmem:[%s36_s2] sm:$0xf] %v7_v2 }

// kernel: _lambda_.103
= control target key start
LH: loop header
LB: loop body
LE: loop exit
PB: predicated region body
PF: predicated region fallthrough
CT: control target
= control target key end

     0   :  { %vm24_vm0 = vcmask 1043456   ;;  %vm75_vm1 = vcmask 1041408   ;;  %vm79_vm2 = vcmask 1045508   ;;  %s132_s1 = inlined_call_operand.vmem [shape: f32[1,512], index: 1, kind: input, shape index: {}]   ;;  %s133_s2 = inlined_call_operand.vmem [shape: f32[1,512], index: 2, kind: input, shape index: {}]   ;;  %s134_s0 = inlined_call_operand.vmem [shape: f32[1,4,512], index: 0, kind: input, shape index: {}]   ;;  %s135_s3 = inlined_call_operand.vmem [shape: bf16[1,4,512], index: 3, kind: output, shape index: {}]  }
   0x1   :  { %v16_v0 = vld [vmem:[%s132_s1] sm:$0xf]  ;;  %v15_v13 = vld [vmem:[%s134_s0 + $0x8] sm:$0xff] }
   0x2   :  { %v31_v1 = vld [vmem:[%s133_s2] sm:$0xf]  ;;  %v18_v2 = vperm.slane %v16_v0, 0  ;;  %v19_v3 = vperm.slane %v16_v0, 1  ;;  %v20_v6 = vperm.slane %v16_v0, 2  ;;  %v21_v7 = vperm.slane %v16_v0, 3 }
   0x3   :  { %v33_v4 = vperm.slane %v31_v1, 0  ;;  %v34_v5 = vperm.slane %v31_v1, 1  ;;  %v35_v8 = vperm.slane %v31_v1, 2  ;;  %v36_v9 = vperm.slane %v31_v1, 3  ;;  %v14_v10 = vld [vmem:[%s134_s0] sm:$0xff] }
   0x4   :  { %v22_v11 = vrot.slane %v19_v3, 4  ;;  %v23_v14 = vrot.slane %v21_v7, 4 }
   0x5   :  { %v37_v12 = vrot.slane %v34_v5, 4  ;;  %v38_v15 = vrot.slane %v36_v9, 4 }
   0x6   :  { %v25_v16 = vsel %vm24_vm0, %v18_v2, %v22_v11  ;;  %v26_v19 = vsel %vm24_vm0, %v20_v6, %v23_v14 }
   0x7   :  { %v39_v17 = vsel %vm24_vm0, %v33_v4, %v37_v12  ;;  %v29_v18 = vmul.f32 %v25_v16, %v14_v10  ;;  %v40_v20 = vsel %vm24_vm0, %v35_v8, %v38_v15  ;;  %v30_v21 = vmul.f32 %v26_v19, %v15_v13 }
   0x9   :  { %v43_v22 = vadd.f32 %v39_v17, %v29_v18  ;;  %v44_v23 = vadd.f32 %v40_v20, %v30_v21 }
   0xb   :  { %v90_v24 = vadd.f32 -1.0, %v43_v22  ;;  %v91_v25 = vadd.f32 -1.0, %v44_v23 }
   0xd   :  { %v47_v26 = vadd.f32 1.0, %v90_v24  ;;  %v48_v27 = vadd.f32 1.0, %v91_v25 }
   0xf   :  { %v49_v28 = vfloor.f32 %v47_v26  ;;  %v50_v29 = vfloor.f32 %v48_v27 }
  0x11   :  { %v51_v30 = vmax.f32 %v49_v28, 0.0  ;;  %v52_v31 = vmax.f32 %v50_v29, 0.0 }
  0x13   :  { %v53_v32 = vmin.f32 %v51_v30, 8.0  ;;  %v54_v33 = vmin.f32 %v52_v31, 8.0 }
  0x15   :  { %57 = vst [vmem:[#allocation1] ss:$2 sm:$0xff] %v53_v32 }
  0x16   :  { %59 = vst [vmem:[#allocation1 + $0x10] ss:$2 sm:$0xff] %v54_v33 }
  0x1c   :  { %v60_v34 = vld.sshfl [vmem:[#allocation1] sm:$0xff pattern:$0x75316420]  ;;  %v61_v35 = vld.sshfl [vmem:[#allocation1 + $0x8] sm:$0xff pattern:$0x75316420] }
  0x1d   :  { %v62_v36 = vld.sshfl [vmem:[#allocation1 + $0x10] sm:$0xff pattern:$0x75316420]  ;;  %v63_v37 = vld.sshfl [vmem:[#allocation1 + $0x18] sm:$0xff pattern:$0x75316420]  ;;  %v68_v38 = vpack.c.bf16 %v61_v35, %v60_v34 }
  0x1e   :  { %v69_v39 = vpack.c.bf16 %v63_v37, %v62_v36 }
  0x1f   :  { %v72_v40 = vrot.slane %v68_v38, 2 }
  0x20   :  { %v73_v41 = vrot.slane %v69_v39, 4  ;;  %v74_v42 = vrot.slane %v69_v39, 6 }
  0x21   :  { %v78_v43 = vsel %vm75_vm1, %v68_v38, %v72_v40 }
  0x22   :  { %v82_v44 = vsel %vm79_vm2, %v73_v41, %v74_v42 }
  0x23   :  { %v83_v45 = vsel %vm24_vm0, %v78_v43, %v82_v44 }
  0x24   :  { %85 = vst [vmem:[%s135_s3] sm:$0xff] %v83_v45 }

// kernel: _lambda_.112
= control target key start
LH: loop header
LB: loop body
LE: loop exit
PB: predicated region body
PF: predicated region fallthrough
CT: control target
= control target key end

     0   :  { %s1764_s15 = smov 0   ;;  %s1766_s16 = smov 0   ;;  %s2130_s0 = inlined_call_operand.vmem [shape: bf16[1,512], index: 0, kind: input, shape index: {}]   ;;  %s2131_s1 = inlined_call_operand.vmem [shape: bf16[512,1024], index: 1, kind: input, shape index: {}]   ;;  %s2132_s2 = inlined_call_operand.vmem [shape: f32[1,1024], index: 2, kind: output, shape index: {0}]   ;;  %s2133_s3 = inlined_call_operand.vmem [shape: f32[1,1,1024], index: 3, kind: output, shape index: {1}]   ;;  %s2134_s4 = inlined_call_operand.vmem [shape: f32[1,1,1024], index: 4, kind: output, shape index: {2}]  }
   0x1   :  { %s1768_s17 = smov 0   ;;  %s1770_s18 = smov 0  }
   0x2   :  { %s1772_s19 = smov 0  }
   0x3 LB: > { %s30_s20 = sadd.s32 1, %s1732_s18  ;;  %p78_p1 = scmp.ne.s32.totalorder %s1724_s16, %s1720_s15  ;;  %s1736_s19 = sphi %s1772_s19, %s15_s19   ;;  %s1732_s18 = sphi %s1770_s18, %s2140_s18   ;;  %s1728_s17 = sphi %s1768_s17, %s2139_s17   ;;  %s1724_s16 = sphi %s1766_s16, %s2138_s16   ;;  %s1720_s15 = sphi %s1764_s15, %s2137_s15  }
   0x4   : > { %p32_p0 = scmp.ge.s32.totalorder %s30_s20, 4  ;;  %p79_p2 = scmp.eq.s32.totalorder %s1736_s19, 0 }
   0x5   : > { %s71_s22 = sadd.s32 1, %s1724_s16  ;;  %p1325_p5 = scmp.ge.s32.totalorder %s1736_s19, 4 }
   0x6   : > { %s2142_s20 = smov (%p32_p0, %s30_s20), 0  ;;  %p80_p3 = por %p79_p2, %p78_p1 }
   0x7   : > { %s67_s21 = ssub.s32 %s1732_s18, %s2142_s20  ;;  %200 = sbr.rel (%p1325_p5) target bundleno = 80 (0x50), region = 20 }
   0x8   : > { %p69_p4 = scmp.eq.s32.totalorder %s67_s21, 0 }
   0xa   : > { %s1799_s23 = scalar_select %p69_p4, %s1724_s16, %s71_s22  }
   0xc   : > { %203 = sbr.rel (!%p80_p3) target bundleno = 80 (0x50), region = 24  ;;  %s205_s24 = sand.u32 (%p80_p3), 1, %s1724_s16  }
   0xd   : > { %s1592_s25 = sshll.u32 (%p80_p3), %s1732_s18, 3  ;;  %s1326_s26 = sshll.u32 (%p80_p3), %s205_s24, 9 }
   0xe   : > { %s1807_s29 = scalar_lea.vmem (%p80_p3), %s2131_s1, %s1592_s25  ;;  %s1812_s30 = scalar_lea.vmem (%p80_p3), [#allocation3], %s1326_s26 }
   0xf   : > { %v368_v0 = vld [vmem:[%s1807_s29] sm:$0xff] (%p80_p3) }
  0x10   : > { %v370_v1 = vld [vmem:[%s1807_s29 + $0x20] sm:$0xff] (%p80_p3)  ;;  %369 = vst [vmem:[%s1812_s30] sm:$0xff] (%p80_p3), %v368_v0 }
  0x11   : > { %v372_v2 = vld [vmem:[%s1807_s29 + $0x40] sm:$0xff]  ;;  %371 = vst [vmem:[%s1812_s30 + $0x8] sm:$0xff] %v370_v1 }
  0x12   : > { %v374_v3 = vld [vmem:[%s1807_s29 + $0x60] sm:$0xff]  ;;  %373 = vst [vmem:[%s1812_s30 + $0x10] sm:$0xff] %v372_v2 }
  0x13   : > { %v376_v4 = vld [vmem:[%s1807_s29 + $0x80] sm:$0xff]  ;;  %375 = vst [vmem:[%s1812_s30 + $0x18] sm:$0xff] %v374_v3 }
  0x14   : > { %v378_v5 = vld [vmem:[%s1807_s29 + $0xa0] sm:$0xff]  ;;  %377 = vst [vmem:[%s1812_s30 + $0x20] sm:$0xff] %v376_v4 }
  0x15   : > { %v380_v6 = vld [vmem:[%s1807_s29 + $0xc0] sm:$0xff]  ;;  %379 = vst [vmem:[%s1812_s30 + $0x28] sm:$0xff] %v378_v5 }
  0x16   : > { %v382_v7 = vld [vmem:[%s1807_s29 + $0xe0] sm:$0xff]  ;;  %381 = vst [vmem:[%s1812_s30 + $0x30] sm:$0xff] %v380_v6 }
  0x17   : > { %v384_v8 = vld [vmem:[%s1807_s29 + $0x100] sm:$0xff]  ;;  %383 = vst [vmem:[%s1812_s30 + $0x38] sm:$0xff] %v382_v7 }
  0x18   : > { %v386_v9 = vld [vmem:[%s1807_s29 + $0x120] sm:$0xff]  ;;  %385 = vst [vmem:[%s1812_s30 + $0x40] sm:$0xff] %v384_v8 }
  0x19   : > { %v388_v10 = vld [vmem:[%s1807_s29 + $0x140] sm:$0xff]  ;;  %387 = vst [vmem:[%s1812_s30 + $0x48] sm:$0xff] %v386_v9 }
  0x1a   : > { %v390_v11 = vld [vmem:[%s1807_s29 + $0x160] sm:$0xff]  ;;  %389 = vst [vmem:[%s1812_s30 + $0x50] sm:$0xff] %v388_v10 }
  0x1b   : > { %v392_v12 = vld [vmem:[%s1807_s29 + $0x180] sm:$0xff]  ;;  %391 = vst [vmem:[%s1812_s30 + $0x58] sm:$0xff] %v390_v11 }
  0x1c   : > { %v394_v13 = vld [vmem:[%s1807_s29 + $0x1a0] sm:$0xff]  ;;  %393 = vst [vmem:[%s1812_s30 + $0x60] sm:$0xff] %v392_v12 }
  0x1d   : > { %v396_v14 = vld [vmem:[%s1807_s29 + $0x1c0] sm:$0xff]  ;;  %395 = vst [vmem:[%s1812_s30 + $0x68] sm:$0xff] %v394_v13 }
  0x1e   : > { %v398_v15 = vld [vmem:[%s1807_s29 + $0x1e0] sm:$0xff]  ;;  %397 = vst [vmem:[%s1812_s30 + $0x70] sm:$0xff] %v396_v14 }
  0x1f   : > { %v400_v16 = vld [vmem:[%s1807_s29 + $0x200] sm:$0xff]  ;;  %399 = vst [vmem:[%s1812_s30 + $0x78] sm:$0xff] %v398_v15 }
  0x20   : > { %v402_v17 = vld [vmem:[%s1807_s29 + $0x220] sm:$0xff]  ;;  %401 = vst [vmem:[%s1812_s30 + $0x80] sm:$0xff] %v400_v16 }
  0x21   : > { %v404_v18 = vld [vmem:[%s1807_s29 + $0x240] sm:$0xff]  ;;  %403 = vst [vmem:[%s1812_s30 + $0x88] sm:$0xff] %v402_v17 }
  0x22   : > { %v406_v19 = vld [vmem:[%s1807_s29 + $0x260] sm:$0xff]  ;;  %405 = vst [vmem:[%s1812_s30 + $0x90] sm:$0xff] %v404_v18 }
  0x23   : > { %v408_v20 = vld [vmem:[%s1807_s29 + $0x280] sm:$0xff]  ;;  %407 = vst [vmem:[%s1812_s30 + $0x98] sm:$0xff] %v406_v19 }
  0x24   : > { %v410_v21 = vld [vmem:[%s1807_s29 + $0x2a0] sm:$0xff]  ;;  %409 = vst [vmem:[%s1812_s30 + $0xa0] sm:$0xff] %v408_v20 }
  0x25   : > { %v412_v22 = vld [vmem:[%s1807_s29 + $0x2c0] sm:$0xff]  ;;  %411 = vst [vmem:[%s1812_s30 + $0xa8] sm:$0xff] %v410_v21 }
  0x26   : > { %v414_v23 = vld [vmem:[%s1807_s29 + $0x2e0] sm:$0xff]  ;;  %413 = vst [vmem:[%s1812_s30 + $0xb0] sm:$0xff] %v412_v22 }
  0x27   : > { %v416_v24 = vld [vmem:[%s1807_s29 + $0x300] sm:$0xff]  ;;  %415 = vst [vmem:[%s1812_s30 + $0xb8] sm:$0xff] %v414_v23 }
  0x28   : > { %v418_v25 = vld [vmem:[%s1807_s29 + $0x320] sm:$0xff]  ;;  %417 = vst [vmem:[%s1812_s30 + $0xc0] sm:$0xff] %v416_v24 }
  0x29   : > { %v420_v26 = vld [vmem:[%s1807_s29 + $0x340] sm:$0xff]  ;;  %419 = vst [vmem:[%s1812_s30 + $0xc8] sm:$0xff] %v418_v25 }
  0x2a   : > { %v422_v27 = vld [vmem:[%s1807_s29 + $0x360] sm:$0xff]  ;;  %421 = vst [vmem:[%s1812_s30 + $0xd0] sm:$0xff] %v420_v26 }
  0x2b   : > { %v424_v28 = vld [vmem:[%s1807_s29 + $0x380] sm:$0xff]  ;;  %423 = vst [vmem:[%s1812_s30 + $0xd8] sm:$0xff] %v422_v27 }
  0x2c   : > { %v426_v29 = vld [vmem:[%s1807_s29 + $0x3a0] sm:$0xff]  ;;  %425 = vst [vmem:[%s1812_s30 + $0xe0] sm:$0xff] %v424_v28 }
  0x2d   : > { %v428_v30 = vld [vmem:[%s1807_s29 + $0x3c0] sm:$0xff]  ;;  %427 = vst [vmem:[%s1812_s30 + $0xe8] sm:$0xff] %v426_v29 }
  0x2e   : > { %v430_v31 = vld [vmem:[%s1807_s29 + $0x3e0] sm:$0xff]  ;;  %429 = vst [vmem:[%s1812_s30 + $0xf0] sm:$0xff] %v428_v30 }
  0x2f   : > { %v432_v32 = vld [vmem:[%s1807_s29 + $0x400] sm:$0xff]  ;;  %431 = vst [vmem:[%s1812_s30 + $0xf8] sm:$0xff] %v430_v31 }
  0x30   : > { %v434_v33 = vld [vmem:[%s1807_s29 + $0x420] sm:$0xff]  ;;  %433 = vst [vmem:[%s1812_s30 + $0x100] sm:$0xff] %v432_v32 }
  0x31   : > { %v436_v34 = vld [vmem:[%s1807_s29 + $0x440] sm:$0xff]  ;;  %435 = vst [vmem:[%s1812_s30 + $0x108] sm:$0xff] %v434_v33 }
  0x32   : > { %v438_v35 = vld [vmem:[%s1807_s29 + $0x460] sm:$0xff]  ;;  %437 = vst [vmem:[%s1812_s30 + $0x110] sm:$0xff] %v436_v34 }
  0x33   : > { %v440_v36 = vld [vmem:[%s1807_s29 + $0x480] sm:$0xff]  ;;  %439 = vst [vmem:[%s1812_s30 + $0x118] sm:$0xff] %v438_v35 }
  0x34   : > { %v442_v37 = vld [vmem:[%s1807_s29 + $0x4a0] sm:$0xff]  ;;  %441 = vst [vmem:[%s1812_s30 + $0x120] sm:$0xff] %v440_v36 }
  0x35   : > { %v444_v38 = vld [vmem:[%s1807_s29 + $0x4c0] sm:$0xff]  ;;  %443 = vst [vmem:[%s1812_s30 + $0x128] sm:$0xff] %v442_v37 }
  0x36   : > { %v446_v39 = vld [vmem:[%s1807_s29 + $0x4e0] sm:$0xff]  ;;  %445 = vst [vmem:[%s1812_s30 + $0x130] sm:$0xff] %v444_v38 }
  0x37   : > { %v448_v40 = vld [vmem:[%s1807_s29 + $0x500] sm:$0xff]  ;;  %447 = vst [vmem:[%s1812_s30 + $0x138] sm:$0xff] %v446_v39 }
  0x38   : > { %v450_v41 = vld [vmem:[%s1807_s29 + $0x520] sm:$0xff]  ;;  %449 = vst [vmem:[%s1812_s30 + $0x140] sm:$0xff] %v448_v40 }
  0x39   : > { %v452_v42 = vld [vmem:[%s1807_s29 + $0x540] sm:$0xff]  ;;  %451 = vst [vmem:[%s1812_s30 + $0x148] sm:$0xff] %v450_v41 }
  0x3a   : > { %v454_v43 = vld [vmem:[%s1807_s29 + $0x560] sm:$0xff]  ;;  %453 = vst [vmem:[%s1812_s30 + $0x150] sm:$0xff] %v452_v42 }
  0x3b   : > { %v456_v44 = vld [vmem:[%s1807_s29 + $0x580] sm:$0xff]  ;;  %455 = vst [vmem:[%s1812_s30 + $0x158] sm:$0xff] %v454_v43 }
  0x3c   : > { %v458_v45 = vld [vmem:[%s1807_s29 + $0x5a0] sm:$0xff]  ;;  %457 = vst [vmem:[%s1812_s30 + $0x160] sm:$0xff] %v456_v44 }
  0x3d   : > { %v460_v46 = vld [vmem:[%s1807_s29 + $0x5c0] sm:$0xff]  ;;  %459 = vst [vmem:[%s1812_s30 + $0x168] sm:$0xff] %v458_v45 }
  0x3e   : > { %v462_v47 = vld [vmem:[%s1807_s29 + $0x5e0] sm:$0xff]  ;;  %461 = vst [vmem:[%s1812_s30 + $0x170] sm:$0xff] %v460_v46 }
  0x3f   : > { %v464_v48 = vld [vmem:[%s1807_s29 + $0x600] sm:$0xff]  ;;  %463 = vst [vmem:[%s1812_s30 + $0x178] sm:$0xff] %v462_v47 }
  0x40   : > { %v466_v49 = vld [vmem:[%s1807_s29 + $0x620] sm:$0xff]  ;;  %465 = vst [vmem:[%s1812_s30 + $0x180] sm:$0xff] %v464_v48 }
  0x41   : > { %v468_v50 = vld [vmem:[%s1807_s29 + $0x640] sm:$0xff]  ;;  %467 = vst [vmem:[%s1812_s30 + $0x188] sm:$0xff] %v466_v49 }
  0x42   : > { %v470_v51 = vld [vmem:[%s1807_s29 + $0x660] sm:$0xff]  ;;  %469 = vst [vmem:[%s1812_s30 + $0x190] sm:$0xff] %v468_v50 }
  0x43   : > { %v472_v52 = vld [vmem:[%s1807_s29 + $0x680] sm:$0xff]  ;;  %471 = vst [vmem:[%s1812_s30 + $0x198] sm:$0xff] %v470_v51 }
  0x44   : > { %v474_v53 = vld [vmem:[%s1807_s29 + $0x6a0] sm:$0xff]  ;;  %473 = vst [vmem:[%s1812_s30 + $0x1a0] sm:$0xff] %v472_v52 }
  0x45   : > { %v476_v54 = vld [vmem:[%s1807_s29 + $0x6c0] sm:$0xff]  ;;  %475 = vst [vmem:[%s1812_s30 + $0x1a8] sm:$0xff] %v474_v53 }
  0x46   : > { %v478_v55 = vld [vmem:[%s1807_s29 + $0x6e0] sm:$0xff]  ;;  %477 = vst [vmem:[%s1812_s30 + $0x1b0] sm:$0xff] %v476_v54 }
  0x47   : > { %v480_v56 = vld [vmem:[%s1807_s29 + $0x700] sm:$0xff]  ;;  %479 = vst [vmem:[%s1812_s30 + $0x1b8] sm:$0xff] %v478_v55 }
  0x48   : > { %v482_v57 = vld [vmem:[%s1807_s29 + $0x720] sm:$0xff]  ;;  %481 = vst [vmem:[%s1812_s30 + $0x1c0] sm:$0xff] %v480_v56 }
  0x49   : > { %v484_v58 = vld [vmem:[%s1807_s29 + $0x740] sm:$0xff]  ;;  %483 = vst [vmem:[%s1812_s30 + $0x1c8] sm:$0xff] %v482_v57 }
  0x4a   : > { %v486_v59 = vld [vmem:[%s1807_s29 + $0x760] sm:$0xff]  ;;  %485 = vst [vmem:[%s1812_s30 + $0x1d0] sm:$0xff] %v484_v58 }
  0x4b   : > { %v488_v60 = vld [vmem:[%s1807_s29 + $0x780] sm:$0xff]  ;;  %487 = vst [vmem:[%s1812_s30 + $0x1d8] sm:$0xff] %v486_v59 }
  0x4c   : > { %v490_v61 = vld [vmem:[%s1807_s29 + $0x7a0] sm:$0xff]  ;;  %489 = vst [vmem:[%s1812_s30 + $0x1e0] sm:$0xff] %v488_v60 }
  0x4d   : > { %v492_v62 = vld [vmem:[%s1807_s29 + $0x7c0] sm:$0xff]  ;;  %491 = vst [vmem:[%s1812_s30 + $0x1e8] sm:$0xff] %v490_v61 }
  0x4e   : > { %v494_v63 = vld [vmem:[%s1807_s29 + $0x7e0] sm:$0xff]  ;;  %493 = vst [vmem:[%s1812_s30 + $0x1f0] sm:$0xff] %v492_v62 }
  0x4f   : > { %495 = vst [vmem:[%s1812_s30 + $0x1f8] sm:$0xff] %v494_v63 }
  0x50 PF: > { %p1329_p6 = scmp.ge.s32.totalorder %s1736_s19, 1  ;;  %p500_p7 = scmp.lt.s32.totalorder %s1736_s19, 5 }
  0x52   : > { %p501_p8 = pnand %p1329_p6, %p500_p7 }
  0x53   : > { %s507_s5 = sand.u32 (!%p501_p8), 1, %s1720_s15   ;;  %s1331_s10 = sshll.u32 (!%p501_p8), %s1728_s17, 1 }
  0x54   : > { %504 = sbr.rel (%p501_p8) target bundleno = 309 (0x135), region = 62  ;;  %s1330_s6 = sshll.u32 (!%p501_p8), %s507_s5, 9 }
  0x55   : > { %s1942_s7 = scalar_lea.vmem (!%p501_p8), [#allocation3], %s1330_s6  ;;  %p573_p9 = scmp.lt.s32.totalorder (!%p501_p8), %s1331_s10, 7 }
  0x59   : > { %v1392_v0 = vld [vmem:[%s1942_s7 + $0x70] sm:$0xf]  ;;  %v1608_v1 = vld [vmem:[%s1942_s7 + $0x74] sm:$0xf0]  ;;  %v1384_v11 = vld [vmem:[%s1942_s7 + $0x60] sm:$0xf] }
  0x5a   : > { %v1456_v2 = vld [vmem:[%s1942_s7 + $0xf0] sm:$0xf]  ;;  %v1393_v3 = vor.u32 %v1608_v1, %v1392_v0  ;;  %v1624_v4 = vld [vmem:[%s1942_s7 + $0xf4] sm:$0xf0]  ;;  %v1606_v13 = vld [vmem:[%s1942_s7 + $0x64] sm:$0xf0] }
  0x5b   : > { %v1520_v5 = vld [vmem:[%s1942_s7 + $0x170] sm:$0xf]  ;;  %v1640_v6 = vld [vmem:[%s1942_s7 + $0x174] sm:$0xf0]  ;;  %v1457_v7 = vor.u32 %v1624_v4, %v1456_v2  ;;  %v1448_v14 = vld [vmem:[%s1942_s7 + $0xe0] sm:$0xf]  ;;  %v1385_v16 = vor.u32 %v1606_v13, %v1384_v11 }
  0x5c   : > { %v1521_v8 = vor.u32 %v1640_v6, %v1520_v5  ;;  %v1584_v9 = vld [vmem:[%s1942_s7 + $0x1f0] sm:$0xf]  ;;  %v1656_v10 = vld [vmem:[%s1942_s7 + $0x1f4] sm:$0xf0]  ;;  %1002 = vmatpush.bf16.msra.mxu0 %v1393_v3  ;;  %v1622_v15 = vld [vmem:[%s1942_s7 + $0xe4] sm:$0xf0] }
  0x5d   : > { %v1585_v12 = vor.u32 %v1656_v10, %v1584_v9  ;;  %1015 = vmatpush.bf16.msra.mxu1 %v1457_v7  ;;  %v1449_v17 = vor.u32 %v1622_v15, %v1448_v14  ;;  %v1512_v18 = vld [vmem:[%s1942_s7 + $0x160] sm:$0xf]  ;;  %v1638_v19 = vld [vmem:[%s1942_s7 + $0x164] sm:$0xf0]  ;;  %v1376_v23 = vld [vmem:[%s1942_s7 + $0x50] sm:$0xf] }
  0x5e   : > { %1028 = vmatpush.bf16.msra.mxu2 %v1521_v8  ;;  %v1576_v20 = vld [vmem:[%s1942_s7 + $0x1e0] sm:$0xf]  ;;  %v1513_v21 = vor.u32 %v1638_v19, %v1512_v18  ;;  %v1654_v22 = vld [vmem:[%s1942_s7 + $0x1e4] sm:$0xf0]  ;;  %v1604_v24 = vld [vmem:[%s1942_s7 + $0x54] sm:$0xf0] }
  0x5f   : > { %1041 = vmatpush.bf16.msra.mxu3 %v1585_v12  ;;  %v1577_v25 = vor.u32 %v1654_v22, %v1576_v20  ;;  %v1440_v26 = vld [vmem:[%s1942_s7 + $0xd0] sm:$0xf]  ;;  %v1620_v27 = vld [vmem:[%s1942_s7 + $0xd4] sm:$0xf0]  ;;  %v1377_v29 = vor.u32 %v1604_v24, %v1376_v23  ;;  %v1368_v35 = vld [vmem:[%s1942_s7 + $0x40] sm:$0xf] }
  0x60   : > { %v1504_v28 = vld [vmem:[%s1942_s7 + $0x150] sm:$0xf]  ;;  %1003 = vmatpush.bf16.msra.mxu0 %v1385_v16  ;;  %v1636_v30 = vld [vmem:[%s1942_s7 + $0x154] sm:$0xf0]  ;;  %v1441_v33 = vor.u32 %v1620_v27, %v1440_v26  ;;  %v1602_v36 = vld [vmem:[%s1942_s7 + $0x44] sm:$0xf0] }
  0x61   : > { %v1568_v31 = vld [vmem:[%s1942_s7 + $0x1d0] sm:$0xf]  ;;  %v1652_v32 = vld [vmem:[%s1942_s7 + $0x1d4] sm:$0xf0]  ;;  %1016 = vmatpush.bf16.msra.mxu1 %v1449_v17  ;;  %v1505_v34 = vor.u32 %v1636_v30, %v1504_v28  ;;  %v1432_v37 = vld [vmem:[%s1942_s7 + $0xc0] sm:$0xf]  ;;  %v1369_v44 = vor.u32 %v1602_v36, %v1368_v35 }
  0x62   : > { %1029 = vmatpush.bf16.msra.mxu2 %v1513_v21  ;;  %v1569_v38 = vor.u32 %v1652_v32, %v1568_v31  ;;  %v1618_v39 = vld [vmem:[%s1942_s7 + $0xc4] sm:$0xf0]  ;;  %v1496_v40 = vld [vmem:[%s1942_s7 + $0x140] sm:$0xf]  ;;  %v1360_v47 = vld [vmem:[%s1942_s7 + $0x30] sm:$0xf] }
  0x63   : > { %1042 = vmatpush.bf16.msra.mxu3 %v1577_v25  ;;  %v1634_v41 = vld [vmem:[%s1942_s7 + $0x144] sm:$0xf0]  ;;  %v1560_v42 = vld [vmem:[%s1942_s7 + $0x1c0] sm:$0xf]  ;;  %v1433_v45 = vor.u32 %v1618_v39, %v1432_v37  ;;  %v1600_v48 = vld [vmem:[%s1942_s7 + $0x34] sm:$0xf0] }
  0x64   : > { %v1650_v43 = vld [vmem:[%s1942_s7 + $0x1c4] sm:$0xf0]  ;;  %1004 = vmatpush.bf16.msra.mxu0 %v1377_v29  ;;  %v1497_v46 = vor.u32 %v1634_v41, %v1496_v40  ;;  %v1424_v49 = vld [vmem:[%s1942_s7 + $0xb0] sm:$0xf]  ;;  %v1616_v51 = vld [vmem:[%s1942_s7 + $0xb4] sm:$0xf0]  ;;  %v1361_v56 = vor.u32 %v1600_v48, %v1360_v47 }
  0x65   : > { %1017 = vmatpush.bf16.msra.mxu1 %v1441_v33  ;;  %v1561_v50 = vor.u32 %v1650_v43, %v1560_v42  ;;  %v1488_v52 = vld [vmem:[%s1942_s7 + $0x130] sm:$0xf]  ;;  %v1632_v53 = vld [vmem:[%s1942_s7 + $0x134] sm:$0xf0]  ;;  %v1425_v57 = vor.u32 %v1616_v51, %v1424_v49  ;;  %v1352_v59 = vld [vmem:[%s1942_s7 + $0x20] sm:$0xf] }
  0x66   : > { %1030 = vmatpush.bf16.msra.mxu2 %v1505_v34  ;;  %v1552_v54 = vld [vmem:[%s1942_s7 + $0x1b0] sm:$0xf]  ;;  %v1648_v55 = vld [vmem:[%s1942_s7 + $0x1b4] sm:$0xf0]  ;;  %v1489_v58 = vor.u32 %v1632_v53, %v1488_v52  ;;  %v1598_v60 = vld [vmem:[%s1942_s7 + $0x24] sm:$0xf0] }
  0x67   : > { %1043 = vmatpush.bf16.msra.mxu3 %v1569_v38  ;;  %v1416_v61 = vld [vmem:[%s1942_s7 + $0xa0] sm:$0xf]  ;;  %v1553_v62 = vor.u32 %v1648_v55, %v1552_v54  ;;  %v1614_v63 = vld [vmem:[%s1942_s7 + $0xa4] sm:$0xf0]  ;;  %v1353_v4 = vor.u32 %v1598_v60, %v1352_v59  ;;  %v1344_v7 = vld [vmem:[%s1942_s7 + $0x10] sm:$0xf] }
  0x68   : > { %1005 = vmatpush.bf16.msra.mxu0 %v1369_v44  ;;  %v1480_v0 = vld [vmem:[%s1942_s7 + $0x120] sm:$0xf]  ;;  %v1630_v1 = vld [vmem:[%s1942_s7 + $0x124] sm:$0xf0]  ;;  %v1417_v5 = vor.u32 %v1614_v63, %v1416_v61  ;;  %v1596_v8 = vld [vmem:[%s1942_s7 + $0x14] sm:$0xf0] }
  0x69   : > { %1018 = vmatpush.bf16.msra.mxu1 %v1433_v45  ;;  %v1544_v2 = vld [vmem:[%s1942_s7 + $0x1a0] sm:$0xf]  ;;  %v1646_v3 = vld [vmem:[%s1942_s7 + $0x1a4] sm:$0xf0]  ;;  %v1481_v6 = vor.u32 %v1630_v1, %v1480_v0  ;;  %v1408_v9 = vld [vmem:[%s1942_s7 + $0x90] sm:$0xf]  ;;  %v1345_v17 = vor.u32 %v1596_v8, %v1344_v7 }
  0x6a   : > { %1031 = vmatpush.bf16.msra.mxu2 %v1497_v46  ;;  %v1545_v10 = vor.u32 %v1646_v3, %v1544_v2  ;;  %v1612_v11 = vld [vmem:[%s1942_s7 + $0x94] sm:$0xf0]  ;;  %v1472_v12 = vld [vmem:[%s1942_s7 + $0x110] sm:$0xf]  ;;  %v1336_v16 = vld [vmem:[%s1942_s7] sm:$0xf] }
  0x6b   : > { %1044 = vmatpush.bf16.msra.mxu3 %v1561_v50  ;;  %v1628_v13 = vld [vmem:[%s1942_s7 + $0x114] sm:$0xf0]  ;;  %v1536_v14 = vld [vmem:[%s1942_s7 + $0x190] sm:$0xf]  ;;  %v1594_v18 = vld [vmem:[%s1942_s7 + $0x4] sm:$0xf0]  ;;  %v1409_v21 = vor.u32 %v1612_v11, %v1408_v9 }
  0x6c   : > { %1006 = vmatpush.bf16.msra.mxu0 %v1361_v56  ;;  %v1644_v15 = vld [vmem:[%s1942_s7 + $0x194] sm:$0xf0]  ;;  %v1400_v19 = vld [vmem:[%s1942_s7 + $0x80] sm:$0xf]  ;;  %v1610_v20 = vld [vmem:[%s1942_s7 + $0x84] sm:$0xf0]  ;;  %v1473_v22 = vor.u32 %v1628_v13, %v1472_v12  ;;  %v1337_v33 = vor.u32 %v1594_v18, %v1336_v16 }
  0x6d   : > { %1019 = vmatpush.bf16.msra.mxu1 %v1425_v57  ;;  %v1464_v23 = vld [vmem:[%s1942_s7 + $0x100] sm:$0xf]  ;;  %v1626_v24 = vld [vmem:[%s1942_s7 + $0x104] sm:$0xf0]  ;;  %v1537_v26 = vor.u32 %v1644_v15, %v1536_v14  ;;  %v1607_v28 = vld [vmem:[%s1942_s7 + $0x74] sm:$0xf]  ;;  %v1401_v36 = vor.u32 %v1610_v20, %v1400_v19 }
  0x6e   : > { %1032 = vmatpush.bf16.msra.mxu2 %v1489_v58  ;;  %v1528_v25 = vld [vmem:[%s1942_s7 + $0x180] sm:$0xf]  ;;  %v1642_v27 = vld [vmem:[%s1942_s7 + $0x184] sm:$0xf0]  ;;  %v1394_v29 = vld [vmem:[%s1942_s7 + $0x78] sm:$0xf0]  ;;  %v1465_v37 = vor.u32 %v1626_v24, %v1464_v23 }
  0x6f   : > { %1045 = vmatpush.bf16.msra.mxu3 %v1553_v62  ;;  %v1623_v30 = vld [vmem:[%s1942_s7 + $0xf4] sm:$0xf]  ;;  %v1458_v31 = vld [vmem:[%s1942_s7 + $0xf8] sm:$0xf0]  ;;  %v1529_v40 = vor.u32 %v1642_v27, %v1528_v25  ;;  %v1397_v41 = vor.u32 %v1607_v28, %v1394_v29  ;;  %v1605_v44 = vld [vmem:[%s1942_s7 + $0x64] sm:$0xf] }
  0x70   : > { %1007 = vmatpush.bf16.msra.mxu0 %v1353_v4  ;;  %v607_v32 = vld [vmem:[%s2130_s0] sm:$0xf]  ;;  %v1522_v35 = vld [vmem:[%s1942_s7 + $0x178] sm:$0xf0]  ;;  %v1461_v42 = vor.u32 %v1623_v30, %v1458_v31  ;;  %v1386_v45 = vld [vmem:[%s1942_s7 + $0x68] sm:$0xf0] }
  0x71   : > { %1020 = vmatpush.bf16.msra.mxu1 %v1417_v5  ;;  %v1639_v34 = vld [vmem:[%s1942_s7 + $0x174] sm:$0xf]  ;;  %673 = vst [vmem:[#allocation1] ss:$9 sm:$0xff] %v607_v32  ;;  %v1586_v39 = vld [vmem:[%s1942_s7 + $0x1f8] sm:$0xf0]  ;;  %v1389_v54 = vor.u32 %v1605_v44, %v1386_v45 }
  0x72   : > { %1033 = vmatpush.bf16.msra.mxu2 %v1481_v6  ;;  %v1655_v38 = vld [vmem:[%s1942_s7 + $0x1f4] sm:$0xf]  ;;  %v1525_v43 = vor.u32 %v1639_v34, %v1522_v35  ;;  %v1621_v46 = vld [vmem:[%s1942_s7 + $0xe4] sm:$0xf]  ;;  %v1450_v48 = vld [vmem:[%s1942_s7 + $0xe8] sm:$0xf0] }
  0x73   : > { %1046 = vmatpush.bf16.msra.mxu3 %v1545_v10  ;;  %v1589_v47 = vor.u32 %v1655_v38, %v1586_v39  ;;  %v1637_v49 = vld [vmem:[%s1942_s7 + $0x164] sm:$0xf]  ;;  %v1514_v50 = vld [vmem:[%s1942_s7 + $0x168] sm:$0xf0]  ;;  %v1603_v53 = vld [vmem:[%s1942_s7 + $0x54] sm:$0xf]  ;;  %v1453_v58 = vor.u32 %v1621_v46, %v1450_v48 }
  0x74   : > { %1008 = vmatpush.bf16.msra.mxu0 %v1345_v17  ;;  %v1653_v51 = vld [vmem:[%s1942_s7 + $0x1e4] sm:$0xf]  ;;  %v1578_v52 = vld [vmem:[%s1942_s7 + $0x1e8] sm:$0xf0]  ;;  %v1378_v55 = vld [vmem:[%s1942_s7 + $0x58] sm:$0xf0]  ;;  %v1517_v59 = vor.u32 %v1637_v49, %v1514_v50 }
  0x75   : > { %1021 = vmatpush.bf16.msra.mxu1 %v1409_v21  ;;  %v1619_v56 = vld [vmem:[%s1942_s7 + $0xd4] sm:$0xf]  ;;  %v1442_v57 = vld [vmem:[%s1942_s7 + $0xd8] sm:$0xf0]  ;;  %v1581_v63 = vor.u32 %v1653_v51, %v1578_v52  ;;  %v1381_v5 = vor.u32 %v1603_v53, %v1378_v55  ;;  %v1601_v8 = vld [vmem:[%s1942_s7 + $0x44] sm:$0xf] }
  0x76   : > { %1034 = vmatpush.bf16.msra.mxu2 %v1473_v22  ;;  %v1635_v0 = vld [vmem:[%s1942_s7 + $0x154] sm:$0xf]  ;;  %v1506_v1 = vld [vmem:[%s1942_s7 + $0x158] sm:$0xf0]  ;;  %v1445_v6 = vor.u32 %v1619_v56, %v1442_v57  ;;  %v1370_v9 = vld [vmem:[%s1942_s7 + $0x48] sm:$0xf0] }
  0x77   : > { %1047 = vmatpush.bf16.msra.mxu3 %v1537_v26  ;;  %v1651_v3 = vld [vmem:[%s1942_s7 + $0x1d4] sm:$0xf]  ;;  %v1570_v4 = vld [vmem:[%s1942_s7 + $0x1d8] sm:$0xf0]  ;;  %v1509_v7 = vor.u32 %v1635_v0, %v1506_v1  ;;  %v1617_v10 = vld [vmem:[%s1942_s7 + $0xc4] sm:$0xf]  ;;  %v1373_v17 = vor.u32 %v1601_v8, %v1370_v9 }
  0x78   : > { %1009 = vmatpush.bf16.msra.mxu0 %v1337_v33  ;;  %v2031_v60 = vld [vmem:[#allocation1 + $0x12] sm:$0xff]  ;;  %v2033_v61 = vld [vmem:[#allocation1 + $0x1b] sm:$0xff]  ;;  %v2040_v2 = vld [vmem:[#allocation1 + $0x9] sm:$0xff]  ;;  %v1573_v11 = vor.u32 %v1651_v3, %v1570_v4  ;;  %vm1109_vm1 = vcmask 1040384   ;;  %s2144_s10 = smov (!%p573_p9, %s1331_s10), 7 }
  0x79   : > { %1022 = vmatpush.bf16.msra.mxu1 %v1401_v36  ;;  %v2035_v62 = vld [vmem:[#allocation1] sm:$0xff]  ;;  %v1434_v12 = vld [vmem:[%s1942_s7 + $0xc8] sm:$0xf0]  ;;  %v1633_v13 = vld [vmem:[%s1942_s7 + $0x144] sm:$0xf]  ;;  %s577_s13 = scalar_lea.vmem %s2132_s2, %s2144_s10  ;;  %s586_s17 = scalar_lea.vmem %s2133_s3, %s2144_s10 }
  0x7a   : > { %1035 = vmatpush.bf16.msra.mxu2 %v1465_v37  ;;  %v1498_v14 = vld [vmem:[%s1942_s7 + $0x148] sm:$0xf0]  ;;  %v1649_v15 = vld [vmem:[%s1942_s7 + $0x1c4] sm:$0xf]  ;;  %v1437_v18 = vor.u32 %v1617_v10, %v1434_v12  ;;  %v1599_v20 = vld [vmem:[%s1942_s7 + $0x34] sm:$0xf]  ;;  %s595_s24 = scalar_lea.vmem %s2134_s4, %s2144_s10 }
  0x7b   : > { %1048 = vmatpush.bf16.msra.mxu3 %v1529_v40  ;;  %1010 = vmatmul.bf16.vlgmr.msra.gmra.mxu0 %v2035_v62  ;;  %v1562_v16 = vld [vmem:[%s1942_s7 + $0x1c8] sm:$0xf0]  ;;  %v1501_v19 = vor.u32 %v1633_v13, %v1498_v14  ;;  %v1362_v21 = vld [vmem:[%s1942_s7 + $0x38] sm:$0xf0]  ;;  %v1615_v22 = vld [vmem:[%s1942_s7 + $0xb4] sm:$0xf] }
  0x7c   : > { %1054 = vmatpush.bf16.msrb.mxu0 %v1397_v41  ;;  %1023 = vmatmul.bf16.vlgmr.msra.gmra.mxu1 %v2040_v2  ;;  %v1565_v23 = vor.u32 %v1649_v15, %v1562_v16  ;;  %v1426_v24 = vld [vmem:[%s1942_s7 + $0xb8] sm:$0xf0]  ;;  %v1631_v25 = vld [vmem:[%s1942_s7 + $0x134] sm:$0xf]  ;;  %v1365_v29 = vor.u32 %v1599_v20, %v1362_v21  ;;  %v1597_v32 = vld [vmem:[%s1942_s7 + $0x24] sm:$0xf] }
  0x7d   : > { %1067 = vmatpush.bf16.msrb.mxu1 %v1461_v42  ;;  %1036 = vmatmul.bf16.vlgmr.msra.gmra.mxu2 %v2031_v60  ;;  %v1490_v26 = vld [vmem:[%s1942_s7 + $0x138] sm:$0xf0]  ;;  %v1647_v27 = vld [vmem:[%s1942_s7 + $0x1b4] sm:$0xf]  ;;  %v1429_v30 = vor.u32 %v1615_v22, %v1426_v24  ;;  %v1354_v33 = vld [vmem:[%s1942_s7 + $0x28] sm:$0xf0] }
  0x7e   : > { %1080 = vmatpush.bf16.msrb.mxu2 %v1525_v43  ;;  %1049 = vmatmul.bf16.vlgmr.msra.gmra.mxu3 %v2033_v61  ;;  %v1554_v28 = vld [vmem:[%s1942_s7 + $0x1b8] sm:$0xf0]  ;;  %v1493_v31 = vor.u32 %v1631_v25, %v1490_v26  ;;  %v1613_v34 = vld [vmem:[%s1942_s7 + $0xa4] sm:$0xf]  ;;  %v1418_v36 = vld [vmem:[%s1942_s7 + $0xa8] sm:$0xf0]  ;;  %v1357_v41 = vor.u32 %v1597_v32, %v1354_v33 }
  0x7f   : > { %1093 = vmatpush.bf16.msrb.mxu3 %v1589_v47  ;;  %v1557_v35 = vor.u32 %v1647_v27, %v1554_v28  ;;  %v1629_v37 = vld [vmem:[%s1942_s7 + $0x124] sm:$0xf]  ;;  %v1482_v38 = vld [vmem:[%s1942_s7 + $0x128] sm:$0xf0]  ;;  %v1421_v42 = vor.u32 %v1613_v34, %v1418_v36  ;;  %v1595_v44 = vld [vmem:[%s1942_s7 + $0x14] sm:$0xf] }
  0x80   : > { %1055 = vmatpush.bf16.msrb.mxu0 %v1389_v54  ;;  %v1645_v39 = vld [vmem:[%s1942_s7 + $0x1a4] sm:$0xf]  ;;  %v1546_v40 = vld [vmem:[%s1942_s7 + $0x1a8] sm:$0xf0]  ;;  %v1485_v43 = vor.u32 %v1629_v37, %v1482_v38  ;;  %v1346_v45 = vld [vmem:[%s1942_s7 + $0x18] sm:$0xf0] }
  0x81   : > { %1068 = vmatpush.bf16.msrb.mxu1 %v1453_v58  ;;  %v1611_v46 = vld [vmem:[%s1942_s7 + $0x94] sm:$0xf]  ;;  %v1549_v47 = vor.u32 %v1645_v39, %v1546_v40  ;;  %v1410_v48 = vld [vmem:[%s1942_s7 + $0x98] sm:$0xf0]  ;;  %v1349_v53 = vor.u32 %v1595_v44, %v1346_v45  ;;  %v1593_v56 = vld [vmem:[%s1942_s7 + $0x4] sm:$0xf] }
  0x82   : > { %1081 = vmatpush.bf16.msrb.mxu2 %v1517_v59  ;;  %v1627_v49 = vld [vmem:[%s1942_s7 + $0x114] sm:$0xf]  ;;  %v1474_v50 = vld [vmem:[%s1942_s7 + $0x118] sm:$0xf0]  ;;  %v1413_v54 = vor.u32 %v1611_v46, %v1410_v48  ;;  %v1338_v57 = vld [vmem:[%s1942_s7 + $0x8] sm:$0xf0] }
  0x83   : > { %1094 = vmatpush.bf16.msrb.mxu3 %v1581_v63  ;;  %v1643_v51 = vld [vmem:[%s1942_s7 + $0x194] sm:$0xf]  ;;  %v1538_v52 = vld [vmem:[%s1942_s7 + $0x198] sm:$0xf0]  ;;  %v1477_v55 = vor.u32 %v1627_v49, %v1474_v50  ;;  %v1609_v58 = vld [vmem:[%s1942_s7 + $0x84] sm:$0xf] }
  0x84   : > { %1056 = vmatpush.bf16.msrb.mxu0 %v1381_v5  ;;  %v1541_v59 = vor.u32 %v1643_v51, %v1538_v52  ;;  %v1402_v63 = vld [vmem:[%s1942_s7 + $0x88] sm:$0xf0]  ;;  %v1625_v0 = vld [vmem:[%s1942_s7 + $0x104] sm:$0xf]  ;;  %v1341_v5 = vor.u32 %v1593_v56, %v1338_v57  ;;  %v1738_v13 = vmov 0.0  }
  0x85   : > { %1069 = vmatpush.bf16.msrb.mxu1 %v1445_v6  ;;  %v1466_v1 = vld [vmem:[%s1942_s7 + $0x108] sm:$0xf0]  ;;  %v1641_v3 = vld [vmem:[%s1942_s7 + $0x184] sm:$0xf]  ;;  %v1405_v6 = vor.u32 %v1609_v58, %v1402_v63 }
  0x86   : > { %1082 = vmatpush.bf16.msrb.mxu2 %v1509_v7  ;;  %v1530_v4 = vld [vmem:[%s1942_s7 + $0x188] sm:$0xf0]  ;;  %v1469_v7 = vor.u32 %v1625_v0, %v1466_v1 }
  0x87   : > { %1095 = vmatpush.bf16.msrb.mxu3 %v1573_v11  ;;  %v1533_v8 = vor.u32 %v1641_v3, %v1530_v4  ;;  %v601_v11 = vlaneseq }
  0x88   : > { %1057 = vmatpush.bf16.msrb.mxu0 %v1373_v17 }
  0x89   : > { %1070 = vmatpush.bf16.msrb.mxu1 %v1437_v18  ;;  %vm2091_vm0 = vcmp.lt.s32.totalorder %v601_v11, 256 }
  0x8a   : > { %1083 = vmatpush.bf16.msrb.mxu2 %v1501_v19  ;;  %605 = vst.msk [vmem:[#allocation2] sm:$0x3] %vm2091_vm0, %v1738_v13 }
  0x8b   : > { %1096 = vmatpush.bf16.msrb.mxu3 %v1565_v23 }
  0x8c   : > { %1058 = vmatpush.bf16.msrb.mxu0 %v1365_v29 }
  0x8d   : > { %1071 = vmatpush.bf16.msrb.mxu1 %v1429_v30 }
  0x8e   : > { %1084 = vmatpush.bf16.msrb.mxu2 %v1493_v31 }
  0x8f   : > { %1097 = vmatpush.bf16.msrb.mxu3 %v1557_v35 }
  0x90   : > { %1059 = vmatpush.bf16.msrb.mxu0 %v1357_v41 }
  0x91   : > { %1072 = vmatpush.bf16.msrb.mxu1 %v1421_v42  ;;  %v606_v28 = vld [vmem:[#allocation2] sm:$0x3] }
  0x92   : > { %1085 = vmatpush.bf16.msrb.mxu2 %v1485_v43 }
  0x93   : > { %1098 = vmatpush.bf16.msrb.mxu3 %v1549_v47 }
  0x94   : > { %1060 = vmatpush.bf16.msrb.mxu0 %v1349_v53 }
  0x95   : > { %1073 = vmatpush.bf16.msrb.mxu1 %v1413_v54 }
  0x96   : > { %1086 = vmatpush.bf16.msrb.mxu2 %v1477_v55 }
  0x97   : > { %1099 = vmatpush.bf16.msrb.mxu3 %v1541_v59 }
  0x98   : > { %1061 = vmatpush.bf16.msrb.mxu0 %v1341_v5 }
  0x99   : > { %1074 = vmatpush.bf16.msrb.mxu1 %v1405_v6 }
  0x9a   : > { %1087 = vmatpush.bf16.msrb.mxu2 %v1469_v7 }
  0x9b   : > { %1100 = vmatpush.bf16.msrb.mxu3 %v1533_v8  ;;  %1062 = vmatmul.bf16.vlgmr.msrb.gmra.mxu0 %v2035_v62 }
  0x9c   : > { %1075 = vmatmul.bf16.vlgmr.msrb.gmra.mxu1 %v2040_v2 }
  0x9d   : > { %1088 = vmatmul.bf16.vlgmr.msrb.gmra.mxu2 %v2031_v60 }
  0x9e   : > { %1101 = vmatmul.bf16.vlgmr.msrb.gmra.mxu3 %v2033_v61 }
  0xf8   : > { %v1011_v9 = vpop.f32.mrf.mxu0 }
  0xf9   : > { %v1024_v10 = vpop.f32.mrf.mxu1 }
  0xfa   : > { %v1025_v18 = vadd.f32 %v1024_v10, %v1011_v9 }
 0x100   : > { %v1037_v14 = vpop.f32.mrf.mxu2  ;;  %v1013_v62 = vpop.f32.mrf.mxu0 }
 0x101   : > { %v1050_v15 = vpop.f32.mrf.mxu3  ;;  %v1026_v2 = vpop.f32.mrf.mxu1  ;;  %v1038_v21 = vadd.f32 %v1037_v14, %v1025_v18 }
 0x103   : > { %v1051_v27 = vadd.f32 %v1050_v15, %v1038_v21 }
 0x108   : > { %v1039_v16 = vpop.f32.mrf.mxu2 }
 0x109   : > { %v1052_v60 = vpop.f32.mrf.mxu3 }
 0x118   : > { %v1063_v17 = vpop.f32.mrf.mxu0 }
 0x119   : > { %v1076_v61 = vpop.f32.mrf.mxu1 }
 0x11a   : > { %v1077_v19 = vadd.f32 %v1076_v61, %v1063_v17 }
 0x120   : > { %v1089_v20 = vpop.f32.mrf.mxu2  ;;  %v1065_v24 = vpop.f32.mrf.mxu0 }
 0x121   : > { %v1090_v22 = vadd.f32 %v1089_v20, %v1077_v19  ;;  %v1102_v23 = vpop.f32.mrf.mxu3  ;;  %v1078_v25 = vpop.f32.mrf.mxu1 }
 0x123   : > { %v1103_v26 = vadd.f32 %v1102_v23, %v1090_v22 }
 0x125   : > { %v1108_v29 = vrot.slane %v1103_v26, 7 }
 0x127   : > { %v1110_v30 = vsel %vm1109_vm1, %v1051_v27, %v1108_v29 }
 0x128   : > { %v1112_v31 = vadd.f32 %v1110_v30, %v606_v28  ;;  %v1091_v32 = vpop.f32.mrf.mxu2 }
 0x129   : > { %v1104_v33 = vpop.f32.mrf.mxu3 }
 0x12a   : > { %1117 = vst.msk [vmem:[#allocation2] sm:$0x3] %vm2091_vm0, %v1112_v31 }
 0x131   : > { %v1121_v34 = vld [vmem:[#allocation2] sm:$0x3] }
 0x132   : > { %1122 = vst.msk [vmem:[%s577_s13] sm:$0x3] %vm2091_vm0, %v1121_v34  ;;  %v1125_v35 = vmul.f32 %v1121_v34, %v1121_v34 }
 0x133   : > { %1124 = vst.msk [vmem:[%s586_s17] sm:$0x3] %vm2091_vm0, %v1121_v34 }
 0x134   : > { %1127 = vst.msk [vmem:[%s595_s24] sm:$0x3] %vm2091_vm0, %v1125_v35 }
 0x135 PF: > { %s15_s19 = sadd.s32 1, %s1736_s19   ;;  %s2137_s15 = smov %s1724_s16 }
 0x136   : > { %p12_p10 = scmp.ge.s32.totalorder %s15_s19, 6   ;;  %s2138_s16 = smov %s1799_s23 }
 0x137   : > { %s2139_s17 = smov %s1732_s18  ;;  %s2140_s18 = smov %s2142_s20 }
 0x138   :  { %14 = sbr.rel (!%p12_p10) target bundleno = 3 (0x3), region = 136 }

// kernel: _lambda_.104
= control target key start
LH: loop header
LB: loop body
LE: loop exit
PB: predicated region body
PF: predicated region fallthrough
CT: control target
= control target key end

     0   :  { %s1822_s15 = smov 0   ;;  %s1824_s16 = smov 0   ;;  %s2194_s0 = inlined_call_operand.vmem [shape: bf16[4,512], index: 0, kind: input, shape index: {}]   ;;  %s2195_s1 = inlined_call_operand.vmem [shape: bf16[512,512], index: 1, kind: input, shape index: {}]   ;;  %s2196_s2 = inlined_call_operand.vmem [shape: f32[4,512], index: 2, kind: output, shape index: {0}]   ;;  %s2197_s3 = inlined_call_operand.vmem [shape: f32[1,1,512], index: 3, kind: output, shape index: {1}]   ;;  %s2198_s4 = inlined_call_operand.vmem [shape: f32[1,1,512], index: 4, kind: output, shape index: {2}]  }
   0x1   :  { %s1826_s17 = smov 0   ;;  %s1828_s18 = smov 0  }
   0x2   :  { %s1830_s19 = smov 0  }
   0x3 LB: > { %s30_s20 = sadd.s32 1, %s1791_s18  ;;  %p78_p1 = scmp.ne.s32.totalorder %s1783_s16, %s1779_s15  ;;  %s1795_s19 = sphi %s1830_s19, %s15_s19   ;;  %s1791_s18 = sphi %s1828_s18, %s2204_s18   ;;  %s1787_s17 = sphi %s1826_s17, %s2203_s17   ;;  %s1783_s16 = sphi %s1824_s16, %s2202_s16   ;;  %s1779_s15 = sphi %s1822_s15, %s2201_s15  }
   0x4   : > { %p32_p0 = scmp.ge.s32.totalorder %s30_s20, 2  ;;  %p79_p2 = scmp.eq.s32.totalorder %s1795_s19, 0 }
   0x5   : > { %s71_s22 = sadd.s32 1, %s1783_s16  ;;  %p1384_p5 = scmp.ge.s32.totalorder %s1795_s19, 2 }
   0x6   : > { %s2206_s20 = smov (%p32_p0, %s30_s20), 0  ;;  %p80_p3 = por %p79_p2, %p78_p1 }
   0x7   : > { %s67_s21 = ssub.s32 %s1791_s18, %s2206_s20  ;;  %201 = sbr.rel (%p1384_p5) target bundleno = 80 (0x50), region = 20 }
   0x8   : > { %p69_p4 = scmp.eq.s32.totalorder %s67_s21, 0 }
   0xa   : > { %s1857_s23 = scalar_select %p69_p4, %s1783_s16, %s71_s22  }
   0xc   : > { %204 = sbr.rel (!%p80_p3) target bundleno = 80 (0x50), region = 24  ;;  %s206_s24 = sand.u32 (%p80_p3), 1, %s1783_s16  }
   0xd   : > { %s1652_s25 = sshll.u32 (%p80_p3), %s1791_s18, 3  ;;  %s1385_s26 = sshll.u32 (%p80_p3), %s206_s24, 9 }
   0xe   : > { %s1865_s29 = scalar_lea.vmem (%p80_p3), %s2195_s1, %s1652_s25  ;;  %s1870_s30 = scalar_lea.vmem (%p80_p3), [#allocation3], %s1385_s26 }
   0xf   : > { %v369_v0 = vld [vmem:[%s1865_s29] sm:$0xff] (%p80_p3)  ;;  %v371_v1 = vld [vmem:[%s1865_s29 + $0x10] sm:$0xff] (%p80_p3) }
  0x10   : > { %v373_v2 = vld [vmem:[%s1865_s29 + $0x20] sm:$0xff] (%p80_p3)  ;;  %370 = vst [vmem:[%s1870_s30] sm:$0xff] (%p80_p3), %v369_v0  ;;  %v375_v3 = vld [vmem:[%s1865_s29 + $0x30] sm:$0xff] (%p80_p3) }
  0x11   : > { %372 = vst [vmem:[%s1870_s30 + $0x8] sm:$0xff] %v371_v1  ;;  %v377_v4 = vld [vmem:[%s1865_s29 + $0x40] sm:$0xff]  ;;  %v379_v5 = vld [vmem:[%s1865_s29 + $0x50] sm:$0xff] }
  0x12   : > { %374 = vst [vmem:[%s1870_s30 + $0x10] sm:$0xff] %v373_v2  ;;  %v381_v6 = vld [vmem:[%s1865_s29 + $0x60] sm:$0xff]  ;;  %v383_v7 = vld [vmem:[%s1865_s29 + $0x70] sm:$0xff] }
  0x13   : > { %376 = vst [vmem:[%s1870_s30 + $0x18] sm:$0xff] %v375_v3  ;;  %v385_v8 = vld [vmem:[%s1865_s29 + $0x80] sm:$0xff]  ;;  %v387_v9 = vld [vmem:[%s1865_s29 + $0x90] sm:$0xff] }
  0x14   : > { %378 = vst [vmem:[%s1870_s30 + $0x20] sm:$0xff] %v377_v4  ;;  %v389_v10 = vld [vmem:[%s1865_s29 + $0xa0] sm:$0xff]  ;;  %v391_v11 = vld [vmem:[%s1865_s29 + $0xb0] sm:$0xff] }
  0x15   : > { %380 = vst [vmem:[%s1870_s30 + $0x28] sm:$0xff] %v379_v5  ;;  %v393_v12 = vld [vmem:[%s1865_s29 + $0xc0] sm:$0xff]  ;;  %v395_v13 = vld [vmem:[%s1865_s29 + $0xd0] sm:$0xff] }
  0x16   : > { %382 = vst [vmem:[%s1870_s30 + $0x30] sm:$0xff] %v381_v6  ;;  %v397_v14 = vld [vmem:[%s1865_s29 + $0xe0] sm:$0xff]  ;;  %v399_v15 = vld [vmem:[%s1865_s29 + $0xf0] sm:$0xff] }
  0x17   : > { %384 = vst [vmem:[%s1870_s30 + $0x38] sm:$0xff] %v383_v7  ;;  %v401_v16 = vld [vmem:[%s1865_s29 + $0x100] sm:$0xff]  ;;  %v403_v17 = vld [vmem:[%s1865_s29 + $0x110] sm:$0xff] }
  0x18   : > { %386 = vst [vmem:[%s1870_s30 + $0x40] sm:$0xff] %v385_v8  ;;  %v405_v18 = vld [vmem:[%s1865_s29 + $0x120] sm:$0xff]  ;;  %v407_v19 = vld [vmem:[%s1865_s29 + $0x130] sm:$0xff] }
  0x19   : > { %388 = vst [vmem:[%s1870_s30 + $0x48] sm:$0xff] %v387_v9  ;;  %v409_v20 = vld [vmem:[%s1865_s29 + $0x140] sm:$0xff]  ;;  %v411_v21 = vld [vmem:[%s1865_s29 + $0x150] sm:$0xff] }
  0x1a   : > { %390 = vst [vmem:[%s1870_s30 + $0x50] sm:$0xff] %v389_v10  ;;  %v413_v22 = vld [vmem:[%s1865_s29 + $0x160] sm:$0xff]  ;;  %v415_v23 = vld [vmem:[%s1865_s29 + $0x170] sm:$0xff] }
  0x1b   : > { %392 = vst [vmem:[%s1870_s30 + $0x58] sm:$0xff] %v391_v11  ;;  %v417_v24 = vld [vmem:[%s1865_s29 + $0x180] sm:$0xff]  ;;  %v419_v25 = vld [vmem:[%s1865_s29 + $0x190] sm:$0xff] }
  0x1c   : > { %394 = vst [vmem:[%s1870_s30 + $0x60] sm:$0xff] %v393_v12  ;;  %v421_v26 = vld [vmem:[%s1865_s29 + $0x1a0] sm:$0xff]  ;;  %v423_v27 = vld [vmem:[%s1865_s29 + $0x1b0] sm:$0xff] }
  0x1d   : > { %396 = vst [vmem:[%s1870_s30 + $0x68] sm:$0xff] %v395_v13  ;;  %v425_v28 = vld [vmem:[%s1865_s29 + $0x1c0] sm:$0xff]  ;;  %v427_v29 = vld [vmem:[%s1865_s29 + $0x1d0] sm:$0xff] }
  0x1e   : > { %398 = vst [vmem:[%s1870_s30 + $0x70] sm:$0xff] %v397_v14  ;;  %v429_v30 = vld [vmem:[%s1865_s29 + $0x1e0] sm:$0xff]  ;;  %v431_v31 = vld [vmem:[%s1865_s29 + $0x1f0] sm:$0xff] }
  0x1f   : > { %400 = vst [vmem:[%s1870_s30 + $0x78] sm:$0xff] %v399_v15  ;;  %v433_v32 = vld [vmem:[%s1865_s29 + $0x200] sm:$0xff]  ;;  %v435_v33 = vld [vmem:[%s1865_s29 + $0x210] sm:$0xff] }
  0x20   : > { %402 = vst [vmem:[%s1870_s30 + $0x80] sm:$0xff] %v401_v16  ;;  %v437_v34 = vld [vmem:[%s1865_s29 + $0x220] sm:$0xff]  ;;  %v439_v35 = vld [vmem:[%s1865_s29 + $0x230] sm:$0xff] }
  0x21   : > { %404 = vst [vmem:[%s1870_s30 + $0x88] sm:$0xff] %v403_v17  ;;  %v441_v36 = vld [vmem:[%s1865_s29 + $0x240] sm:$0xff]  ;;  %v443_v37 = vld [vmem:[%s1865_s29 + $0x250] sm:$0xff] }
  0x22   : > { %406 = vst [vmem:[%s1870_s30 + $0x90] sm:$0xff] %v405_v18  ;;  %v445_v38 = vld [vmem:[%s1865_s29 + $0x260] sm:$0xff]  ;;  %v447_v39 = vld [vmem:[%s1865_s29 + $0x270] sm:$0xff] }
  0x23   : > { %408 = vst [vmem:[%s1870_s30 + $0x98] sm:$0xff] %v407_v19  ;;  %v449_v40 = vld [vmem:[%s1865_s29 + $0x280] sm:$0xff]  ;;  %v451_v41 = vld [vmem:[%s1865_s29 + $0x290] sm:$0xff] }
  0x24   : > { %410 = vst [vmem:[%s1870_s30 + $0xa0] sm:$0xff] %v409_v20  ;;  %v453_v42 = vld [vmem:[%s1865_s29 + $0x2a0] sm:$0xff]  ;;  %v455_v43 = vld [vmem:[%s1865_s29 + $0x2b0] sm:$0xff] }
  0x25   : > { %412 = vst [vmem:[%s1870_s30 + $0xa8] sm:$0xff] %v411_v21  ;;  %v457_v44 = vld [vmem:[%s1865_s29 + $0x2c0] sm:$0xff]  ;;  %v459_v45 = vld [vmem:[%s1865_s29 + $0x2d0] sm:$0xff] }
  0x26   : > { %414 = vst [vmem:[%s1870_s30 + $0xb0] sm:$0xff] %v413_v22  ;;  %v461_v46 = vld [vmem:[%s1865_s29 + $0x2e0] sm:$0xff]  ;;  %v463_v47 = vld [vmem:[%s1865_s29 + $0x2f0] sm:$0xff] }
  0x27   : > { %416 = vst [vmem:[%s1870_s30 + $0xb8] sm:$0xff] %v415_v23  ;;  %v465_v48 = vld [vmem:[%s1865_s29 + $0x300] sm:$0xff]  ;;  %v467_v49 = vld [vmem:[%s1865_s29 + $0x310] sm:$0xff] }
  0x28   : > { %418 = vst [vmem:[%s1870_s30 + $0xc0] sm:$0xff] %v417_v24  ;;  %v469_v50 = vld [vmem:[%s1865_s29 + $0x320] sm:$0xff]  ;;  %v471_v51 = vld [vmem:[%s1865_s29 + $0x330] sm:$0xff] }
  0x29   : > { %420 = vst [vmem:[%s1870_s30 + $0xc8] sm:$0xff] %v419_v25  ;;  %v473_v52 = vld [vmem:[%s1865_s29 + $0x340] sm:$0xff]  ;;  %v475_v53 = vld [vmem:[%s1865_s29 + $0x350] sm:$0xff] }
  0x2a   : > { %422 = vst [vmem:[%s1870_s30 + $0xd0] sm:$0xff] %v421_v26  ;;  %v477_v54 = vld [vmem:[%s1865_s29 + $0x360] sm:$0xff]  ;;  %v479_v55 = vld [vmem:[%s1865_s29 + $0x370] sm:$0xff] }
  0x2b   : > { %424 = vst [vmem:[%s1870_s30 + $0xd8] sm:$0xff] %v423_v27  ;;  %v481_v56 = vld [vmem:[%s1865_s29 + $0x380] sm:$0xff]  ;;  %v483_v57 = vld [vmem:[%s1865_s29 + $0x390] sm:$0xff] }
  0x2c   : > { %426 = vst [vmem:[%s1870_s30 + $0xe0] sm:$0xff] %v425_v28  ;;  %v485_v58 = vld [vmem:[%s1865_s29 + $0x3a0] sm:$0xff]  ;;  %v487_v59 = vld [vmem:[%s1865_s29 + $0x3b0] sm:$0xff] }
  0x2d   : > { %428 = vst [vmem:[%s1870_s30 + $0xe8] sm:$0xff] %v427_v29  ;;  %v489_v60 = vld [vmem:[%s1865_s29 + $0x3c0] sm:$0xff]  ;;  %v491_v61 = vld [vmem:[%s1865_s29 + $0x3d0] sm:$0xff] }
  0x2e   : > { %430 = vst [vmem:[%s1870_s30 + $0xf0] sm:$0xff] %v429_v30  ;;  %v493_v62 = vld [vmem:[%s1865_s29 + $0x3e0] sm:$0xff]  ;;  %v495_v63 = vld [vmem:[%s1865_s29 + $0x3f0] sm:$0xff] }
  0x2f   : > { %432 = vst [vmem:[%s1870_s30 + $0xf8] sm:$0xff] %v431_v31 }
  0x30   : > { %434 = vst [vmem:[%s1870_s30 + $0x100] sm:$0xff] %v433_v32 }
  0x31   : > { %436 = vst [vmem:[%s1870_s30 + $0x108] sm:$0xff] %v435_v33 }
  0x32   : > { %438 = vst [vmem:[%s1870_s30 + $0x110] sm:$0xff] %v437_v34 }
  0x33   : > { %440 = vst [vmem:[%s1870_s30 + $0x118] sm:$0xff] %v439_v35 }
  0x34   : > { %442 = vst [vmem:[%s1870_s30 + $0x120] sm:$0xff] %v441_v36 }
  0x35   : > { %444 = vst [vmem:[%s1870_s30 + $0x128] sm:$0xff] %v443_v37 }
  0x36   : > { %446 = vst [vmem:[%s1870_s30 + $0x130] sm:$0xff] %v445_v38 }
  0x37   : > { %448 = vst [vmem:[%s1870_s30 + $0x138] sm:$0xff] %v447_v39 }
  0x38   : > { %450 = vst [vmem:[%s1870_s30 + $0x140] sm:$0xff] %v449_v40 }
  0x39   : > { %452 = vst [vmem:[%s1870_s30 + $0x148] sm:$0xff] %v451_v41 }
  0x3a   : > { %454 = vst [vmem:[%s1870_s30 + $0x150] sm:$0xff] %v453_v42 }
  0x3b   : > { %456 = vst [vmem:[%s1870_s30 + $0x158] sm:$0xff] %v455_v43 }
  0x3c   : > { %458 = vst [vmem:[%s1870_s30 + $0x160] sm:$0xff] %v457_v44 }
  0x3d   : > { %460 = vst [vmem:[%s1870_s30 + $0x168] sm:$0xff] %v459_v45 }
  0x3e   : > { %462 = vst [vmem:[%s1870_s30 + $0x170] sm:$0xff] %v461_v46 }
  0x3f   : > { %464 = vst [vmem:[%s1870_s30 + $0x178] sm:$0xff] %v463_v47 }
  0x40   : > { %466 = vst [vmem:[%s1870_s30 + $0x180] sm:$0xff] %v465_v48 }
  0x41   : > { %468 = vst [vmem:[%s1870_s30 + $0x188] sm:$0xff] %v467_v49 }
  0x42   : > { %470 = vst [vmem:[%s1870_s30 + $0x190] sm:$0xff] %v469_v50 }
  0x43   : > { %472 = vst [vmem:[%s1870_s30 + $0x198] sm:$0xff] %v471_v51 }
  0x44   : > { %474 = vst [vmem:[%s1870_s30 + $0x1a0] sm:$0xff] %v473_v52 }
  0x45   : > { %476 = vst [vmem:[%s1870_s30 + $0x1a8] sm:$0xff] %v475_v53 }
  0x46   : > { %478 = vst [vmem:[%s1870_s30 + $0x1b0] sm:$0xff] %v477_v54 }
  0x47   : > { %480 = vst [vmem:[%s1870_s30 + $0x1b8] sm:$0xff] %v479_v55 }
  0x48   : > { %482 = vst [vmem:[%s1870_s30 + $0x1c0] sm:$0xff] %v481_v56 }
  0x49   : > { %484 = vst [vmem:[%s1870_s30 + $0x1c8] sm:$0xff] %v483_v57 }
  0x4a   : > { %486 = vst [vmem:[%s1870_s30 + $0x1d0] sm:$0xff] %v485_v58 }
  0x4b   : > { %488 = vst [vmem:[%s1870_s30 + $0x1d8] sm:$0xff] %v487_v59 }
  0x4c   : > { %490 = vst [vmem:[%s1870_s30 + $0x1e0] sm:$0xff] %v489_v60 }
  0x4d   : > { %492 = vst [vmem:[%s1870_s30 + $0x1e8] sm:$0xff] %v491_v61 }
  0x4e   : > { %494 = vst [vmem:[%s1870_s30 + $0x1f0] sm:$0xff] %v493_v62 }
  0x4f   : > { %496 = vst [vmem:[%s1870_s30 + $0x1f8] sm:$0xff] %v495_v63 }
  0x50 PF: > { %p1388_p6 = scmp.ge.s32.totalorder %s1795_s19, 1  ;;  %p501_p7 = scmp.lt.s32.totalorder %s1795_s19, 3 }
  0x52   : > { %p502_p8 = pnand %p1388_p6, %p501_p7 }
  0x53   : > { %s508_s5 = sand.u32 (!%p502_p8), 1, %s1779_s15   ;;  %s1390_s10 = sshll.u32 (!%p502_p8), %s1787_s17, 1 }
  0x54   : > { %505 = sbr.rel (%p502_p8) target bundleno = 330 (0x14a), region = 62  ;;  %s1389_s6 = sshll.u32 (!%p502_p8), %s508_s5, 9 }
  0x55   : > { %s2000_s7 = scalar_lea.vmem (!%p502_p8), [#allocation3], %s1389_s6  ;;  %p577_p9 = scmp.lt.s32.totalorder (!%p502_p8), %s1390_s10, 3 }
  0x59   : > { %v1452_v0 = vld [vmem:[%s2000_s7 + $0x70] sm:$0xf]  ;;  %v1668_v1 = vld [vmem:[%s2000_s7 + $0x74] sm:$0xf0]  ;;  %v1444_v11 = vld [vmem:[%s2000_s7 + $0x60] sm:$0xf] }
  0x5a   : > { %v1516_v2 = vld [vmem:[%s2000_s7 + $0xf0] sm:$0xf]  ;;  %v1453_v3 = vor.u32 %v1668_v1, %v1452_v0  ;;  %v1684_v4 = vld [vmem:[%s2000_s7 + $0xf4] sm:$0xf0]  ;;  %v1666_v13 = vld [vmem:[%s2000_s7 + $0x64] sm:$0xf0] }
  0x5b   : > { %v1580_v5 = vld [vmem:[%s2000_s7 + $0x170] sm:$0xf]  ;;  %v1700_v6 = vld [vmem:[%s2000_s7 + $0x174] sm:$0xf0]  ;;  %v1517_v7 = vor.u32 %v1684_v4, %v1516_v2  ;;  %v1508_v14 = vld [vmem:[%s2000_s7 + $0xe0] sm:$0xf]  ;;  %v1445_v16 = vor.u32 %v1666_v13, %v1444_v11 }
  0x5c   : > { %v1581_v8 = vor.u32 %v1700_v6, %v1580_v5  ;;  %v1644_v9 = vld [vmem:[%s2000_s7 + $0x1f0] sm:$0xf]  ;;  %v1716_v10 = vld [vmem:[%s2000_s7 + $0x1f4] sm:$0xf0]  ;;  %1003 = vmatpush.bf16.msra.mxu0 %v1453_v3  ;;  %v1682_v15 = vld [vmem:[%s2000_s7 + $0xe4] sm:$0xf0] }
  0x5d   : > { %v1645_v12 = vor.u32 %v1716_v10, %v1644_v9  ;;  %1016 = vmatpush.bf16.msra.mxu1 %v1517_v7  ;;  %v1509_v17 = vor.u32 %v1682_v15, %v1508_v14  ;;  %v1572_v18 = vld [vmem:[%s2000_s7 + $0x160] sm:$0xf]  ;;  %v1698_v19 = vld [vmem:[%s2000_s7 + $0x164] sm:$0xf0]  ;;  %v1436_v23 = vld [vmem:[%s2000_s7 + $0x50] sm:$0xf] }
  0x5e   : > { %1029 = vmatpush.bf16.msra.mxu2 %v1581_v8  ;;  %v1636_v20 = vld [vmem:[%s2000_s7 + $0x1e0] sm:$0xf]  ;;  %v1573_v21 = vor.u32 %v1698_v19, %v1572_v18  ;;  %v1714_v22 = vld [vmem:[%s2000_s7 + $0x1e4] sm:$0xf0]  ;;  %v1664_v24 = vld [vmem:[%s2000_s7 + $0x54] sm:$0xf0] }
  0x5f   : > { %1042 = vmatpush.bf16.msra.mxu3 %v1645_v12  ;;  %v1637_v25 = vor.u32 %v1714_v22, %v1636_v20  ;;  %v1500_v26 = vld [vmem:[%s2000_s7 + $0xd0] sm:$0xf]  ;;  %v1680_v27 = vld [vmem:[%s2000_s7 + $0xd4] sm:$0xf0]  ;;  %v1437_v29 = vor.u32 %v1664_v24, %v1436_v23  ;;  %v1428_v35 = vld [vmem:[%s2000_s7 + $0x40] sm:$0xf] }
  0x60   : > { %v1564_v28 = vld [vmem:[%s2000_s7 + $0x150] sm:$0xf]  ;;  %1004 = vmatpush.bf16.msra.mxu0 %v1445_v16  ;;  %v1696_v30 = vld [vmem:[%s2000_s7 + $0x154] sm:$0xf0]  ;;  %v1501_v33 = vor.u32 %v1680_v27, %v1500_v26  ;;  %v1662_v36 = vld [vmem:[%s2000_s7 + $0x44] sm:$0xf0] }
  0x61   : > { %v1628_v31 = vld [vmem:[%s2000_s7 + $0x1d0] sm:$0xf]  ;;  %v1712_v32 = vld [vmem:[%s2000_s7 + $0x1d4] sm:$0xf0]  ;;  %1017 = vmatpush.bf16.msra.mxu1 %v1509_v17  ;;  %v1565_v34 = vor.u32 %v1696_v30, %v1564_v28  ;;  %v1492_v37 = vld [vmem:[%s2000_s7 + $0xc0] sm:$0xf]  ;;  %v1429_v44 = vor.u32 %v1662_v36, %v1428_v35 }
  0x62   : > { %1030 = vmatpush.bf16.msra.mxu2 %v1573_v21  ;;  %v1629_v38 = vor.u32 %v1712_v32, %v1628_v31  ;;  %v1678_v39 = vld [vmem:[%s2000_s7 + $0xc4] sm:$0xf0]  ;;  %v1556_v40 = vld [vmem:[%s2000_s7 + $0x140] sm:$0xf]  ;;  %v1420_v47 = vld [vmem:[%s2000_s7 + $0x30] sm:$0xf] }
  0x63   : > { %1043 = vmatpush.bf16.msra.mxu3 %v1637_v25  ;;  %v1694_v41 = vld [vmem:[%s2000_s7 + $0x144] sm:$0xf0]  ;;  %v1620_v42 = vld [vmem:[%s2000_s7 + $0x1c0] sm:$0xf]  ;;  %v1493_v45 = vor.u32 %v1678_v39, %v1492_v37  ;;  %v1660_v48 = vld [vmem:[%s2000_s7 + $0x34] sm:$0xf0] }
  0x64   : > { %v1710_v43 = vld [vmem:[%s2000_s7 + $0x1c4] sm:$0xf0]  ;;  %1005 = vmatpush.bf16.msra.mxu0 %v1437_v29  ;;  %v1557_v46 = vor.u32 %v1694_v41, %v1556_v40  ;;  %v1484_v49 = vld [vmem:[%s2000_s7 + $0xb0] sm:$0xf]  ;;  %v1676_v51 = vld [vmem:[%s2000_s7 + $0xb4] sm:$0xf0]  ;;  %v1421_v56 = vor.u32 %v1660_v48, %v1420_v47 }
  0x65   : > { %1018 = vmatpush.bf16.msra.mxu1 %v1501_v33  ;;  %v1621_v50 = vor.u32 %v1710_v43, %v1620_v42  ;;  %v1548_v52 = vld [vmem:[%s2000_s7 + $0x130] sm:$0xf]  ;;  %v1692_v53 = vld [vmem:[%s2000_s7 + $0x134] sm:$0xf0]  ;;  %v1485_v57 = vor.u32 %v1676_v51, %v1484_v49  ;;  %v1412_v59 = vld [vmem:[%s2000_s7 + $0x20] sm:$0xf] }
  0x66   : > { %1031 = vmatpush.bf16.msra.mxu2 %v1565_v34  ;;  %v1612_v54 = vld [vmem:[%s2000_s7 + $0x1b0] sm:$0xf]  ;;  %v1708_v55 = vld [vmem:[%s2000_s7 + $0x1b4] sm:$0xf0]  ;;  %v1549_v58 = vor.u32 %v1692_v53, %v1548_v52  ;;  %v1658_v60 = vld [vmem:[%s2000_s7 + $0x24] sm:$0xf0] }
  0x67   : > { %1044 = vmatpush.bf16.msra.mxu3 %v1629_v38  ;;  %v1476_v61 = vld [vmem:[%s2000_s7 + $0xa0] sm:$0xf]  ;;  %v1613_v62 = vor.u32 %v1708_v55, %v1612_v54  ;;  %v1674_v63 = vld [vmem:[%s2000_s7 + $0xa4] sm:$0xf0]  ;;  %v1413_v4 = vor.u32 %v1658_v60, %v1412_v59  ;;  %v1404_v7 = vld [vmem:[%s2000_s7 + $0x10] sm:$0xf] }
  0x68   : > { %1006 = vmatpush.bf16.msra.mxu0 %v1429_v44  ;;  %v1540_v0 = vld [vmem:[%s2000_s7 + $0x120] sm:$0xf]  ;;  %v1690_v1 = vld [vmem:[%s2000_s7 + $0x124] sm:$0xf0]  ;;  %v1477_v5 = vor.u32 %v1674_v63, %v1476_v61  ;;  %v1656_v8 = vld [vmem:[%s2000_s7 + $0x14] sm:$0xf0] }
  0x69   : > { %1019 = vmatpush.bf16.msra.mxu1 %v1493_v45  ;;  %v1604_v2 = vld [vmem:[%s2000_s7 + $0x1a0] sm:$0xf]  ;;  %v1706_v3 = vld [vmem:[%s2000_s7 + $0x1a4] sm:$0xf0]  ;;  %v1541_v6 = vor.u32 %v1690_v1, %v1540_v0  ;;  %v1468_v9 = vld [vmem:[%s2000_s7 + $0x90] sm:$0xf]  ;;  %v1405_v17 = vor.u32 %v1656_v8, %v1404_v7 }
  0x6a   : > { %1032 = vmatpush.bf16.msra.mxu2 %v1557_v46  ;;  %v1605_v10 = vor.u32 %v1706_v3, %v1604_v2  ;;  %v1672_v11 = vld [vmem:[%s2000_s7 + $0x94] sm:$0xf0]  ;;  %v1532_v12 = vld [vmem:[%s2000_s7 + $0x110] sm:$0xf]  ;;  %v1396_v16 = vld [vmem:[%s2000_s7] sm:$0xf] }
  0x6b   : > { %1045 = vmatpush.bf16.msra.mxu3 %v1621_v50  ;;  %v1688_v13 = vld [vmem:[%s2000_s7 + $0x114] sm:$0xf0]  ;;  %v1596_v14 = vld [vmem:[%s2000_s7 + $0x190] sm:$0xf]  ;;  %v1654_v18 = vld [vmem:[%s2000_s7 + $0x4] sm:$0xf0]  ;;  %v1469_v21 = vor.u32 %v1672_v11, %v1468_v9 }
  0x6c   : > { %1007 = vmatpush.bf16.msra.mxu0 %v1421_v56  ;;  %v1704_v15 = vld [vmem:[%s2000_s7 + $0x194] sm:$0xf0]  ;;  %v1460_v19 = vld [vmem:[%s2000_s7 + $0x80] sm:$0xf]  ;;  %v1670_v20 = vld [vmem:[%s2000_s7 + $0x84] sm:$0xf0]  ;;  %v1533_v22 = vor.u32 %v1688_v13, %v1532_v12  ;;  %v1397_v33 = vor.u32 %v1654_v18, %v1396_v16 }
  0x6d   : > { %1020 = vmatpush.bf16.msra.mxu1 %v1485_v57  ;;  %v1524_v23 = vld [vmem:[%s2000_s7 + $0x100] sm:$0xf]  ;;  %v1686_v24 = vld [vmem:[%s2000_s7 + $0x104] sm:$0xf0]  ;;  %v1597_v26 = vor.u32 %v1704_v15, %v1596_v14  ;;  %v1667_v28 = vld [vmem:[%s2000_s7 + $0x74] sm:$0xf]  ;;  %v1461_v36 = vor.u32 %v1670_v20, %v1460_v19 }
  0x6e   : > { %1033 = vmatpush.bf16.msra.mxu2 %v1549_v58  ;;  %v1588_v25 = vld [vmem:[%s2000_s7 + $0x180] sm:$0xf]  ;;  %v1702_v27 = vld [vmem:[%s2000_s7 + $0x184] sm:$0xf0]  ;;  %v1454_v29 = vld [vmem:[%s2000_s7 + $0x78] sm:$0xf0]  ;;  %v1525_v37 = vor.u32 %v1686_v24, %v1524_v23 }
  0x6f   : > { %1046 = vmatpush.bf16.msra.mxu3 %v1613_v62  ;;  %v1683_v30 = vld [vmem:[%s2000_s7 + $0xf4] sm:$0xf]  ;;  %v1518_v31 = vld [vmem:[%s2000_s7 + $0xf8] sm:$0xf0]  ;;  %v1589_v40 = vor.u32 %v1702_v27, %v1588_v25  ;;  %v1457_v41 = vor.u32 %v1667_v28, %v1454_v29  ;;  %v1665_v42 = vld [vmem:[%s2000_s7 + $0x64] sm:$0xf] }
  0x70   : > { %1008 = vmatpush.bf16.msra.mxu0 %v1413_v4  ;;  %v608_v32 = vld [vmem:[%s2194_s0] sm:$0xff]  ;;  %v1699_v34 = vld [vmem:[%s2000_s7 + $0x174] sm:$0xf]  ;;  %v1521_v43 = vor.u32 %v1683_v30, %v1518_v31  ;;  %v1446_v45 = vld [vmem:[%s2000_s7 + $0x68] sm:$0xf0]  ;;  %s2208_s10 = smov (!%p577_p9, %s1390_s10), 3 }
  0x71   : > { %1021 = vmatpush.bf16.msra.mxu1 %v1477_v5  ;;  %v1582_v35 = vld [vmem:[%s2000_s7 + $0x178] sm:$0xf0]  ;;  %674 = vst [vmem:[#allocation1] ss:$4 sm:$0xff] %v608_v32  ;;  %v1715_v38 = vld [vmem:[%s2000_s7 + $0x1f4] sm:$0xf]  ;;  %v1449_v55 = vor.u32 %v1665_v42, %v1446_v45  ;;  %s591_s21 = scalar_lea.vmem %s2197_s3, %s2208_s10  ;;  %s600_s25 = scalar_lea.vmem %s2198_s4, %s2208_s10 }
  0x72   : > { %1034 = vmatpush.bf16.msra.mxu2 %v1541_v6  ;;  %v1646_v39 = vld [vmem:[%s2000_s7 + $0x1f8] sm:$0xf0]  ;;  %v1585_v44 = vor.u32 %v1699_v34, %v1582_v35  ;;  %v1681_v46 = vld [vmem:[%s2000_s7 + $0xe4] sm:$0xf]  ;;  %v1510_v47 = vld [vmem:[%s2000_s7 + $0xe8] sm:$0xf0] }
  0x73   : > { %1047 = vmatpush.bf16.msra.mxu3 %v1605_v10  ;;  %v1649_v48 = vor.u32 %v1715_v38, %v1646_v39  ;;  %v1697_v49 = vld [vmem:[%s2000_s7 + $0x164] sm:$0xf]  ;;  %v1574_v50 = vld [vmem:[%s2000_s7 + $0x168] sm:$0xf0]  ;;  %v1663_v53 = vld [vmem:[%s2000_s7 + $0x54] sm:$0xf]  ;;  %v1513_v60 = vor.u32 %v1681_v46, %v1510_v47 }
  0x74   : > { %1009 = vmatpush.bf16.msra.mxu0 %v1405_v17  ;;  %v1713_v51 = vld [vmem:[%s2000_s7 + $0x1e4] sm:$0xf]  ;;  %v1638_v52 = vld [vmem:[%s2000_s7 + $0x1e8] sm:$0xf0]  ;;  %v1438_v54 = vld [vmem:[%s2000_s7 + $0x58] sm:$0xf0]  ;;  %v1577_v61 = vor.u32 %v1697_v49, %v1574_v50 }
  0x75   : > { %1022 = vmatpush.bf16.msra.mxu1 %v1469_v21  ;;  %v1679_v56 = vld [vmem:[%s2000_s7 + $0xd4] sm:$0xf]  ;;  %v1502_v57 = vld [vmem:[%s2000_s7 + $0xd8] sm:$0xf0]  ;;  %v1641_v0 = vor.u32 %v1713_v51, %v1638_v52  ;;  %v1441_v5 = vor.u32 %v1663_v53, %v1438_v54  ;;  %v1661_v8 = vld [vmem:[%s2000_s7 + $0x44] sm:$0xf] }
  0x76   : > { %1035 = vmatpush.bf16.msra.mxu2 %v1533_v22  ;;  %v1695_v58 = vld [vmem:[%s2000_s7 + $0x154] sm:$0xf]  ;;  %v1566_v59 = vld [vmem:[%s2000_s7 + $0x158] sm:$0xf0]  ;;  %v1505_v6 = vor.u32 %v1679_v56, %v1502_v57  ;;  %v1430_v9 = vld [vmem:[%s2000_s7 + $0x48] sm:$0xf0] }
  0x77   : > { %1048 = vmatpush.bf16.msra.mxu3 %v1597_v26  ;;  %v1711_v3 = vld [vmem:[%s2000_s7 + $0x1d4] sm:$0xf]  ;;  %v1630_v4 = vld [vmem:[%s2000_s7 + $0x1d8] sm:$0xf0]  ;;  %v1569_v7 = vor.u32 %v1695_v58, %v1566_v59  ;;  %v1677_v10 = vld [vmem:[%s2000_s7 + $0xc4] sm:$0xf]  ;;  %v1433_v17 = vor.u32 %v1661_v8, %v1430_v9 }
  0x78   : > { %1010 = vmatpush.bf16.msra.mxu0 %v1397_v33  ;;  %v2091_v62 = vld.sshfl [vmem:[#allocation1 + $0x10] sm:$0xff pattern:$0x73625140]  ;;  %v2093_v63 = vld.sshfl [vmem:[#allocation1 + $0x18] sm:$0xff pattern:$0x73625140]  ;;  %v1633_v11 = vor.u32 %v1711_v3, %v1630_v4 }
  0x79   : > { %1023 = vmatpush.bf16.msra.mxu1 %v1461_v36  ;;  %v2096_v1 = vld.sshfl [vmem:[#allocation1] sm:$0xff pattern:$0x73625140]  ;;  %v2098_v2 = vld.sshfl [vmem:[#allocation1 + $0x8] sm:$0xff pattern:$0x73625140] }
  0x7a   : > { %1036 = vmatpush.bf16.msra.mxu2 %v1525_v37  ;;  %v1494_v12 = vld [vmem:[%s2000_s7 + $0xc8] sm:$0xf0]  ;;  %v1693_v13 = vld [vmem:[%s2000_s7 + $0x144] sm:$0xf]  ;;  %v1659_v20 = vld [vmem:[%s2000_s7 + $0x34] sm:$0xf] }
  0x7b   : > { %1049 = vmatpush.bf16.msra.mxu3 %v1589_v40  ;;  %1011 = vmatmul.bf16.vlgmr.msra.gmra.mxu0 %v2096_v1  ;;  %v1558_v14 = vld [vmem:[%s2000_s7 + $0x148] sm:$0xf0]  ;;  %v1709_v15 = vld [vmem:[%s2000_s7 + $0x1c4] sm:$0xf]  ;;  %v1497_v18 = vor.u32 %v1677_v10, %v1494_v12  ;;  %v1422_v21 = vld [vmem:[%s2000_s7 + $0x38] sm:$0xf0] }
  0x7c   : > { %1055 = vmatpush.bf16.msrb.mxu0 %v1457_v41  ;;  %1024 = vmatmul.bf16.vlgmr.msra.gmra.mxu1 %v2098_v2  ;;  %v1622_v16 = vld [vmem:[%s2000_s7 + $0x1c8] sm:$0xf0]  ;;  %v1561_v19 = vor.u32 %v1693_v13, %v1558_v14  ;;  %v1675_v22 = vld [vmem:[%s2000_s7 + $0xb4] sm:$0xf]  ;;  %v1486_v24 = vld [vmem:[%s2000_s7 + $0xb8] sm:$0xf0]  ;;  %v1425_v29 = vor.u32 %v1659_v20, %v1422_v21 }
  0x7d   : > { %1068 = vmatpush.bf16.msrb.mxu1 %v1521_v43  ;;  %1037 = vmatmul.bf16.vlgmr.msra.gmra.mxu2 %v2091_v62  ;;  %v1625_v23 = vor.u32 %v1709_v15, %v1622_v16  ;;  %v1691_v25 = vld [vmem:[%s2000_s7 + $0x134] sm:$0xf]  ;;  %v1550_v26 = vld [vmem:[%s2000_s7 + $0x138] sm:$0xf0]  ;;  %v1489_v30 = vor.u32 %v1675_v22, %v1486_v24  ;;  %v1657_v32 = vld [vmem:[%s2000_s7 + $0x24] sm:$0xf] }
  0x7e   : > { %1081 = vmatpush.bf16.msrb.mxu2 %v1585_v44  ;;  %1050 = vmatmul.bf16.vlgmr.msra.gmra.mxu3 %v2093_v63  ;;  %v1707_v27 = vld [vmem:[%s2000_s7 + $0x1b4] sm:$0xf]  ;;  %v1614_v28 = vld [vmem:[%s2000_s7 + $0x1b8] sm:$0xf0]  ;;  %v1553_v31 = vor.u32 %v1691_v25, %v1550_v26  ;;  %v1414_v33 = vld [vmem:[%s2000_s7 + $0x28] sm:$0xf0] }
  0x7f   : > { %1094 = vmatpush.bf16.msrb.mxu3 %v1649_v48  ;;  %v1673_v34 = vld [vmem:[%s2000_s7 + $0xa4] sm:$0xf]  ;;  %v1617_v35 = vor.u32 %v1707_v27, %v1614_v28  ;;  %v1478_v36 = vld [vmem:[%s2000_s7 + $0xa8] sm:$0xf0]  ;;  %v1417_v41 = vor.u32 %v1657_v32, %v1414_v33  ;;  %v1655_v44 = vld [vmem:[%s2000_s7 + $0x14] sm:$0xf] }
  0x80   : > { %1056 = vmatpush.bf16.msrb.mxu0 %v1449_v55  ;;  %v1689_v37 = vld [vmem:[%s2000_s7 + $0x124] sm:$0xf]  ;;  %v1542_v38 = vld [vmem:[%s2000_s7 + $0x128] sm:$0xf0]  ;;  %v1481_v42 = vor.u32 %v1673_v34, %v1478_v36  ;;  %v1406_v45 = vld [vmem:[%s2000_s7 + $0x18] sm:$0xf0] }
  0x81   : > { %1069 = vmatpush.bf16.msrb.mxu1 %v1513_v60  ;;  %v1705_v39 = vld [vmem:[%s2000_s7 + $0x1a4] sm:$0xf]  ;;  %v1606_v40 = vld [vmem:[%s2000_s7 + $0x1a8] sm:$0xf0]  ;;  %v1545_v43 = vor.u32 %v1689_v37, %v1542_v38  ;;  %v1671_v46 = vld [vmem:[%s2000_s7 + $0x94] sm:$0xf]  ;;  %v1409_v53 = vor.u32 %v1655_v44, %v1406_v45  ;;  %v1146_v44 = vlaneseq }
  0x82   : > { %1082 = vmatpush.bf16.msrb.mxu2 %v1577_v61  ;;  %v1609_v47 = vor.u32 %v1705_v39, %v1606_v40  ;;  %v1470_v48 = vld [vmem:[%s2000_s7 + $0x98] sm:$0xf0]  ;;  %v1687_v49 = vld [vmem:[%s2000_s7 + $0x114] sm:$0xf]  ;;  %v1653_v56 = vld [vmem:[%s2000_s7 + $0x4] sm:$0xf] }
  0x83   : > { %1095 = vmatpush.bf16.msrb.mxu3 %v1641_v0  ;;  %v1534_v50 = vld [vmem:[%s2000_s7 + $0x118] sm:$0xf0]  ;;  %v1703_v51 = vld [vmem:[%s2000_s7 + $0x194] sm:$0xf]  ;;  %v1473_v54 = vor.u32 %v1671_v46, %v1470_v48  ;;  %v1398_v57 = vld [vmem:[%s2000_s7 + $0x8] sm:$0xf0] }
  0x84   : > { %1057 = vmatpush.bf16.msrb.mxu0 %v1441_v5  ;;  %v1598_v52 = vld [vmem:[%s2000_s7 + $0x198] sm:$0xf0]  ;;  %v1537_v55 = vor.u32 %v1687_v49, %v1534_v50  ;;  %v1669_v58 = vld [vmem:[%s2000_s7 + $0x84] sm:$0xf]  ;;  %v1462_v60 = vld [vmem:[%s2000_s7 + $0x88] sm:$0xf0]  ;;  %v1401_v5 = vor.u32 %v1653_v56, %v1398_v57 }
  0x85   : > { %1070 = vmatpush.bf16.msrb.mxu1 %v1505_v6  ;;  %v1601_v59 = vor.u32 %v1703_v51, %v1598_v52  ;;  %v1685_v61 = vld [vmem:[%s2000_s7 + $0x104] sm:$0xf]  ;;  %v1526_v0 = vld [vmem:[%s2000_s7 + $0x108] sm:$0xf0]  ;;  %v1465_v6 = vor.u32 %v1669_v58, %v1462_v60  ;;  %s1391_s11 = sshll.u32 %s2208_s10, 2  ;;  %vm1110_vm0 = vcmask 1043456  }
  0x86   : > { %1083 = vmatpush.bf16.msrb.mxu2 %v1569_v7  ;;  %v1701_v3 = vld [vmem:[%s2000_s7 + $0x184] sm:$0xf]  ;;  %v1590_v4 = vld [vmem:[%s2000_s7 + $0x188] sm:$0xf0]  ;;  %v1529_v7 = vor.u32 %v1685_v61, %v1526_v0  ;;  %s582_s14 = scalar_lea.vmem %s2196_s2, %s1391_s11  ;;  %vm1143_vm1 = vcmask 1040384   ;;  %vm2161_vm2 = vcmp.lt.s32.totalorder %v1146_v44, 256 }
  0x87   : > { %1096 = vmatpush.bf16.msrb.mxu3 %v1633_v11  ;;  %v1593_v8 = vor.u32 %v1701_v3, %v1590_v4 }
  0x88   : > { %1058 = vmatpush.bf16.msrb.mxu0 %v1433_v17 }
  0x89   : > { %1071 = vmatpush.bf16.msrb.mxu1 %v1497_v18 }
  0x8a   : > { %1084 = vmatpush.bf16.msrb.mxu2 %v1561_v19 }
  0x8b   : > { %1097 = vmatpush.bf16.msrb.mxu3 %v1625_v23 }
  0x8c   : > { %1059 = vmatpush.bf16.msrb.mxu0 %v1425_v29 }
  0x8d   : > { %1072 = vmatpush.bf16.msrb.mxu1 %v1489_v30 }
  0x8e   : > { %1085 = vmatpush.bf16.msrb.mxu2 %v1553_v31 }
  0x8f   : > { %1098 = vmatpush.bf16.msrb.mxu3 %v1617_v35 }
  0x90   : > { %1060 = vmatpush.bf16.msrb.mxu0 %v1417_v41 }
  0x91   : > { %1073 = vmatpush.bf16.msrb.mxu1 %v1481_v42 }
  0x92   : > { %1086 = vmatpush.bf16.msrb.mxu2 %v1545_v43 }
  0x93   : > { %1099 = vmatpush.bf16.msrb.mxu3 %v1609_v47 }
  0x94   : > { %1061 = vmatpush.bf16.msrb.mxu0 %v1409_v53 }
  0x95   : > { %1074 = vmatpush.bf16.msrb.mxu1 %v1473_v54 }
  0x96   : > { %1087 = vmatpush.bf16.msrb.mxu2 %v1537_v55 }
  0x97   : > { %1100 = vmatpush.bf16.msrb.mxu3 %v1601_v59 }
  0x98   : > { %1062 = vmatpush.bf16.msrb.mxu0 %v1401_v5 }
  0x99   : > { %1075 = vmatpush.bf16.msrb.mxu1 %v1465_v6 }
  0x9a   : > { %1088 = vmatpush.bf16.msrb.mxu2 %v1529_v7 }
  0x9b   : > { %1101 = vmatpush.bf16.msrb.mxu3 %v1593_v8  ;;  %1063 = vmatmul.bf16.vlgmr.msrb.gmra.mxu0 %v2096_v1 }
  0x9c   : > { %1076 = vmatmul.bf16.vlgmr.msrb.gmra.mxu1 %v2098_v2 }
  0x9d   : > { %1089 = vmatmul.bf16.vlgmr.msrb.gmra.mxu2 %v2091_v62 }
  0x9e   : > { %1102 = vmatmul.bf16.vlgmr.msrb.gmra.mxu3 %v2093_v63 }
  0xf8   : > { %v1012_v9 = vpop.f32.mrf.mxu0 }
  0xf9   : > { %v1025_v10 = vpop.f32.mrf.mxu1 }
  0xfa   : > { %v1026_v19 = vadd.f32 %v1025_v10, %v1012_v9 }
 0x100   : > { %v1038_v11 = vpop.f32.mrf.mxu2  ;;  %v1014_v13 = vpop.f32.mrf.mxu0 }
 0x101   : > { %v1051_v12 = vpop.f32.mrf.mxu3  ;;  %v1027_v14 = vpop.f32.mrf.mxu1  ;;  %v1039_v2 = vadd.f32 %v1038_v11, %v1026_v19 }
 0x103   : > { %v1052_v24 = vadd.f32 %v1051_v12, %v1039_v2 }
 0x108   : > { %v1040_v15 = vpop.f32.mrf.mxu2 }
 0x109   : > { %v1053_v16 = vpop.f32.mrf.mxu3 }
 0x118   : > { %v1064_v17 = vpop.f32.mrf.mxu0 }
 0x119   : > { %v1077_v18 = vpop.f32.mrf.mxu1 }
 0x11a   : > { %v1078_v1 = vadd.f32 %v1077_v18, %v1064_v17 }
 0x120   : > { %v1090_v62 = vpop.f32.mrf.mxu2  ;;  %v1066_v21 = vpop.f32.mrf.mxu0 }
 0x121   : > { %v1091_v63 = vadd.f32 %v1090_v62, %v1078_v1  ;;  %v1103_v20 = vpop.f32.mrf.mxu3  ;;  %v1079_v22 = vpop.f32.mrf.mxu1 }
 0x123   : > { %v1104_v23 = vadd.f32 %v1103_v20, %v1091_v63 }
 0x125   : > { %v1109_v25 = vrot.slane %v1104_v23, 4 }
 0x127   : > { %v1111_v26 = vsel %vm1110_vm0, %v1052_v24, %v1109_v25 }
 0x128   : > { %1119 = vst [vmem:[%s582_s14] sm:$0xff] %v1111_v26  ;;  %v1092_v27 = vpop.f32.mrf.mxu2  ;;  %v1151_v29 = vmul.f32 %v1111_v26, %v1111_v26 }
 0x129   : > { %1121 = vst [vmem:[#allocation1] ss:$2 sm:$0xff] %v1111_v26  ;;  %v1105_v28 = vpop.f32.mrf.mxu3 }
 0x130   : > { %v1122_v30 = vld.sshfl [vmem:[#allocation1] sm:$0xff pattern:$0x75316420]  ;;  %v1123_v31 = vld.sshfl [vmem:[#allocation1 + $0x8] sm:$0xff pattern:$0x75316420] }
 0x131   : > { %v1126_v32 = vsel %vm1110_vm0, %v1122_v30, 0.0  ;;  %v1133_v33 = vsel %vm1110_vm0, %v1123_v31, 0.0  ;;  %1153 = vst [vmem:[#allocation1] ss:$2 sm:$0xff] %v1151_v29 }
 0x132   : > { %v1127_v34 = vrot.slane %v1126_v32, 4  ;;  %v1134_v35 = vrot.slane %v1133_v33, 4 }
 0x134   : > { %v1128_v36 = vadd.f32 %v1127_v34, %v1126_v32  ;;  %v1135_v37 = vadd.f32 %v1134_v35, %v1133_v33 }
 0x136   : > { %v1129_v38 = vrot.slane %v1128_v36, 2  ;;  %v1136_v39 = vrot.slane %v1135_v37, 2 }
 0x138   : > { %v1130_v40 = vadd.f32 %v1129_v38, %v1128_v36  ;;  %v1137_v41 = vadd.f32 %v1136_v39, %v1135_v37  ;;  %v1154_v42 = vld.sshfl [vmem:[#allocation1] sm:$0xff pattern:$0x75316420]  ;;  %v1155_v43 = vld.sshfl [vmem:[#allocation1 + $0x8] sm:$0xff pattern:$0x75316420] }
 0x139   : > { %v1158_v45 = vsel %vm1110_vm0, %v1154_v42, 0.0  ;;  %v1165_v46 = vsel %vm1110_vm0, %v1155_v43, 0.0 }
 0x13a   : > { %v1131_v47 = vrot.slane %v1130_v40, 1  ;;  %v1138_v48 = vrot.slane %v1137_v41, 1  ;;  %v1159_v49 = vrot.slane %v1158_v45, 4  ;;  %v1166_v50 = vrot.slane %v1165_v46, 4 }
 0x13c   : > { %v1139_v51 = vadd.f32 %v1138_v48, %v1137_v41  ;;  %v1160_v52 = vadd.f32 %v1159_v49, %v1158_v45  ;;  %v1167_v53 = vadd.f32 %v1166_v50, %v1165_v46  ;;  %v1132_v55 = vadd.f32 %v1131_v47, %v1130_v40 }
 0x13e   : > { %v1142_v56 = vrot.slane %v1139_v51, 7  ;;  %v1161_v57 = vrot.slane %v1160_v52, 2  ;;  %v1168_v58 = vrot.slane %v1167_v53, 2 }
 0x140   : > { %v1144_v59 = vsel %vm1143_vm1, %v1132_v55, %v1142_v56  ;;  %v1162_v60 = vadd.f32 %v1161_v57, %v1160_v52  ;;  %v1169_v61 = vadd.f32 %v1168_v58, %v1167_v53 }
 0x141   : > { %1150 = vst.msk [vmem:[%s591_s21] sm:$0x3] %vm2161_vm2, %v1144_v59 }
 0x142   : > { %v1163_v0 = vrot.slane %v1162_v60, 1  ;;  %v1170_v3 = vrot.slane %v1169_v61, 1 }
 0x144   : > { %v1171_v4 = vadd.f32 %v1170_v3, %v1169_v61  ;;  %v1164_v5 = vadd.f32 %v1163_v0, %v1162_v60 }
 0x146   : > { %v1174_v6 = vrot.slane %v1171_v4, 7 }
 0x148   : > { %v1175_v7 = vsel %vm1143_vm1, %v1164_v5, %v1174_v6 }
 0x149   : > { %1177 = vst.msk [vmem:[%s600_s25] sm:$0x3] %vm2161_vm2, %v1175_v7 }
 0x14a PF: > { %s15_s19 = sadd.s32 1, %s1795_s19   ;;  %s2201_s15 = smov %s1783_s16 }
 0x14b   : > { %p12_p10 = scmp.ge.s32.totalorder %s15_s19, 4   ;;  %s2202_s16 = smov %s1857_s23 }
 0x14c   : > { %s2203_s17 = smov %s1791_s18  ;;  %s2204_s18 = smov %s2206_s20 }
 0x14d   :  { %14 = sbr.rel (!%p12_p10) target bundleno = 3 (0x3), region = 136 }

// kernel: _lambda_.105
= control target key start
LH: loop header
LB: loop body
LE: loop exit
PB: predicated region body
PF: predicated region fallthrough
CT: control target
= control target key end

     0   :  { %vm23_vm0 = vcmask 1043456   ;;  %vm71_vm1 = vcmask 1045508   ;;  %vm67_vm2 = vcmask 1041408   ;;  %s122_s0 = inlined_call_operand.vmem [shape: f32[1,4,384], index: 0, kind: input, shape index: {}]   ;;  %s123_s1 = inlined_call_operand.vmem [shape: f32[1,384], index: 1, kind: input, shape index: {}]   ;;  %s124_s2 = inlined_call_operand.vmem [shape: f32[1,384], index: 2, kind: input, shape index: {}]   ;;  %s125_s3 = inlined_call_operand.vmem [shape: bf16[1,4,384], index: 3, kind: output, shape index: {}]  }
   0x1   :  { %v16_v0 = vld [vmem:[%s123_s1] sm:$0x7]  ;;  %v15_v6 = vld [vmem:[%s122_s0 + $0x8] sm:$0xf] }
   0x2   :  { %v28_v1 = vld [vmem:[%s124_s2] sm:$0x7]  ;;  %v18_v2 = vperm.slane %v16_v0, 0  ;;  %v19_v3 = vperm.slane %v16_v0, 1  ;;  %v20_v7 = vperm.slane %v16_v0, 2 }
   0x3   :  { %v30_v4 = vperm.slane %v28_v1, 0  ;;  %v31_v5 = vperm.slane %v28_v1, 1  ;;  %v32_v8 = vperm.slane %v28_v1, 2  ;;  %v14_v9 = vld [vmem:[%s122_s0] sm:$0xff] }
   0x4   :  { %v22_v10 = vrot.slane %v19_v3, 4  ;;  %v27_v12 = vmul.f32 %v20_v7, %v15_v6 }
   0x5   :  { %v34_v11 = vrot.slane %v31_v5, 4 }
   0x6   :  { %v24_v13 = vsel %vm23_vm0, %v18_v2, %v22_v10  ;;  %v38_v16 = vadd.f32 %v32_v8, %v27_v12 }
   0x7   :  { %v35_v14 = vsel %vm23_vm0, %v30_v4, %v34_v11  ;;  %v26_v15 = vmul.f32 %v24_v13, %v14_v9 }
   0x8   :  { %v83_v18 = vadd.f32 -1.0, %v38_v16 }
   0x9   :  { %v37_v17 = vadd.f32 %v35_v14, %v26_v15 }
   0xa   :  { %v42_v20 = vadd.f32 1.0, %v83_v18 }
   0xb   :  { %v82_v19 = vadd.f32 -1.0, %v37_v17 }
   0xc   :  { %v44_v22 = vfloor.f32 %v42_v20 }
   0xd   :  { %v41_v21 = vadd.f32 1.0, %v82_v19 }
   0xe   :  { %v46_v24 = vmax.f32 %v44_v22, 0.0 }
   0xf   :  { %v43_v23 = vfloor.f32 %v41_v21 }
  0x10   :  { %v48_v26 = vmin.f32 %v46_v24, 8.0 }
  0x11   :  { %v45_v25 = vmax.f32 %v43_v23, 0.0 }
  0x12   :  { %53 = vst [vmem:[#allocation1 + $0x10] ss:$2 sm:$0xff] %v48_v26 }
  0x13   :  { %v47_v27 = vmin.f32 %v45_v25, 8.0 }
  0x15   :  { %51 = vst [vmem:[#allocation1] ss:$2 sm:$0xff] %v47_v27 }
  0x19   :  { %v56_v28 = vld.sshfl [vmem:[#allocation1 + $0x10] sm:$0xff pattern:$0x75316420] }
  0x1a   :  { %v61_v29 = vpack.c.bf16 %v56_v28, %v56_v28 }
  0x1c   :  { %v54_v30 = vld.sshfl [vmem:[#allocation1] sm:$0xff pattern:$0x75316420]  ;;  %v55_v31 = vld.sshfl [vmem:[#allocation1 + $0x8] sm:$0xff pattern:$0x75316420] }
  0x1d   :  { %v60_v32 = vpack.c.bf16 %v55_v31, %v54_v30  ;;  %v65_v33 = vrot.slane %v61_v29, 4  ;;  %v66_v34 = vrot.slane %v61_v29, 6 }
  0x1f   :  { %v64_v35 = vrot.slane %v60_v32, 2  ;;  %v74_v36 = vsel %vm71_vm1, %v65_v33, %v66_v34 }
  0x21   :  { %v70_v37 = vsel %vm67_vm2, %v60_v32, %v64_v35 }
  0x22   :  { %v75_v38 = vsel %vm23_vm0, %v70_v37, %v74_v36 }
  0x23   :  { %77 = vst [vmem:[%s125_s3] sm:$0x3f] %v75_v38 }

// kernel: _lambda_.109
= control target key start
LH: loop header
LB: loop body
LE: loop exit
PB: predicated region body
PF: predicated region fallthrough
CT: control target
= control target key end

     0   :  { %s64_s0 = inlined_call_operand.vmem [shape: f32[4,128], index: 0, kind: input, shape index: {}]   ;;  %s65_s1 = inlined_call_operand.vmem [shape: f32[1,128], index: 1, kind: input, shape index: {}]   ;;  %s66_s2 = inlined_call_operand.vmem [shape: f32[1,128], index: 2, kind: input, shape index: {}]   ;;  %s67_s3 = inlined_call_operand.vmem [shape: f32[4,128], index: 3, kind: output, shape index: {}]  }
   0x1   :  { %v14_v0 = vld [vmem:[%s64_s0] sm:$0xf] }
   0x2   :  { %v30_v1 = vld [vmem:[%s65_s1] ss:$0 sm:$0xff] }
   0x3   :  { %v31_v2 = vld [vmem:[%s66_s2] ss:$0 sm:$0xff]  ;;  %v19_v3 = vmul.f32 %v30_v1, %v14_v0 }
   0x5   :  { %v24_v4 = vadd.f32 %v31_v2, %v19_v3 }
   0x7   :  { %25 = vst [vmem:[%s67_s3] sm:$0xf] %v24_v4 }

// kernel: _lambda_.106
= control target key start
LH: loop header
LB: loop body
LE: loop exit
PB: predicated region body
PF: predicated region fallthrough
CT: control target
= control target key end

     0   :  { %s668_s15 = smov 0   ;;  %s670_s16 = smov 0   ;;  %s717_s0 = inlined_call_operand.vmem [shape: bf16[1,1152], index: 0, kind: input, shape index: {}]   ;;  %s718_s1 = inlined_call_operand.vmem [shape: bf16[1152,128], index: 1, kind: input, shape index: {}]   ;;  %s719_s2 = inlined_call_operand.vmem [shape: f32[1,128], index: 2, kind: output, shape index: {0}]   ;;  %s720_s3 = inlined_call_operand.vmem [shape: f32[1,1,128], index: 3, kind: output, shape index: {1}]   ;;  %s721_s4 = inlined_call_operand.vmem [shape: f32[1,1,128], index: 4, kind: output, shape index: {2}]  }
   0x1   :  { %s672_s17 = smov 0  }
   0x2 LB: > { %s27_s18 = sadd.s32 1, %s636_s16  ;;  %p543_p0 = scmp.ge.s32.totalorder %s640_s17, 1  ;;  %s640_s17 = sphi %s672_s17, %s15_s17   ;;  %s636_s16 = sphi %s670_s16, %s723_s16   ;;  %s632_s15 = sphi %s668_s15, %s722_s15  }
   0x3   : > { %p28_p1 = scmp.ge.s32.totalorder %s27_s18, 9  ;;  %p212_p2 = scmp.lt.s32.totalorder %s640_s17, 10 }
   0x5   : > { %s725_s18 = smov (%p28_p1, %s27_s18), 0  ;;  %p213_p3 = pnand %p543_p0, %p212_p2 }
   0x6   : > { %p263_p4 = scmp.lt.s32.totalorder (!%p213_p3), %s632_s15, 8  ;;  %s544_s19 = sshll.u32 (!%p213_p3), %s632_s15, 4 }
   0x7   : > { %216 = sbr.rel (%p213_p3) target bundleno = 191 (0xbf), region = 28  ;;  %p269_p5 = scmp.lt.s32.totalorder (!%p213_p3), %s544_s19, 143 }
   0x8   : > { %p546_p6 = scmp.ne.s32.totalorder (!%p213_p3), %s632_s15, 0 }
   0xc   : > { %s264_s20 = scalar_select %p263_p4, %s632_s15, 8 }
   0xd   : > { %s727_s19 = smov (!%p269_p5, %s544_s19), 143  ;;  %298 = sbr.rel (%p546_p6) target bundleno = 20 (0x14), region = 32 }
   0xe   : > { %s267_s23 = scalar_lea.vmem %s717_s0, %s264_s20  ;;  %s545_s24 = sshll.u32 %s727_s19, 2 }
   0xf   : > { %s275_s27 = scalar_lea.vmem %s718_s1, %s545_s24 }
  0x12   : > { %v642_v0 = vmov 0.0  }
  0x13   : > { %299 = vst [vmem:[#allocation2] sm:$0x1] %v642_v0 }
  0x14 PF: > { %v592_v1 = vld [vmem:[%s275_s27 + $0x38] sm:$0xff]  ;;  %v591_v2 = vld [vmem:[%s275_s27 + $0x30] sm:$0xff]  ;;  %v590_v3 = vld [vmem:[%s275_s27 + $0x28] sm:$0xff]  ;;  %p579_p7 = scmp.ne.s32.totalorder %s632_s15, 8 }
  0x15   : > { %366 = vmatpush.bf16.msra.mxu0 %v592_v1  ;;  %v589_v4 = vld [vmem:[%s275_s27 + $0x20] sm:$0xff]  ;;  %v588_v5 = vld [vmem:[%s275_s27 + $0x18] sm:$0xff]  ;;  %v587_v6 = vld [vmem:[%s275_s27 + $0x10] sm:$0xff] }
  0x16   : > { %v586_v7 = vld [vmem:[%s275_s27 + $0x8] sm:$0xff]  ;;  %v585_v8 = vld [vmem:[%s275_s27] sm:$0xff] }
  0x17   : > { %v301_v9 = vld [vmem:[%s267_s23] sm:$0x1] }
  0x19   : > { %367 = vmatpush.bf16.msra.mxu0 %v591_v2 }
  0x1a   : > { %v300_v10 = vld [vmem:[#allocation2] sm:$0x1] }
  0x1d   : > { %368 = vmatpush.bf16.msra.mxu0 %v590_v3 }
  0x21   : > { %369 = vmatpush.bf16.msra.mxu0 %v589_v4 }
  0x25   : > { %370 = vmatpush.bf16.msra.mxu0 %v588_v5 }
  0x29   : > { %371 = vmatpush.bf16.msra.mxu0 %v587_v6 }
  0x2d   : > { %372 = vmatpush.bf16.msra.mxu0 %v586_v7 }
  0x31   : > { %373 = vmatpush.bf16.msra.mxu0 %v585_v8 }
  0x34   : > { %374 = vmatmul.bf16.vlgmr.msra.gmra.mxu0 %v301_v9 }
  0xb1   : > { %v375_v11 = vpop.f32.mrf.mxu0 }
  0xb2   : > { %v379_v12 = vadd.f32 %v375_v11, %v300_v10 }
  0xb4   : > { %380 = vst [vmem:[#allocation2] sm:$0x1] %v379_v12 }
  0xb5   : > { %384 = sbr.rel (%p579_p7) target bundleno = 191 (0xbf), region = 36 }
  0xb9   : > { %v377_v13 = vpop.f32.mrf.mxu0 }
  0xbb   : > { %v385_v14 = vld [vmem:[#allocation2] sm:$0x1] }
  0xbc   : > { %386 = vst [vmem:[%s719_s2] sm:$0x1] %v385_v14  ;;  %v389_v15 = vmul.f32 %v385_v14, %v385_v14 }
  0xbd   : > { %388 = vst [vmem:[%s720_s3] sm:$0x1] %v385_v14 }
  0xbe   : > { %391 = vst [vmem:[%s721_s4] sm:$0x1] %v389_v15 }
  0xbf PF: > { %s15_s17 = sadd.s32 1, %s640_s17   ;;  %s722_s15 = smov %s636_s16 }
  0xc0   : > { %p12_p8 = scmp.ge.s32.totalorder %s15_s17, 11   ;;  %s723_s16 = smov %s725_s18 }
  0xc2   :  { %14 = sbr.rel (!%p12_p8) target bundleno = 2 (0x2), region = 93 }

// kernel: _lambda_.110
= control target key start
LH: loop header
LB: loop body
LE: loop exit
PB: predicated region body
PF: predicated region fallthrough
CT: control target
= control target key end

     0   :  { %vm40_vm0 = vcmask 1040384   ;;  %vm52_vm1 = vsmask.f32 256  ;;  %vm54_vm2 = vcmask 1041409   ;;  %vm55_vm3 = vsmask.f32 1280  ;;  %s119_s0 = inlined_call_operand.vmem [shape: f32[1,1,512], index: 0, kind: input, shape index: {}]   ;;  %s120_s1 = inlined_call_operand.vmem [shape: f32[1,512], index: 1, kind: input, shape index: {}]   ;;  %s121_s2 = inlined_call_operand.vmem [shape: f32[1,512], index: 2, kind: input, shape index: {}]   ;;  %s122_s3 = inlined_call_operand.vmem [shape: bf16[1,1,512], index: 3, kind: output, shape index: {}]  }
   0x1   :  { %v14_v0 = vld [vmem:[%s119_s0] sm:$0xf]  ;;  %vm104_vm4 = vmand %vm40_vm0, %vm52_vm1  ;;  %vm44_vm6 = vcmask 1042434   ;;  %vm59_vm7 = vsmask.f32 2304  ;;  %vm62_vm10 = vcmask 1043459  }
   0x2   :  { %v15_v1 = vld [vmem:[%s120_s1] sm:$0xf]  ;;  %vm56_vm5 = vmand %vm54_vm2, %vm55_vm3  ;;  %vm63_vm11 = vsmask.f32 3328  ;;  %vm48_vm14 = vcmask 1041408  }
   0x3   :  { %v17_v2 = vld [vmem:[%s121_s2] sm:$0xf]  ;;  %v16_v3 = vmul.f32 %v15_v1, %v14_v0  ;;  %vm57_vm8 = vmor %vm56_vm5, %vm104_vm4 }
   0x4   :  { %vm60_vm9 = vmand %vm44_vm6, %vm59_vm7  ;;  %v66_v20 = vld [vmem:[%s122_s3] sm:$0xf] }
   0x5   :  { %v18_v4 = vadd.f32 %v17_v2, %v16_v3  ;;  %vm61_vm12 = vmor %vm60_vm9, %vm57_vm8 }
   0x6   :  { %vm64_vm13 = vmand %vm62_vm10, %vm63_vm11 }
   0x7   :  { %v73_v5 = vadd.f32 -1.0, %v18_v4  ;;  %vm65_vm15 = vmor %vm64_vm13, %vm61_vm12 }
   0x9   :  { %v20_v6 = vadd.f32 1.0, %v73_v5 }
   0xb   :  { %v21_v8 = vfloor.f32 %v20_v6 }
   0xd   :  { %v22_v9 = vmax.f32 %v21_v8, 0.0 }
   0xf   :  { %v23_v10 = vmin.f32 %v22_v9, 8.0 }
  0x11   :  { %v25_v11 = vperm.slane %v23_v10, 0  ;;  %v26_v12 = vperm.slane %v23_v10, 1  ;;  %v27_v13 = vperm.slane %v23_v10, 2  ;;  %v28_v14 = vperm.slane %v23_v10, 3 }
  0x13   :  { %v33_v15 = vpack.c.bf16 %v26_v12, %v25_v11  ;;  %v34_v16 = vpack.c.bf16 %v28_v14, %v27_v13 }
  0x15   :  { %v37_v17 = vrot.slane %v33_v15, 3  ;;  %v38_v18 = vrot.slane %v34_v16, 6  ;;  %v39_v19 = vrot.slane %v34_v16, 1 }
  0x17   :  { %v43_v21 = vsel %vm40_vm0, %v33_v15, %v37_v17  ;;  %v47_v22 = vsel %vm44_vm6, %v38_v18, %v39_v19 }
  0x18   :  { %v49_v23 = vsel %vm48_vm14, %v43_v21, %v47_v22 }
  0x19   :  { %v67_v24 = vsel %vm65_vm15, %v49_v23, %v66_v20 }
  0x1a   :  { %68 = vst [vmem:[%s122_s3] sm:$0xf] %v67_v24 }

// kernel: _lambda_.113
= control target key start
LH: loop header
LB: loop body
LE: loop exit
PB: predicated region body
PF: predicated region fallthrough
CT: control target
= control target key end

     0   :  { %s136_s0 = inlined_call_operand.vmem [shape: f32[1,1024], index: 0, kind: input, shape index: {}]   ;;  %s137_s1 = inlined_call_operand.vmem [shape: f32[1,1024], index: 1, kind: input, shape index: {}]   ;;  %s138_s2 = inlined_call_operand.vmem [shape: f32[1,1024], index: 2, kind: input, shape index: {}]   ;;  %s139_s3 = inlined_call_operand.vmem [shape: f32[1,1024], index: 3, kind: input, shape index: {}]   ;;  %s140_s4 = inlined_call_operand.vmem [shape: f32[1,1024], index: 4, kind: input, shape index: {}]   ;;  %s141_s5 = inlined_call_operand.vmem [shape: f32[1,1024], index: 5, kind: input, shape index: {}]   ;;  %s142_s6 = inlined_call_operand.hbm [shape: f32[1,1024], index: 6, kind: output, shape index: {}]  }
   0x1   :  { %v24_v0 = vld [vmem:[%s136_s0] sm:$0xff] }
   0x2   :  { %v25_v1 = vld [vmem:[%s137_s1] sm:$0xff] }
   0x3   :  { %v27_v2 = vld [vmem:[%s138_s2] sm:$0xff]  ;;  %v26_v3 = vmul.f32 %v25_v1, %v24_v0 }
   0x4   :  { %v29_v4 = vld [vmem:[%s139_s3] sm:$0xff] }
   0x5   :  { %v30_v5 = vld [vmem:[%s140_s4] sm:$0xff] }
   0x6   :  { %v31_v6 = vmul.f32 %v30_v5, %v29_v4 }
   0x7   :  { %11 = vsyncpa [#allocation3], 0  ;;  %v28_v7 = vadd.f32 %v27_v2, %v26_v3  ;;  %v33_v8 = vld [vmem:[%s141_s5] sm:$0xff]  ;;  %s79_s1 = smov [#allocation2]   ;;  %s43_s10 = sshll.u32 %s142_s6, 4  ;;  %s44_s10 = int_to_ptr.hbm [resolvable:$true] %s43_s10 }
   0x8   :  { %s41_s8 = sshll.u32 %s79_s1, 4  ;;  %s42_s8 = int_to_ptr.vmem [resolvable:$true] %s41_s8 }
   0x9   :  { %v32_v9 = vadd.f32 %v31_v6, %v28_v7 }
   0xb   :  { %v34_v10 = vadd.f32 %v33_v8, %v32_v9 }
   0xd   :  { %35 = vst [vmem:[#allocation2] sm:$0xff] %v34_v10 }
   0xe   :  { %46 = dma.vmem_to_hbm [thread:$0]  %s42_s8, 128, %s44_s10, [#allocation3]  }
   0xf   :  { %77 = dma.done.wait [#allocation3], 128  }
  0x10   :  { %78 = vsyncadd [#allocation3], 4294967168 }
  0x11   :  { %51 = vsyncpa [#allocation3], 1 }

</bundles_post_ra>
